<compile_context>
chip_gen: v7x
topology: tpu7x:2x2x1
jax: 0.10.0
libtpu: 0.0.40
codegen_flags: <defaults>
</compile_context>

<pallas_src>
import functools

import jax
import jax.numpy as jnp
from jax.experimental import pallas as pl
from jax.experimental.pallas import tpu as pltpu


def _rnn_kernel(x_ref, wx_ref, wh_ref, b_ref, at_ref, zs_ref, *,
                hidden_dim, n_step):
    # Block layouts (per batch element n, channels-first, V on lanes):
    #   x_ref : (1, C, V)          z0 for this batch element
    #   wx_ref: (2, 4C, C)         per-layer input->gates weight
    #   wh_ref: (2, 4C, C)         per-layer hidden->gates weight
    #   b_ref : (2, 4C, 1)         per-layer bias
    #   at_ref: (V, V)             A^T (node aggregation)
    #   zs_ref: (n_step+1, 1, C, V)
    C = hidden_dim
    x = x_ref[0]                                   # (C, V)
    At = at_ref[...]                               # (V, V)

    wx0, wh0, b0 = wx_ref[0], wh_ref[0], b_ref[0]
    wx1, wh1, b1 = wx_ref[1], wh_ref[1], b_ref[1]

    # zs[0] = z0 itself.
    zs_ref[0, 0] = x.astype(zs_ref.dtype)

    # Hoisted: layer-0 input contribution, constant across all timesteps.
    #   (Wx0 @ z0) @ A^T + b0   -> (4C, V)
    xz0 = jnp.dot(jnp.dot(wx0, x, preferred_element_type=jnp.float32), At,
                  preferred_element_type=jnp.float32) + b0

    V = x.shape[-1]
    zero = jnp.zeros((C, V), jnp.float32)
    h0, c0, h1, c1 = zero, zero, zero, zero

    def lstm_gates(y, c_prev):
        # Sublane slices at multiples of C=32 (multiples of 8) -> free.
        i = jax.nn.sigmoid(y[0 * C:1 * C])
        f = jax.nn.sigmoid(y[1 * C:2 * C])
        o = jax.nn.sigmoid(y[2 * C:3 * C])
        g = jnp.tanh(y[3 * C:4 * C])
        c_next = f * c_prev + i * g
        h_next = o * jnp.tanh(c_next)
        return h_next, c_next

    for s in range(n_step):
        # Layer 0: input z0 (hoisted contribution) + recurrent h0.
        y0 = xz0 + jnp.dot(
            jnp.dot(wh0, h0, preferred_element_type=jnp.float32), At,
            preferred_element_type=jnp.float32)
        h0, c0 = lstm_gates(y0, c0)

        # Layer 1: input is the freshly updated h0, recurrent h1.
        y1 = jnp.dot(
            jnp.dot(wx1, h0, preferred_element_type=jnp.float32) +
            jnp.dot(wh1, h1, preferred_element_type=jnp.float32), At,
            preferred_element_type=jnp.float32) + b1
        h1, c1 = lstm_gates(y1, c1)

        zs_ref[s + 1, 0] = h1.astype(zs_ref.dtype)


@functools.partial(jax.jit, static_argnames=("n_step",))
def rnn_forward(z0, W0, b0, W1, b1, A, *, n_step):
    """z0: (BT, C, V); W{0,1}: (4C, 2C) GCN 1x1-conv weight on cat([x, h]);
    b{0,1}: (4C,); A: (V, V).  Returns zs: (n_step+1, BT, C, V)."""
    BT, C, V = z0.shape

    # Split each layer's weight along its input-channel axis (cat([x, h]) order
    # in the reference): columns [:C] act on x, [C:] act on h.  Free slices.
    Wx = jnp.stack([W0[:, :C], W1[:, :C]])              # (2, 4C, C)
    Wh = jnp.stack([W0[:, C:], W1[:, C:]])              # (2, 4C, C)
    bb = jnp.stack([b0, b1]).reshape(2, 4 * C, 1)        # (2, 4C, 1)
    At = A.T                                             # (V, V)

    kernel = functools.partial(_rnn_kernel, hidden_dim=C, n_step=n_step)

    zs = pl.pallas_call(
        kernel,
        out_shape=jax.ShapeDtypeStruct((n_step + 1, BT, C, V), jnp.float32),
        grid_spec=pltpu.PrefetchScalarGridSpec(
            num_scalar_prefetch=0,
            grid=(BT,),
            in_specs=[
                pl.BlockSpec((1, C, V), lambda n: (n, 0, 0)),            # z0
                pl.BlockSpec((2, 4 * C, C), lambda n: (0, 0, 0)),        # Wx
                pl.BlockSpec((2, 4 * C, C), lambda n: (0, 0, 0)),        # Wh
                pl.BlockSpec((2, 4 * C, 1), lambda n: (0, 0, 0)),        # b
                pl.BlockSpec((V, V), lambda n: (0, 0)),                  # A^T
            ],
            out_specs=pl.BlockSpec((n_step + 1, 1, C, V),
                                   lambda n: (0, n, 0, 0)),
        ),
        compiler_params=pltpu.CompilerParams(
            dimension_semantics=("parallel",)),
    )(z0, Wx, Wh, bb, At)

    return zs


def _reference(z0, W0, b0, W1, b1, A, n_step):
    """Plain-JAX reference mirroring the PyTorch RNN.forward."""
    BT, C, V = z0.shape

    def gcn(W, b, inp):                                   # inp: (BT, Cin, V)
        z = jnp.einsum('oc,ncv->nov', W, inp)
        return jnp.einsum('vw,now->nov', A, z) + b[None, :, None]

    def cell(W, b, x, h, c):
        y = gcn(W, b, jnp.concatenate([x, h], axis=1))
        i, f, o, g = jnp.split(y, 4, axis=1)
        c_next = jax.nn.sigmoid(f) * c + jax.nn.sigmoid(i) * jnp.tanh(g)
        h_next = jax.nn.sigmoid(o) * jnp.tanh(c_next)
        return h_next, c_next

    zero = jnp.zeros((BT, C, V), jnp.float32)
    h0, c0, h1, c1 = zero, zero, zero, zero
    zs = [z0]
    for _ in range(n_step):
        h0, c0 = cell(W0, b0, z0, h0, c0)   # layer 0: constant input z0
        h1, c1 = cell(W1, b1, h0, h1, c1)   # layer 1: input is fresh h0
        zs.append(h1)
    return jnp.stack(zs, axis=0)            # (n_step+1, BT, C, V)


if __name__ == "__main__":
    # Small shapes implied by the module: batch BT=2, latent_dim C=32 (input
    # and hidden channels are equal in RNN), V=16 graph nodes, n_step=8.
    BT, C, V, n_step = 2, 32, 16, 8

    key = jax.random.PRNGKey(0)
    kz, kw0, kb0, kw1, kb1, ka = jax.random.split(key, 6)

    z0 = jax.random.normal(kz, (BT, C, V), dtype=jnp.float32)

    # Deterministic parameter init: per-layer GCN weight (4C, 2C), bias (4C,),
    # row-normalized adjacency (V, V).
    W0 = 0.1 * jax.random.normal(kw0, (4 * C, 2 * C), dtype=jnp.float32)
    b0 = 0.1 * jax.random.normal(kb0, (4 * C,), dtype=jnp.float32)
    W1 = 0.1 * jax.random.normal(kw1, (4 * C, 2 * C), dtype=jnp.float32)
    b1 = 0.1 * jax.random.normal(kb1, (4 * C,), dtype=jnp.float32)
    A_raw = jax.random.uniform(ka, (V, V), dtype=jnp.float32)
    A = A_raw / jnp.sum(A_raw, axis=1, keepdims=True)

    zs = rnn_forward(z0, W0, b0, W1, b1, A, n_step=n_step)
    jax.block_until_ready(zs)

    zs_ref = _reference(z0, W0, b0, W1, b1, A, n_step)
    assert zs.shape == (n_step + 1, BT, C, V)
    assert jnp.allclose(zs, zs_ref, atol=1e-5, rtol=1e-5)

    # TODO(synk): RNN.forward also computes self.hiddens_to_z0(z0) into a local
    # that is never returned (dead code) — intentionally not computed.
    print("KERNEL_OK")
</pallas_src>

<mosaic_0001>
module attributes {stable_mosaic.version = 11 : i64} {
  func.func @_rnn_kernel(%arg0: i32, %arg1: memref<1x32x16xf32, #tpu.memory_space<vmem>>, %arg2: memref<2x128x32xf32, #tpu.memory_space<vmem>>, %arg3: memref<2x128x32xf32, #tpu.memory_space<vmem>>, %arg4: memref<2x128x1xf32, #tpu.memory_space<vmem>>, %arg5: memref<16x16xf32, #tpu.memory_space<vmem>>, %arg6: memref<9x1x32x16xf32, #tpu.memory_space<vmem>>) attributes {dimension_semantics = [#tpu.dimension_semantics<parallel>], iteration_bounds = array<i64: 2>, scalar_prefetch = 0 : i64, scratch_operands = 0 : i64, tpu.core_type = #tpu.core_type<tc>, window_params = [{transform_indices = @transform_0, window_bounds = array<i64: 1, 32, 16>}, {pipeline_mode = #tpu.pipeline_mode<synchronous>, transform_indices = @transform_1, window_bounds = array<i64: 2, 128, 32>}, {pipeline_mode = #tpu.pipeline_mode<synchronous>, transform_indices = @transform_2, window_bounds = array<i64: 2, 128, 32>}, {pipeline_mode = #tpu.pipeline_mode<synchronous>, transform_indices = @transform_3, window_bounds = array<i64: 2, 128, 1>}, {pipeline_mode = #tpu.pipeline_mode<synchronous>, transform_indices = @transform_4, window_bounds = array<i64: 16, 16>}, {transform_indices = @transform_5, window_bounds = array<i64: 9, 1, 32, 16>}]} {
    %c0 = arith.constant 0 : index
    %c0_0 = arith.constant 0 : index
    %c0_1 = arith.constant 0 : index
    %0 = vector.load %arg1[%c0, %c0_0, %c0_1] : memref<1x32x16xf32, #tpu.memory_space<vmem>>, vector<1x32x16xf32>
    %1 = vector.shape_cast %0 : vector<1x32x16xf32> to vector<32x16xf32>
    %c0_2 = arith.constant 0 : index
    %c0_3 = arith.constant 0 : index
    %2 = vector.load %arg5[%c0_2, %c0_3] : memref<16x16xf32, #tpu.memory_space<vmem>>, vector<16x16xf32>
    %c0_4 = arith.constant 0 : index
    %c0_5 = arith.constant 0 : index
    %c0_6 = arith.constant 0 : index
    %3 = vector.load %arg2[%c0_4, %c0_5, %c0_6] : memref<2x128x32xf32, #tpu.memory_space<vmem>>, vector<1x128x32xf32>
    %4 = vector.shape_cast %3 : vector<1x128x32xf32> to vector<128x32xf32>
    %c0_7 = arith.constant 0 : index
    %c0_8 = arith.constant 0 : index
    %c0_9 = arith.constant 0 : index
    %5 = vector.load %arg3[%c0_7, %c0_8, %c0_9] : memref<2x128x32xf32, #tpu.memory_space<vmem>>, vector<1x128x32xf32>
    %6 = vector.shape_cast %5 : vector<1x128x32xf32> to vector<128x32xf32>
    %c0_10 = arith.constant 0 : index
    %c0_11 = arith.constant 0 : index
    %c0_12 = arith.constant 0 : index
    %7 = vector.load %arg4[%c0_10, %c0_11, %c0_12] : memref<2x128x1xf32, #tpu.memory_space<vmem>>, vector<1x128x1xf32>
    %8 = vector.shape_cast %7 : vector<1x128x1xf32> to vector<128x1xf32>
    %c1 = arith.constant 1 : index
    %c0_13 = arith.constant 0 : index
    %c0_14 = arith.constant 0 : index
    %9 = vector.load %arg2[%c1, %c0_13, %c0_14] : memref<2x128x32xf32, #tpu.memory_space<vmem>>, vector<1x128x32xf32>
    %10 = vector.shape_cast %9 : vector<1x128x32xf32> to vector<128x32xf32>
    %c1_15 = arith.constant 1 : index
    %c0_16 = arith.constant 0 : index
    %c0_17 = arith.constant 0 : index
    %11 = vector.load %arg3[%c1_15, %c0_16, %c0_17] : memref<2x128x32xf32, #tpu.memory_space<vmem>>, vector<1x128x32xf32>
    %12 = vector.shape_cast %11 : vector<1x128x32xf32> to vector<128x32xf32>
    %c1_18 = arith.constant 1 : index
    %c0_19 = arith.constant 0 : index
    %c0_20 = arith.constant 0 : index
    %13 = vector.load %arg4[%c1_18, %c0_19, %c0_20] : memref<2x128x1xf32, #tpu.memory_space<vmem>>, vector<1x128x1xf32>
    %14 = vector.shape_cast %13 : vector<1x128x1xf32> to vector<128x1xf32>
    %c0_21 = arith.constant 0 : index
    %c0_22 = arith.constant 0 : index
    %c0_23 = arith.constant 0 : index
    %c0_24 = arith.constant 0 : index
    %15 = vector.load %arg6[%c0_21, %c0_22, %c0_23, %c0_24] : memref<9x1x32x16xf32, #tpu.memory_space<vmem>>, vector<1x1x32x16xf32>
    %16 = vector.shape_cast %15 : vector<1x1x32x16xf32> to vector<32x16xf32>
    %17 = vector.shape_cast %1 : vector<32x16xf32> to vector<1x1x32x16xf32>
    tpu.vector_store %arg6[%c0_21, %c0_22, %c0_23, %c0_24], %17 {strides = array<i32>} : memref<9x1x32x16xf32, #tpu.memory_space<vmem>>, vector<1x1x32x16xf32>,
    %cst = arith.constant dense<0.000000e+00> : vector<128x16xf32>
    %18 = tpu.matmul %4, %1, %cst {dimension_numbers = #tpu.dot_dimension_numbers<[1], [0], [0], [1], [0, 0, 1, 1], [], []>} : vector<128x32xf32>, vector<32x16xf32>, vector<128x16xf32> -> vector<128x16xf32>
    %cst_25 = arith.constant dense<0.000000e+00> : vector<128x16xf32>
    %19 = tpu.matmul %18, %2, %cst_25 {dimension_numbers = #tpu.dot_dimension_numbers<[1], [0], [0], [1], [0, 0, 1, 1], [], []>} : vector<128x16xf32>, vector<16x16xf32>, vector<128x16xf32> -> vector<128x16xf32>
    %20 = vector.broadcast %8 : vector<128x1xf32> to vector<128x16xf32>
    %21 = arith.addf %19, %20 : vector<128x16xf32>
    %cst_26 = arith.constant 0.000000e+00 : f32
    %22 = vector.broadcast %cst_26 : f32 to vector<32x16xf32>
    %cst_27 = arith.constant dense<0.000000e+00> : vector<128x16xf32>
    %23 = tpu.matmul %6, %22, %cst_27 {dimension_numbers = #tpu.dot_dimension_numbers<[1], [0], [0], [1], [0, 0, 1, 1], [], []>} : vector<128x32xf32>, vector<32x16xf32>, vector<128x16xf32> -> vector<128x16xf32>
    %cst_28 = arith.constant dense<0.000000e+00> : vector<128x16xf32>
    %24 = tpu.matmul %23, %2, %cst_28 {dimension_numbers = #tpu.dot_dimension_numbers<[1], [0], [0], [1], [0, 0, 1, 1], [], []>} : vector<128x16xf32>, vector<16x16xf32>, vector<128x16xf32> -> vector<128x16xf32>
    %25 = arith.addf %21, %24 : vector<128x16xf32>
    %26 = vector.extract_strided_slice %25 {offsets = [0, 0], sizes = [32, 16], strides = [1, 1]} : vector<128x16xf32> to vector<32x16xf32>
    %27 = arith.negf %26 : vector<32x16xf32>
    %28 = math.exp %27 : vector<32x16xf32>
    %cst_29 = arith.constant 1.000000e+00 : f32
    %29 = vector.broadcast %cst_29 : f32 to vector<32x16xf32>
    %30 = arith.addf %29, %28 : vector<32x16xf32>
    %31 = arith.divf %29, %30 : vector<32x16xf32>
    %32 = vector.extract_strided_slice %25 {offsets = [32, 0], sizes = [32, 16], strides = [1, 1]} : vector<128x16xf32> to vector<32x16xf32>
    %33 = arith.negf %32 : vector<32x16xf32>
    %34 = math.exp %33 : vector<32x16xf32>
    %cst_30 = arith.constant 1.000000e+00 : f32
    %35 = vector.broadcast %cst_30 : f32 to vector<32x16xf32>
    %36 = arith.addf %35, %34 : vector<32x16xf32>
    %37 = arith.divf %35, %36 : vector<32x16xf32>
    %38 = vector.extract_strided_slice %25 {offsets = [64, 0], sizes = [32, 16], strides = [1, 1]} : vector<128x16xf32> to vector<32x16xf32>
    %39 = arith.negf %38 : vector<32x16xf32>
    %40 = math.exp %39 : vector<32x16xf32>
    %cst_31 = arith.constant 1.000000e+00 : f32
    %41 = vector.broadcast %cst_31 : f32 to vector<32x16xf32>
    %42 = arith.addf %41, %40 : vector<32x16xf32>
    %43 = arith.divf %41, %42 : vector<32x16xf32>
    %44 = vector.extract_strided_slice %25 {offsets = [96, 0], sizes = [32, 16], strides = [1, 1]} : vector<128x16xf32> to vector<32x16xf32>
    %45 = math.tanh %44 : vector<32x16xf32>
    %46 = arith.mulf %37, %22 : vector<32x16xf32>
    %47 = arith.mulf %31, %45 : vector<32x16xf32>
    %48 = arith.addf %46, %47 : vector<32x16xf32>
    %49 = math.tanh %48 : vector<32x16xf32>
    %50 = arith.mulf %43, %49 : vector<32x16xf32>
    %cst_32 = arith.constant dense<0.000000e+00> : vector<128x16xf32>
    %51 = tpu.matmul %10, %50, %cst_32 {dimension_numbers = #tpu.dot_dimension_numbers<[1], [0], [0], [1], [0, 0, 1, 1], [], []>} : vector<128x32xf32>, vector<32x16xf32>, vector<128x16xf32> -> vector<128x16xf32>
    %cst_33 = arith.constant dense<0.000000e+00> : vector<128x16xf32>
    %52 = tpu.matmul %12, %22, %cst_33 {dimension_numbers = #tpu.dot_dimension_numbers<[1], [0], [0], [1], [0, 0, 1, 1], [], []>} : vector<128x32xf32>, vector<32x16xf32>, vector<128x16xf32> -> vector<128x16xf32>
    %53 = arith.addf %51, %52 : vector<128x16xf32>
    %cst_34 = arith.constant dense<0.000000e+00> : vector<128x16xf32>
    %54 = tpu.matmul %53, %2, %cst_34 {dimension_numbers = #tpu.dot_dimension_numbers<[1], [0], [0], [1], [0, 0, 1, 1], [], []>} : vector<128x16xf32>, vector<16x16xf32>, vector<128x16xf32> -> vector<128x16xf32>
    %55 = vector.broadcast %14 : vector<128x1xf32> to vector<128x16xf32>
    %56 = arith.addf %54, %55 : vector<128x16xf32>
    %57 = vector.extract_strided_slice %56 {offsets = [0, 0], sizes = [32, 16], strides = [1, 1]} : vector<128x16xf32> to vector<32x16xf32>
    %58 = arith.negf %57 : vector<32x16xf32>
    %59 = math.exp %58 : vector<32x16xf32>
    %cst_35 = arith.constant 1.000000e+00 : f32
    %60 = vector.broadcast %cst_35 : f32 to vector<32x16xf32>
    %61 = arith.addf %60, %59 : vector<32x16xf32>
    %62 = arith.divf %60, %61 : vector<32x16xf32>
    %63 = vector.extract_strided_slice %56 {offsets = [32, 0], sizes = [32, 16], strides = [1, 1]} : vector<128x16xf32> to vector<32x16xf32>
    %64 = arith.negf %63 : vector<32x16xf32>
    %65 = math.exp %64 : vector<32x16xf32>
    %cst_36 = arith.constant 1.000000e+00 : f32
    %66 = vector.broadcast %cst_36 : f32 to vector<32x16xf32>
    %67 = arith.addf %66, %65 : vector<32x16xf32>
    %68 = arith.divf %66, %67 : vector<32x16xf32>
    %69 = vector.extract_strided_slice %56 {offsets = [64, 0], sizes = [32, 16], strides = [1, 1]} : vector<128x16xf32> to vector<32x16xf32>
    %70 = arith.negf %69 : vector<32x16xf32>
    %71 = math.exp %70 : vector<32x16xf32>
    %cst_37 = arith.constant 1.000000e+00 : f32
    %72 = vector.broadcast %cst_37 : f32 to vector<32x16xf32>
    %73 = arith.addf %72, %71 : vector<32x16xf32>
    %74 = arith.divf %72, %73 : vector<32x16xf32>
    %75 = vector.extract_strided_slice %56 {offsets = [96, 0], sizes = [32, 16], strides = [1, 1]} : vector<128x16xf32> to vector<32x16xf32>
    %76 = math.tanh %75 : vector<32x16xf32>
    %77 = arith.mulf %68, %22 : vector<32x16xf32>
    %78 = arith.mulf %62, %76 : vector<32x16xf32>
    %79 = arith.addf %77, %78 : vector<32x16xf32>
    %80 = math.tanh %79 : vector<32x16xf32>
    %81 = arith.mulf %74, %80 : vector<32x16xf32>
    %c1_38 = arith.constant 1 : index
    %c0_39 = arith.constant 0 : index
    %c0_40 = arith.constant 0 : index
    %c0_41 = arith.constant 0 : index
    %82 = vector.load %arg6[%c1_38, %c0_39, %c0_40, %c0_41] : memref<9x1x32x16xf32, #tpu.memory_space<vmem>>, vector<1x1x32x16xf32>
    %83 = vector.shape_cast %82 : vector<1x1x32x16xf32> to vector<32x16xf32>
    %84 = vector.shape_cast %81 : vector<32x16xf32> to vector<1x1x32x16xf32>
    tpu.vector_store %arg6[%c1_38, %c0_39, %c0_40, %c0_41], %84 {strides = array<i32>} : memref<9x1x32x16xf32, #tpu.memory_space<vmem>>, vector<1x1x32x16xf32>,
    %cst_42 = arith.constant dense<0.000000e+00> : vector<128x16xf32>
    %85 = tpu.matmul %6, %50, %cst_42 {dimension_numbers = #tpu.dot_dimension_numbers<[1], [0], [0], [1], [0, 0, 1, 1], [], []>} : vector<128x32xf32>, vector<32x16xf32>, vector<128x16xf32> -> vector<128x16xf32>
    %cst_43 = arith.constant dense<0.000000e+00> : vector<128x16xf32>
    %86 = tpu.matmul %85, %2, %cst_43 {dimension_numbers = #tpu.dot_dimension_numbers<[1], [0], [0], [1], [0, 0, 1, 1], [], []>} : vector<128x16xf32>, vector<16x16xf32>, vector<128x16xf32> -> vector<128x16xf32>
    %87 = arith.addf %21, %86 : vector<128x16xf32>
    %88 = vector.extract_strided_slice %87 {offsets = [0, 0], sizes = [32, 16], strides = [1, 1]} : vector<128x16xf32> to vector<32x16xf32>
    %89 = arith.negf %88 : vector<32x16xf32>
    %90 = math.exp %89 : vector<32x16xf32>
    %cst_44 = arith.constant 1.000000e+00 : f32
    %91 = vector.broadcast %cst_44 : f32 to vector<32x16xf32>
    %92 = arith.addf %91, %90 : vector<32x16xf32>
    %93 = arith.divf %91, %92 : vector<32x16xf32>
    %94 = vector.extract_strided_slice %87 {offsets = [32, 0], sizes = [32, 16], strides = [1, 1]} : vector<128x16xf32> to vector<32x16xf32>
    %95 = arith.negf %94 : vector<32x16xf32>
    %96 = math.exp %95 : vector<32x16xf32>
    %cst_45 = arith.constant 1.000000e+00 : f32
    %97 = vector.broadcast %cst_45 : f32 to vector<32x16xf32>
    %98 = arith.addf %97, %96 : vector<32x16xf32>
    %99 = arith.divf %97, %98 : vector<32x16xf32>
    %100 = vector.extract_strided_slice %87 {offsets = [64, 0], sizes = [32, 16], strides = [1, 1]} : vector<128x16xf32> to vector<32x16xf32>
    %101 = arith.negf %100 : vector<32x16xf32>
    %102 = math.exp %101 : vector<32x16xf32>
    %cst_46 = arith.constant 1.000000e+00 : f32
    %103 = vector.broadcast %cst_46 : f32 to vector<32x16xf32>
    %104 = arith.addf %103, %102 : vector<32x16xf32>
    %105 = arith.divf %103, %104 : vector<32x16xf32>
    %106 = vector.extract_strided_slice %87 {offsets = [96, 0], sizes = [32, 16], strides = [1, 1]} : vector<128x16xf32> to vector<32x16xf32>
    %107 = math.tanh %106 : vector<32x16xf32>
    %108 = arith.mulf %99, %48 : vector<32x16xf32>
    %109 = arith.mulf %93, %107 : vector<32x16xf32>
    %110 = arith.addf %108, %109 : vector<32x16xf32>
    %111 = math.tanh %110 : vector<32x16xf32>
    %112 = arith.mulf %105, %111 : vector<32x16xf32>
    %cst_47 = arith.constant dense<0.000000e+00> : vector<128x16xf32>
    %113 = tpu.matmul %10, %112, %cst_47 {dimension_numbers = #tpu.dot_dimension_numbers<[1], [0], [0], [1], [0, 0, 1, 1], [], []>} : vector<128x32xf32>, vector<32x16xf32>, vector<128x16xf32> -> vector<128x16xf32>
    %cst_48 = arith.constant dense<0.000000e+00> : vector<128x16xf32>
    %114 = tpu.matmul %12, %81, %cst_48 {dimension_numbers = #tpu.dot_dimension_numbers<[1], [0], [0], [1], [0, 0, 1, 1], [], []>} : vector<128x32xf32>, vector<32x16xf32>, vector<128x16xf32> -> vector<128x16xf32>
    %115 = arith.addf %113, %114 : vector<128x16xf32>
    %cst_49 = arith.constant dense<0.000000e+00> : vector<128x16xf32>
    %116 = tpu.matmul %115, %2, %cst_49 {dimension_numbers = #tpu.dot_dimension_numbers<[1], [0], [0], [1], [0, 0, 1, 1], [], []>} : vector<128x16xf32>, vector<16x16xf32>, vector<128x16xf32> -> vector<128x16xf32>
    %117 = vector.broadcast %14 : vector<128x1xf32> to vector<128x16xf32>
    %118 = arith.addf %116, %117 : vector<128x16xf32>
    %119 = vector.extract_strided_slice %118 {offsets = [0, 0], sizes = [32, 16], strides = [1, 1]} : vector<128x16xf32> to vector<32x16xf32>
    %120 = arith.negf %119 : vector<32x16xf32>
    %121 = math.exp %120 : vector<32x16xf32>
    %cst_50 = arith.constant 1.000000e+00 : f32
    %122 = vector.broadcast %cst_50 : f32 to vector<32x16xf32>
    %123 = arith.addf %122, %121 : vector<32x16xf32>
    %124 = arith.divf %122, %123 : vector<32x16xf32>
    %125 = vector.extract_strided_slice %118 {offsets = [32, 0], sizes = [32, 16], strides = [1, 1]} : vector<128x16xf32> to vector<32x16xf32>
    %126 = arith.negf %125 : vector<32x16xf32>
    %127 = math.exp %126 : vector<32x16xf32>
    %cst_51 = arith.constant 1.000000e+00 : f32
    %128 = vector.broadcast %cst_51 : f32 to vector<32x16xf32>
    %129 = arith.addf %128, %127 : vector<32x16xf32>
    %130 = arith.divf %128, %129 : vector<32x16xf32>
    %131 = vector.extract_strided_slice %118 {offsets = [64, 0], sizes = [32, 16], strides = [1, 1]} : vector<128x16xf32> to vector<32x16xf32>
    %132 = arith.negf %131 : vector<32x16xf32>
    %133 = math.exp %132 : vector<32x16xf32>
    %cst_52 = arith.constant 1.000000e+00 : f32
    %134 = vector.broadcast %cst_52 : f32 to vector<32x16xf32>
    %135 = arith.addf %134, %133 : vector<32x16xf32>
    %136 = arith.divf %134, %135 : vector<32x16xf32>
    %137 = vector.extract_strided_slice %118 {offsets = [96, 0], sizes = [32, 16], strides = [1, 1]} : vector<128x16xf32> to vector<32x16xf32>
    %138 = math.tanh %137 : vector<32x16xf32>
    %139 = arith.mulf %130, %79 : vector<32x16xf32>
    %140 = arith.mulf %124, %138 : vector<32x16xf32>
    %141 = arith.addf %139, %140 : vector<32x16xf32>
    %142 = math.tanh %141 : vector<32x16xf32>
    %143 = arith.mulf %136, %142 : vector<32x16xf32>
    %c2 = arith.constant 2 : index
    %c0_53 = arith.constant 0 : index
    %c0_54 = arith.constant 0 : index
    %c0_55 = arith.constant 0 : index
    %144 = vector.load %arg6[%c2, %c0_53, %c0_54, %c0_55] : memref<9x1x32x16xf32, #tpu.memory_space<vmem>>, vector<1x1x32x16xf32>
    %145 = vector.shape_cast %144 : vector<1x1x32x16xf32> to vector<32x16xf32>
    %146 = vector.shape_cast %143 : vector<32x16xf32> to vector<1x1x32x16xf32>
    tpu.vector_store %arg6[%c2, %c0_53, %c0_54, %c0_55], %146 {strides = array<i32>} : memref<9x1x32x16xf32, #tpu.memory_space<vmem>>, vector<1x1x32x16xf32>,
    %cst_56 = arith.constant dense<0.000000e+00> : vector<128x16xf32>
    %147 = tpu.matmul %6, %112, %cst_56 {dimension_numbers = #tpu.dot_dimension_numbers<[1], [0], [0], [1], [0, 0, 1, 1], [], []>} : vector<128x32xf32>, vector<32x16xf32>, vector<128x16xf32> -> vector<128x16xf32>
    %cst_57 = arith.constant dense<0.000000e+00> : vector<128x16xf32>
    %148 = tpu.matmul %147, %2, %cst_57 {dimension_numbers = #tpu.dot_dimension_numbers<[1], [0], [0], [1], [0, 0, 1, 1], [], []>} : vector<128x16xf32>, vector<16x16xf32>, vector<128x16xf32> -> vector<128x16xf32>
    %149 = arith.addf %21, %148 : vector<128x16xf32>
    %150 = vector.extract_strided_slice %149 {offsets = [0, 0], sizes = [32, 16], strides = [1, 1]} : vector<128x16xf32> to vector<32x16xf32>
    %151 = arith.negf %150 : vector<32x16xf32>
    %152 = math.exp %151 : vector<32x16xf32>
    %cst_58 = arith.constant 1.000000e+00 : f32
    %153 = vector.broadcast %cst_58 : f32 to vector<32x16xf32>
    %154 = arith.addf %153, %152 : vector<32x16xf32>
    %155 = arith.divf %153, %154 : vector<32x16xf32>
    %156 = vector.extract_strided_slice %149 {offsets = [32, 0], sizes = [32, 16], strides = [1, 1]} : vector<128x16xf32> to vector<32x16xf32>
    %157 = arith.negf %156 : vector<32x16xf32>
    %158 = math.exp %157 : vector<32x16xf32>
    %cst_59 = arith.constant 1.000000e+00 : f32
    %159 = vector.broadcast %cst_59 : f32 to vector<32x16xf32>
    %160 = arith.addf %159, %158 : vector<32x16xf32>
    %161 = arith.divf %159, %160 : vector<32x16xf32>
    %162 = vector.extract_strided_slice %149 {offsets = [64, 0], sizes = [32, 16], strides = [1, 1]} : vector<128x16xf32> to vector<32x16xf32>
    %163 = arith.negf %162 : vector<32x16xf32>
    %164 = math.exp %163 : vector<32x16xf32>
    %cst_60 = arith.constant 1.000000e+00 : f32
    %165 = vector.broadcast %cst_60 : f32 to vector<32x16xf32>
    %166 = arith.addf %165, %164 : vector<32x16xf32>
    %167 = arith.divf %165, %166 : vector<32x16xf32>
    %168 = vector.extract_strided_slice %149 {offsets = [96, 0], sizes = [32, 16], strides = [1, 1]} : vector<128x16xf32> to vector<32x16xf32>
    %169 = math.tanh %168 : vector<32x16xf32>
    %170 = arith.mulf %161, %110 : vector<32x16xf32>
    %171 = arith.mulf %155, %169 : vector<32x16xf32>
    %172 = arith.addf %170, %171 : vector<32x16xf32>
    %173 = math.tanh %172 : vector<32x16xf32>
    %174 = arith.mulf %167, %173 : vector<32x16xf32>
    %cst_61 = arith.constant dense<0.000000e+00> : vector<128x16xf32>
    %175 = tpu.matmul %10, %174, %cst_61 {dimension_numbers = #tpu.dot_dimension_numbers<[1], [0], [0], [1], [0, 0, 1, 1], [], []>} : vector<128x32xf32>, vector<32x16xf32>, vector<128x16xf32> -> vector<128x16xf32>
    %cst_62 = arith.constant dense<0.000000e+00> : vector<128x16xf32>
    %176 = tpu.matmul %12, %143, %cst_62 {dimension_numbers = #tpu.dot_dimension_numbers<[1], [0], [0], [1], [0, 0, 1, 1], [], []>} : vector<128x32xf32>, vector<32x16xf32>, vector<128x16xf32> -> vector<128x16xf32>
    %177 = arith.addf %175, %176 : vector<128x16xf32>
    %cst_63 = arith.constant dense<0.000000e+00> : vector<128x16xf32>
    %178 = tpu.matmul %177, %2, %cst_63 {dimension_numbers = #tpu.dot_dimension_numbers<[1], [0], [0], [1], [0, 0, 1, 1], [], []>} : vector<128x16xf32>, vector<16x16xf32>, vector<128x16xf32> -> vector<128x16xf32>
    %179 = vector.broadcast %14 : vector<128x1xf32> to vector<128x16xf32>
    %180 = arith.addf %178, %179 : vector<128x16xf32>
    %181 = vector.extract_strided_slice %180 {offsets = [0, 0], sizes = [32, 16], strides = [1, 1]} : vector<128x16xf32> to vector<32x16xf32>
    %182 = arith.negf %181 : vector<32x16xf32>
    %183 = math.exp %182 : vector<32x16xf32>
    %cst_64 = arith.constant 1.000000e+00 : f32
    %184 = vector.broadcast %cst_64 : f32 to vector<32x16xf32>
    %185 = arith.addf %184, %183 : vector<32x16xf32>
    %186 = arith.divf %184, %185 : vector<32x16xf32>
    %187 = vector.extract_strided_slice %180 {offsets = [32, 0], sizes = [32, 16], strides = [1, 1]} : vector<128x16xf32> to vector<32x16xf32>
    %188 = arith.negf %187 : vector<32x16xf32>
    %189 = math.exp %188 : vector<32x16xf32>
    %cst_65 = arith.constant 1.000000e+00 : f32
    %190 = vector.broadcast %cst_65 : f32 to vector<32x16xf32>
    %191 = arith.addf %190, %189 : vector<32x16xf32>
    %192 = arith.divf %190, %191 : vector<32x16xf32>
    %193 = vector.extract_strided_slice %180 {offsets = [64, 0], sizes = [32, 16], strides = [1, 1]} : vector<128x16xf32> to vector<32x16xf32>
    %194 = arith.negf %193 : vector<32x16xf32>
    %195 = math.exp %194 : vector<32x16xf32>
    %cst_66 = arith.constant 1.000000e+00 : f32
    %196 = vector.broadcast %cst_66 : f32 to vector<32x16xf32>
    %197 = arith.addf %196, %195 : vector<32x16xf32>
    %198 = arith.divf %196, %197 : vector<32x16xf32>
    %199 = vector.extract_strided_slice %180 {offsets = [96, 0], sizes = [32, 16], strides = [1, 1]} : vector<128x16xf32> to vector<32x16xf32>
    %200 = math.tanh %199 : vector<32x16xf32>
    %201 = arith.mulf %192, %141 : vector<32x16xf32>
    %202 = arith.mulf %186, %200 : vector<32x16xf32>
    %203 = arith.addf %201, %202 : vector<32x16xf32>
    %204 = math.tanh %203 : vector<32x16xf32>
    %205 = arith.mulf %198, %204 : vector<32x16xf32>
    %c3 = arith.constant 3 : index
    %c0_67 = arith.constant 0 : index
    %c0_68 = arith.constant 0 : index
    %c0_69 = arith.constant 0 : index
    %206 = vector.load %arg6[%c3, %c0_67, %c0_68, %c0_69] : memref<9x1x32x16xf32, #tpu.memory_space<vmem>>, vector<1x1x32x16xf32>
    %207 = vector.shape_cast %206 : vector<1x1x32x16xf32> to vector<32x16xf32>
    %208 = vector.shape_cast %205 : vector<32x16xf32> to vector<1x1x32x16xf32>
    tpu.vector_store %arg6[%c3, %c0_67, %c0_68, %c0_69], %208 {strides = array<i32>} : memref<9x1x32x16xf32, #tpu.memory_space<vmem>>, vector<1x1x32x16xf32>,
    %cst_70 = arith.constant dense<0.000000e+00> : vector<128x16xf32>
    %209 = tpu.matmul %6, %174, %cst_70 {dimension_numbers = #tpu.dot_dimension_numbers<[1], [0], [0], [1], [0, 0, 1, 1], [], []>} : vector<128x32xf32>, vector<32x16xf32>, vector<128x16xf32> -> vector<128x16xf32>
    %cst_71 = arith.constant dense<0.000000e+00> : vector<128x16xf32>
    %210 = tpu.matmul %209, %2, %cst_71 {dimension_numbers = #tpu.dot_dimension_numbers<[1], [0], [0], [1], [0, 0, 1, 1], [], []>} : vector<128x16xf32>, vector<16x16xf32>, vector<128x16xf32> -> vector<128x16xf32>
    %211 = arith.addf %21, %210 : vector<128x16xf32>
    %212 = vector.extract_strided_slice %211 {offsets = [0, 0], sizes = [32, 16], strides = [1, 1]} : vector<128x16xf32> to vector<32x16xf32>
    %213 = arith.negf %212 : vector<32x16xf32>
    %214 = math.exp %213 : vector<32x16xf32>
    %cst_72 = arith.constant 1.000000e+00 : f32
    %215 = vector.broadcast %cst_72 : f32 to vector<32x16xf32>
    %216 = arith.addf %215, %214 : vector<32x16xf32>
    %217 = arith.divf %215, %216 : vector<32x16xf32>
    %218 = vector.extract_strided_slice %211 {offsets = [32, 0], sizes = [32, 16], strides = [1, 1]} : vector<128x16xf32> to vector<32x16xf32>
    %219 = arith.negf %218 : vector<32x16xf32>
    %220 = math.exp %219 : vector<32x16xf32>
    %cst_73 = arith.constant 1.000000e+00 : f32
    %221 = vector.broadcast %cst_73 : f32 to vector<32x16xf32>
    %222 = arith.addf %221, %220 : vector<32x16xf32>
    %223 = arith.divf %221, %222 : vector<32x16xf32>
    %224 = vector.extract_strided_slice %211 {offsets = [64, 0], sizes = [32, 16], strides = [1, 1]} : vector<128x16xf32> to vector<32x16xf32>
    %225 = arith.negf %224 : vector<32x16xf32>
    %226 = math.exp %225 : vector<32x16xf32>
    %cst_74 = arith.constant 1.000000e+00 : f32
    %227 = vector.broadcast %cst_74 : f32 to vector<32x16xf32>
    %228 = arith.addf %227, %226 : vector<32x16xf32>
    %229 = arith.divf %227, %228 : vector<32x16xf32>
    %230 = vector.extract_strided_slice %211 {offsets = [96, 0], sizes = [32, 16], strides = [1, 1]} : vector<128x16xf32> to vector<32x16xf32>
    %231 = math.tanh %230 : vector<32x16xf32>
    %232 = arith.mulf %223, %172 : vector<32x16xf32>
    %233 = arith.mulf %217, %231 : vector<32x16xf32>
    %234 = arith.addf %232, %233 : vector<32x16xf32>
    %235 = math.tanh %234 : vector<32x16xf32>
    %236 = arith.mulf %229, %235 : vector<32x16xf32>
    %cst_75 = arith.constant dense<0.000000e+00> : vector<128x16xf32>
    %237 = tpu.matmul %10, %236, %cst_75 {dimension_numbers = #tpu.dot_dimension_numbers<[1], [0], [0], [1], [0, 0, 1, 1], [], []>} : vector<128x32xf32>, vector<32x16xf32>, vector<128x16xf32> -> vector<128x16xf32>
    %cst_76 = arith.constant dense<0.000000e+00> : vector<128x16xf32>
    %238 = tpu.matmul %12, %205, %cst_76 {dimension_numbers = #tpu.dot_dimension_numbers<[1], [0], [0], [1], [0, 0, 1, 1], [], []>} : vector<128x32xf32>, vector<32x16xf32>, vector<128x16xf32> -> vector<128x16xf32>
    %239 = arith.addf %237, %238 : vector<128x16xf32>
    %cst_77 = arith.constant dense<0.000000e+00> : vector<128x16xf32>
    %240 = tpu.matmul %239, %2, %cst_77 {dimension_numbers = #tpu.dot_dimension_numbers<[1], [0], [0], [1], [0, 0, 1, 1], [], []>} : vector<128x16xf32>, vector<16x16xf32>, vector<128x16xf32> -> vector<128x16xf32>
    %241 = vector.broadcast %14 : vector<128x1xf32> to vector<128x16xf32>
    %242 = arith.addf %240, %241 : vector<128x16xf32>
    %243 = vector.extract_strided_slice %242 {offsets = [0, 0], sizes = [32, 16], strides = [1, 1]} : vector<128x16xf32> to vector<32x16xf32>
    %244 = arith.negf %243 : vector<32x16xf32>
    %245 = math.exp %244 : vector<32x16xf32>
    %cst_78 = arith.constant 1.000000e+00 : f32
    %246 = vector.broadcast %cst_78 : f32 to vector<32x16xf32>
    %247 = arith.addf %246, %245 : vector<32x16xf32>
    %248 = arith.divf %246, %247 : vector<32x16xf32>
    %249 = vector.extract_strided_slice %242 {offsets = [32, 0], sizes = [32, 16], strides = [1, 1]} : vector<128x16xf32> to vector<32x16xf32>
    %250 = arith.negf %249 : vector<32x16xf32>
    %251 = math.exp %250 : vector<32x16xf32>
    %cst_79 = arith.constant 1.000000e+00 : f32
    %252 = vector.broadcast %cst_79 : f32 to vector<32x16xf32>
    %253 = arith.addf %252, %251 : vector<32x16xf32>
    %254 = arith.divf %252, %253 : vector<32x16xf32>
    %255 = vector.extract_strided_slice %242 {offsets = [64, 0], sizes = [32, 16], strides = [1, 1]} : vector<128x16xf32> to vector<32x16xf32>
    %256 = arith.negf %255 : vector<32x16xf32>
    %257 = math.exp %256 : vector<32x16xf32>
    %cst_80 = arith.constant 1.000000e+00 : f32
    %258 = vector.broadcast %cst_80 : f32 to vector<32x16xf32>
    %259 = arith.addf %258, %257 : vector<32x16xf32>
    %260 = arith.divf %258, %259 : vector<32x16xf32>
    %261 = vector.extract_strided_slice %242 {offsets = [96, 0], sizes = [32, 16], strides = [1, 1]} : vector<128x16xf32> to vector<32x16xf32>
    %262 = math.tanh %261 : vector<32x16xf32>
    %263 = arith.mulf %254, %203 : vector<32x16xf32>
    %264 = arith.mulf %248, %262 : vector<32x16xf32>
    %265 = arith.addf %263, %264 : vector<32x16xf32>
    %266 = math.tanh %265 : vector<32x16xf32>
    %267 = arith.mulf %260, %266 : vector<32x16xf32>
    %c4 = arith.constant 4 : index
    %c0_81 = arith.constant 0 : index
    %c0_82 = arith.constant 0 : index
    %c0_83 = arith.constant 0 : index
    %268 = vector.load %arg6[%c4, %c0_81, %c0_82, %c0_83] : memref<9x1x32x16xf32, #tpu.memory_space<vmem>>, vector<1x1x32x16xf32>
    %269 = vector.shape_cast %268 : vector<1x1x32x16xf32> to vector<32x16xf32>
    %270 = vector.shape_cast %267 : vector<32x16xf32> to vector<1x1x32x16xf32>
    tpu.vector_store %arg6[%c4, %c0_81, %c0_82, %c0_83], %270 {strides = array<i32>} : memref<9x1x32x16xf32, #tpu.memory_space<vmem>>, vector<1x1x32x16xf32>,
    %cst_84 = arith.constant dense<0.000000e+00> : vector<128x16xf32>
    %271 = tpu.matmul %6, %236, %cst_84 {dimension_numbers = #tpu.dot_dimension_numbers<[1], [0], [0], [1], [0, 0, 1, 1], [], []>} : vector<128x32xf32>, vector<32x16xf32>, vector<128x16xf32> -> vector<128x16xf32>
    %cst_85 = arith.constant dense<0.000000e+00> : vector<128x16xf32>
    %272 = tpu.matmul %271, %2, %cst_85 {dimension_numbers = #tpu.dot_dimension_numbers<[1], [0], [0], [1], [0, 0, 1, 1], [], []>} : vector<128x16xf32>, vector<16x16xf32>, vector<128x16xf32> -> vector<128x16xf32>
    %273 = arith.addf %21, %272 : vector<128x16xf32>
    %274 = vector.extract_strided_slice %273 {offsets = [0, 0], sizes = [32, 16], strides = [1, 1]} : vector<128x16xf32> to vector<32x16xf32>
    %275 = arith.negf %274 : vector<32x16xf32>
    %276 = math.exp %275 : vector<32x16xf32>
    %cst_86 = arith.constant 1.000000e+00 : f32
    %277 = vector.broadcast %cst_86 : f32 to vector<32x16xf32>
    %278 = arith.addf %277, %276 : vector<32x16xf32>
    %279 = arith.divf %277, %278 : vector<32x16xf32>
    %280 = vector.extract_strided_slice %273 {offsets = [32, 0], sizes = [32, 16], strides = [1, 1]} : vector<128x16xf32> to vector<32x16xf32>
    %281 = arith.negf %280 : vector<32x16xf32>
    %282 = math.exp %281 : vector<32x16xf32>
    %cst_87 = arith.constant 1.000000e+00 : f32
    %283 = vector.broadcast %cst_87 : f32 to vector<32x16xf32>
    %284 = arith.addf %283, %282 : vector<32x16xf32>
    %285 = arith.divf %283, %284 : vector<32x16xf32>
    %286 = vector.extract_strided_slice %273 {offsets = [64, 0], sizes = [32, 16], strides = [1, 1]} : vector<128x16xf32> to vector<32x16xf32>
    %287 = arith.negf %286 : vector<32x16xf32>
    %288 = math.exp %287 : vector<32x16xf32>
    %cst_88 = arith.constant 1.000000e+00 : f32
    %289 = vector.broadcast %cst_88 : f32 to vector<32x16xf32>
    %290 = arith.addf %289, %288 : vector<32x16xf32>
    %291 = arith.divf %289, %290 : vector<32x16xf32>
    %292 = vector.extract_strided_slice %273 {offsets = [96, 0], sizes = [32, 16], strides = [1, 1]} : vector<128x16xf32> to vector<32x16xf32>
    %293 = math.tanh %292 : vector<32x16xf32>
    %294 = arith.mulf %285, %234 : vector<32x16xf32>
    %295 = arith.mulf %279, %293 : vector<32x16xf32>
    %296 = arith.addf %294, %295 : vector<32x16xf32>
    %297 = math.tanh %296 : vector<32x16xf32>
    %298 = arith.mulf %291, %297 : vector<32x16xf32>
    %cst_89 = arith.constant dense<0.000000e+00> : vector<128x16xf32>
    %299 = tpu.matmul %10, %298, %cst_89 {dimension_numbers = #tpu.dot_dimension_numbers<[1], [0], [0], [1], [0, 0, 1, 1], [], []>} : vector<128x32xf32>, vector<32x16xf32>, vector<128x16xf32> -> vector<128x16xf32>
    %cst_90 = arith.constant dense<0.000000e+00> : vector<128x16xf32>
    %300 = tpu.matmul %12, %267, %cst_90 {dimension_numbers = #tpu.dot_dimension_numbers<[1], [0], [0], [1], [0, 0, 1, 1], [], []>} : vector<128x32xf32>, vector<32x16xf32>, vector<128x16xf32> -> vector<128x16xf32>
    %301 = arith.addf %299, %300 : vector<128x16xf32>
    %cst_91 = arith.constant dense<0.000000e+00> : vector<128x16xf32>
    %302 = tpu.matmul %301, %2, %cst_91 {dimension_numbers = #tpu.dot_dimension_numbers<[1], [0], [0], [1], [0, 0, 1, 1], [], []>} : vector<128x16xf32>, vector<16x16xf32>, vector<128x16xf32> -> vector<128x16xf32>
    %303 = vector.broadcast %14 : vector<128x1xf32> to vector<128x16xf32>
    %304 = arith.addf %302, %303 : vector<128x16xf32>
    %305 = vector.extract_strided_slice %304 {offsets = [0, 0], sizes = [32, 16], strides = [1, 1]} : vector<128x16xf32> to vector<32x16xf32>
    %306 = arith.negf %305 : vector<32x16xf32>
    %307 = math.exp %306 : vector<32x16xf32>
    %cst_92 = arith.constant 1.000000e+00 : f32
    %308 = vector.broadcast %cst_92 : f32 to vector<32x16xf32>
    %309 = arith.addf %308, %307 : vector<32x16xf32>
    %310 = arith.divf %308, %309 : vector<32x16xf32>
    %311 = vector.extract_strided_slice %304 {offsets = [32, 0], sizes = [32, 16], strides = [1, 1]} : vector<128x16xf32> to vector<32x16xf32>
    %312 = arith.negf %311 : vector<32x16xf32>
    %313 = math.exp %312 : vector<32x16xf32>
    %cst_93 = arith.constant 1.000000e+00 : f32
    %314 = vector.broadcast %cst_93 : f32 to vector<32x16xf32>
    %315 = arith.addf %314, %313 : vector<32x16xf32>
    %316 = arith.divf %314, %315 : vector<32x16xf32>
    %317 = vector.extract_strided_slice %304 {offsets = [64, 0], sizes = [32, 16], strides = [1, 1]} : vector<128x16xf32> to vector<32x16xf32>
    %318 = arith.negf %317 : vector<32x16xf32>
    %319 = math.exp %318 : vector<32x16xf32>
    %cst_94 = arith.constant 1.000000e+00 : f32
    %320 = vector.broadcast %cst_94 : f32 to vector<32x16xf32>
    %321 = arith.addf %320, %319 : vector<32x16xf32>
    %322 = arith.divf %320, %321 : vector<32x16xf32>
    %323 = vector.extract_strided_slice %304 {offsets = [96, 0], sizes = [32, 16], strides = [1, 1]} : vector<128x16xf32> to vector<32x16xf32>
    %324 = math.tanh %323 : vector<32x16xf32>
    %325 = arith.mulf %316, %265 : vector<32x16xf32>
    %326 = arith.mulf %310, %324 : vector<32x16xf32>
    %327 = arith.addf %325, %326 : vector<32x16xf32>
    %328 = math.tanh %327 : vector<32x16xf32>
    %329 = arith.mulf %322, %328 : vector<32x16xf32>
    %c5 = arith.constant 5 : index
    %c0_95 = arith.constant 0 : index
    %c0_96 = arith.constant 0 : index
    %c0_97 = arith.constant 0 : index
    %330 = vector.load %arg6[%c5, %c0_95, %c0_96, %c0_97] : memref<9x1x32x16xf32, #tpu.memory_space<vmem>>, vector<1x1x32x16xf32>
    %331 = vector.shape_cast %330 : vector<1x1x32x16xf32> to vector<32x16xf32>
    %332 = vector.shape_cast %329 : vector<32x16xf32> to vector<1x1x32x16xf32>
    tpu.vector_store %arg6[%c5, %c0_95, %c0_96, %c0_97], %332 {strides = array<i32>} : memref<9x1x32x16xf32, #tpu.memory_space<vmem>>, vector<1x1x32x16xf32>,
    %cst_98 = arith.constant dense<0.000000e+00> : vector<128x16xf32>
    %333 = tpu.matmul %6, %298, %cst_98 {dimension_numbers = #tpu.dot_dimension_numbers<[1], [0], [0], [1], [0, 0, 1, 1], [], []>} : vector<128x32xf32>, vector<32x16xf32>, vector<128x16xf32> -> vector<128x16xf32>
    %cst_99 = arith.constant dense<0.000000e+00> : vector<128x16xf32>
    %334 = tpu.matmul %333, %2, %cst_99 {dimension_numbers = #tpu.dot_dimension_numbers<[1], [0], [0], [1], [0, 0, 1, 1], [], []>} : vector<128x16xf32>, vector<16x16xf32>, vector<128x16xf32> -> vector<128x16xf32>
    %335 = arith.addf %21, %334 : vector<128x16xf32>
    %336 = vector.extract_strided_slice %335 {offsets = [0, 0], sizes = [32, 16], strides = [1, 1]} : vector<128x16xf32> to vector<32x16xf32>
    %337 = arith.negf %336 : vector<32x16xf32>
    %338 = math.exp %337 : vector<32x16xf32>
    %cst_100 = arith.constant 1.000000e+00 : f32
    %339 = vector.broadcast %cst_100 : f32 to vector<32x16xf32>
    %340 = arith.addf %339, %338 : vector<32x16xf32>
    %341 = arith.divf %339, %340 : vector<32x16xf32>
    %342 = vector.extract_strided_slice %335 {offsets = [32, 0], sizes = [32, 16], strides = [1, 1]} : vector<128x16xf32> to vector<32x16xf32>
    %343 = arith.negf %342 : vector<32x16xf32>
    %344 = math.exp %343 : vector<32x16xf32>
    %cst_101 = arith.constant 1.000000e+00 : f32
    %345 = vector.broadcast %cst_101 : f32 to vector<32x16xf32>
    %346 = arith.addf %345, %344 : vector<32x16xf32>
    %347 = arith.divf %345, %346 : vector<32x16xf32>
    %348 = vector.extract_strided_slice %335 {offsets = [64, 0], sizes = [32, 16], strides = [1, 1]} : vector<128x16xf32> to vector<32x16xf32>
    %349 = arith.negf %348 : vector<32x16xf32>
    %350 = math.exp %349 : vector<32x16xf32>
    %cst_102 = arith.constant 1.000000e+00 : f32
    %351 = vector.broadcast %cst_102 : f32 to vector<32x16xf32>
    %352 = arith.addf %351, %350 : vector<32x16xf32>
    %353 = arith.divf %351, %352 : vector<32x16xf32>
    %354 = vector.extract_strided_slice %335 {offsets = [96, 0], sizes = [32, 16], strides = [1, 1]} : vector<128x16xf32> to vector<32x16xf32>
    %355 = math.tanh %354 : vector<32x16xf32>
    %356 = arith.mulf %347, %296 : vector<32x16xf32>
    %357 = arith.mulf %341, %355 : vector<32x16xf32>
    %358 = arith.addf %356, %357 : vector<32x16xf32>
    %359 = math.tanh %358 : vector<32x16xf32>
    %360 = arith.mulf %353, %359 : vector<32x16xf32>
    %cst_103 = arith.constant dense<0.000000e+00> : vector<128x16xf32>
    %361 = tpu.matmul %10, %360, %cst_103 {dimension_numbers = #tpu.dot_dimension_numbers<[1], [0], [0], [1], [0, 0, 1, 1], [], []>} : vector<128x32xf32>, vector<32x16xf32>, vector<128x16xf32> -> vector<128x16xf32>
    %cst_104 = arith.constant dense<0.000000e+00> : vector<128x16xf32>
    %362 = tpu.matmul %12, %329, %cst_104 {dimension_numbers = #tpu.dot_dimension_numbers<[1], [0], [0], [1], [0, 0, 1, 1], [], []>} : vector<128x32xf32>, vector<32x16xf32>, vector<128x16xf32> -> vector<128x16xf32>
    %363 = arith.addf %361, %362 : vector<128x16xf32>
    %cst_105 = arith.constant dense<0.000000e+00> : vector<128x16xf32>
    %364 = tpu.matmul %363, %2, %cst_105 {dimension_numbers = #tpu.dot_dimension_numbers<[1], [0], [0], [1], [0, 0, 1, 1], [], []>} : vector<128x16xf32>, vector<16x16xf32>, vector<128x16xf32> -> vector<128x16xf32>
    %365 = vector.broadcast %14 : vector<128x1xf32> to vector<128x16xf32>
    %366 = arith.addf %364, %365 : vector<128x16xf32>
    %367 = vector.extract_strided_slice %366 {offsets = [0, 0], sizes = [32, 16], strides = [1, 1]} : vector<128x16xf32> to vector<32x16xf32>
    %368 = arith.negf %367 : vector<32x16xf32>
    %369 = math.exp %368 : vector<32x16xf32>
    %cst_106 = arith.constant 1.000000e+00 : f32
    %370 = vector.broadcast %cst_106 : f32 to vector<32x16xf32>
    %371 = arith.addf %370, %369 : vector<32x16xf32>
    %372 = arith.divf %370, %371 : vector<32x16xf32>
    %373 = vector.extract_strided_slice %366 {offsets = [32, 0], sizes = [32, 16], strides = [1, 1]} : vector<128x16xf32> to vector<32x16xf32>
    %374 = arith.negf %373 : vector<32x16xf32>
    %375 = math.exp %374 : vector<32x16xf32>
    %cst_107 = arith.constant 1.000000e+00 : f32
    %376 = vector.broadcast %cst_107 : f32 to vector<32x16xf32>
    %377 = arith.addf %376, %375 : vector<32x16xf32>
    %378 = arith.divf %376, %377 : vector<32x16xf32>
    %379 = vector.extract_strided_slice %366 {offsets = [64, 0], sizes = [32, 16], strides = [1, 1]} : vector<128x16xf32> to vector<32x16xf32>
    %380 = arith.negf %379 : vector<32x16xf32>
    %381 = math.exp %380 : vector<32x16xf32>
    %cst_108 = arith.constant 1.000000e+00 : f32
    %382 = vector.broadcast %cst_108 : f32 to vector<32x16xf32>
    %383 = arith.addf %382, %381 : vector<32x16xf32>
    %384 = arith.divf %382, %383 : vector<32x16xf32>
    %385 = vector.extract_strided_slice %366 {offsets = [96, 0], sizes = [32, 16], strides = [1, 1]} : vector<128x16xf32> to vector<32x16xf32>
    %386 = math.tanh %385 : vector<32x16xf32>
    %387 = arith.mulf %378, %327 : vector<32x16xf32>
    %388 = arith.mulf %372, %386 : vector<32x16xf32>
    %389 = arith.addf %387, %388 : vector<32x16xf32>
    %390 = math.tanh %389 : vector<32x16xf32>
    %391 = arith.mulf %384, %390 : vector<32x16xf32>
    %c6 = arith.constant 6 : index
    %c0_109 = arith.constant 0 : index
    %c0_110 = arith.constant 0 : index
    %c0_111 = arith.constant 0 : index
    %392 = vector.load %arg6[%c6, %c0_109, %c0_110, %c0_111] : memref<9x1x32x16xf32, #tpu.memory_space<vmem>>, vector<1x1x32x16xf32>
    %393 = vector.shape_cast %392 : vector<1x1x32x16xf32> to vector<32x16xf32>
    %394 = vector.shape_cast %391 : vector<32x16xf32> to vector<1x1x32x16xf32>
    tpu.vector_store %arg6[%c6, %c0_109, %c0_110, %c0_111], %394 {strides = array<i32>} : memref<9x1x32x16xf32, #tpu.memory_space<vmem>>, vector<1x1x32x16xf32>,
    %cst_112 = arith.constant dense<0.000000e+00> : vector<128x16xf32>
    %395 = tpu.matmul %6, %360, %cst_112 {dimension_numbers = #tpu.dot_dimension_numbers<[1], [0], [0], [1], [0, 0, 1, 1], [], []>} : vector<128x32xf32>, vector<32x16xf32>, vector<128x16xf32> -> vector<128x16xf32>
    %cst_113 = arith.constant dense<0.000000e+00> : vector<128x16xf32>
    %396 = tpu.matmul %395, %2, %cst_113 {dimension_numbers = #tpu.dot_dimension_numbers<[1], [0], [0], [1], [0, 0, 1, 1], [], []>} : vector<128x16xf32>, vector<16x16xf32>, vector<128x16xf32> -> vector<128x16xf32>
    %397 = arith.addf %21, %396 : vector<128x16xf32>
    %398 = vector.extract_strided_slice %397 {offsets = [0, 0], sizes = [32, 16], strides = [1, 1]} : vector<128x16xf32> to vector<32x16xf32>
    %399 = arith.negf %398 : vector<32x16xf32>
    %400 = math.exp %399 : vector<32x16xf32>
    %cst_114 = arith.constant 1.000000e+00 : f32
    %401 = vector.broadcast %cst_114 : f32 to vector<32x16xf32>
    %402 = arith.addf %401, %400 : vector<32x16xf32>
    %403 = arith.divf %401, %402 : vector<32x16xf32>
    %404 = vector.extract_strided_slice %397 {offsets = [32, 0], sizes = [32, 16], strides = [1, 1]} : vector<128x16xf32> to vector<32x16xf32>
    %405 = arith.negf %404 : vector<32x16xf32>
    %406 = math.exp %405 : vector<32x16xf32>
    %cst_115 = arith.constant 1.000000e+00 : f32
    %407 = vector.broadcast %cst_115 : f32 to vector<32x16xf32>
    %408 = arith.addf %407, %406 : vector<32x16xf32>
    %409 = arith.divf %407, %408 : vector<32x16xf32>
    %410 = vector.extract_strided_slice %397 {offsets = [64, 0], sizes = [32, 16], strides = [1, 1]} : vector<128x16xf32> to vector<32x16xf32>
    %411 = arith.negf %410 : vector<32x16xf32>
    %412 = math.exp %411 : vector<32x16xf32>
    %cst_116 = arith.constant 1.000000e+00 : f32
    %413 = vector.broadcast %cst_116 : f32 to vector<32x16xf32>
    %414 = arith.addf %413, %412 : vector<32x16xf32>
    %415 = arith.divf %413, %414 : vector<32x16xf32>
    %416 = vector.extract_strided_slice %397 {offsets = [96, 0], sizes = [32, 16], strides = [1, 1]} : vector<128x16xf32> to vector<32x16xf32>
    %417 = math.tanh %416 : vector<32x16xf32>
    %418 = arith.mulf %409, %358 : vector<32x16xf32>
    %419 = arith.mulf %403, %417 : vector<32x16xf32>
    %420 = arith.addf %418, %419 : vector<32x16xf32>
    %421 = math.tanh %420 : vector<32x16xf32>
    %422 = arith.mulf %415, %421 : vector<32x16xf32>
    %cst_117 = arith.constant dense<0.000000e+00> : vector<128x16xf32>
    %423 = tpu.matmul %10, %422, %cst_117 {dimension_numbers = #tpu.dot_dimension_numbers<[1], [0], [0], [1], [0, 0, 1, 1], [], []>} : vector<128x32xf32>, vector<32x16xf32>, vector<128x16xf32> -> vector<128x16xf32>
    %cst_118 = arith.constant dense<0.000000e+00> : vector<128x16xf32>
    %424 = tpu.matmul %12, %391, %cst_118 {dimension_numbers = #tpu.dot_dimension_numbers<[1], [0], [0], [1], [0, 0, 1, 1], [], []>} : vector<128x32xf32>, vector<32x16xf32>, vector<128x16xf32> -> vector<128x16xf32>
    %425 = arith.addf %423, %424 : vector<128x16xf32>
    %cst_119 = arith.constant dense<0.000000e+00> : vector<128x16xf32>
    %426 = tpu.matmul %425, %2, %cst_119 {dimension_numbers = #tpu.dot_dimension_numbers<[1], [0], [0], [1], [0, 0, 1, 1], [], []>} : vector<128x16xf32>, vector<16x16xf32>, vector<128x16xf32> -> vector<128x16xf32>
    %427 = vector.broadcast %14 : vector<128x1xf32> to vector<128x16xf32>
    %428 = arith.addf %426, %427 : vector<128x16xf32>
    %429 = vector.extract_strided_slice %428 {offsets = [0, 0], sizes = [32, 16], strides = [1, 1]} : vector<128x16xf32> to vector<32x16xf32>
    %430 = arith.negf %429 : vector<32x16xf32>
    %431 = math.exp %430 : vector<32x16xf32>
    %cst_120 = arith.constant 1.000000e+00 : f32
    %432 = vector.broadcast %cst_120 : f32 to vector<32x16xf32>
    %433 = arith.addf %432, %431 : vector<32x16xf32>
    %434 = arith.divf %432, %433 : vector<32x16xf32>
    %435 = vector.extract_strided_slice %428 {offsets = [32, 0], sizes = [32, 16], strides = [1, 1]} : vector<128x16xf32> to vector<32x16xf32>
    %436 = arith.negf %435 : vector<32x16xf32>
    %437 = math.exp %436 : vector<32x16xf32>
    %cst_121 = arith.constant 1.000000e+00 : f32
    %438 = vector.broadcast %cst_121 : f32 to vector<32x16xf32>
    %439 = arith.addf %438, %437 : vector<32x16xf32>
    %440 = arith.divf %438, %439 : vector<32x16xf32>
    %441 = vector.extract_strided_slice %428 {offsets = [64, 0], sizes = [32, 16], strides = [1, 1]} : vector<128x16xf32> to vector<32x16xf32>
    %442 = arith.negf %441 : vector<32x16xf32>
    %443 = math.exp %442 : vector<32x16xf32>
    %cst_122 = arith.constant 1.000000e+00 : f32
    %444 = vector.broadcast %cst_122 : f32 to vector<32x16xf32>
    %445 = arith.addf %444, %443 : vector<32x16xf32>
    %446 = arith.divf %444, %445 : vector<32x16xf32>
    %447 = vector.extract_strided_slice %428 {offsets = [96, 0], sizes = [32, 16], strides = [1, 1]} : vector<128x16xf32> to vector<32x16xf32>
    %448 = math.tanh %447 : vector<32x16xf32>
    %449 = arith.mulf %440, %389 : vector<32x16xf32>
    %450 = arith.mulf %434, %448 : vector<32x16xf32>
    %451 = arith.addf %449, %450 : vector<32x16xf32>
    %452 = math.tanh %451 : vector<32x16xf32>
    %453 = arith.mulf %446, %452 : vector<32x16xf32>
    %c7 = arith.constant 7 : index
    %c0_123 = arith.constant 0 : index
    %c0_124 = arith.constant 0 : index
    %c0_125 = arith.constant 0 : index
    %454 = vector.load %arg6[%c7, %c0_123, %c0_124, %c0_125] : memref<9x1x32x16xf32, #tpu.memory_space<vmem>>, vector<1x1x32x16xf32>
    %455 = vector.shape_cast %454 : vector<1x1x32x16xf32> to vector<32x16xf32>
    %456 = vector.shape_cast %453 : vector<32x16xf32> to vector<1x1x32x16xf32>
    tpu.vector_store %arg6[%c7, %c0_123, %c0_124, %c0_125], %456 {strides = array<i32>} : memref<9x1x32x16xf32, #tpu.memory_space<vmem>>, vector<1x1x32x16xf32>,
    %cst_126 = arith.constant dense<0.000000e+00> : vector<128x16xf32>
    %457 = tpu.matmul %6, %422, %cst_126 {dimension_numbers = #tpu.dot_dimension_numbers<[1], [0], [0], [1], [0, 0, 1, 1], [], []>} : vector<128x32xf32>, vector<32x16xf32>, vector<128x16xf32> -> vector<128x16xf32>
    %cst_127 = arith.constant dense<0.000000e+00> : vector<128x16xf32>
    %458 = tpu.matmul %457, %2, %cst_127 {dimension_numbers = #tpu.dot_dimension_numbers<[1], [0], [0], [1], [0, 0, 1, 1], [], []>} : vector<128x16xf32>, vector<16x16xf32>, vector<128x16xf32> -> vector<128x16xf32>
    %459 = arith.addf %21, %458 : vector<128x16xf32>
    %460 = vector.extract_strided_slice %459 {offsets = [0, 0], sizes = [32, 16], strides = [1, 1]} : vector<128x16xf32> to vector<32x16xf32>
    %461 = arith.negf %460 : vector<32x16xf32>
    %462 = math.exp %461 : vector<32x16xf32>
    %cst_128 = arith.constant 1.000000e+00 : f32
    %463 = vector.broadcast %cst_128 : f32 to vector<32x16xf32>
    %464 = arith.addf %463, %462 : vector<32x16xf32>
    %465 = arith.divf %463, %464 : vector<32x16xf32>
    %466 = vector.extract_strided_slice %459 {offsets = [32, 0], sizes = [32, 16], strides = [1, 1]} : vector<128x16xf32> to vector<32x16xf32>
    %467 = arith.negf %466 : vector<32x16xf32>
    %468 = math.exp %467 : vector<32x16xf32>
    %cst_129 = arith.constant 1.000000e+00 : f32
    %469 = vector.broadcast %cst_129 : f32 to vector<32x16xf32>
    %470 = arith.addf %469, %468 : vector<32x16xf32>
    %471 = arith.divf %469, %470 : vector<32x16xf32>
    %472 = vector.extract_strided_slice %459 {offsets = [64, 0], sizes = [32, 16], strides = [1, 1]} : vector<128x16xf32> to vector<32x16xf32>
    %473 = arith.negf %472 : vector<32x16xf32>
    %474 = math.exp %473 : vector<32x16xf32>
    %cst_130 = arith.constant 1.000000e+00 : f32
    %475 = vector.broadcast %cst_130 : f32 to vector<32x16xf32>
    %476 = arith.addf %475, %474 : vector<32x16xf32>
    %477 = arith.divf %475, %476 : vector<32x16xf32>
    %478 = vector.extract_strided_slice %459 {offsets = [96, 0], sizes = [32, 16], strides = [1, 1]} : vector<128x16xf32> to vector<32x16xf32>
    %479 = math.tanh %478 : vector<32x16xf32>
    %480 = arith.mulf %471, %420 : vector<32x16xf32>
    %481 = arith.mulf %465, %479 : vector<32x16xf32>
    %482 = arith.addf %480, %481 : vector<32x16xf32>
    %483 = math.tanh %482 : vector<32x16xf32>
    %484 = arith.mulf %477, %483 : vector<32x16xf32>
    %cst_131 = arith.constant dense<0.000000e+00> : vector<128x16xf32>
    %485 = tpu.matmul %10, %484, %cst_131 {dimension_numbers = #tpu.dot_dimension_numbers<[1], [0], [0], [1], [0, 0, 1, 1], [], []>} : vector<128x32xf32>, vector<32x16xf32>, vector<128x16xf32> -> vector<128x16xf32>
    %cst_132 = arith.constant dense<0.000000e+00> : vector<128x16xf32>
    %486 = tpu.matmul %12, %453, %cst_132 {dimension_numbers = #tpu.dot_dimension_numbers<[1], [0], [0], [1], [0, 0, 1, 1], [], []>} : vector<128x32xf32>, vector<32x16xf32>, vector<128x16xf32> -> vector<128x16xf32>
    %487 = arith.addf %485, %486 : vector<128x16xf32>
    %cst_133 = arith.constant dense<0.000000e+00> : vector<128x16xf32>
    %488 = tpu.matmul %487, %2, %cst_133 {dimension_numbers = #tpu.dot_dimension_numbers<[1], [0], [0], [1], [0, 0, 1, 1], [], []>} : vector<128x16xf32>, vector<16x16xf32>, vector<128x16xf32> -> vector<128x16xf32>
    %489 = vector.broadcast %14 : vector<128x1xf32> to vector<128x16xf32>
    %490 = arith.addf %488, %489 : vector<128x16xf32>
    %491 = vector.extract_strided_slice %490 {offsets = [0, 0], sizes = [32, 16], strides = [1, 1]} : vector<128x16xf32> to vector<32x16xf32>
    %492 = arith.negf %491 : vector<32x16xf32>
    %493 = math.exp %492 : vector<32x16xf32>
    %cst_134 = arith.constant 1.000000e+00 : f32
    %494 = vector.broadcast %cst_134 : f32 to vector<32x16xf32>
    %495 = arith.addf %494, %493 : vector<32x16xf32>
    %496 = arith.divf %494, %495 : vector<32x16xf32>
    %497 = vector.extract_strided_slice %490 {offsets = [32, 0], sizes = [32, 16], strides = [1, 1]} : vector<128x16xf32> to vector<32x16xf32>
    %498 = arith.negf %497 : vector<32x16xf32>
    %499 = math.exp %498 : vector<32x16xf32>
    %cst_135 = arith.constant 1.000000e+00 : f32
    %500 = vector.broadcast %cst_135 : f32 to vector<32x16xf32>
    %501 = arith.addf %500, %499 : vector<32x16xf32>
    %502 = arith.divf %500, %501 : vector<32x16xf32>
    %503 = vector.extract_strided_slice %490 {offsets = [64, 0], sizes = [32, 16], strides = [1, 1]} : vector<128x16xf32> to vector<32x16xf32>
    %504 = arith.negf %503 : vector<32x16xf32>
    %505 = math.exp %504 : vector<32x16xf32>
    %cst_136 = arith.constant 1.000000e+00 : f32
    %506 = vector.broadcast %cst_136 : f32 to vector<32x16xf32>
    %507 = arith.addf %506, %505 : vector<32x16xf32>
    %508 = arith.divf %506, %507 : vector<32x16xf32>
    %509 = vector.extract_strided_slice %490 {offsets = [96, 0], sizes = [32, 16], strides = [1, 1]} : vector<128x16xf32> to vector<32x16xf32>
    %510 = math.tanh %509 : vector<32x16xf32>
    %511 = arith.mulf %502, %451 : vector<32x16xf32>
    %512 = arith.mulf %496, %510 : vector<32x16xf32>
    %513 = arith.addf %511, %512 : vector<32x16xf32>
    %514 = math.tanh %513 : vector<32x16xf32>
    %515 = arith.mulf %508, %514 : vector<32x16xf32>
    %c8 = arith.constant 8 : index
    %c0_137 = arith.constant 0 : index
    %c0_138 = arith.constant 0 : index
    %c0_139 = arith.constant 0 : index
    %516 = vector.load %arg6[%c8, %c0_137, %c0_138, %c0_139] : memref<9x1x32x16xf32, #tpu.memory_space<vmem>>, vector<1x1x32x16xf32>
    %517 = vector.shape_cast %516 : vector<1x1x32x16xf32> to vector<32x16xf32>
    %518 = vector.shape_cast %515 : vector<32x16xf32> to vector<1x1x32x16xf32>
    tpu.vector_store %arg6[%c8, %c0_137, %c0_138, %c0_139], %518 {strides = array<i32>} : memref<9x1x32x16xf32, #tpu.memory_space<vmem>>, vector<1x1x32x16xf32>,
    return
  }
  func.func @transform_0(%arg0: i32) -> (i32, i32, i32) {
    %c0_i32 = arith.constant 0 : i32
    %c0_i32_0 = arith.constant 0 : i32
    %c0_i32_1 = arith.constant 0 : i32
    return %arg0, %c0_i32, %c0_i32_0 : i32, i32, i32
  }
  func.func @transform_1(%arg0: i32) -> (i32, i32, i32) {
    %c0_i32 = arith.constant 0 : i32
    %c0_i32_0 = arith.constant 0 : i32
    %c0_i32_1 = arith.constant 0 : i32
    %c0_i32_2 = arith.constant 0 : i32
    return %c0_i32, %c0_i32_0, %c0_i32_1 : i32, i32, i32
  }
  func.func @transform_2(%arg0: i32) -> (i32, i32, i32) {
    %c0_i32 = arith.constant 0 : i32
    %c0_i32_0 = arith.constant 0 : i32
    %c0_i32_1 = arith.constant 0 : i32
    %c0_i32_2 = arith.constant 0 : i32
    return %c0_i32, %c0_i32_0, %c0_i32_1 : i32, i32, i32
  }
  func.func @transform_3(%arg0: i32) -> (i32, i32, i32) {
    %c0_i32 = arith.constant 0 : i32
    %c0_i32_0 = arith.constant 0 : i32
    %c0_i32_1 = arith.constant 0 : i32
    %c0_i32_2 = arith.constant 0 : i32
    return %c0_i32, %c0_i32_0, %c0_i32_1 : i32, i32, i32
  }
  func.func @transform_4(%arg0: i32) -> (i32, i32) {
    %c0_i32 = arith.constant 0 : i32
    %c0_i32_0 = arith.constant 0 : i32
    %c0_i32_1 = arith.constant 0 : i32
    return %c0_i32, %c0_i32_0 : i32, i32
  }
  func.func @transform_5(%arg0: i32) -> (i32, i32, i32, i32) {
    %c0_i32 = arith.constant 0 : i32
    %c0_i32_0 = arith.constant 0 : i32
    %c0_i32_1 = arith.constant 0 : i32
    %c0_i32_2 = arith.constant 0 : i32
    return %c0_i32, %arg0, %c0_i32_0, %c0_i32_1 : i32, i32, i32, i32
  }
}

</mosaic_0001>

<bundles_post_ra>
// kernel: rnn_forward.1
= control target key start
LH: loop header
LB: loop body
LE: loop exit
PB: predicated region body
PF: predicated region fallthrough
CT: control target
= control target key end

     0   :  { %s14178_s18 = smov 0   ;;  %s14180_s19 = smov 0   ;;  %s17171_s0 = inlined_call_operand.vmem [shape: f32[2,32,16], index: 0, kind: input, shape index: {}]   ;;  %s17172_s1 = inlined_call_operand.vmem [shape: f32[2,128,32], index: 1, kind: input, shape index: {}]   ;;  %s17173_s2 = inlined_call_operand.vmem [shape: f32[2,128,32], index: 2, kind: input, shape index: {}]   ;;  %s17174_s3 = inlined_call_operand.vmem [shape: f32[2,128,1], index: 3, kind: input, shape index: {}]   ;;  %s17175_s4 = inlined_call_operand.vmem [shape: f32[16,16], index: 4, kind: input, shape index: {}]   ;;  %s17176_s5 = inlined_call_operand.vmem [shape: f32[9,2,32,16], index: 5, kind: output, shape index: {}]  }
   0x1   :  { %s14182_s20 = smov 0  }
   0x2 LB: > { %s14189_s21 = sadd.s32 4294967295, %s14144_s20   ;;  %s14191_s22 = sadd.s32 1, %s14144_s20   ;;  %s14144_s20 = sphi %s14182_s20, %s17538_s20   ;;  %s14140_s19 = sphi %s14180_s19, %s17537_s19   ;;  %s14136_s18 = sphi %s14178_s18, %s17536_s18  }
   0x3   : > { %s129_s23 = ssub.s32 %s14144_s20, %s14191_s22  ;;  %s132_s24 = sadd.s32 1, %s14140_s19 }
   0x4   : > { %p130_p0 = scmp.eq.s32.totalorder %s129_s23, 0  ;;  %p142_p1 = scmp.ne.s32.totalorder %s14140_s19, %s14136_s18 }
   0x5   : > { %p143_p2 = scmp.eq.s32.totalorder %s14189_s21, 1  ;;  %p9528_p3 = scmp.ge.s32.totalorder %s14144_s20, 1 }
   0x6   : > { %s14198_s25 = scalar_select %p130_p0, %s14140_s19, %s132_s24  }
   0x7   : > { %p14200_p4 = por %p143_p2, %p142_p1  ;;  %p187_p5 = scmp.lt.s32.totalorder %s14144_s20, 3 }
   0x9   : > { %p188_p6 = pnand %p9528_p3, %p187_p5 }
   0xb   : > { %191 = sbr.rel (%p188_p6) target bundleno = 6452 (0x1934), region = 40 }
  0x12   : > { %s211_s27 = sand.u32 1, %s14136_s18   ;;  %p214_p7 = scmp.lt.s32.totalorder %s14189_s21, 1  ;;  %v225_v0 = vld [vmem:[%s17172_s1] sm:$0xff]  ;;  %vm329_vm0 = vcmask 261120   ;;  %vm324_vm1 = vcmask 130048   ;;  %v224_v7 = vld [vmem:[%s17175_s4 + $0x8] sm:$0xff] }
  0x13   : > { %s12925_s30 = smul.u32 288, %s211_s27  ;;  %11289 = vmatprep.mubr.msk.f32.mxu0 %vm329_vm0, %v225_v0  ;;  %v223_v1 = vld [vmem:[%s17175_s4] sm:$0xff]  ;;  %v226_v10 = vld [vmem:[%s17172_s1 + $0x8] sm:$0xff]  ;;  %v227_v11 = vld [vmem:[%s17172_s1 + $0x10] sm:$0xff]  ;;  %v14146_v25 = vmov 0.0   ;;  %v14147_v28 = vmov 0  }
  0x14   : > { %s215_s6 = scalar_select %p214_p7, %s14189_s21, 1  ;;  %v14229_v9 = vpack.c.bf16 %v224_v7, %v223_v1  ;;  %v228_v12 = vld [vmem:[%s17172_s1 + $0x18] sm:$0xff]  ;;  %v229_v13 = vld [vmem:[%s17172_s1 + $0x20] sm:$0xff]  ;;  %v230_v14 = vld [vmem:[%s17172_s1 + $0x28] sm:$0xff]  ;;  %12953 = vset.pattern.permute.xlu1 %v14147_v28  ;;  %12952 = vset.pattern.permute.xlu0 %v14147_v28 }
  0x15   : > { %s14216_s13 = scalar_lea.vmem [#allocation2], %s12925_s30  ;;  %v231_v15 = vld [vmem:[%s17172_s1 + $0x30] sm:$0xff]  ;;  %v232_v16 = vld [vmem:[%s17172_s1 + $0x38] sm:$0xff]  ;;  %v233_v17 = vld [vmem:[%s17172_s1 + $0x40] sm:$0xff]  ;;  %s10480_s20 = sshll.u32 (%p14200_p4), %s14189_s21, 5 }
  0x16   : > { %s10479_s7 = sshll.u32 %s215_s6, 5  ;;  %12554 = vmatprep.subr.bf16.mxu1 %v14229_v9  ;;  %v234_v18 = vld [vmem:[%s17172_s1 + $0x48] sm:$0xff]  ;;  %v235_v19 = vld [vmem:[%s17172_s1 + $0x50] sm:$0xff]  ;;  %v236_v20 = vld [vmem:[%s17172_s1 + $0x58] sm:$0xff]  ;;  %s17090_s27 = scalar_lea.vmem (%p14200_p4), %s17176_s5, %s10480_s20 }
  0x17   : > { %s218_s10 = scalar_lea.vmem %s17171_s0, %s10479_s7  ;;  %12556 = vmatpush3.bf16.msra.mxu1 %v14229_v9  ;;  %v237_v21 = vld [vmem:[%s17172_s1 + $0x60] sm:$0xff]  ;;  %v238_v22 = vld [vmem:[%s17172_s1 + $0x68] sm:$0xff]  ;;  %v239_v23 = vld [vmem:[%s17172_s1 + $0x70] sm:$0xff] }
  0x18   : > { %v219_v2 = vld [vmem:[%s218_s10] sm:$0xff]  ;;  %v220_v3 = vld [vmem:[%s218_s10 + $0x8] sm:$0xff]  ;;  %v221_v4 = vld [vmem:[%s218_s10 + $0x10] sm:$0xff]  ;;  %11341 = vmatprep.subr.mxu1 %v14146_v25 }
  0x19   : > { %325 = vst.msk [vmem:[%s14216_s13] sm:$0xff] %vm324_vm1, %v219_v2  ;;  %326 = vst.msk [vmem:[%s14216_s13 + $0x8] sm:$0xff] %vm324_vm1, %v220_v3  ;;  %v12545_v5 = vpack.c.bf16 %v220_v3, %v219_v2  ;;  %v222_v6 = vld [vmem:[%s218_s10 + $0x18] sm:$0xff]  ;;  %v261_v26 = vld [vmem:[%s17174_s3 + $0x20] sm:$0xff] }
  0x1a   : > { %327 = vst.msk [vmem:[%s14216_s13 + $0x10] sm:$0xff] %vm324_vm1, %v221_v4  ;;  %328 = vst.msk [vmem:[%s14216_s13 + $0x18] sm:$0xff] %vm324_vm1, %v222_v6  ;;  %v12549_v8 = vpack.c.bf16 %v222_v6, %v221_v4  ;;  %v240_v24 = vld [vmem:[%s17172_s1 + $0x78] sm:$0xff]  ;;  %v257_v27 = vld [vmem:[%s17174_s3] sm:$0xff]  ;;  %545 = vperm.xlu1 %12953, %v261_v26  }
  0x1b   : > { %12546 = vmatprep.subr.bf16.mxu0 %v12545_v5  ;;  %525 = vperm.xlu0 %12952, %v257_v27   ;;  %v262_v29 = vld [vmem:[%s17174_s3 + $0x28] sm:$0xff]  ;;  %v260_v31 = vld [vmem:[%s17174_s3 + $0x18] sm:$0xff]  ;;  %v259_v32 = vld [vmem:[%s17174_s3 + $0x10] sm:$0xff] }
  0x1c   : > { %12548 = vmatpush3.bf16.msra.mxu0 %v12545_v5  ;;  %v258_v30 = vld [vmem:[%s17174_s3 + $0x8] sm:$0xff]  ;;  %v264_v33 = vld [vmem:[%s17174_s3 + $0x38] sm:$0xff]  ;;  %v263_v34 = vld [vmem:[%s17174_s3 + $0x30] sm:$0xff] }
  0x1d   : > { %12550 = vmatprep.subr.bf16.mxu0 %v12549_v8  ;;  %v266_v35 = vld [vmem:[%s17174_s3 + $0x48] sm:$0xff]  ;;  %v265_v36 = vld [vmem:[%s17174_s3 + $0x40] sm:$0xff]  ;;  %v268_v39 = vld [vmem:[%s17174_s3 + $0x58] sm:$0xff] }
  0x1e   : > { %550 = vperm.xlu1 %12953, %v262_v29   ;;  %v270_v37 = vld [vmem:[%s17174_s3 + $0x68] sm:$0xff]  ;;  %v269_v38 = vld [vmem:[%s17174_s3 + $0x60] sm:$0xff]  ;;  %v267_v40 = vld [vmem:[%s17174_s3 + $0x50] sm:$0xff] }
  0x1f   : > { %530 = vperm.xlu0 %12952, %v258_v30   ;;  %v272_v41 = vld [vmem:[%s17174_s3 + $0x78] sm:$0xff]  ;;  %v271_v42 = vld [vmem:[%s17174_s3 + $0x70] sm:$0xff]  ;;  %v14364_v59 = vld [vmem:[%s17173_s2] sm:$0xff] }
  0x20   : > { %12552 = vmatpush3.bf16.msra.mxu0 %v12549_v8  ;;  %v14373_v60 = vld [vmem:[%s17173_s2 + $0x8] sm:$0xff]  ;;  %v14378_v61 = vld [vmem:[%s17173_s2 + $0x10] sm:$0xff]  ;;  %v14387_v62 = vld [vmem:[%s17173_s2 + $0x18] sm:$0xff] }
  0x21   : > { %12558 = vmatprep.subr.bf16.mxu0 %v14229_v9  ;;  %v14393_v63 = vld [vmem:[%s17173_s2 + $0x20] sm:$0xff]  ;;  %v14402_v0 = vld [vmem:[%s17173_s2 + $0x28] sm:$0xff]  ;;  %v14407_v1 = vld [vmem:[%s17173_s2 + $0x30] sm:$0xff] }
  0x22   : > { %540 = vperm.xlu1 %12953, %v260_v31   ;;  %v14416_v2 = vld [vmem:[%s17173_s2 + $0x38] sm:$0xff]  ;;  %v14421_v3 = vld [vmem:[%s17173_s2 + $0x40] sm:$0xff]  ;;  %v14430_v4 = vld [vmem:[%s17173_s2 + $0x48] sm:$0xff] }
  0x23   : > { %11290 = vmatmul.mubr.msk.f32.vlgmr.msra.gmra.mrb[0].mxu0 %vm329_vm0, %v226_v10  ;;  %535 = vperm.xlu0 %12952, %v259_v32   ;;  %v14435_v5 = vld [vmem:[%s17173_s2 + $0x50] sm:$0xff]  ;;  %v14444_v6 = vld [vmem:[%s17173_s2 + $0x58] sm:$0xff]  ;;  %v14449_v7 = vld [vmem:[%s17173_s2 + $0x60] sm:$0xff] }
  0x24   : > { %11292 = vmatprep.mubr.msk.f32.mxu0 %vm329_vm0, %v227_v11  ;;  %12560 = vmatpush3.bf16.msra.mxu0 %v14229_v9  ;;  %v14458_v8 = vld [vmem:[%s17173_s2 + $0x68] sm:$0xff]  ;;  %v14463_v10 = vld [vmem:[%s17173_s2 + $0x70] sm:$0xff]  ;;  %v14472_v11 = vld [vmem:[%s17173_s2 + $0x78] sm:$0xff] }
  0x25   : > { %12570 = vmatprep.subr.bf16.mxu0 %v14229_v9  ;;  %v9578_v26 = vld [vmem:[%s17174_s3 + $0xf8] sm:$0xff]  ;;  %v9577_v27 = vld [vmem:[%s17174_s3 + $0xf0] sm:$0xff] }
  0x26   : > { %560 = vperm.xlu1 %12953, %v264_v33  }
  0x27   : > { %11293 = vmatmul.mubr.msk.f32.gmra.mrb[2].mxu0 %vm329_vm0, %v228_v12  ;;  %555 = vperm.xlu0 %12952, %v263_v34   ;;  %v9564_v12 = vld [vmem:[%s17174_s3 + $0x88] sm:$0xff] }
  0x28   : > { %11295 = vmatprep.mubr.msk.f32.mxu0 %vm329_vm0, %v229_v13  ;;  %v9563_v13 = vld [vmem:[%s17174_s3 + $0x80] sm:$0xff] }
  0x2a   : > { %570 = vperm.xlu1 %12953, %v266_v35  }
  0x2b   : > { %11296 = vmatmul.mubr.msk.f32.gmra.mrb[4].mxu0 %vm329_vm0, %v230_v14  ;;  %565 = vperm.xlu0 %12952, %v265_v36   ;;  %v9568_v14 = vld [vmem:[%s17174_s3 + $0xa8] sm:$0xff] }
  0x2c   : > { %11298 = vmatprep.mubr.msk.f32.mxu0 %vm329_vm0, %v231_v15  ;;  %v9567_v15 = vld [vmem:[%s17174_s3 + $0xa0] sm:$0xff] }
  0x2e   : > { %590 = vperm.xlu1 %12953, %v270_v37  }
  0x2f   : > { %11299 = vmatmul.mubr.msk.f32.gmra.mrb[6].mxu0 %vm329_vm0, %v232_v16  ;;  %585 = vperm.xlu0 %12952, %v269_v38   ;;  %v9566_v16 = vld [vmem:[%s17174_s3 + $0x98] sm:$0xff] }
  0x30   : > { %11301 = vmatprep.mubr.msk.f32.mxu0 %vm329_vm0, %v233_v17  ;;  %v9565_v17 = vld [vmem:[%s17174_s3 + $0x90] sm:$0xff] }
  0x32   : > { %580 = vperm.xlu1 %12953, %v268_v39  }
  0x33   : > { %11302 = vmatmul.mubr.msk.f32.gmra.mrb[8].mxu0 %vm329_vm0, %v234_v18  ;;  %575 = vperm.xlu0 %12952, %v267_v40   ;;  %v9570_v18 = vld [vmem:[%s17174_s3 + $0xb8] sm:$0xff] }
  0x34   : > { %11304 = vmatprep.mubr.msk.f32.mxu0 %vm329_vm0, %v235_v19  ;;  %v9569_v19 = vld [vmem:[%s17174_s3 + $0xb0] sm:$0xff] }
  0x36   : > { %600 = vperm.xlu1 %12953, %v272_v41  }
  0x37   : > { %11305 = vmatmul.mubr.msk.f32.gmra.mrb[10].mxu0 %vm329_vm0, %v236_v20  ;;  %595 = vperm.xlu0 %12952, %v271_v42   ;;  %v9572_v20 = vld [vmem:[%s17174_s3 + $0xc8] sm:$0xff] }
  0x38   : > { %11307 = vmatprep.mubr.msk.f32.mxu0 %vm329_vm0, %v237_v21  ;;  %v9571_v21 = vld [vmem:[%s17174_s3 + $0xc0] sm:$0xff] }
  0x3a   : > { %1687 = vperm.xlu1 %12953, %v9564_v12  }
  0x3b   : > { %11308 = vmatmul.mubr.msk.f32.gmra.mrb[12].mxu0 %vm329_vm0, %v238_v22  ;;  %1682 = vperm.xlu0 %12952, %v9563_v13   ;;  %v9576_v22 = vld [vmem:[%s17174_s3 + $0xe8] sm:$0xff]  ;;  %v14576_v13 = vld [vmem:[%s17173_s2 + $0x80] sm:$0xff] }
  0x3c   : > { %11310 = vmatprep.mubr.msk.f32.mxu0 %vm329_vm0, %v239_v23  ;;  %v9575_v23 = vld [vmem:[%s17174_s3 + $0xe0] sm:$0xff] }
  0x3e   : > { %1707 = vperm.xlu1 %12953, %v9568_v14   ;;  %v14583_v14 = vld [vmem:[%s17173_s2 + $0x88] sm:$0xff] }
  0x3f   : > { %11311 = vmatmul.mubr.msk.f32.gmra.mrb[14].mxu0 %vm329_vm0, %v240_v24  ;;  %1702 = vperm.xlu0 %12952, %v9567_v15   ;;  %v9574_v24 = vld [vmem:[%s17174_s3 + $0xd8] sm:$0xff]  ;;  %v14590_v15 = vld [vmem:[%s17173_s2 + $0x90] sm:$0xff] }
  0x42   : > { %1697 = vperm.xlu1 %12953, %v9566_v16   ;;  %v14597_v16 = vld [vmem:[%s17173_s2 + $0x98] sm:$0xff] }
  0x43   : > { %1692 = vperm.xlu0 %12952, %v9565_v17   ;;  %v14604_v17 = vld [vmem:[%s17173_s2 + $0xa0] sm:$0xff] }
  0x46   : > { %1717 = vperm.xlu1 %12953, %v9570_v18   ;;  %v14611_v18 = vld [vmem:[%s17173_s2 + $0xa8] sm:$0xff] }
  0x47   : > { %1712 = vperm.xlu0 %12952, %v9569_v19   ;;  %v14618_v19 = vld [vmem:[%s17173_s2 + $0xb0] sm:$0xff] }
  0x4a   : > { %1727 = vperm.xlu1 %12953, %v9572_v20   ;;  %v14625_v20 = vld [vmem:[%s17173_s2 + $0xb8] sm:$0xff] }
  0x4b   : > { %1722 = vperm.xlu0 %12952, %v9571_v21   ;;  %v14632_v21 = vld [vmem:[%s17173_s2 + $0xc0] sm:$0xff] }
  0x4e   : > { %1747 = vperm.xlu1 %12953, %v9576_v22   ;;  %v14637_v22 = vld [vmem:[%s17173_s2 + $0xc8] sm:$0xff] }
  0x4f   : > { %1742 = vperm.xlu0 %12952, %v9575_v23   ;;  %v14644_v23 = vld [vmem:[%s17173_s2 + $0xd0] sm:$0xff] }
  0x52   : > { %1737 = vperm.xlu1 %12953, %v9574_v24   ;;  %v14653_v24 = vld [vmem:[%s17173_s2 + $0xd8] sm:$0xff] }
  0x53   : > { %17295 = vst [vmem:[#allocation3_spill] sm:$0xff] %v14653_v24 }
  0x56   : > { %1757 = vperm.xlu1 %12953, %v9578_v26   ;;  %v14667_v26 = vld [vmem:[%s17173_s2 + $0xe8] sm:$0xff] }
  0x57   : > { %17297 = vst [vmem:[#allocation5_spill] sm:$0xff] %v14667_v26 }
  0xf6   : > { %v11291_v43 = vpop.f32.mrb[0].mxu0 }
  0xf7   : > { %v444_v44 = vpop.f32.mrb[1].mxu0 }
  0xf8   : > { %11317 = vmatprep.mubr.msk.f32.mxu1 %vm324_vm1, %v444_v44 }
  0xf9   : > { %11318 = vmatmul.mubr.msk.f32.vlgmr.msra.gmra.mrb[0].mxu1 %vm324_vm1, %v11291_v43 }
  0xfa   : > { %v11294_v45 = vpop.f32.mrb[2].mxu0  ;;  %11342 = vmatpush3.msra.mxu1 %v14146_v25 }
  0xfb   : > { %v454_v46 = vpop.f32.mrb[3].mxu0  ;;  %11395 = vmatprep.subr.mxu1 %v14146_v25 }
  0xfc   : > { %11320 = vmatprep.mubr.msk.f32.mxu1 %vm324_vm1, %v454_v46 }
  0xfd   : > { %11321 = vmatmul.mubr.msk.f32.gmra.mrb[2].mxu1 %vm324_vm1, %v11294_v45 }
  0xfe   : > { %v11297_v47 = vpop.f32.mrb[4].mxu0 }
  0xff   : > { %v464_v48 = vpop.f32.mrb[5].mxu0 }
 0x100   : > { %11323 = vmatprep.mubr.msk.f32.mxu1 %vm324_vm1, %v464_v48 }
 0x101   : > { %11324 = vmatmul.mubr.msk.f32.gmra.mrb[4].mxu1 %vm324_vm1, %v11297_v47 }
 0x102   : > { %v11300_v49 = vpop.f32.mrb[6].mxu0 }
 0x103   : > { %v474_v50 = vpop.f32.mrb[7].mxu0 }
 0x104   : > { %11326 = vmatprep.mubr.msk.f32.mxu1 %vm324_vm1, %v474_v50 }
 0x105   : > { %11327 = vmatmul.mubr.msk.f32.gmra.mrb[6].mxu1 %vm324_vm1, %v11300_v49 }
 0x106   : > { %v11303_v51 = vpop.f32.mrb[8].mxu0 }
 0x107   : > { %v484_v52 = vpop.f32.mrb[9].mxu0 }
 0x108   : > { %11329 = vmatprep.mubr.msk.f32.mxu1 %vm324_vm1, %v484_v52 }
 0x109   : > { %11330 = vmatmul.mubr.msk.f32.gmra.mrb[8].mxu1 %vm324_vm1, %v11303_v51 }
 0x10a   : > { %v11306_v53 = vpop.f32.mrb[10].mxu0 }
 0x10b   : > { %v494_v54 = vpop.f32.mrb[11].mxu0 }
 0x10c   : > { %11332 = vmatprep.mubr.msk.f32.mxu1 %vm324_vm1, %v494_v54 }
 0x10d   : > { %11333 = vmatmul.mubr.msk.f32.gmra.mrb[10].mxu1 %vm324_vm1, %v11306_v53 }
 0x10e   : > { %v11309_v55 = vpop.f32.mrb[12].mxu0 }
 0x10f   : > { %v504_v56 = vpop.f32.mrb[13].mxu0 }
 0x110   : > { %11335 = vmatprep.mubr.msk.f32.mxu1 %vm324_vm1, %v504_v56 }
 0x111   : > { %11336 = vmatmul.mubr.msk.f32.gmra.mrb[12].mxu1 %vm324_vm1, %v11309_v55 }
 0x112   : > { %v11312_v57 = vpop.f32.mrb[14].mxu0 }
 0x113   : > { %v514_v58 = vpop.f32.mrb[15].mxu0 }
 0x114   : > { %11338 = vmatprep.mubr.msk.f32.mxu1 %vm324_vm1, %v514_v58 }
 0x115   : > { %11339 = vmatmul.mubr.msk.f32.gmra.mrb[14].mxu1 %vm324_vm1, %v11312_v57 }
 0x116   : > { %11343 = vmatprep.mubr.msk.f32.mxu1 %vm329_vm0, %v14364_v59 }
 0x119   : > { %11344 = vmatmul.mubr.msk.f32.vlgmr.msra.gmra.mrb[16].mxu1 %vm329_vm0, %v14373_v60 }
 0x11a   : > { %11346 = vmatprep.mubr.msk.f32.mxu1 %vm329_vm0, %v14378_v61  ;;  %11396 = vmatpush3.msra.mxu1 %v14146_v25  ;;  %v9573_v25 = vld [vmem:[%s17174_s3 + $0xd0] sm:$0xff] }
 0x11b   : > { %1732 = vperm.xlu0 %12952, %v9573_v25   ;;  %v14658_v25 = vld [vmem:[%s17173_s2 + $0xe0] sm:$0xff] }
 0x11c   : > { %17296 = vst [vmem:[#allocation4_spill] sm:$0xff] %v14658_v25 }
 0x11d   : > { %11347 = vmatmul.mubr.msk.f32.gmra.mrb[18].mxu1 %vm329_vm0, %v14387_v62 }
 0x11e   : > { %11349 = vmatprep.mubr.msk.f32.mxu1 %vm329_vm0, %v14393_v63 }
 0x11f   : > { %1752 = vperm.xlu0 %12952, %v9577_v27   ;;  %v14674_v27 = vld [vmem:[%s17173_s2 + $0xf0] sm:$0xff] }
 0x120   : > { %17298 = vst [vmem:[#allocation6_spill] sm:$0xff] %v14674_v27 }
 0x121   : > { %11350 = vmatmul.mubr.msk.f32.gmra.mrb[20].mxu1 %vm329_vm0, %v14402_v0 }
 0x122   : > { %11352 = vmatprep.mubr.msk.f32.mxu1 %vm329_vm0, %v14407_v1 }
 0x125   : > { %11353 = vmatmul.mubr.msk.f32.gmra.mrb[22].mxu1 %vm329_vm0, %v14416_v2 }
 0x126   : > { %11355 = vmatprep.mubr.msk.f32.mxu1 %vm329_vm0, %v14421_v3 }
 0x129   : > { %11356 = vmatmul.mubr.msk.f32.gmra.mrb[24].mxu1 %vm329_vm0, %v14430_v4 }
 0x12a   : > { %11358 = vmatprep.mubr.msk.f32.mxu1 %vm329_vm0, %v14435_v5 }
 0x12d   : > { %11359 = vmatmul.mubr.msk.f32.gmra.mrb[26].mxu1 %vm329_vm0, %v14444_v6 }
 0x12e   : > { %11361 = vmatprep.mubr.msk.f32.mxu1 %vm329_vm0, %v14449_v7 }
 0x131   : > { %11362 = vmatmul.mubr.msk.f32.gmra.mrb[28].mxu1 %vm329_vm0, %v14458_v8 }
 0x132   : > { %11364 = vmatprep.mubr.msk.f32.mxu1 %vm329_vm0, %v14463_v10 }
 0x135   : > { %11365 = vmatmul.mubr.msk.f32.gmra.mrb[30].mxu1 %vm329_vm0, %v14472_v11 }
 0x136   : > { %11397 = vmatprep.mubr.msk.f32.mxu1 %vm329_vm0, %v14576_v13 }
 0x139   : > { %11398 = vmatmul.mubr.msk.f32.vlgmr.msra.gmra.mrb[32].mxu1 %vm329_vm0, %v14583_v14 }
 0x13a   : > { %11400 = vmatprep.mubr.msk.f32.mxu1 %vm329_vm0, %v14590_v15 }
 0x13d   : > { %11401 = vmatmul.mubr.msk.f32.gmra.mrb[34].mxu1 %vm329_vm0, %v14597_v16 }
 0x13e   : > { %11403 = vmatprep.mubr.msk.f32.mxu1 %vm329_vm0, %v14604_v17 }
 0x141   : > { %11404 = vmatmul.mubr.msk.f32.gmra.mrb[36].mxu1 %vm329_vm0, %v14611_v18 }
 0x142   : > { %11406 = vmatprep.mubr.msk.f32.mxu1 %vm329_vm0, %v14618_v19 }
 0x145   : > { %11407 = vmatmul.mubr.msk.f32.gmra.mrb[38].mxu1 %vm329_vm0, %v14625_v20 }
 0x146   : > { %11409 = vmatprep.mubr.msk.f32.mxu1 %vm329_vm0, %v14632_v21 }
 0x149   : > { %11410 = vmatmul.mubr.msk.f32.gmra.mrb[40].mxu1 %vm329_vm0, %v14637_v22 }
 0x14a   : > { %11412 = vmatprep.mubr.msk.f32.mxu1 %vm329_vm0, %v14644_v23 }
 0x14d   : > { %11413 = vmatmul.mubr.msk.f32.gmra.mrb[42].mxu1 %vm329_vm0, %v14653_v24 }
 0x14e   : > { %11415 = vmatprep.mubr.msk.f32.mxu1 %vm329_vm0, %v14658_v25 }
 0x151   : > { %11416 = vmatmul.mubr.msk.f32.gmra.mrb[44].mxu1 %vm329_vm0, %v14667_v26 }
 0x152   : > { %11418 = vmatprep.mubr.msk.f32.mxu1 %vm329_vm0, %v14674_v27 }
 0x1cc   : > { %v14524_v28 = vpop.f32.mrb[0].mxu1 }
 0x1cd   : > { %v14526_v29 = vpop.f32.mrb[1].mxu1 }
 0x1d0   : > { %v14528_v30 = vpop.f32.mrb[2].mxu1 }
 0x1d1   : > { %v14530_v31 = vpop.f32.mrb[3].mxu1 }
 0x1d4   : > { %v14532_v32 = vpop.f32.mrb[4].mxu1 }
 0x1d5   : > { %v14534_v33 = vpop.f32.mrb[5].mxu1 }
 0x1d8   : > { %v14536_v34 = vpop.f32.mrb[6].mxu1 }
 0x1d9   : > { %v14538_v35 = vpop.f32.mrb[7].mxu1 }
 0x1dc   : > { %v14540_v36 = vpop.f32.mrb[8].mxu1 }
 0x1dd   : > { %v14542_v37 = vpop.f32.mrb[9].mxu1 }
 0x1e0   : > { %v14544_v38 = vpop.f32.mrb[10].mxu1 }
 0x1e1   : > { %v14546_v39 = vpop.f32.mrb[11].mxu1 }
 0x1e4   : > { %v14548_v40 = vpop.f32.mrb[12].mxu1 }
 0x1e5   : > { %v14550_v41 = vpop.f32.mrb[13].mxu1 }
 0x1e8   : > { %v14552_v42 = vpop.f32.mrb[14].mxu1 }
 0x1e9   : > { %v14554_v43 = vpop.f32.mrb[15].mxu1 }
 0x1ec   : > { %v11345_v44 = vpop.f32.mrb[16].mxu1 }
 0x1ed   : > { %v910_v45 = vpop.f32.mrb[17].mxu1 }
 0x1ee   : > { %11371 = vmatprep.mubr.msk.f32.mxu0 %vm324_vm1, %v910_v45  ;;  %v14688_v45 = vld [vmem:[%s17172_s1 + $0x80] sm:$0xff] }
 0x1ef   : > { %11372 = vmatmul.mubr.msk.f32.vlgmr.msra.gmra.mrb[16].mxu0 %vm324_vm1, %v11345_v44  ;;  %v14679_v44 = vld [vmem:[%s17173_s2 + $0xf8] sm:$0xff]  ;;  %17300 = vst [vmem:[#allocation8_spill] sm:$0xff] %v14688_v45 }
 0x1f0   : > { %v11348_v46 = vpop.f32.mrb[18].mxu1  ;;  %12572 = vmatpush3.bf16.msra.mxu0 %v14229_v9  ;;  %17299 = vst [vmem:[#allocation7_spill] sm:$0xff] %v14679_v44  ;;  %11419 = vmatmul.mubr.msk.f32.gmra.mrb[46].mxu1 %vm329_vm0, %v14679_v44 }
 0x1f1   : > { %v920_v47 = vpop.f32.mrb[19].mxu1  ;;  %11429 = vmatprep.mubr.msk.f32.mxu1 %vm329_vm0, %v14688_v45 }
 0x1f2   : > { %11374 = vmatprep.mubr.msk.f32.mxu0 %vm324_vm1, %v920_v47  ;;  %v526_v47 = vpop.permute.xlu0 %525 }
 0x1f3   : > { %11375 = vmatmul.mubr.msk.f32.gmra.mrb[18].mxu0 %vm324_vm1, %v11348_v46  ;;  %v546_v46 = vpop.permute.xlu1 %545 }
 0x1f4   : > { %v11351_v48 = vpop.f32.mrb[20].mxu1 }
 0x1f5   : > { %v930_v49 = vpop.f32.mrb[21].mxu1 }
 0x1f6   : > { %11377 = vmatprep.mubr.msk.f32.mxu0 %vm324_vm1, %v930_v49  ;;  %v531_v49 = vpop.permute.xlu0 %530 }
 0x1f7   : > { %11378 = vmatmul.mubr.msk.f32.gmra.mrb[20].mxu0 %vm324_vm1, %v11351_v48  ;;  %v551_v48 = vpop.permute.xlu1 %550 }
 0x1f8   : > { %v11354_v50 = vpop.f32.mrb[22].mxu1 }
 0x1f9   : > { %v940_v51 = vpop.f32.mrb[23].mxu1 }
 0x1fa   : > { %11380 = vmatprep.mubr.msk.f32.mxu0 %vm324_vm1, %v940_v51  ;;  %v536_v51 = vpop.permute.xlu0 %535 }
 0x1fb   : > { %11381 = vmatmul.mubr.msk.f32.gmra.mrb[22].mxu0 %vm324_vm1, %v11354_v50  ;;  %v541_v50 = vpop.permute.xlu1 %540 }
 0x1fc   : > { %v11357_v52 = vpop.f32.mrb[24].mxu1  ;;  %v14701_v45 = vadd.f32 %v14528_v30, %v541_v50  ;;  %v14711_v30 = vadd.f32 %v14534_v33, %v546_v46 }
 0x1fd   : > { %v950_v53 = vpop.f32.mrb[25].mxu1 }
 0x1fe   : > { %11383 = vmatprep.mubr.msk.f32.mxu0 %vm324_vm1, %v950_v53  ;;  %v14693_v53 = vadd.f32 %v14524_v28, %v531_v49  ;;  %17302 = vst [vmem:[#allocation10_spill] sm:$0xff] %v14701_v45 }
 0x1ff   : > { %11384 = vmatmul.mubr.msk.f32.gmra.mrb[24].mxu0 %vm324_vm1, %v11357_v52  ;;  %v561_v52 = vpop.permute.xlu1 %560 }
 0x200   : > { %v11360_v54 = vpop.f32.mrb[26].mxu1  ;;  %17301 = vst [vmem:[#allocation9_spill] sm:$0xff] %v14693_v53 }
 0x201   : > { %v960_v55 = vpop.f32.mrb[27].mxu1 }
 0x202   : > { %11386 = vmatprep.mubr.msk.f32.mxu0 %vm324_vm1, %v960_v55  ;;  %v14696_v55 = vadd.f32 %v14526_v29, %v526_v47  ;;  %v14705_v29 = vadd.f32 %v14530_v31, %v536_v51  ;;  %v14708_v47 = vadd.f32 %v14532_v32, %v551_v48  ;;  %v14717_v31 = vadd.f32 %v14536_v34, %v561_v52 }
 0x203   : > { %11387 = vmatmul.mubr.msk.f32.gmra.mrb[26].mxu0 %vm324_vm1, %v11360_v54  ;;  %v556_v54 = vpop.permute.xlu0 %555  ;;  %v571_v27 = vpop.permute.xlu1 %570 }
 0x204   : > { %v11363_v56 = vpop.f32.mrb[28].mxu1  ;;  %17303 = vst [vmem:[#allocation11_spill] sm:$0xff] %v14705_v29  ;;  %17304 = vst [vmem:[#allocation12_spill] sm:$0xff] %v14708_v47  ;;  %v14720_v48 = vadd.f32 %v14538_v35, %v556_v54 }
 0x205   : > { %v970_v57 = vpop.f32.mrb[29].mxu1 }
 0x206   : > { %11389 = vmatprep.mubr.msk.f32.mxu0 %vm324_vm1, %v970_v57  ;;  %17305 = vst [vmem:[#allocation13_spill] sm:$0xff] %v14720_v48 }
 0x207   : > { %11390 = vmatmul.mubr.msk.f32.gmra.mrb[28].mxu0 %vm324_vm1, %v11363_v56  ;;  %v566_v24 = vpop.permute.xlu0 %565 }
 0x208   : > { %v11366_v58 = vpop.f32.mrb[30].mxu1 }
 0x209   : > { %v980_v12 = vpop.f32.mrb[31].mxu1 }
 0x20a   : > { %11392 = vmatprep.mubr.msk.f32.mxu0 %vm324_vm1, %v980_v12 }
 0x20b   : > { %11393 = vmatmul.mubr.msk.f32.gmra.mrb[30].mxu0 %vm324_vm1, %v11366_v58 }
 0x2c2   : > { %v11373_v56 = vpop.f32.mrb[16].mxu0 }
 0x2c3   : > { %v1183_v57 = vadd.f32 %v11373_v56, %v14693_v53  ;;  %v1103_v58 = vpop.f32.mrb[17].mxu0 }
 0x2c4   : > { %v1182_v12 = vadd.f32 %v1103_v58, %v14696_v55 }
 0x2c5   : > { %v9644_v44 = vmul.f32 -1.442695, %v1183_v57 }
 0x2c6   : > { %v9643_v26 = vmul.f32 -1.442695, %v1182_v12  ;;  %v11376_v25 = vpop.f32.mrb[18].mxu0 }
 0x2c7   : > { %12954 = vpow2.f32 %v9644_v44  ;;  %v1185_v28 = vadd.f32 %v11376_v25, %v14701_v45  ;;  %v1113_v49 = vpop.f32.mrb[19].mxu0  ;;  %v591_v25 = vpop.permute.xlu1 %590 }
 0x2c8   : > { %12956 = vpow2.f32 %v9643_v26  ;;  %v1184_v50 = vadd.f32 %v1113_v49, %v14705_v29  ;;  %v586_v26 = vpop.permute.xlu0 %585 }
 0x2c9   : > { %v9646_v56 = vmul.f32 -1.442695, %v1185_v28 }
 0x2ca   : > { %v11379_v57 = vpop.f32.mrb[20].mxu0  ;;  %v9645_v33 = vmul.f32 -1.442695, %v1184_v50 }
 0x2cb   : > { %12958 = vpow2.f32 %v9646_v56  ;;  %v1187_v44 = vadd.f32 %v11379_v57, %v14708_v47  ;;  %v1123_v58 = vpop.f32.mrb[21].mxu0  ;;  %v581_v35 = vpop.permute.xlu1 %580 }
 0x2cc   : > { %v1186_v12 = vadd.f32 %v1123_v58, %v14711_v30  ;;  %v14725_v58 = vadd.f32 %v14540_v36, %v571_v27  ;;  %v14733_v27 = vadd.f32 %v14544_v38, %v581_v35  ;;  %v14741_v38 = vadd.f32 %v14548_v40, %v591_v25 }
 0x2cd   : > { %v9648_v32 = vmul.f32 -1.442695, %v1187_v44  ;;  %v14728_v44 = vadd.f32 %v14542_v37, %v566_v24 }
 0x2ce   : > { %v9647_v46 = vmul.f32 -1.442695, %v1186_v12  ;;  %v11382_v51 = vpop.f32.mrb[22].mxu0  ;;  %17306 = vst [vmem:[#allocation14_spill] sm:$0xff] %v14733_v27  ;;  %17308 = vst [vmem:[#allocation16_spill] sm:$0xff] %v14741_v38 }
 0x2cf   : > { %12960 = vpow2.f32 %v9648_v32  ;;  %v1189_v28 = vadd.f32 %v11382_v51, %v14717_v31  ;;  %v1133_v49 = vpop.f32.mrb[23].mxu0  ;;  %v576_v32 = vpop.permute.xlu0 %575 }
 0x2d0   : > { %12962 = vpow2.f32 %v9647_v46  ;;  %v1188_v56 = vadd.f32 %v1133_v49, %v14720_v48  ;;  %v14736_v24 = vadd.f32 %v14546_v39, %v576_v32  ;;  %v601_v39 = vpop.permute.xlu1 %600 }
 0x2d1   : > { %v12955_v57 = vpop.eup %12954  ;;  %v9650_v34 = vmul.f32 -1.442695, %v1189_v28  ;;  %12964 = vpow2.f32 %v9645_v33  ;;  %v14748_v25 = vadd.f32 %v14552_v42, %v601_v39 }
 0x2d2   : > { %v12957_v52 = vpop.eup %12956  ;;  %v1211_v54 = vadd.f32 1.0, %v12955_v57  ;;  %v9649_v50 = vmul.f32 -1.442695, %v1188_v56  ;;  %v11385_v12 = vpop.f32.mrb[24].mxu0  ;;  %17307 = vst [vmem:[#allocation15_spill] sm:$0xff] %v14736_v24 }
 0x2d3   : > { %v1210_v51 = vadd.f32 1.0, %v12957_v52  ;;  %12966 = vpow2.f32 %v9650_v34  ;;  %v1191_v46 = vadd.f32 %v11385_v12, %v14725_v58  ;;  %v1143_v49 = vpop.f32.mrb[25].mxu0  ;;  %17310 = vst [vmem:[#allocation18_spill] sm:$0xff] %v14748_v25 }
 0x2d4   : > { %v1190_v48 = vadd.f32 %v1143_v49, %v14728_v44  ;;  %12968 = vrcp.f32 %v1211_v54 }
 0x2d5   : > { %v12959_v36 = vpop.eup %12958  ;;  %v9652_v37 = vmul.f32 -1.442695, %v1191_v46  ;;  %12970 = vpow2.f32 %v9649_v50 }
 0x2d6   : > { %v1213_v33 = vadd.f32 1.0, %v12959_v36  ;;  %v9651_v28 = vmul.f32 -1.442695, %v1190_v48  ;;  %v11388_v56 = vpop.f32.mrb[26].mxu0  ;;  %12972 = vrcp.f32 %v1210_v51  ;;  %v14744_v51 = vadd.f32 %v14550_v41, %v586_v26 }
 0x2d7   : > { %v1193_v57 = vadd.f32 %v11388_v56, %v14733_v27  ;;  %v1153_v34 = vpop.f32.mrb[27].mxu0  ;;  %12974 = vpow2.f32 %v9652_v37  ;;  %v596_v56 = vpop.permute.xlu0 %595 }
 0x2d8   : > { %v1192_v52 = vadd.f32 %v1153_v34, %v14736_v24  ;;  %12976 = vrcp.f32 %v1213_v33  ;;  %17309 = vst [vmem:[#allocation17_spill] sm:$0xff] %v14744_v51  ;;  %v14752_v26 = vadd.f32 %v14554_v43, %v596_v56 }
 0x2d9   : > { %v12961_v12 = vpop.eup %12960  ;;  %v9654_v35 = vmul.f32 -1.442695, %v1193_v57  ;;  %12978 = vpow2.f32 %v9651_v28 }
 0x2da   : > { %v12963_v54 = vpop.eup %12962  ;;  %v1235_v32 = vadd.f32 1.0, %v12961_v12  ;;  %v9653_v50 = vmul.f32 -1.442695, %v1192_v52  ;;  %v11391_v48 = vpop.f32.mrb[28].mxu0  ;;  %17311 = vst [vmem:[#allocation19_spill] sm:$0xff] %v14752_v26 }
 0x2db   : > { %v1234_v46 = vadd.f32 1.0, %v12963_v54  ;;  %12980 = vpow2.f32 %v9654_v35  ;;  %v1195_v49 = vadd.f32 %v11391_v48, %v14741_v38  ;;  %v1163_v36 = vpop.f32.mrb[29].mxu0  ;;  %v12965_v37 = vpop.eup %12964 }
 0x2dc   : > { %12982 = vrcp.f32 %v1235_v32  ;;  %v1194_v33 = vadd.f32 %v1163_v36, %v14744_v51  ;;  %v1212_v35 = vadd.f32 1.0, %v12965_v37 }
 0x2dd   : > { %v12967_v40 = vpop.eup %12966  ;;  %12984 = vrcp.f32 %v1234_v46 }
 0x2de   : > { %v1237_v28 = vadd.f32 1.0, %v12967_v40  ;;  %12986 = vpow2.f32 %v9653_v50  ;;  %v11394_v57 = vpop.f32.mrb[30].mxu0  ;;  %v12969_v41 = vpop.eup %12968 }
 0x2df   : > { %12988 = vtanh.f32 %v1195_v49  ;;  %v1197_v34 = vadd.f32 %v11394_v57, %v14748_v25  ;;  %v1173_v52 = vpop.f32.mrb[31].mxu0  ;;  %v12971_v12 = vpop.eup %12970 }
 0x2e0   : > { %12990 = vrcp.f32 %v1237_v28  ;;  %v12973_v54 = vpop.eup %12972  ;;  %v1236_v42 = vadd.f32 1.0, %v12971_v12  ;;  %v1196_v39 = vadd.f32 %v1173_v52, %v14752_v26 }
 0x2e1   : > { %12992 = vtanh.f32 %v1194_v33  ;;  %v12975_v32 = vpop.eup %12974 }
 0x2e2   : > { %12994 = vtanh.f32 %v1197_v34  ;;  %v12977_v50 = vpop.eup %12976  ;;  %v1259_v37 = vadd.f32 1.0, %v12975_v32 }
 0x2e3   : > { %12996 = vrcp.f32 %v1236_v42  ;;  %v12979_v48 = vpop.eup %12978 }
 0x2e4   : > { %12998 = vrcp.f32 %v1212_v35  ;;  %v1258_v52 = vadd.f32 1.0, %v12979_v48 }
 0x2e5   : > { %v12981_v43 = vpop.eup %12980  ;;  %13000 = vtanh.f32 %v1196_v39 }
 0x2e6   : > { %v12983_v46 = vpop.eup %12982  ;;  %13002 = vrcp.f32 %v1259_v37  ;;  %v1261_v24 = vadd.f32 1.0, %v12981_v43 }
 0x2e7   : > { %v12985_v49 = vpop.eup %12984  ;;  %v1275_v56 = vmul.f32 0.0, %v12983_v46 }
 0x2e8   : > { %v12987_v36 = vpop.eup %12986  ;;  %v1274_v57 = vmul.f32 0.0, %v12985_v49 }
 0x2e9   : > { %v12989_v40 = vpop.eup %12988 }
 0x2ea   : > { %v12991_v28 = vpop.eup %12990  ;;  %v1279_v12 = vmul.f32 %v12989_v40, %v12969_v41  ;;  %v1260_v41 = vadd.f32 1.0, %v12987_v36 }
 0x2eb   : > { %v12993_v33 = vpop.eup %12992  ;;  %v1277_v25 = vmul.f32 0.0, %v12991_v28 }
 0x2ec   : > { %v12995_v26 = vpop.eup %12994  ;;  %v14756_v34 = vadd.f32 %v1279_v12, %v1275_v56  ;;  %v1278_v42 = vmul.f32 %v12993_v33, %v12973_v54  ;;  %v14771_v33 = vld [vmem:[%s17172_s1 + $0x88] sm:$0xff] }
 0x2ed   : > { %v12997_v51 = vpop.eup %12996  ;;  %v1281_v35 = vmul.f32 %v12995_v26, %v12977_v50 }
 0x2ee   : > { %v12999_v39 = vpop.eup %12998  ;;  %v1276_v38 = vmul.f32 0.0, %v12997_v51  ;;  %13004 = vtanh.f32 %v14756_v34  ;;  %v14759_v46 = vadd.f32 %v1278_v42, %v1274_v57  ;;  %v14786_v42 = vld [vmem:[%s17172_s1 + $0x98] sm:$0xff] }
 0x2ef   : > { %v13001_v32 = vpop.eup %13000  ;;  %13006 = vrcp.f32 %v1258_v52  ;;  %v14761_v49 = vadd.f32 %v1281_v35, %v1277_v25  ;;  %v14776_v52 = vld [vmem:[%s17172_s1 + $0x90] sm:$0xff]  ;;  %v14792_v35 = vld [vmem:[%s17172_s1 + $0xa0] sm:$0xff] }
 0x2f0   : > { %13008 = vtanh.f32 %v14759_v46  ;;  %v1280_v48 = vmul.f32 %v13001_v32, %v12999_v39  ;;  %v13003_v51 = vpop.eup %13002  ;;  %v14802_v39 = vld [vmem:[%s17172_s1 + $0xa8] sm:$0xff]  ;;  %v14807_v32 = vld [vmem:[%s17172_s1 + $0xb0] sm:$0xff] }
 0x2f1   : > { %13010 = vtanh.f32 %v14761_v49 }
 0x2f2   : > { %13012 = vrcp.f32 %v1261_v24  ;;  %v14765_v54 = vadd.f32 %v1280_v48, %v1276_v38  ;;  %v14821_v48 = vld [vmem:[%s17172_s1 + $0xc0] sm:$0xff] }
 0x2f3   : > { %13014 = vrcp.f32 %v1260_v41  ;;  %v14816_v41 = vld [vmem:[%s17172_s1 + $0xb8] sm:$0xff] }
 0x2f4   : > { %13016 = vtanh.f32 %v14765_v54 }
 0x2f8   : > { %v13005_v26 = vpop.eup %13004 }
 0x2f9   : > { %v13007_v50 = vpop.eup %13006  ;;  %v1291_v43 = vmul.f32 %v13005_v26, %v13003_v51  ;;  %v14830_v51 = vld [vmem:[%s17172_s1 + $0xc8] sm:$0xff]  ;;  %v14835_v26 = vld [vmem:[%s17172_s1 + $0xd0] sm:$0xff] }
 0x2fa   : > { %v13009_v56 = vpop.eup %13008 }
 0x2fb   : > { %v13011_v40 = vpop.eup %13010  ;;  %v1290_v36 = vmul.f32 %v13009_v56, %v13007_v50  ;;  %v14844_v50 = vld [vmem:[%s17172_s1 + $0xd8] sm:$0xff]  ;;  %v14858_v56 = vld [vmem:[%s17172_s1 + $0xe8] sm:$0xff] }
 0x2fc   : > { %v13013_v25 = vpop.eup %13012  ;;  %17312 = vst [vmem:[#allocation20_spill] sm:$0xff] %v14858_v56 }
 0x2fd   : > { %v13015_v37 = vpop.eup %13014  ;;  %v12561_v28 = vpack.c.bf16 %v1291_v43, %v1290_v36  ;;  %v1293_v57 = vmul.f32 %v13013_v25, %v13011_v40  ;;  %v14849_v43 = vld [vmem:[%s17172_s1 + $0xe0] sm:$0xff]  ;;  %v14863_v40 = vld [vmem:[%s17172_s1 + $0xf0] sm:$0xff]  ;;  %v14872_v36 = vld [vmem:[%s17172_s1 + $0xf8] sm:$0xff] }
 0x2fe   : > { %v13017_v12 = vpop.eup %13016  ;;  %17313 = vst [vmem:[#allocation21_spill] sm:$0xff] %v14863_v40  ;;  %17314 = vst [vmem:[#allocation22_spill] sm:$0xff] %v14872_v36 }
 0x2ff   : > { %12562 = vmatprep.subr.bf16.mxu1 %v12561_v28  ;;  %12574 = vmatprep.subr.bf16.mxu0 %v12561_v28  ;;  %v1292_v24 = vmul.f32 %v13017_v12, %v13015_v37 }
 0x300   : > { %12564 = vmatpush3.bf16.msra.mxu1 %v12561_v28 }
 0x301   : > { %v12565_v38 = vpack.c.bf16 %v1293_v57, %v1292_v24 }
 0x303   : > { %12566 = vmatprep.subr.bf16.mxu1 %v12565_v38 }
 0x304   : > { %12568 = vmatpush3.bf16.msra.mxu1 %v12565_v38 }
 0x305   : > { %12582 = vmatprep.subr.bf16.mxu1 %v14229_v9 }
 0x307   : > { %11430 = vmatmul.mubr.msk.f32.vlgmr.msra.gmra.mrb[32].mxu1 %vm329_vm0, %v14771_v33 }
 0x308   : > { %11432 = vmatprep.mubr.msk.f32.mxu1 %vm329_vm0, %v14776_v52  ;;  %12584 = vmatpush3.bf16.msra.mxu1 %v14229_v9 }
 0x309   : > { %12602 = vmatprep.subr.bf16.mxu1 %v14229_v9 }
 0x30b   : > { %11433 = vmatmul.mubr.msk.f32.gmra.mrb[34].mxu1 %vm329_vm0, %v14786_v42 }
 0x30c   : > { %11435 = vmatprep.mubr.msk.f32.mxu1 %vm329_vm0, %v14792_v35 }
 0x30f   : > { %11436 = vmatmul.mubr.msk.f32.gmra.mrb[36].mxu1 %vm329_vm0, %v14802_v39 }
 0x310   : > { %11438 = vmatprep.mubr.msk.f32.mxu1 %vm329_vm0, %v14807_v32 }
 0x313   : > { %11439 = vmatmul.mubr.msk.f32.gmra.mrb[38].mxu1 %vm329_vm0, %v14816_v41 }
 0x314   : > { %11441 = vmatprep.mubr.msk.f32.mxu1 %vm329_vm0, %v14821_v48 }
 0x317   : > { %11442 = vmatmul.mubr.msk.f32.gmra.mrb[40].mxu1 %vm329_vm0, %v14830_v51 }
 0x318   : > { %11444 = vmatprep.mubr.msk.f32.mxu1 %vm329_vm0, %v14835_v26 }
 0x31b   : > { %11445 = vmatmul.mubr.msk.f32.gmra.mrb[42].mxu1 %vm329_vm0, %v14844_v50 }
 0x31c   : > { %11447 = vmatprep.mubr.msk.f32.mxu1 %vm329_vm0, %v14849_v43 }
 0x31f   : > { %11448 = vmatmul.mubr.msk.f32.gmra.mrb[44].mxu1 %vm329_vm0, %v14858_v56 }
 0x320   : > { %11450 = vmatprep.mubr.msk.f32.mxu1 %vm329_vm0, %v14863_v40 }
 0x323   : > { %11451 = vmatmul.mubr.msk.f32.gmra.mrb[46].mxu1 %vm329_vm0, %v14872_v36 }
 0x3da   : > { %v11431_v25 = vpop.f32.mrb[32].mxu1 }
 0x3db   : > { %v1601_v37 = vpop.f32.mrb[33].mxu1 }
 0x3dc   : > { %11457 = vmatprep.mubr.msk.f32.mxu0 %vm324_vm1, %v1601_v37 }
 0x3dd   : > { %11458 = vmatmul.mubr.msk.f32.vlgmr.msra.gmra.mrb[32].mxu0 %vm324_vm1, %v11431_v25 }
 0x3de   : > { %12576 = vmatpush3.bf16.msra.mxu0 %v12561_v28  ;;  %v11434_v57 = vpop.f32.mrb[34].mxu1 }
 0x3df   : > { %12578 = vmatprep.subr.bf16.mxu0 %v12565_v38  ;;  %v1611_v12 = vpop.f32.mrb[35].mxu1 }
 0x3e0   : > { %11460 = vmatprep.mubr.msk.f32.mxu0 %vm324_vm1, %v1611_v12 }
 0x3e1   : > { %11461 = vmatmul.mubr.msk.f32.gmra.mrb[34].mxu0 %vm324_vm1, %v11434_v57 }
 0x3e2   : > { %12580 = vmatpush3.bf16.msra.mxu0 %v12565_v38  ;;  %v11437_v24 = vpop.f32.mrb[36].mxu1 }
 0x3e3   : > { %v1621_v40 = vpop.f32.mrb[37].mxu1 }
 0x3e4   : > { %11463 = vmatprep.mubr.msk.f32.mxu0 %vm324_vm1, %v1621_v40 }
 0x3e5   : > { %11464 = vmatmul.mubr.msk.f32.gmra.mrb[36].mxu0 %vm324_vm1, %v11437_v24 }
 0x3e6   : > { %v11440_v36 = vpop.f32.mrb[38].mxu1 }
 0x3e7   : > { %v1631_v56 = vpop.f32.mrb[39].mxu1 }
 0x3e8   : > { %11466 = vmatprep.mubr.msk.f32.mxu0 %vm324_vm1, %v1631_v56 }
 0x3e9   : > { %11467 = vmatmul.mubr.msk.f32.gmra.mrb[38].mxu0 %vm324_vm1, %v11440_v36 }
 0x3ea   : > { %v11443_v28 = vpop.f32.mrb[40].mxu1 }
 0x3eb   : > { %v1641_v25 = vpop.f32.mrb[41].mxu1 }
 0x3ec   : > { %11469 = vmatprep.mubr.msk.f32.mxu0 %vm324_vm1, %v1641_v25 }
 0x3ed   : > { %11470 = vmatmul.mubr.msk.f32.gmra.mrb[40].mxu0 %vm324_vm1, %v11443_v28 }
 0x3ee   : > { %v11446_v37 = vpop.f32.mrb[42].mxu1 }
 0x3ef   : > { %v1651_v38 = vpop.f32.mrb[43].mxu1 }
 0x3f0   : > { %11472 = vmatprep.mubr.msk.f32.mxu0 %vm324_vm1, %v1651_v38 }
 0x3f1   : > { %11473 = vmatmul.mubr.msk.f32.gmra.mrb[42].mxu0 %vm324_vm1, %v11446_v37 }
 0x3f2   : > { %v11449_v40 = vpop.f32.mrb[44].mxu1 }
 0x3f3   : > { %v1661_v57 = vpop.f32.mrb[45].mxu1 }
 0x3f4   : > { %11475 = vmatprep.mubr.msk.f32.mxu0 %vm324_vm1, %v1661_v57 }
 0x3f5   : > { %11476 = vmatmul.mubr.msk.f32.gmra.mrb[44].mxu0 %vm324_vm1, %v11449_v40 }
 0x3f6   : > { %v11452_v56 = vpop.f32.mrb[46].mxu1 }
 0x3f7   : > { %v1671_v36 = vpop.f32.mrb[47].mxu1 }
 0x3f8   : > { %11478 = vmatprep.mubr.msk.f32.mxu0 %vm324_vm1, %v1671_v36 }
 0x3f9   : > { %11479 = vmatmul.mubr.msk.f32.gmra.mrb[46].mxu0 %vm324_vm1, %v11452_v56 }
 0x3fa   : > { %11489 = vmatprep.mubr.msk.f32.mxu0 %vm329_vm0, %v14364_v59  ;;  %v14926_v59 = vpop.permute.xlu1 %1687 }
 0x3fb   : > { %17315 = vst [vmem:[#allocation23_spill] sm:$0xff] %v14926_v59 }
 0x3fd   : > { %11490 = vmatmul.mubr.msk.f32.vlgmr.msra.gmra.mrb[48].mxu0 %vm329_vm0, %v14373_v60  ;;  %v14928_v60 = vpop.permute.xlu0 %1682 }
 0x3fe   : > { %11492 = vmatprep.mubr.msk.f32.mxu0 %vm329_vm0, %v14378_v61  ;;  %17316 = vst [vmem:[#allocation24_spill] sm:$0xff] %v14928_v60  ;;  %v14930_v61 = vpop.permute.xlu1 %1707 }
 0x3ff   : > { %17317 = vst [vmem:[#allocation25_spill] sm:$0xff] %v14930_v61 }
 0x401   : > { %11493 = vmatmul.mubr.msk.f32.gmra.mrb[50].mxu0 %vm329_vm0, %v14387_v62  ;;  %v14932_v62 = vpop.permute.xlu0 %1702 }
 0x402   : > { %11495 = vmatprep.mubr.msk.f32.mxu0 %vm329_vm0, %v14393_v63  ;;  %17318 = vst [vmem:[#allocation26_spill] sm:$0xff] %v14932_v62  ;;  %v14934_v63 = vpop.permute.xlu1 %1697 }
 0x403   : > { %17319 = vst [vmem:[#allocation27_spill] sm:$0xff] %v14934_v63 }
 0x405   : > { %11496 = vmatmul.mubr.msk.f32.gmra.mrb[52].mxu0 %vm329_vm0, %v14402_v0  ;;  %v14936_v0 = vpop.permute.xlu0 %1692 }
 0x406   : > { %11498 = vmatprep.mubr.msk.f32.mxu0 %vm329_vm0, %v14407_v1  ;;  %17320 = vst [vmem:[#allocation28_spill] sm:$0xff] %v14936_v0 }
 0x409   : > { %11499 = vmatmul.mubr.msk.f32.gmra.mrb[54].mxu0 %vm329_vm0, %v14416_v2 }
 0x40a   : > { %11501 = vmatprep.mubr.msk.f32.mxu0 %vm329_vm0, %v14421_v3 }
 0x40d   : > { %11502 = vmatmul.mubr.msk.f32.gmra.mrb[56].mxu0 %vm329_vm0, %v14430_v4  ;;  %v14939_v4 = vpop.permute.xlu1 %1717 }
 0x40e   : > { %11504 = vmatprep.mubr.msk.f32.mxu0 %vm329_vm0, %v14435_v5  ;;  %17321 = vst [vmem:[#allocation29_spill] sm:$0xff] %v14939_v4 }
 0x411   : > { %11505 = vmatmul.mubr.msk.f32.gmra.mrb[58].mxu0 %vm329_vm0, %v14444_v6  ;;  %v14942_v6 = vpop.permute.xlu0 %1712  ;;  %v14945_v24 = vpop.permute.xlu1 %1727 }
 0x412   : > { %11507 = vmatprep.mubr.msk.f32.mxu0 %vm329_vm0, %v14449_v7  ;;  %17322 = vst [vmem:[#allocation30_spill] sm:$0xff] %v14942_v6  ;;  %17323 = vst [vmem:[#allocation31_spill] sm:$0xff] %v14945_v24 }
 0x415   : > { %11508 = vmatmul.mubr.msk.f32.gmra.mrb[60].mxu0 %vm329_vm0, %v14458_v8  ;;  %v14948_v37 = vpop.permute.xlu0 %1722 }
 0x416   : > { %11510 = vmatprep.mubr.msk.f32.mxu0 %vm329_vm0, %v14463_v10  ;;  %17324 = vst [vmem:[#allocation32_spill] sm:$0xff] %v14948_v37 }
 0x419   : > { %11511 = vmatmul.mubr.msk.f32.gmra.mrb[62].mxu0 %vm329_vm0, %v14472_v11 }
 0x41a   : > { %11549 = vmatprep.mubr.msk.f32.mxu0 %vm329_vm0, %v14576_v13 }
 0x4b0   : > { %v11459_v1 = vpop.f32.mrb[32].mxu0 }
 0x4b1   : > { %v1880_v2 = vadd.f32 %v11459_v1, %v14926_v59  ;;  %v1874_v3 = vpop.f32.mrb[33].mxu0 }
 0x4b2   : > { %v1875_v5 = vadd.f32 %v1874_v3, %v14928_v60 }
 0x4b3   : > { %v9704_v7 = vmul.f32 -1.442695, %v1880_v2 }
 0x4b4   : > { %v9703_v8 = vmul.f32 -1.442695, %v1875_v5  ;;  %v11462_v10 = vpop.f32.mrb[34].mxu0 }
 0x4b5   : > { %13018 = vpow2.f32 %v9704_v7  ;;  %v1890_v11 = vadd.f32 %v11462_v10, %v14934_v63  ;;  %v1884_v13 = vpop.f32.mrb[35].mxu0  ;;  %v14953_v7 = vpop.permute.xlu1 %1747 }
 0x4b6   : > { %13020 = vpow2.f32 %v9703_v8  ;;  %v1885_v28 = vadd.f32 %v1884_v13, %v14936_v0  ;;  %17325 = vst [vmem:[#allocation33_spill] sm:$0xff] %v14953_v7 }
 0x4b7   : > { %v9706_v12 = vmul.f32 -1.442695, %v1890_v11  ;;  %v14956_v11 = vpop.permute.xlu0 %1742 }
 0x4b8   : > { %v11465_v25 = vpop.f32.mrb[36].mxu0  ;;  %v9705_v36 = vmul.f32 -1.442695, %v1885_v28  ;;  %17326 = vst [vmem:[#allocation34_spill] sm:$0xff] %v14956_v11 }
 0x4b9   : > { %13022 = vpow2.f32 %v9706_v12  ;;  %v1900_v38 = vadd.f32 %v11465_v25, %v14930_v61  ;;  %v1894_v40 = vpop.f32.mrb[37].mxu0 }
 0x4ba   : > { %v1895_v57 = vadd.f32 %v1894_v40, %v14932_v62 }
 0x4bb   : > { %v9708_v56 = vmul.f32 -1.442695, %v1900_v38 }
 0x4bc   : > { %v9707_v1 = vmul.f32 -1.442695, %v1895_v57  ;;  %v11468_v2 = vpop.f32.mrb[38].mxu0 }
 0x4bd   : > { %13024 = vpow2.f32 %v9708_v56  ;;  %v1910_v3 = vadd.f32 %v11468_v2, %v14939_v4  ;;  %v1904_v5 = vpop.f32.mrb[39].mxu0 }
 0x4be   : > { %13026 = vpow2.f32 %v9707_v1  ;;  %v1905_v8 = vadd.f32 %v1904_v5, %v14942_v6  ;;  %v14960_v5 = vpop.permute.xlu1 %1737 }
 0x4bf   : > { %v13019_v10 = vpop.eup %13018  ;;  %v9710_v13 = vmul.f32 -1.442695, %v1910_v3  ;;  %13028 = vpow2.f32 %v9705_v36  ;;  %17327 = vst [vmem:[#allocation35_spill] sm:$0xff] %v14960_v5 }
 0x4c0   : > { %v13021_v12 = vpop.eup %13020  ;;  %v1966_v25 = vadd.f32 1.0, %v13019_v10  ;;  %v9709_v38 = vmul.f32 -1.442695, %v1905_v8  ;;  %v11471_v28 = vpop.f32.mrb[40].mxu0 }
 0x4c1   : > { %v1965_v40 = vadd.f32 1.0, %v13021_v12  ;;  %13030 = vpow2.f32 %v9710_v13  ;;  %v1920_v57 = vadd.f32 %v11471_v28, %v14945_v24  ;;  %v1914_v56 = vpop.f32.mrb[41].mxu0  ;;  %v14962_v10 = vpop.permute.xlu0 %1732 }
 0x4c2   : > { %v1915_v2 = vadd.f32 %v1914_v56, %v14948_v37  ;;  %13032 = vrcp.f32 %v1966_v25  ;;  %17328 = vst [vmem:[#allocation36_spill] sm:$0xff] %v14962_v10 }
 0x4c3   : > { %v13023_v4 = vpop.eup %13022  ;;  %v9712_v1 = vmul.f32 -1.442695, %v1920_v57  ;;  %13034 = vpow2.f32 %v9709_v38 }
 0x4c4   : > { %v1968_v6 = vadd.f32 1.0, %v13023_v4  ;;  %v9711_v3 = vmul.f32 -1.442695, %v1915_v2  ;;  %v11474_v62 = vpop.f32.mrb[42].mxu0  ;;  %13036 = vrcp.f32 %v1965_v40 }
 0x4c5   : > { %v1930_v36 = vadd.f32 %v11474_v62, %v14960_v5  ;;  %v1924_v8 = vpop.f32.mrb[43].mxu0  ;;  %13038 = vpow2.f32 %v9712_v1 }
 0x4c6   : > { %v1925_v13 = vadd.f32 %v1924_v8, %v14962_v10  ;;  %13040 = vrcp.f32 %v1968_v6  ;;  %v14968_v8 = vpop.permute.xlu1 %1757 }
 0x4c7   : > { %v13025_v12 = vpop.eup %13024  ;;  %v9714_v28 = vmul.f32 -1.442695, %v1930_v36  ;;  %13042 = vpow2.f32 %v9711_v3  ;;  %17329 = vst [vmem:[#allocation37_spill] sm:$0xff] %v14968_v8 }
 0x4c8   : > { %v13027_v25 = vpop.eup %13026  ;;  %v1990_v57 = vadd.f32 1.0, %v13025_v12  ;;  %v9713_v56 = vmul.f32 -1.442695, %v1925_v13  ;;  %v11477_v4 = vpop.f32.mrb[44].mxu0 }
 0x4c9   : > { %v1989_v38 = vadd.f32 1.0, %v13027_v25  ;;  %13044 = vpow2.f32 %v9714_v28  ;;  %v1940_v2 = vadd.f32 %v11477_v4, %v14953_v7  ;;  %v1934_v37 = vpop.f32.mrb[45].mxu0  ;;  %v13029_v40 = vpop.eup %13028 }
 0x4ca   : > { %13046 = vrcp.f32 %v1990_v57  ;;  %v1935_v1 = vadd.f32 %v1934_v37, %v14956_v11  ;;  %v14971_v25 = vpop.permute.xlu0 %1752  ;;  %v1967_v4 = vadd.f32 1.0, %v13029_v40 }
 0x4cb   : > { %v13031_v62 = vpop.eup %13030  ;;  %13048 = vrcp.f32 %v1989_v38  ;;  %17330 = vst [vmem:[#allocation38_spill] sm:$0xff] %v14971_v25 }
 0x4cc   : > { %v1992_v6 = vadd.f32 1.0, %v13031_v62  ;;  %13050 = vpow2.f32 %v9713_v56  ;;  %v11480_v36 = vpop.f32.mrb[46].mxu0  ;;  %v13033_v12 = vpop.eup %13032 }
 0x4cd   : > { %13052 = vtanh.f32 %v1940_v2  ;;  %v1950_v3 = vadd.f32 %v11480_v36, %v14968_v8  ;;  %v1944_v13 = vpop.f32.mrb[47].mxu0  ;;  %v13035_v28 = vpop.eup %13034 }
 0x4ce   : > { %13054 = vrcp.f32 %v1992_v6  ;;  %v13037_v57 = vpop.eup %13036  ;;  %v1991_v7 = vadd.f32 1.0, %v13035_v28  ;;  %v1945_v37 = vadd.f32 %v1944_v13, %v14971_v25 }
 0x4cf   : > { %13056 = vtanh.f32 %v1935_v1  ;;  %v13039_v38 = vpop.eup %13038 }
 0x4d0   : > { %13058 = vtanh.f32 %v1950_v3  ;;  %v11491_v62 = vpop.f32.mrb[48].mxu0  ;;  %v13041_v56 = vpop.eup %13040  ;;  %v2014_v25 = vadd.f32 1.0, %v13039_v38 }
 0x4d1   : > { %13060 = vrcp.f32 %v1991_v7  ;;  %v2120_v11 = vpop.f32.mrb[49].mxu0  ;;  %v13043_v2 = vpop.eup %13042 }
 0x4d2   : > { %13062 = vrcp.f32 %v1967_v4  ;;  %11517 = vmatprep.mubr.msk.f32.mxu1 %vm324_vm1, %v2120_v11  ;;  %v2013_v8 = vadd.f32 1.0, %v13043_v2 }
 0x4d3   : > { %v13045_v36 = vpop.eup %13044  ;;  %13064 = vtanh.f32 %v1945_v37  ;;  %11518 = vmatmul.mubr.msk.f32.vlgmr.msra.gmra.mrb[48].mxu1 %vm324_vm1, %v11491_v62 }
 0x4d4   : > { %v13047_v40 = vpop.eup %13046  ;;  %v11494_v6 = vpop.f32.mrb[50].mxu0  ;;  %12604 = vmatpush3.bf16.msra.mxu1 %v14229_v9  ;;  %v2016_v24 = vadd.f32 1.0, %v13045_v36  ;;  %13066 = vrcp.f32 %v2014_v25 }
 0x4d5   : > { %v13049_v1 = vpop.eup %13048  ;;  %v2130_v13 = vpop.f32.mrb[51].mxu0  ;;  %v2030_v3 = vmul.f32 0.0, %v13047_v40  ;;  %13068 = vrcp.f32 %v2013_v8 }
 0x4d6   : > { %v13051_v28 = vpop.eup %13050  ;;  %11520 = vmatprep.mubr.msk.f32.mxu1 %vm324_vm1, %v2130_v13  ;;  %v2029_v4 = vmul.f32 0.0, %v13049_v1 }
 0x4d7   : > { %v13053_v7 = vpop.eup %13052  ;;  %11521 = vmatmul.mubr.msk.f32.gmra.mrb[50].mxu1 %vm324_vm1, %v11494_v6  ;;  %v2015_v25 = vadd.f32 1.0, %v13051_v28 }
 0x4d8   : > { %v13055_v11 = vpop.eup %13054  ;;  %v2034_v37 = vmul.f32 %v13053_v7, %v13033_v12  ;;  %v11497_v10 = vpop.f32.mrb[52].mxu0 }
 0x4d9   : > { %v13057_v62 = vpop.eup %13056  ;;  %v2032_v5 = vmul.f32 0.0, %v13055_v11  ;;  %v2140_v61 = vpop.f32.mrb[53].mxu0 }
 0x4da   : > { %v13059_v0 = vpop.eup %13058  ;;  %v14979_v63 = vadd.f32 %v2034_v37, %v2030_v3  ;;  %v2033_v40 = vmul.f32 %v13057_v62, %v13037_v57  ;;  %11523 = vmatprep.mubr.msk.f32.mxu1 %vm324_vm1, %v2140_v61 }
 0x4db   : > { %v13061_v38 = vpop.eup %13060  ;;  %v2036_v2 = vmul.f32 %v13059_v0, %v13041_v56  ;;  %11524 = vmatmul.mubr.msk.f32.gmra.mrb[52].mxu1 %vm324_vm1, %v11497_v10 }
 0x4dc   : > { %v13063_v6 = vpop.eup %13062  ;;  %v2031_v1 = vmul.f32 0.0, %v13061_v38  ;;  %13070 = vtanh.f32 %v14979_v63  ;;  %v14984_v12 = vadd.f32 %v2033_v40, %v2029_v4  ;;  %v11500_v36 = vpop.f32.mrb[54].mxu0 }
 0x4dd   : > { %v13065_v13 = vpop.eup %13064  ;;  %13072 = vrcp.f32 %v2016_v24  ;;  %v14986_v3 = vadd.f32 %v2036_v2, %v2032_v5  ;;  %v2150_v57 = vpop.f32.mrb[55].mxu0 }
 0x4de   : > { %13074 = vtanh.f32 %v14984_v12  ;;  %v2035_v61 = vmul.f32 %v13065_v13, %v13063_v6  ;;  %11526 = vmatprep.mubr.msk.f32.mxu1 %vm324_vm1, %v2150_v57  ;;  %v13067_v24 = vpop.eup %13066 }
 0x4df   : > { %13076 = vtanh.f32 %v14986_v3  ;;  %11527 = vmatmul.mubr.msk.f32.gmra.mrb[54].mxu1 %vm324_vm1, %v11500_v36  ;;  %v13069_v56 = vpop.eup %13068 }
 0x4e0   : > { %v14992_v0 = vadd.f32 %v2035_v61, %v2031_v1  ;;  %v11503_v10 = vpop.f32.mrb[56].mxu0  ;;  %13078 = vrcp.f32 %v2015_v25 }
 0x4e1   : > { %v2160_v8 = vpop.f32.mrb[57].mxu0 }
 0x4e2   : > { %13080 = vtanh.f32 %v14992_v0  ;;  %11529 = vmatprep.mubr.msk.f32.mxu1 %vm324_vm1, %v2160_v8 }
 0x4e3   : > { %11530 = vmatmul.mubr.msk.f32.gmra.mrb[56].mxu1 %vm324_vm1, %v11503_v10 }
 0x4e4   : > { %v11506_v5 = vpop.f32.mrb[58].mxu0 }
 0x4e5   : > { %v2170_v28 = vpop.f32.mrb[59].mxu0 }
 0x4e6   : > { %v13071_v7 = vpop.eup %13070  ;;  %11532 = vmatprep.mubr.msk.f32.mxu1 %vm324_vm1, %v2170_v28 }
 0x4e7   : > { %v13073_v11 = vpop.eup %13072  ;;  %11533 = vmatmul.mubr.msk.f32.gmra.mrb[58].mxu1 %vm324_vm1, %v11506_v5  ;;  %v2046_v4 = vmul.f32 %v13071_v7, %v13067_v24 }
 0x4e8   : > { %v13075_v37 = vpop.eup %13074  ;;  %v11509_v62 = vpop.f32.mrb[60].mxu0 }
 0x4e9   : > { %v13077_v40 = vpop.eup %13076  ;;  %v2180_v38 = vpop.f32.mrb[61].mxu0  ;;  %v2045_v2 = vmul.f32 %v13075_v37, %v13069_v56  ;;  %9716 = vst.msk [vmem:[%s14216_s13 + $0x28] sm:$0xff] %vm324_vm1, %v2046_v4 }
 0x4ea   : > { %11535 = vmatprep.mubr.msk.f32.mxu1 %vm324_vm1, %v2180_v38  ;;  %v2048_v6 = vmul.f32 %v13077_v40, %v13073_v11  ;;  %v13079_v1 = vpop.eup %13078 }
 0x4eb   : > { %9715 = vst.msk [vmem:[%s14216_s13 + $0x20] sm:$0xff] %vm324_vm1, %v2045_v2  ;;  %v12585_v36 = vpack.c.bf16 %v2046_v4, %v2045_v2  ;;  %11536 = vmatmul.mubr.msk.f32.gmra.mrb[60].mxu1 %vm324_vm1, %v11509_v62 }
 0x4ec   : > { %v13081_v13 = vpop.eup %13080  ;;  %v11512_v25 = vpop.f32.mrb[62].mxu0  ;;  %9718 = vst.msk [vmem:[%s14216_s13 + $0x38] sm:$0xff] %vm324_vm1, %v2048_v6 }
 0x4ed   : > { %12586 = vmatprep.subr.bf16.mxu0 %v12585_v36  ;;  %v2190_v57 = vpop.f32.mrb[63].mxu0  ;;  %v2047_v61 = vmul.f32 %v13081_v13, %v13079_v1 }
 0x4ee   : > { %12588 = vmatpush3.bf16.msra.mxu0 %v12585_v36  ;;  %11538 = vmatprep.mubr.msk.f32.mxu1 %vm324_vm1, %v2190_v57 }
 0x4ef   : > { %9717 = vst.msk [vmem:[%s14216_s13 + $0x30] sm:$0xff] %vm324_vm1, %v2047_v61  ;;  %v12589_v10 = vpack.c.bf16 %v2048_v6, %v2047_v61  ;;  %11539 = vmatmul.mubr.msk.f32.gmra.mrb[62].mxu1 %vm324_vm1, %v11512_v25  ;;  %v17337_v25 = vld [vmem:[#allocation13_spill] sm:$0xff] }
 0x4f1   : > { %12590 = vmatprep.subr.bf16.mxu0 %v12589_v10 }
 0x4f2   : > { %12592 = vmatpush3.bf16.msra.mxu0 %v12589_v10 }
 0x4f5   : > { %11550 = vmatmul.mubr.msk.f32.vlgmr.msra.gmra.mrb[64].mxu0 %vm329_vm0, %v14583_v14  ;;  %v17331_v14 = vld [vmem:[#allocation3_spill] sm:$0xff] }
 0x4f6   : > { %11552 = vmatprep.mubr.msk.f32.mxu0 %vm329_vm0, %v14590_v15  ;;  %v17332_v15 = vld [vmem:[#allocation4_spill] sm:$0xff] }
 0x4f9   : > { %11553 = vmatmul.mubr.msk.f32.gmra.mrb[66].mxu0 %vm329_vm0, %v14597_v16  ;;  %v17333_v16 = vld [vmem:[#allocation5_spill] sm:$0xff] }
 0x4fa   : > { %11555 = vmatprep.mubr.msk.f32.mxu0 %vm329_vm0, %v14604_v17  ;;  %v17334_v17 = vld [vmem:[#allocation6_spill] sm:$0xff] }
 0x4fd   : > { %11556 = vmatmul.mubr.msk.f32.gmra.mrb[68].mxu0 %vm329_vm0, %v14611_v18  ;;  %v17335_v18 = vld [vmem:[#allocation7_spill] sm:$0xff] }
 0x4fe   : > { %11558 = vmatprep.mubr.msk.f32.mxu0 %vm329_vm0, %v14618_v19  ;;  %v17336_v19 = vld [vmem:[#allocation8_spill] sm:$0xff] }
 0x501   : > { %11559 = vmatmul.mubr.msk.f32.gmra.mrb[70].mxu0 %vm329_vm0, %v14625_v20 }
 0x502   : > { %11561 = vmatprep.mubr.msk.f32.mxu0 %vm329_vm0, %v14632_v21 }
 0x505   : > { %11562 = vmatmul.mubr.msk.f32.gmra.mrb[72].mxu0 %vm329_vm0, %v14637_v22 }
 0x506   : > { %11564 = vmatprep.mubr.msk.f32.mxu0 %vm329_vm0, %v14644_v23 }
 0x509   : > { %11565 = vmatmul.mubr.msk.f32.gmra.mrb[74].mxu0 %vm329_vm0, %v17331_v14 }
 0x50a   : > { %11567 = vmatprep.mubr.msk.f32.mxu0 %vm329_vm0, %v17332_v15 }
 0x50d   : > { %11568 = vmatmul.mubr.msk.f32.gmra.mrb[76].mxu0 %vm329_vm0, %v17333_v16 }
 0x50e   : > { %11570 = vmatprep.mubr.msk.f32.mxu0 %vm329_vm0, %v17334_v17 }
 0x511   : > { %11571 = vmatmul.mubr.msk.f32.gmra.mrb[78].mxu0 %vm329_vm0, %v17335_v18 }
 0x512   : > { %11581 = vmatprep.mubr.msk.f32.mxu0 %vm329_vm0, %v17336_v19 }
 0x5a6   : > { %v11519_v20 = vpop.f32.mrb[48].mxu1 }
 0x5a7   : > { %v2393_v21 = vadd.f32 %v11519_v20, %v14693_v53  ;;  %v2313_v22 = vpop.f32.mrb[49].mxu1 }
 0x5a8   : > { %v2392_v23 = vadd.f32 %v2313_v22, %v14696_v55 }
 0x5a9   : > { %v9752_v8 = vmul.f32 -1.442695, %v2393_v21 }
 0x5aa   : > { %v9751_v24 = vmul.f32 -1.442695, %v2392_v23  ;;  %v11522_v5 = vpop.f32.mrb[50].mxu1 }
 0x5ab   : > { %13082 = vpow2.f32 %v9752_v8  ;;  %v2395_v56 = vadd.f32 %v11522_v5, %v14701_v45  ;;  %v2323_v28 = vpop.f32.mrb[51].mxu1 }
 0x5ac   : > { %13084 = vpow2.f32 %v9751_v24  ;;  %v2394_v11 = vadd.f32 %v2323_v28, %v14705_v29 }
 0x5ad   : > { %v9754_v7 = vmul.f32 -1.442695, %v2395_v56 }
 0x5ae   : > { %v11525_v4 = vpop.f32.mrb[52].mxu1  ;;  %v9753_v2 = vmul.f32 -1.442695, %v2394_v11 }
 0x5af   : > { %13086 = vpow2.f32 %v9754_v7  ;;  %v2397_v37 = vadd.f32 %v11525_v4, %v14708_v47  ;;  %v2333_v62 = vpop.f32.mrb[53].mxu1  ;;  %v17338_v7 = vld [vmem:[#allocation15_spill] sm:$0xff] }
 0x5b0   : > { %v2396_v40 = vadd.f32 %v2333_v62, %v14711_v30 }
 0x5b1   : > { %v9756_v38 = vmul.f32 -1.442695, %v2397_v37 }
 0x5b2   : > { %v9755_v6 = vmul.f32 -1.442695, %v2396_v40  ;;  %v11528_v1 = vpop.f32.mrb[54].mxu1 }
 0x5b3   : > { %13088 = vpow2.f32 %v9756_v38  ;;  %v2399_v36 = vadd.f32 %v11528_v1, %v14717_v31  ;;  %v2343_v13 = vpop.f32.mrb[55].mxu1  ;;  %v17339_v1 = vld [vmem:[#allocation16_spill] sm:$0xff] }
 0x5b4   : > { %13090 = vpow2.f32 %v9755_v6  ;;  %v2398_v57 = vadd.f32 %v2343_v13, %v17337_v25 }
 0x5b5   : > { %v13083_v61 = vpop.eup %13082  ;;  %v9758_v10 = vmul.f32 -1.442695, %v2399_v36  ;;  %13092 = vpow2.f32 %v9753_v2 }
 0x5b6   : > { %v13085_v14 = vpop.eup %13084  ;;  %v2421_v15 = vadd.f32 1.0, %v13083_v61  ;;  %v9757_v16 = vmul.f32 -1.442695, %v2398_v57  ;;  %v11531_v17 = vpop.f32.mrb[56].mxu1 }
 0x5b7   : > { %v2420_v18 = vadd.f32 1.0, %v13085_v14  ;;  %13094 = vpow2.f32 %v9758_v10  ;;  %v2401_v19 = vadd.f32 %v11531_v17, %v14725_v58  ;;  %v2353_v20 = vpop.f32.mrb[57].mxu1  ;;  %v17340_v10 = vld [vmem:[#allocation17_spill] sm:$0xff] }
 0x5b8   : > { %v2400_v21 = vadd.f32 %v2353_v20, %v14728_v44  ;;  %13096 = vrcp.f32 %v2421_v15 }
 0x5b9   : > { %v13087_v22 = vpop.eup %13086  ;;  %v9760_v23 = vmul.f32 -1.442695, %v2401_v19  ;;  %13098 = vpow2.f32 %v9757_v16 }
 0x5ba   : > { %v2423_v8 = vadd.f32 1.0, %v13087_v22  ;;  %v9759_v24 = vmul.f32 -1.442695, %v2400_v21  ;;  %v11534_v5 = vpop.f32.mrb[58].mxu1  ;;  %13100 = vrcp.f32 %v2420_v18  ;;  %v17341_v18 = vld [vmem:[#allocation18_spill] sm:$0xff] }
 0x5bb   : > { %v2403_v56 = vadd.f32 %v11534_v5, %v14733_v27  ;;  %v2363_v28 = vpop.f32.mrb[59].mxu1  ;;  %13102 = vpow2.f32 %v9760_v23 }
 0x5bc   : > { %v2402_v11 = vadd.f32 %v2363_v28, %v17338_v7  ;;  %13104 = vrcp.f32 %v2423_v8 }
 0x5bd   : > { %v13089_v4 = vpop.eup %13088  ;;  %v9762_v37 = vmul.f32 -1.442695, %v2403_v56  ;;  %13106 = vpow2.f32 %v9759_v24  ;;  %v17342_v24 = vld [vmem:[#allocation19_spill] sm:$0xff] }
 0x5be   : > { %v13091_v62 = vpop.eup %13090  ;;  %v2445_v40 = vadd.f32 1.0, %v13089_v4  ;;  %v9761_v38 = vmul.f32 -1.442695, %v2402_v11  ;;  %v11537_v2 = vpop.f32.mrb[60].mxu1 }
 0x5bf   : > { %v2444_v6 = vadd.f32 1.0, %v13091_v62  ;;  %13108 = vpow2.f32 %v9762_v37  ;;  %v2405_v36 = vadd.f32 %v11537_v2, %v17339_v1  ;;  %v2373_v13 = vpop.f32.mrb[61].mxu1  ;;  %v13093_v57 = vpop.eup %13092 }
 0x5c0   : > { %13110 = vrcp.f32 %v2445_v40  ;;  %v2404_v14 = vadd.f32 %v2373_v13, %v17340_v10  ;;  %v2422_v22 = vadd.f32 1.0, %v13093_v57 }
 0x5c1   : > { %v13095_v61 = vpop.eup %13094  ;;  %13112 = vrcp.f32 %v2444_v6 }
 0x5c2   : > { %v2447_v15 = vadd.f32 1.0, %v13095_v61  ;;  %13114 = vpow2.f32 %v9761_v38  ;;  %v11540_v16 = vpop.f32.mrb[62].mxu1  ;;  %v13097_v17 = vpop.eup %13096 }
 0x5c3   : > { %13116 = vtanh.f32 %v2405_v36  ;;  %v2407_v19 = vadd.f32 %v11540_v16, %v17341_v18  ;;  %v2383_v20 = vpop.f32.mrb[63].mxu1  ;;  %v13099_v21 = vpop.eup %13098 }
 0x5c4   : > { %13118 = vrcp.f32 %v2447_v15  ;;  %v13101_v23 = vpop.eup %13100  ;;  %v2446_v8 = vadd.f32 1.0, %v13099_v21  ;;  %v2406_v5 = vadd.f32 %v2383_v20, %v17342_v24 }
 0x5c5   : > { %13120 = vtanh.f32 %v2404_v14  ;;  %v13103_v56 = vpop.eup %13102 }
 0x5c6   : > { %13122 = vtanh.f32 %v2407_v19  ;;  %v13105_v28 = vpop.eup %13104  ;;  %v2469_v6 = vadd.f32 1.0, %v13103_v56 }
 0x5c7   : > { %13124 = vrcp.f32 %v2446_v8  ;;  %v13107_v11 = vpop.eup %13106 }
 0x5c8   : > { %13126 = vrcp.f32 %v2422_v22  ;;  %v2468_v15 = vadd.f32 1.0, %v13107_v11 }
 0x5c9   : > { %v13109_v4 = vpop.eup %13108  ;;  %13128 = vtanh.f32 %v2406_v5 }
 0x5ca   : > { %v13111_v37 = vpop.eup %13110  ;;  %13130 = vrcp.f32 %v2469_v6  ;;  %v2471_v5 = vadd.f32 1.0, %v13109_v4 }
 0x5cb   : > { %v13113_v62 = vpop.eup %13112  ;;  %v2485_v38 = vmul.f32 %v13111_v37, %v14756_v34 }
 0x5cc   : > { %v13115_v40 = vpop.eup %13114  ;;  %v2484_v13 = vmul.f32 %v13113_v62, %v14759_v46 }
 0x5cd   : > { %v13117_v2 = vpop.eup %13116 }
 0x5ce   : > { %v13119_v36 = vpop.eup %13118  ;;  %v2489_v57 = vmul.f32 %v13117_v2, %v13097_v17  ;;  %v2470_v17 = vadd.f32 1.0, %v13115_v40 }
 0x5cf   : > { %v13121_v61 = vpop.eup %13120  ;;  %v2487_v14 = vmul.f32 %v13119_v36, %v14761_v49 }
 0x5d0   : > { %v13123_v16 = vpop.eup %13122  ;;  %v15062_v19 = vadd.f32 %v2489_v57, %v2485_v38  ;;  %v2488_v20 = vmul.f32 %v13121_v61, %v13101_v23 }
 0x5d1   : > { %v13125_v21 = vpop.eup %13124  ;;  %v2491_v22 = vmul.f32 %v13123_v16, %v13105_v28 }
 0x5d2   : > { %v13127_v8 = vpop.eup %13126  ;;  %v2486_v34 = vmul.f32 %v13125_v21, %v14765_v54  ;;  %13132 = vtanh.f32 %v15062_v19  ;;  %v15066_v56 = vadd.f32 %v2488_v20, %v2484_v13 }
 0x5d3   : > { %v13129_v46 = vpop.eup %13128  ;;  %13134 = vrcp.f32 %v2468_v15  ;;  %v15068_v49 = vadd.f32 %v2491_v22, %v2487_v14 }
 0x5d4   : > { %13136 = vtanh.f32 %v15066_v56  ;;  %v2490_v11 = vmul.f32 %v13129_v46, %v13127_v8  ;;  %v13131_v54 = vpop.eup %13130  ;;  %v15134_v46 = vld [vmem:[%s17173_s2 + $0x8] sm:$0xff] }
 0x5d5   : > { %13138 = vtanh.f32 %v15068_v49 }
 0x5d6   : > { %13140 = vrcp.f32 %v2471_v5  ;;  %v15072_v23 = vadd.f32 %v2490_v11, %v2486_v34  ;;  %v15127_v5 = vld [vmem:[%s17173_s2] sm:$0xff]  ;;  %v15148_v11 = vld [vmem:[%s17173_s2 + $0x18] sm:$0xff] }
 0x5d7   : > { %13142 = vrcp.f32 %v2470_v17  ;;  %v15141_v17 = vld [vmem:[%s17173_s2 + $0x10] sm:$0xff] }
 0x5d8   : > { %13144 = vtanh.f32 %v15072_v23 }
 0x5dc   : > { %v13133_v28 = vpop.eup %13132 }
 0x5dd   : > { %v13135_v4 = vpop.eup %13134  ;;  %v2501_v37 = vmul.f32 %v13133_v28, %v13131_v54  ;;  %v15155_v54 = vld [vmem:[%s17173_s2 + $0x20] sm:$0xff]  ;;  %v15162_v28 = vld [vmem:[%s17173_s2 + $0x28] sm:$0xff] }
 0x5de   : > { %v13137_v62 = vpop.eup %13136 }
 0x5df   : > { %v13139_v38 = vpop.eup %13138  ;;  %v2500_v40 = vmul.f32 %v13137_v62, %v13135_v4  ;;  %v15169_v4 = vld [vmem:[%s17173_s2 + $0x30] sm:$0xff]  ;;  %v15183_v62 = vld [vmem:[%s17173_s2 + $0x40] sm:$0xff] }
 0x5e0   : > { %v13141_v2 = vpop.eup %13140 }
 0x5e1   : > { %v13143_v6 = vpop.eup %13142  ;;  %v12593_v36 = vpack.c.bf16 %v2501_v37, %v2500_v40  ;;  %v2503_v13 = vmul.f32 %v13141_v2, %v13139_v38  ;;  %v15176_v37 = vld [vmem:[%s17173_s2 + $0x38] sm:$0xff]  ;;  %v15190_v38 = vld [vmem:[%s17173_s2 + $0x48] sm:$0xff]  ;;  %v15197_v40 = vld [vmem:[%s17173_s2 + $0x50] sm:$0xff] }
 0x5e2   : > { %v13145_v57 = vpop.eup %13144  ;;  %v15204_v2 = vld [vmem:[%s17173_s2 + $0x58] sm:$0xff] }
 0x5e3   : > { %12594 = vmatprep.subr.bf16.mxu0 %v12593_v36  ;;  %12606 = vmatprep.subr.bf16.mxu1 %v12593_v36  ;;  %v2502_v61 = vmul.f32 %v13145_v57, %v13143_v6  ;;  %v15211_v6 = vld [vmem:[%s17173_s2 + $0x60] sm:$0xff]  ;;  %v15232_v57 = vld [vmem:[%s17173_s2 + $0x78] sm:$0xff] }
 0x5e4   : > { %12596 = vmatpush3.bf16.msra.mxu0 %v12593_v36  ;;  %17346 = vst [vmem:[#allocation3_spill] sm:$0xff] %v15232_v57 }
 0x5e5   : > { %v12597_v14 = vpack.c.bf16 %v2503_v13, %v2502_v61  ;;  %v15225_v13 = vld [vmem:[%s17173_s2 + $0x70] sm:$0xff]  ;;  %v15239_v61 = vld [vmem:[%s17173_s2 + $0x80] sm:$0xff] }
 0x5e6   : > { %17347 = vst [vmem:[#allocation4_spill] sm:$0xff] %v15239_v61 }
 0x5e7   : > { %12598 = vmatprep.subr.bf16.mxu0 %v12597_v14 }
 0x5e8   : > { %12600 = vmatpush3.bf16.msra.mxu0 %v12597_v14 }
 0x5e9   : > { %12614 = vmatprep.subr.bf16.mxu0 %v14229_v9 }
 0x5eb   : > { %11582 = vmatmul.mubr.msk.f32.vlgmr.msra.gmra.mrb[64].mxu0 %vm329_vm0, %v14771_v33  ;;  %v17343_v33 = vld [vmem:[#allocation20_spill] sm:$0xff] }
 0x5ec   : > { %11584 = vmatprep.mubr.msk.f32.mxu0 %vm329_vm0, %v14776_v52  ;;  %12616 = vmatpush3.bf16.msra.mxu0 %v14229_v9  ;;  %v17344_v52 = vld [vmem:[#allocation21_spill] sm:$0xff] }
 0x5ed   : > { %12634 = vmatprep.subr.bf16.mxu0 %v14229_v9 }
 0x5ef   : > { %11585 = vmatmul.mubr.msk.f32.gmra.mrb[66].mxu0 %vm329_vm0, %v14786_v42  ;;  %v17345_v42 = vld [vmem:[#allocation22_spill] sm:$0xff] }
 0x5f0   : > { %11587 = vmatprep.mubr.msk.f32.mxu0 %vm329_vm0, %v14792_v35 }
 0x5f3   : > { %11588 = vmatmul.mubr.msk.f32.gmra.mrb[68].mxu0 %vm329_vm0, %v14802_v39 }
 0x5f4   : > { %11590 = vmatprep.mubr.msk.f32.mxu0 %vm329_vm0, %v14807_v32 }
 0x5f7   : > { %11591 = vmatmul.mubr.msk.f32.gmra.mrb[70].mxu0 %vm329_vm0, %v14816_v41 }
 0x5f8   : > { %11593 = vmatprep.mubr.msk.f32.mxu0 %vm329_vm0, %v14821_v48 }
 0x5fb   : > { %11594 = vmatmul.mubr.msk.f32.gmra.mrb[72].mxu0 %vm329_vm0, %v14830_v51 }
 0x5fc   : > { %11596 = vmatprep.mubr.msk.f32.mxu0 %vm329_vm0, %v14835_v26 }
 0x5ff   : > { %11597 = vmatmul.mubr.msk.f32.gmra.mrb[74].mxu0 %vm329_vm0, %v14844_v50 }
 0x600   : > { %11599 = vmatprep.mubr.msk.f32.mxu0 %vm329_vm0, %v14849_v43 }
 0x603   : > { %11600 = vmatmul.mubr.msk.f32.gmra.mrb[76].mxu0 %vm329_vm0, %v17343_v33 }
 0x604   : > { %11602 = vmatprep.mubr.msk.f32.mxu0 %vm329_vm0, %v17344_v52 }
 0x607   : > { %11603 = vmatmul.mubr.msk.f32.gmra.mrb[78].mxu0 %vm329_vm0, %v17345_v42 }
 0x6be   : > { %v11583_v35 = vpop.f32.mrb[64].mxu0 }
 0x6bf   : > { %v2715_v39 = vpop.f32.mrb[65].mxu0 }
 0x6c0   : > { %11609 = vmatprep.mubr.msk.f32.mxu1 %vm324_vm1, %v2715_v39 }
 0x6c1   : > { %11610 = vmatmul.mubr.msk.f32.vlgmr.msra.gmra.mrb[64].mxu1 %vm324_vm1, %v11583_v35 }
 0x6c2   : > { %12608 = vmatpush3.bf16.msra.mxu1 %v12593_v36  ;;  %v11586_v32 = vpop.f32.mrb[66].mxu0  ;;  %v15218_v36 = vld [vmem:[%s17173_s2 + $0x68] sm:$0xff] }
 0x6c3   : > { %12610 = vmatprep.subr.bf16.mxu1 %v12597_v14  ;;  %v2725_v41 = vpop.f32.mrb[67].mxu0 }
 0x6c4   : > { %11612 = vmatprep.mubr.msk.f32.mxu1 %vm324_vm1, %v2725_v41  ;;  %v17348_v41 = vld [vmem:[#allocation27_spill] sm:$0xff] }
 0x6c5   : > { %11613 = vmatmul.mubr.msk.f32.gmra.mrb[66].mxu1 %vm324_vm1, %v11586_v32 }
 0x6c6   : > { %12612 = vmatpush3.bf16.msra.mxu1 %v12597_v14  ;;  %v11589_v48 = vpop.f32.mrb[68].mxu0 }
 0x6c7   : > { %v2735_v51 = vpop.f32.mrb[69].mxu0 }
 0x6c8   : > { %11615 = vmatprep.mubr.msk.f32.mxu1 %vm324_vm1, %v2735_v51 }
 0x6c9   : > { %11616 = vmatmul.mubr.msk.f32.gmra.mrb[68].mxu1 %vm324_vm1, %v11589_v48 }
 0x6ca   : > { %v11592_v26 = vpop.f32.mrb[70].mxu0 }
 0x6cb   : > { %v2745_v50 = vpop.f32.mrb[71].mxu0 }
 0x6cc   : > { %11618 = vmatprep.mubr.msk.f32.mxu1 %vm324_vm1, %v2745_v50  ;;  %v17349_v50 = vld [vmem:[#allocation28_spill] sm:$0xff] }
 0x6cd   : > { %11619 = vmatmul.mubr.msk.f32.gmra.mrb[70].mxu1 %vm324_vm1, %v11592_v26 }
 0x6ce   : > { %v11595_v43 = vpop.f32.mrb[72].mxu0 }
 0x6cf   : > { %v2755_v15 = vpop.f32.mrb[73].mxu0 }
 0x6d0   : > { %11621 = vmatprep.mubr.msk.f32.mxu1 %vm324_vm1, %v2755_v15 }
 0x6d1   : > { %11622 = vmatmul.mubr.msk.f32.gmra.mrb[72].mxu1 %vm324_vm1, %v11595_v43 }
 0x6d2   : > { %v11598_v16 = vpop.f32.mrb[74].mxu0 }
 0x6d3   : > { %v2765_v20 = vpop.f32.mrb[75].mxu0 }
 0x6d4   : > { %11624 = vmatprep.mubr.msk.f32.mxu1 %vm324_vm1, %v2765_v20 }
 0x6d5   : > { %11625 = vmatmul.mubr.msk.f32.gmra.mrb[74].mxu1 %vm324_vm1, %v11598_v16  ;;  %v17350_v16 = vld [vmem:[#allocation25_spill] sm:$0xff] }
 0x6d6   : > { %v11601_v21 = vpop.f32.mrb[76].mxu0 }
 0x6d7   : > { %v2775_v22 = vpop.f32.mrb[77].mxu0 }
 0x6d8   : > { %11627 = vmatprep.mubr.msk.f32.mxu1 %vm324_vm1, %v2775_v22  ;;  %v17351_v22 = vld [vmem:[#allocation26_spill] sm:$0xff] }
 0x6d9   : > { %11628 = vmatmul.mubr.msk.f32.gmra.mrb[76].mxu1 %vm324_vm1, %v11601_v21 }
 0x6da   : > { %v11604_v8 = vpop.f32.mrb[78].mxu0 }
 0x6db   : > { %v2785_v34 = vpop.f32.mrb[79].mxu0 }
 0x6dc   : > { %11630 = vmatprep.mubr.msk.f32.mxu1 %vm324_vm1, %v2785_v34 }
 0x6dd   : > { %11631 = vmatmul.mubr.msk.f32.gmra.mrb[78].mxu1 %vm324_vm1, %v11604_v8 }
 0x6de   : > { %11641 = vmatprep.mubr.msk.f32.mxu1 %vm329_vm0, %v15127_v5 }
 0x6e1   : > { %11642 = vmatmul.mubr.msk.f32.vlgmr.msra.gmra.mrb[80].mxu1 %vm329_vm0, %v15134_v46 }
 0x6e2   : > { %11644 = vmatprep.mubr.msk.f32.mxu1 %vm329_vm0, %v15141_v17 }
 0x6e5   : > { %11645 = vmatmul.mubr.msk.f32.gmra.mrb[82].mxu1 %vm329_vm0, %v15148_v11 }
 0x6e6   : > { %11647 = vmatprep.mubr.msk.f32.mxu1 %vm329_vm0, %v15155_v54 }
 0x6e9   : > { %11648 = vmatmul.mubr.msk.f32.gmra.mrb[84].mxu1 %vm329_vm0, %v15162_v28 }
 0x6ea   : > { %11650 = vmatprep.mubr.msk.f32.mxu1 %vm329_vm0, %v15169_v4 }
 0x6ed   : > { %11651 = vmatmul.mubr.msk.f32.gmra.mrb[86].mxu1 %vm329_vm0, %v15176_v37 }
 0x6ee   : > { %11653 = vmatprep.mubr.msk.f32.mxu1 %vm329_vm0, %v15183_v62 }
 0x6f1   : > { %11654 = vmatmul.mubr.msk.f32.gmra.mrb[88].mxu1 %vm329_vm0, %v15190_v38 }
 0x6f2   : > { %11656 = vmatprep.mubr.msk.f32.mxu1 %vm329_vm0, %v15197_v40 }
 0x6f5   : > { %11657 = vmatmul.mubr.msk.f32.gmra.mrb[90].mxu1 %vm329_vm0, %v15204_v2 }
 0x6f6   : > { %11659 = vmatprep.mubr.msk.f32.mxu1 %vm329_vm0, %v15211_v6 }
 0x6f9   : > { %11660 = vmatmul.mubr.msk.f32.gmra.mrb[92].mxu1 %vm329_vm0, %v15218_v36 }
 0x6fa   : > { %11662 = vmatprep.mubr.msk.f32.mxu1 %vm329_vm0, %v15225_v13 }
 0x6fd   : > { %11663 = vmatmul.mubr.msk.f32.gmra.mrb[94].mxu1 %vm329_vm0, %v15232_v57 }
 0x6fe   : > { %11701 = vmatprep.mubr.msk.f32.mxu1 %vm329_vm0, %v15239_v61 }
 0x794   : > { %v11611_v14 = vpop.f32.mrb[64].mxu1 }
 0x795   : > { %v2914_v33 = vadd.f32 %v11611_v14, %v14926_v59  ;;  %v2908_v52 = vpop.f32.mrb[65].mxu1 }
 0x796   : > { %v2909_v42 = vadd.f32 %v2908_v52, %v14928_v60 }
 0x797   : > { %v9812_v35 = vmul.f32 -1.442695, %v2914_v33 }
 0x798   : > { %v9811_v39 = vmul.f32 -1.442695, %v2909_v42  ;;  %v11614_v32 = vpop.f32.mrb[66].mxu1  ;;  %v17352_v42 = vld [vmem:[#allocation29_spill] sm:$0xff] }
 0x799   : > { %13146 = vpow2.f32 %v9812_v35  ;;  %v2924_v48 = vadd.f32 %v11614_v32, %v17348_v41  ;;  %v2918_v51 = vpop.f32.mrb[67].mxu1 }
 0x79a   : > { %13148 = vpow2.f32 %v9811_v39  ;;  %v2919_v43 = vadd.f32 %v2918_v51, %v17349_v50  ;;  %v17353_v39 = vld [vmem:[#allocation30_spill] sm:$0xff] }
 0x79b   : > { %v9814_v26 = vmul.f32 -1.442695, %v2924_v48 }
 0x79c   : > { %v11617_v15 = vpop.f32.mrb[68].mxu1  ;;  %v9813_v14 = vmul.f32 -1.442695, %v2919_v43 }
 0x79d   : > { %13150 = vpow2.f32 %v9814_v26  ;;  %v2934_v20 = vadd.f32 %v11617_v15, %v17350_v16  ;;  %v2928_v21 = vpop.f32.mrb[69].mxu1 }
 0x79e   : > { %v2929_v8 = vadd.f32 %v2928_v21, %v17351_v22 }
 0x79f   : > { %v9816_v34 = vmul.f32 -1.442695, %v2934_v20  ;;  %v17354_v20 = vld [vmem:[#allocation31_spill] sm:$0xff] }
 0x7a0   : > { %v9815_v33 = vmul.f32 -1.442695, %v2929_v8  ;;  %v11620_v52 = vpop.f32.mrb[70].mxu1  ;;  %v17355_v8 = vld [vmem:[#allocation32_spill] sm:$0xff] }
 0x7a1   : > { %13152 = vpow2.f32 %v9816_v34  ;;  %v2944_v35 = vadd.f32 %v11620_v52, %v17352_v42  ;;  %v2938_v32 = vpop.f32.mrb[71].mxu1 }
 0x7a2   : > { %13154 = vpow2.f32 %v9815_v33  ;;  %v2939_v48 = vadd.f32 %v2938_v32, %v17353_v39 }
 0x7a3   : > { %v13147_v41 = vpop.eup %13146  ;;  %v9818_v51 = vmul.f32 -1.442695, %v2944_v35  ;;  %13156 = vpow2.f32 %v9813_v14  ;;  %v17356_v35 = vld [vmem:[#allocation35_spill] sm:$0xff] }
 0x7a4   : > { %v13149_v50 = vpop.eup %13148  ;;  %v3000_v26 = vadd.f32 1.0, %v13147_v41  ;;  %v9817_v15 = vmul.f32 -1.442695, %v2939_v48  ;;  %v11623_v16 = vpop.f32.mrb[72].mxu1  ;;  %v17357_v48 = vld [vmem:[#allocation36_spill] sm:$0xff] }
 0x7a5   : > { %v2999_v60 = vadd.f32 1.0, %v13149_v50  ;;  %13158 = vpow2.f32 %v9818_v51  ;;  %v2954_v43 = vadd.f32 %v11623_v16, %v17354_v20  ;;  %v2948_v21 = vpop.f32.mrb[73].mxu1 }
 0x7a6   : > { %v2949_v34 = vadd.f32 %v2948_v21, %v17355_v8  ;;  %13160 = vrcp.f32 %v3000_v26 }
 0x7a7   : > { %v13151_v22 = vpop.eup %13150  ;;  %v9820_v52 = vmul.f32 -1.442695, %v2954_v43  ;;  %13162 = vpow2.f32 %v9817_v15 }
 0x7a8   : > { %v3002_v33 = vadd.f32 1.0, %v13151_v22  ;;  %v9819_v32 = vmul.f32 -1.442695, %v2949_v34  ;;  %v11626_v39 = vpop.f32.mrb[74].mxu1  ;;  %13164 = vrcp.f32 %v2999_v60  ;;  %v17358_v22 = vld [vmem:[#allocation33_spill] sm:$0xff] }
 0x7a9   : > { %v2964_v41 = vadd.f32 %v11626_v39, %v17356_v35  ;;  %v2958_v14 = vpop.f32.mrb[75].mxu1  ;;  %13166 = vpow2.f32 %v9820_v52  ;;  %v17359_v52 = vld [vmem:[#allocation34_spill] sm:$0xff] }
 0x7aa   : > { %v2959_v50 = vadd.f32 %v2958_v14, %v17357_v48  ;;  %13168 = vrcp.f32 %v3002_v33 }
 0x7ab   : > { %v13153_v51 = vpop.eup %13152  ;;  %v9822_v16 = vmul.f32 -1.442695, %v2964_v41  ;;  %13170 = vpow2.f32 %v9819_v32 }
 0x7ac   : > { %v13155_v20 = vpop.eup %13154  ;;  %v3024_v42 = vadd.f32 1.0, %v13153_v51  ;;  %v9821_v21 = vmul.f32 -1.442695, %v2959_v50  ;;  %v11629_v26 = vpop.f32.mrb[76].mxu1  ;;  %v17360_v51 = vld [vmem:[#allocation37_spill] sm:$0xff] }
 0x7ad   : > { %v3023_v43 = vadd.f32 1.0, %v13155_v20  ;;  %13172 = vpow2.f32 %v9822_v16  ;;  %v2974_v15 = vadd.f32 %v11629_v26, %v17358_v22  ;;  %v2968_v34 = vpop.f32.mrb[77].mxu1  ;;  %v13157_v60 = vpop.eup %13156  ;;  %v17361_v22 = vld [vmem:[#allocation38_spill] sm:$0xff] }
 0x7ae   : > { %13174 = vrcp.f32 %v3024_v42  ;;  %v2969_v35 = vadd.f32 %v2968_v34, %v17359_v52  ;;  %v3001_v20 = vadd.f32 1.0, %v13157_v60 }
 0x7af   : > { %v13159_v39 = vpop.eup %13158  ;;  %13176 = vrcp.f32 %v3023_v43 }
 0x7b0   : > { %v3026_v14 = vadd.f32 1.0, %v13159_v39  ;;  %13178 = vpow2.f32 %v9821_v21  ;;  %v11632_v33 = vpop.f32.mrb[78].mxu1  ;;  %v13161_v41 = vpop.eup %13160 }
 0x7b1   : > { %13180 = vtanh.f32 %v2974_v15  ;;  %v2984_v32 = vadd.f32 %v11632_v33, %v17360_v51  ;;  %v2978_v50 = vpop.f32.mrb[79].mxu1  ;;  %v13163_v48 = vpop.eup %13162 }
 0x7b2   : > { %13182 = vrcp.f32 %v3026_v14  ;;  %v13165_v16 = vpop.eup %13164  ;;  %v3025_v26 = vadd.f32 1.0, %v13163_v48  ;;  %v2979_v42 = vadd.f32 %v2978_v50, %v17361_v22 }
 0x7b3   : > { %13184 = vtanh.f32 %v2969_v35  ;;  %v13167_v8 = vpop.eup %13166 }
 0x7b4   : > { %13186 = vtanh.f32 %v2984_v32  ;;  %v11643_v43 = vpop.f32.mrb[80].mxu1  ;;  %v13169_v34 = vpop.eup %13168  ;;  %v3048_v50 = vadd.f32 1.0, %v13167_v8 }
 0x7b5   : > { %13188 = vrcp.f32 %v3025_v26  ;;  %v3154_v21 = vpop.f32.mrb[81].mxu1  ;;  %v13171_v39 = vpop.eup %13170 }
 0x7b6   : > { %13190 = vrcp.f32 %v3001_v20  ;;  %11669 = vmatprep.mubr.msk.f32.mxu0 %vm324_vm1, %v3154_v21  ;;  %v3047_v20 = vadd.f32 1.0, %v13171_v39 }
 0x7b7   : > { %v13173_v15 = vpop.eup %13172  ;;  %13192 = vtanh.f32 %v2979_v42  ;;  %11670 = vmatmul.mubr.msk.f32.vlgmr.msra.gmra.mrb[80].mxu0 %vm324_vm1, %v11643_v43 }
 0x7b8   : > { %v13175_v60 = vpop.eup %13174  ;;  %v11646_v14 = vpop.f32.mrb[82].mxu1  ;;  %12636 = vmatpush3.bf16.msra.mxu0 %v14229_v9  ;;  %v3050_v59 = vadd.f32 1.0, %v13173_v15  ;;  %13194 = vrcp.f32 %v3048_v50 }
 0x7b9   : > { %v13177_v35 = vpop.eup %13176  ;;  %v3164_v48 = vpop.f32.mrb[83].mxu1  ;;  %v3064_v32 = vmul.f32 %v13175_v60, %v14979_v63  ;;  %13196 = vrcp.f32 %v3047_v20 }
 0x7ba   : > { %v13179_v33 = vpop.eup %13178  ;;  %11672 = vmatprep.mubr.msk.f32.mxu0 %vm324_vm1, %v3164_v48  ;;  %v3063_v42 = vmul.f32 %v13177_v35, %v14984_v12 }
 0x7bb   : > { %v13181_v26 = vpop.eup %13180  ;;  %11673 = vmatmul.mubr.msk.f32.gmra.mrb[82].mxu0 %vm324_vm1, %v11646_v14  ;;  %v3049_v35 = vadd.f32 1.0, %v13179_v33 }
 0x7bc   : > { %v13183_v21 = vpop.eup %13182  ;;  %v3068_v43 = vmul.f32 %v13181_v26, %v13161_v41  ;;  %v11649_v22 = vpop.f32.mrb[84].mxu1 }
 0x7bd   : > { %v13185_v51 = vpop.eup %13184  ;;  %v3066_v52 = vmul.f32 %v13183_v21, %v14986_v3  ;;  %v3174_v61 = vpop.f32.mrb[85].mxu1 }
 0x7be   : > { %v13187_v57 = vpop.eup %13186  ;;  %v15267_v63 = vadd.f32 %v3068_v43, %v3064_v32  ;;  %v3067_v8 = vmul.f32 %v13185_v51, %v13165_v16  ;;  %11675 = vmatprep.mubr.msk.f32.mxu0 %vm324_vm1, %v3174_v61 }
 0x7bf   : > { %v13189_v39 = vpop.eup %13188  ;;  %v3070_v60 = vmul.f32 %v13187_v57, %v13169_v34  ;;  %11676 = vmatmul.mubr.msk.f32.gmra.mrb[84].mxu0 %vm324_vm1, %v11649_v22 }
 0x7c0   : > { %v13191_v12 = vpop.eup %13190  ;;  %v3065_v41 = vmul.f32 %v13189_v39, %v14992_v0  ;;  %13198 = vtanh.f32 %v15267_v63  ;;  %v15273_v3 = vadd.f32 %v3067_v8, %v3063_v42  ;;  %v11652_v15 = vpop.f32.mrb[86].mxu1 }
 0x7c1   : > { %v13193_v14 = vpop.eup %13192  ;;  %13200 = vrcp.f32 %v3050_v59  ;;  %v15275_v48 = vadd.f32 %v3070_v60, %v3066_v52  ;;  %v3184_v51 = vpop.f32.mrb[87].mxu1 }
 0x7c2   : > { %13202 = vtanh.f32 %v15273_v3  ;;  %v3069_v61 = vmul.f32 %v13193_v14, %v13191_v12  ;;  %11678 = vmatprep.mubr.msk.f32.mxu0 %vm324_vm1, %v3184_v51  ;;  %v13195_v59 = vpop.eup %13194  ;;  %v15303_v51 = vld [vmem:[%s17173_s2 + $0x88] sm:$0xff] }
 0x7c3   : > { %13204 = vtanh.f32 %v15275_v48  ;;  %11679 = vmatmul.mubr.msk.f32.gmra.mrb[86].mxu0 %vm324_vm1, %v11652_v15  ;;  %v13197_v16 = vpop.eup %13196 }
 0x7c4   : > { %v15281_v0 = vadd.f32 %v3069_v61, %v3065_v41  ;;  %v11655_v57 = vpop.f32.mrb[88].mxu1  ;;  %13206 = vrcp.f32 %v3049_v35  ;;  %v15310_v61 = vld [vmem:[%s17173_s2 + $0x90] sm:$0xff] }
 0x7c5   : > { %v3194_v22 = vpop.f32.mrb[89].mxu1 }
 0x7c6   : > { %13208 = vtanh.f32 %v15281_v0  ;;  %11681 = vmatprep.mubr.msk.f32.mxu0 %vm324_vm1, %v3194_v22  ;;  %v15324_v22 = vld [vmem:[%s17173_s2 + $0xa0] sm:$0xff] }
 0x7c7   : > { %11682 = vmatmul.mubr.msk.f32.gmra.mrb[88].mxu0 %vm324_vm1, %v11655_v57  ;;  %v15317_v57 = vld [vmem:[%s17173_s2 + $0x98] sm:$0xff] }
 0x7c8   : > { %v11658_v52 = vpop.f32.mrb[90].mxu1 }
 0x7c9   : > { %v3204_v34 = vpop.f32.mrb[91].mxu1 }
 0x7ca   : > { %v13199_v33 = vpop.eup %13198  ;;  %11684 = vmatprep.mubr.msk.f32.mxu0 %vm324_vm1, %v3204_v34  ;;  %v15352_v34 = vld [vmem:[%s17173_s2 + $0xc0] sm:$0xff] }
 0x7cb   : > { %v13201_v32 = vpop.eup %13200  ;;  %11685 = vmatmul.mubr.msk.f32.gmra.mrb[90].mxu0 %vm324_vm1, %v11658_v52  ;;  %v3080_v50 = vmul.f32 %v13199_v33, %v13195_v59  ;;  %v15331_v59 = vld [vmem:[%s17173_s2 + $0xa8] sm:$0xff]  ;;  %v15338_v52 = vld [vmem:[%s17173_s2 + $0xb0] sm:$0xff] }
 0x7cc   : > { %v13203_v26 = vpop.eup %13202  ;;  %v11661_v20 = vpop.f32.mrb[92].mxu1  ;;  %v15359_v33 = vld [vmem:[%s17173_s2 + $0xc8] sm:$0xff] }
 0x7cd   : > { %v13205_v21 = vpop.eup %13204  ;;  %v3214_v42 = vpop.f32.mrb[93].mxu1  ;;  %v3079_v43 = vmul.f32 %v13203_v26, %v13197_v16  ;;  %9824 = vst.msk [vmem:[%s14216_s13 + $0x48] sm:$0xff] %vm324_vm1, %v3080_v50  ;;  %v15345_v16 = vld [vmem:[%s17173_s2 + $0xb8] sm:$0xff]  ;;  %v15380_v26 = vld [vmem:[%s17173_s2 + $0xe0] sm:$0xff] }
 0x7ce   : > { %11687 = vmatprep.mubr.msk.f32.mxu0 %vm324_vm1, %v3214_v42  ;;  %v3082_v8 = vmul.f32 %v13205_v21, %v13201_v32  ;;  %v13207_v39 = vpop.eup %13206  ;;  %v15366_v32 = vld [vmem:[%s17173_s2 + $0xd0] sm:$0xff]  ;;  %17363 = vst [vmem:[#allocation6_spill] sm:$0xff] %v15380_v26  ;;  %v15401_v42 = vld [vmem:[%s17173_s2 + $0xf8] sm:$0xff] }
 0x7cf   : > { %9823 = vst.msk [vmem:[%s14216_s13 + $0x40] sm:$0xff] %vm324_vm1, %v3079_v43  ;;  %v12617_v60 = vpack.c.bf16 %v3080_v50, %v3079_v43  ;;  %11688 = vmatmul.mubr.msk.f32.gmra.mrb[92].mxu0 %vm324_vm1, %v11661_v20  ;;  %v15373_v50 = vld [vmem:[%s17173_s2 + $0xd8] sm:$0xff]  ;;  %v15387_v20 = vld [vmem:[%s17173_s2 + $0xe8] sm:$0xff]  ;;  %v15394_v21 = vld [vmem:[%s17173_s2 + $0xf0] sm:$0xff] }
 0x7d0   : > { %v13209_v12 = vpop.eup %13208  ;;  %v11664_v41 = vpop.f32.mrb[94].mxu1  ;;  %9826 = vst.msk [vmem:[%s14216_s13 + $0x58] sm:$0xff] %vm324_vm1, %v3082_v8  ;;  %17362 = vst [vmem:[#allocation5_spill] sm:$0xff] %v15373_v50  ;;  %v15408_v43 = vld [vmem:[%s17172_s1 + $0x80] sm:$0xff] }
 0x7d1   : > { %12618 = vmatprep.subr.bf16.mxu1 %v12617_v60  ;;  %v3224_v15 = vpop.f32.mrb[95].mxu1  ;;  %v3081_v14 = vmul.f32 %v13209_v12, %v13207_v39  ;;  %17364 = vst [vmem:[#allocation7_spill] sm:$0xff] %v15387_v20  ;;  %17365 = vst [vmem:[#allocation8_spill] sm:$0xff] %v15394_v21 }
 0x7d2   : > { %12620 = vmatpush3.bf16.msra.mxu1 %v12617_v60  ;;  %11690 = vmatprep.mubr.msk.f32.mxu0 %vm324_vm1, %v3224_v15  ;;  %17366 = vst [vmem:[#allocation13_spill] sm:$0xff] %v15401_v42  ;;  %17367 = vst [vmem:[#allocation20_spill] sm:$0xff] %v15408_v43 }
 0x7d3   : > { %9825 = vst.msk [vmem:[%s14216_s13 + $0x50] sm:$0xff] %vm324_vm1, %v3081_v14  ;;  %v12621_v35 = vpack.c.bf16 %v3082_v8, %v3081_v14  ;;  %11691 = vmatmul.mubr.msk.f32.gmra.mrb[94].mxu0 %vm324_vm1, %v11664_v41 }
 0x7d5   : > { %12622 = vmatprep.subr.bf16.mxu1 %v12621_v35 }
 0x7d6   : > { %12624 = vmatpush3.bf16.msra.mxu1 %v12621_v35 }
 0x7d9   : > { %11702 = vmatmul.mubr.msk.f32.vlgmr.msra.gmra.mrb[96].mxu1 %vm329_vm0, %v15303_v51 }
 0x7da   : > { %11704 = vmatprep.mubr.msk.f32.mxu1 %vm329_vm0, %v15310_v61 }
 0x7dd   : > { %11705 = vmatmul.mubr.msk.f32.gmra.mrb[98].mxu1 %vm329_vm0, %v15317_v57 }
 0x7de   : > { %11707 = vmatprep.mubr.msk.f32.mxu1 %vm329_vm0, %v15324_v22 }
 0x7e1   : > { %11708 = vmatmul.mubr.msk.f32.gmra.mrb[100].mxu1 %vm329_vm0, %v15331_v59 }
 0x7e2   : > { %11710 = vmatprep.mubr.msk.f32.mxu1 %vm329_vm0, %v15338_v52 }
 0x7e5   : > { %11711 = vmatmul.mubr.msk.f32.gmra.mrb[102].mxu1 %vm329_vm0, %v15345_v16 }
 0x7e6   : > { %11713 = vmatprep.mubr.msk.f32.mxu1 %vm329_vm0, %v15352_v34 }
 0x7e9   : > { %11714 = vmatmul.mubr.msk.f32.gmra.mrb[104].mxu1 %vm329_vm0, %v15359_v33 }
 0x7ea   : > { %11716 = vmatprep.mubr.msk.f32.mxu1 %vm329_vm0, %v15366_v32 }
 0x7ed   : > { %11717 = vmatmul.mubr.msk.f32.gmra.mrb[106].mxu1 %vm329_vm0, %v15373_v50 }
 0x7ee   : > { %11719 = vmatprep.mubr.msk.f32.mxu1 %vm329_vm0, %v15380_v26 }
 0x7f1   : > { %11720 = vmatmul.mubr.msk.f32.gmra.mrb[108].mxu1 %vm329_vm0, %v15387_v20 }
 0x7f2   : > { %11722 = vmatprep.mubr.msk.f32.mxu1 %vm329_vm0, %v15394_v21 }
 0x7f5   : > { %11723 = vmatmul.mubr.msk.f32.gmra.mrb[110].mxu1 %vm329_vm0, %v15401_v42 }
 0x7f6   : > { %11733 = vmatprep.mubr.msk.f32.mxu1 %vm329_vm0, %v15408_v43 }
 0x88a   : > { %v11671_v8 = vpop.f32.mrb[80].mxu0 }
 0x88b   : > { %v3427_v39 = vadd.f32 %v11671_v8, %v14693_v53  ;;  %v3347_v60 = vpop.f32.mrb[81].mxu0 }
 0x88c   : > { %v3426_v12 = vadd.f32 %v3347_v60, %v14696_v55 }
 0x88d   : > { %v9860_v41 = vmul.f32 -1.442695, %v3427_v39 }
 0x88e   : > { %v9859_v15 = vmul.f32 -1.442695, %v3426_v12  ;;  %v11674_v14 = vpop.f32.mrb[82].mxu0 }
 0x88f   : > { %13210 = vpow2.f32 %v9860_v41  ;;  %v3429_v35 = vadd.f32 %v11674_v14, %v14701_v45  ;;  %v3357_v42 = vpop.f32.mrb[83].mxu0 }
 0x890   : > { %13212 = vpow2.f32 %v9859_v15  ;;  %v3428_v20 = vadd.f32 %v3357_v42, %v14705_v29 }
 0x891   : > { %v9862_v21 = vmul.f32 -1.442695, %v3429_v35 }
 0x892   : > { %v11677_v26 = vpop.f32.mrb[84].mxu0  ;;  %v9861_v60 = vmul.f32 -1.442695, %v3428_v20 }
 0x893   : > { %13214 = vpow2.f32 %v9862_v21  ;;  %v3431_v43 = vadd.f32 %v11677_v26, %v14708_v47  ;;  %v3367_v50 = vpop.f32.mrb[85].mxu0 }
 0x894   : > { %v3430_v8 = vadd.f32 %v3367_v50, %v14711_v30 }
 0x895   : > { %v9864_v53 = vmul.f32 -1.442695, %v3431_v43 }
 0x896   : > { %v9863_v39 = vmul.f32 -1.442695, %v3430_v8  ;;  %v11680_v12 = vpop.f32.mrb[86].mxu0 }
 0x897   : > { %13216 = vpow2.f32 %v9864_v53  ;;  %v3433_v41 = vadd.f32 %v11680_v12, %v14717_v31  ;;  %v3377_v14 = vpop.f32.mrb[87].mxu0 }
 0x898   : > { %13218 = vpow2.f32 %v9863_v39  ;;  %v3432_v15 = vadd.f32 %v3377_v14, %v17337_v25 }
 0x899   : > { %v13211_v35 = vpop.eup %13210  ;;  %v9866_v42 = vmul.f32 -1.442695, %v3433_v41  ;;  %13220 = vpow2.f32 %v9861_v60 }
 0x89a   : > { %v13213_v29 = vpop.eup %13212  ;;  %v3455_v21 = vadd.f32 1.0, %v13211_v35  ;;  %v9865_v26 = vmul.f32 -1.442695, %v3432_v15  ;;  %v11683_v47 = vpop.f32.mrb[88].mxu0 }
 0x89b   : > { %v3454_v45 = vadd.f32 1.0, %v13213_v29  ;;  %13222 = vpow2.f32 %v9866_v42  ;;  %v3435_v50 = vadd.f32 %v11683_v47, %v14725_v58  ;;  %v3387_v20 = vpop.f32.mrb[89].mxu0 }
 0x89c   : > { %v3434_v53 = vadd.f32 %v3387_v20, %v14728_v44  ;;  %13224 = vrcp.f32 %v3455_v21 }
 0x89d   : > { %v13215_v43 = vpop.eup %13214  ;;  %v9868_v8 = vmul.f32 -1.442695, %v3435_v50  ;;  %13226 = vpow2.f32 %v9865_v26 }
 0x89e   : > { %v3457_v39 = vadd.f32 1.0, %v13215_v43  ;;  %v9867_v12 = vmul.f32 -1.442695, %v3434_v53  ;;  %v11686_v14 = vpop.f32.mrb[90].mxu0  ;;  %13228 = vrcp.f32 %v3454_v45 }
 0x89f   : > { %v3437_v41 = vadd.f32 %v11686_v14, %v14733_v27  ;;  %v3397_v60 = vpop.f32.mrb[91].mxu0  ;;  %13230 = vpow2.f32 %v9868_v8 }
 0x8a0   : > { %v3436_v29 = vadd.f32 %v3397_v60, %v17338_v7  ;;  %13232 = vrcp.f32 %v3457_v39 }
 0x8a1   : > { %v13217_v15 = vpop.eup %13216  ;;  %v9870_v47 = vmul.f32 -1.442695, %v3437_v41  ;;  %13234 = vpow2.f32 %v9867_v12 }
 0x8a2   : > { %v13219_v35 = vpop.eup %13218  ;;  %v3479_v42 = vadd.f32 1.0, %v13217_v15  ;;  %v9869_v20 = vmul.f32 -1.442695, %v3436_v29  ;;  %v11689_v21 = vpop.f32.mrb[92].mxu0 }
 0x8a3   : > { %v3478_v50 = vadd.f32 1.0, %v13219_v35  ;;  %13236 = vpow2.f32 %v9870_v47  ;;  %v3439_v26 = vadd.f32 %v11689_v21, %v17339_v1  ;;  %v3407_v53 = vpop.f32.mrb[93].mxu0  ;;  %v13221_v45 = vpop.eup %13220 }
 0x8a4   : > { %13238 = vrcp.f32 %v3479_v42  ;;  %v3438_v8 = vadd.f32 %v3407_v53, %v17340_v10  ;;  %v3456_v15 = vadd.f32 1.0, %v13221_v45 }
 0x8a5   : > { %v13223_v43 = vpop.eup %13222  ;;  %13240 = vrcp.f32 %v3478_v50 }
 0x8a6   : > { %v3481_v14 = vadd.f32 1.0, %v13223_v43  ;;  %13242 = vpow2.f32 %v9869_v20  ;;  %v11692_v39 = vpop.f32.mrb[94].mxu0  ;;  %v13225_v41 = vpop.eup %13224 }
 0x8a7   : > { %13244 = vtanh.f32 %v3439_v26  ;;  %v3441_v12 = vadd.f32 %v11692_v39, %v17341_v18  ;;  %v3417_v60 = vpop.f32.mrb[95].mxu0  ;;  %v13227_v29 = vpop.eup %13226 }
 0x8a8   : > { %13246 = vrcp.f32 %v3481_v14  ;;  %v13229_v47 = vpop.eup %13228  ;;  %v3480_v35 = vadd.f32 1.0, %v13227_v29  ;;  %v3440_v42 = vadd.f32 %v3417_v60, %v17342_v24 }
 0x8a9   : > { %13248 = vtanh.f32 %v3438_v8  ;;  %v13231_v21 = vpop.eup %13230 }
 0x8aa   : > { %13250 = vtanh.f32 %v3441_v12  ;;  %v13233_v50 = vpop.eup %13232  ;;  %v3503_v14 = vadd.f32 1.0, %v13231_v21 }
 0x8ab   : > { %13252 = vrcp.f32 %v3480_v35  ;;  %v13235_v53 = vpop.eup %13234 }
 0x8ac   : > { %13254 = vrcp.f32 %v3456_v15  ;;  %v3502_v24 = vadd.f32 1.0, %v13235_v53 }
 0x8ad   : > { %v13237_v20 = vpop.eup %13236  ;;  %13256 = vtanh.f32 %v3440_v42 }
 0x8ae   : > { %v13239_v26 = vpop.eup %13238  ;;  %13258 = vrcp.f32 %v3503_v14 }
 0x8af   : > { %v13241_v43 = vpop.eup %13240  ;;  %v3519_v18 = vmul.f32 %v13239_v26, %v15062_v19  ;;  %v3505_v26 = vadd.f32 1.0, %v13237_v20 }
 0x8b0   : > { %v13243_v39 = vpop.eup %13242  ;;  %v3518_v8 = vmul.f32 %v13241_v43, %v15066_v56 }
 0x8b1   : > { %v13245_v45 = vpop.eup %13244 }
 0x8b2   : > { %v13247_v10 = vpop.eup %13246  ;;  %v3523_v29 = vmul.f32 %v13245_v45, %v13225_v41  ;;  %v3504_v41 = vadd.f32 1.0, %v13243_v39 }
 0x8b3   : > { %v13249_v60 = vpop.eup %13248  ;;  %v3521_v12 = vmul.f32 %v13247_v10, %v15068_v49 }
 0x8b4   : > { %v13251_v35 = vpop.eup %13250  ;;  %v15431_v1 = vadd.f32 %v3523_v29, %v3519_v18  ;;  %v3522_v15 = vmul.f32 %v13249_v60, %v13229_v47  ;;  %v15448_v60 = vld [vmem:[%s17172_s1 + $0x88] sm:$0xff] }
 0x8b5   : > { %v13253_v42 = vpop.eup %13252  ;;  %v3525_v7 = vmul.f32 %v13251_v35, %v13233_v50  ;;  %v15464_v35 = vld [vmem:[%s17172_s1 + $0x98] sm:$0xff] }
 0x8b6   : > { %v13255_v27 = vpop.eup %13254  ;;  %v3520_v19 = vmul.f32 %v13253_v42, %v15072_v23  ;;  %13260 = vtanh.f32 %v15431_v1  ;;  %v15435_v21 = vadd.f32 %v3522_v15, %v3518_v8  ;;  %v15471_v15 = vld [vmem:[%s17172_s1 + $0xa0] sm:$0xff]  ;;  %v15478_v42 = vld [vmem:[%s17172_s1 + $0xa8] sm:$0xff] }
 0x8b7   : > { %v13257_v56 = vpop.eup %13256  ;;  %13262 = vrcp.f32 %v3502_v24  ;;  %v15437_v10 = vadd.f32 %v3525_v7, %v3521_v12  ;;  %v15455_v12 = vld [vmem:[%s17172_s1 + $0x90] sm:$0xff] }
 0x8b8   : > { %13264 = vtanh.f32 %v15435_v21  ;;  %v3524_v18 = vmul.f32 %v13257_v56, %v13255_v27  ;;  %v13259_v23 = vpop.eup %13258  ;;  %v15499_v56 = vld [vmem:[%s17172_s1 + $0xc0] sm:$0xff] }
 0x8b9   : > { %13266 = vtanh.f32 %v15437_v10 }
 0x8ba   : > { %13268 = vrcp.f32 %v3505_v26  ;;  %v15441_v49 = vadd.f32 %v3524_v18, %v3520_v19  ;;  %v15485_v19 = vld [vmem:[%s17172_s1 + $0xb0] sm:$0xff]  ;;  %v15492_v26 = vld [vmem:[%s17172_s1 + $0xb8] sm:$0xff] }
 0x8bb   : > { %13270 = vrcp.f32 %v3504_v41  ;;  %v15506_v41 = vld [vmem:[%s17172_s1 + $0xc8] sm:$0xff]  ;;  %v15513_v18 = vld [vmem:[%s17172_s1 + $0xd0] sm:$0xff] }
 0x8bc   : > { %13272 = vtanh.f32 %v15441_v49 }
 0x8c0   : > { %v13261_v47 = vpop.eup %13260 }
 0x8c1   : > { %v13263_v50 = vpop.eup %13262  ;;  %v3535_v53 = vmul.f32 %v13261_v47, %v13259_v23  ;;  %v15520_v23 = vld [vmem:[%s17172_s1 + $0xd8] sm:$0xff]  ;;  %v15527_v47 = vld [vmem:[%s17172_s1 + $0xe0] sm:$0xff] }
 0x8c2   : > { %v13265_v20 = vpop.eup %13264 }
 0x8c3   : > { %v13267_v24 = vpop.eup %13266  ;;  %v3534_v43 = vmul.f32 %v13265_v20, %v13263_v50  ;;  %v15534_v50 = vld [vmem:[%s17172_s1 + $0xe8] sm:$0xff]  ;;  %v15548_v20 = vld [vmem:[%s17172_s1 + $0xf8] sm:$0xff] }
 0x8c4   : > { %v13269_v7 = vpop.eup %13268  ;;  %17368 = vst [vmem:[#allocation21_spill] sm:$0xff] %v15548_v20 }
 0x8c5   : > { %v13271_v39 = vpop.eup %13270  ;;  %v12625_v45 = vpack.c.bf16 %v3535_v53, %v3534_v43  ;;  %v3537_v14 = vmul.f32 %v13269_v7, %v13267_v24  ;;  %v15541_v53 = vld [vmem:[%s17172_s1 + $0xf0] sm:$0xff] }
 0x8c6   : > { %v13273_v27 = vpop.eup %13272 }
 0x8c7   : > { %12626 = vmatprep.subr.bf16.mxu1 %v12625_v45  ;;  %12638 = vmatprep.subr.bf16.mxu0 %v12625_v45  ;;  %v3536_v8 = vmul.f32 %v13273_v27, %v13271_v39 }
 0x8c8   : > { %12628 = vmatpush3.bf16.msra.mxu1 %v12625_v45 }
 0x8c9   : > { %v12629_v29 = vpack.c.bf16 %v3537_v14, %v3536_v8 }
 0x8cb   : > { %12630 = vmatprep.subr.bf16.mxu1 %v12629_v29 }
 0x8cc   : > { %12632 = vmatpush3.bf16.msra.mxu1 %v12629_v29 }
 0x8cd   : > { %12646 = vmatprep.subr.bf16.mxu1 %v14229_v9 }
 0x8cf   : > { %11734 = vmatmul.mubr.msk.f32.vlgmr.msra.gmra.mrb[96].mxu1 %vm329_vm0, %v15448_v60 }
 0x8d0   : > { %11736 = vmatprep.mubr.msk.f32.mxu1 %vm329_vm0, %v15455_v12  ;;  %12648 = vmatpush3.bf16.msra.mxu1 %v14229_v9 }
 0x8d1   : > { %12666 = vmatprep.subr.bf16.mxu1 %v14229_v9 }
 0x8d3   : > { %11737 = vmatmul.mubr.msk.f32.gmra.mrb[98].mxu1 %vm329_vm0, %v15464_v35 }
 0x8d4   : > { %11739 = vmatprep.mubr.msk.f32.mxu1 %vm329_vm0, %v15471_v15 }
 0x8d7   : > { %11740 = vmatmul.mubr.msk.f32.gmra.mrb[100].mxu1 %vm329_vm0, %v15478_v42 }
 0x8d8   : > { %11742 = vmatprep.mubr.msk.f32.mxu1 %vm329_vm0, %v15485_v19 }
 0x8db   : > { %11743 = vmatmul.mubr.msk.f32.gmra.mrb[102].mxu1 %vm329_vm0, %v15492_v26 }
 0x8dc   : > { %11745 = vmatprep.mubr.msk.f32.mxu1 %vm329_vm0, %v15499_v56 }
 0x8df   : > { %11746 = vmatmul.mubr.msk.f32.gmra.mrb[104].mxu1 %vm329_vm0, %v15506_v41 }
 0x8e0   : > { %11748 = vmatprep.mubr.msk.f32.mxu1 %vm329_vm0, %v15513_v18 }
 0x8e3   : > { %11749 = vmatmul.mubr.msk.f32.gmra.mrb[106].mxu1 %vm329_vm0, %v15520_v23 }
 0x8e4   : > { %11751 = vmatprep.mubr.msk.f32.mxu1 %vm329_vm0, %v15527_v47 }
 0x8e7   : > { %11752 = vmatmul.mubr.msk.f32.gmra.mrb[108].mxu1 %vm329_vm0, %v15534_v50 }
 0x8e8   : > { %11754 = vmatprep.mubr.msk.f32.mxu1 %vm329_vm0, %v15541_v53 }
 0x8eb   : > { %11755 = vmatmul.mubr.msk.f32.gmra.mrb[110].mxu1 %vm329_vm0, %v15548_v20 }
 0x9a2   : > { %v11735_v24 = vpop.f32.mrb[96].mxu1 }
 0x9a3   : > { %v3749_v43 = vpop.f32.mrb[97].mxu1 }
 0x9a4   : > { %11761 = vmatprep.mubr.msk.f32.mxu0 %vm324_vm1, %v3749_v43 }
 0x9a5   : > { %11762 = vmatmul.mubr.msk.f32.vlgmr.msra.gmra.mrb[96].mxu0 %vm324_vm1, %v11735_v24 }
 0x9a6   : > { %12640 = vmatpush3.bf16.msra.mxu0 %v12625_v45  ;;  %v11738_v7 = vpop.f32.mrb[98].mxu1 }
 0x9a7   : > { %12642 = vmatprep.subr.bf16.mxu0 %v12629_v29  ;;  %v3759_v39 = vpop.f32.mrb[99].mxu1 }
 0x9a8   : > { %11764 = vmatprep.mubr.msk.f32.mxu0 %vm324_vm1, %v3759_v39 }
 0x9a9   : > { %11765 = vmatmul.mubr.msk.f32.gmra.mrb[98].mxu0 %vm324_vm1, %v11738_v7 }
 0x9aa   : > { %12644 = vmatpush3.bf16.msra.mxu0 %v12629_v29  ;;  %v11741_v14 = vpop.f32.mrb[100].mxu1 }
 0x9ab   : > { %v3769_v27 = vpop.f32.mrb[101].mxu1 }
 0x9ac   : > { %11767 = vmatprep.mubr.msk.f32.mxu0 %vm324_vm1, %v3769_v27  ;;  %v17374_v27 = vld [vmem:[#allocation28_spill] sm:$0xff] }
 0x9ad   : > { %11768 = vmatmul.mubr.msk.f32.gmra.mrb[100].mxu0 %vm324_vm1, %v11741_v14 }
 0x9ae   : > { %v11744_v8 = vpop.f32.mrb[102].mxu1 }
 0x9af   : > { %v3779_v20 = vpop.f32.mrb[103].mxu1 }
 0x9b0   : > { %11770 = vmatprep.mubr.msk.f32.mxu0 %vm324_vm1, %v3779_v20 }
 0x9b1   : > { %11771 = vmatmul.mubr.msk.f32.gmra.mrb[102].mxu0 %vm324_vm1, %v11744_v8 }
 0x9b2   : > { %v11747_v45 = vpop.f32.mrb[104].mxu1 }
 0x9b3   : > { %v3789_v24 = vpop.f32.mrb[105].mxu1 }
 0x9b4   : > { %11773 = vmatprep.mubr.msk.f32.mxu0 %vm324_vm1, %v3789_v24  ;;  %v17375_v24 = vld [vmem:[#allocation25_spill] sm:$0xff] }
 0x9b5   : > { %11774 = vmatmul.mubr.msk.f32.gmra.mrb[104].mxu0 %vm324_vm1, %v11747_v45 }
 0x9b6   : > { %v11750_v43 = vpop.f32.mrb[106].mxu1 }
 0x9b7   : > { %v3799_v29 = vpop.f32.mrb[107].mxu1 }
 0x9b8   : > { %11776 = vmatprep.mubr.msk.f32.mxu0 %vm324_vm1, %v3799_v29 }
 0x9b9   : > { %11777 = vmatmul.mubr.msk.f32.gmra.mrb[106].mxu0 %vm324_vm1, %v11750_v43 }
 0x9ba   : > { %v11753_v7 = vpop.f32.mrb[108].mxu1 }
 0x9bb   : > { %v3809_v39 = vpop.f32.mrb[109].mxu1 }
 0x9bc   : > { %11779 = vmatprep.mubr.msk.f32.mxu0 %vm324_vm1, %v3809_v39 }
 0x9bd   : > { %11780 = vmatmul.mubr.msk.f32.gmra.mrb[108].mxu0 %vm324_vm1, %v11753_v7  ;;  %v17376_v7 = vld [vmem:[#allocation26_spill] sm:$0xff] }
 0x9be   : > { %v11756_v20 = vpop.f32.mrb[110].mxu1 }
 0x9bf   : > { %v3819_v14 = vpop.f32.mrb[111].mxu1 }
 0x9c0   : > { %11782 = vmatprep.mubr.msk.f32.mxu0 %vm324_vm1, %v3819_v14 }
 0x9c1   : > { %11783 = vmatmul.mubr.msk.f32.gmra.mrb[110].mxu0 %vm324_vm1, %v11756_v20 }
 0x9c2   : > { %11793 = vmatprep.mubr.msk.f32.mxu0 %vm329_vm0, %v15127_v5  ;;  %v17369_v5 = vld [vmem:[#allocation3_spill] sm:$0xff] }
 0x9c5   : > { %11794 = vmatmul.mubr.msk.f32.vlgmr.msra.gmra.mrb[112].mxu0 %vm329_vm0, %v15134_v46  ;;  %v17370_v46 = vld [vmem:[#allocation4_spill] sm:$0xff] }
 0x9c6   : > { %11796 = vmatprep.mubr.msk.f32.mxu0 %vm329_vm0, %v15141_v17 }
 0x9c9   : > { %11797 = vmatmul.mubr.msk.f32.gmra.mrb[114].mxu0 %vm329_vm0, %v15148_v11  ;;  %v17371_v11 = vld [vmem:[#allocation23_spill] sm:$0xff] }
 0x9ca   : > { %11799 = vmatprep.mubr.msk.f32.mxu0 %vm329_vm0, %v15155_v54 }
 0x9cd   : > { %11800 = vmatmul.mubr.msk.f32.gmra.mrb[116].mxu0 %vm329_vm0, %v15162_v28 }
 0x9ce   : > { %11802 = vmatprep.mubr.msk.f32.mxu0 %vm329_vm0, %v15169_v4  ;;  %v17372_v4 = vld [vmem:[#allocation24_spill] sm:$0xff] }
 0x9d1   : > { %11803 = vmatmul.mubr.msk.f32.gmra.mrb[118].mxu0 %vm329_vm0, %v15176_v37 }
 0x9d2   : > { %11805 = vmatprep.mubr.msk.f32.mxu0 %vm329_vm0, %v15183_v62 }
 0x9d5   : > { %11806 = vmatmul.mubr.msk.f32.gmra.mrb[120].mxu0 %vm329_vm0, %v15190_v38 }
 0x9d6   : > { %11808 = vmatprep.mubr.msk.f32.mxu0 %vm329_vm0, %v15197_v40 }
 0x9d9   : > { %11809 = vmatmul.mubr.msk.f32.gmra.mrb[122].mxu0 %vm329_vm0, %v15204_v2  ;;  %v17373_v2 = vld [vmem:[#allocation27_spill] sm:$0xff] }
 0x9da   : > { %11811 = vmatprep.mubr.msk.f32.mxu0 %vm329_vm0, %v15211_v6 }
 0x9dd   : > { %11812 = vmatmul.mubr.msk.f32.gmra.mrb[124].mxu0 %vm329_vm0, %v15218_v36 }
 0x9de   : > { %11814 = vmatprep.mubr.msk.f32.mxu0 %vm329_vm0, %v15225_v13 }
 0x9e1   : > { %11815 = vmatmul.mubr.msk.f32.gmra.mrb[126].mxu0 %vm329_vm0, %v17369_v5 }
 0x9e2   : > { %11853 = vmatprep.mubr.msk.f32.mxu0 %vm329_vm0, %v17370_v46 }
 0xa78   : > { %v11763_v17 = vpop.f32.mrb[96].mxu0 }
 0xa79   : > { %v3948_v54 = vadd.f32 %v11763_v17, %v17371_v11  ;;  %v3942_v28 = vpop.f32.mrb[97].mxu0  ;;  %v17377_v17 = vld [vmem:[#allocation29_spill] sm:$0xff] }
 0xa7a   : > { %v3943_v37 = vadd.f32 %v3942_v28, %v17372_v4 }
 0xa7b   : > { %v9920_v62 = vmul.f32 -1.442695, %v3948_v54 }
 0xa7c   : > { %v9919_v38 = vmul.f32 -1.442695, %v3943_v37  ;;  %v11766_v40 = vpop.f32.mrb[98].mxu0  ;;  %v17378_v37 = vld [vmem:[#allocation30_spill] sm:$0xff] }
 0xa7d   : > { %13274 = vpow2.f32 %v9920_v62  ;;  %v3958_v6 = vadd.f32 %v11766_v40, %v17373_v2  ;;  %v3952_v36 = vpop.f32.mrb[99].mxu0 }
 0xa7e   : > { %13276 = vpow2.f32 %v9919_v38  ;;  %v3953_v8 = vadd.f32 %v3952_v36, %v17374_v27 }
 0xa7f   : > { %v9922_v13 = vmul.f32 -1.442695, %v3958_v6 }
 0xa80   : > { %v11769_v45 = vpop.f32.mrb[100].mxu0  ;;  %v9921_v14 = vmul.f32 -1.442695, %v3953_v8 }
 0xa81   : > { %13278 = vpow2.f32 %v9922_v13  ;;  %v3968_v43 = vadd.f32 %v11769_v45, %v17375_v24  ;;  %v3962_v29 = vpop.f32.mrb[101].mxu0 }
 0xa82   : > { %v3963_v39 = vadd.f32 %v3962_v29, %v17376_v7 }
 0xa83   : > { %v9924_v20 = vmul.f32 -1.442695, %v3968_v43  ;;  %v17379_v43 = vld [vmem:[#allocation31_spill] sm:$0xff] }
 0xa84   : > { %v9923_v5 = vmul.f32 -1.442695, %v3963_v39  ;;  %v11772_v46 = vpop.f32.mrb[102].mxu0  ;;  %v17380_v39 = vld [vmem:[#allocation32_spill] sm:$0xff] }
 0xa85   : > { %13280 = vpow2.f32 %v9924_v20  ;;  %v3978_v54 = vadd.f32 %v11772_v46, %v17377_v17  ;;  %v3972_v28 = vpop.f32.mrb[103].mxu0 }
 0xa86   : > { %13282 = vpow2.f32 %v9923_v5  ;;  %v3973_v62 = vadd.f32 %v3972_v28, %v17378_v37 }
 0xa87   : > { %v13275_v38 = vpop.eup %13274  ;;  %v9926_v40 = vmul.f32 -1.442695, %v3978_v54  ;;  %13284 = vpow2.f32 %v9921_v14  ;;  %v17381_v54 = vld [vmem:[#allocation35_spill] sm:$0xff] }
 0xa88   : > { %v13277_v6 = vpop.eup %13276  ;;  %v4034_v36 = vadd.f32 1.0, %v13275_v38  ;;  %v9925_v13 = vmul.f32 -1.442695, %v3973_v62  ;;  %v11775_v45 = vpop.f32.mrb[104].mxu0  ;;  %v17382_v62 = vld [vmem:[#allocation36_spill] sm:$0xff] }
 0xa89   : > { %v4033_v24 = vadd.f32 1.0, %v13277_v6  ;;  %13286 = vpow2.f32 %v9926_v40  ;;  %v3988_v8 = vadd.f32 %v11775_v45, %v17379_v43  ;;  %v3982_v29 = vpop.f32.mrb[105].mxu0 }
 0xa8a   : > { %v3983_v20 = vadd.f32 %v3982_v29, %v17380_v39  ;;  %13288 = vrcp.f32 %v4034_v36 }
 0xa8b   : > { %v13279_v7 = vpop.eup %13278  ;;  %v9928_v46 = vmul.f32 -1.442695, %v3988_v8  ;;  %13290 = vpow2.f32 %v9925_v13 }
 0xa8c   : > { %v4036_v5 = vadd.f32 1.0, %v13279_v7  ;;  %v9927_v28 = vmul.f32 -1.442695, %v3983_v20  ;;  %v11778_v37 = vpop.f32.mrb[106].mxu0  ;;  %13292 = vrcp.f32 %v4033_v24  ;;  %v17383_v7 = vld [vmem:[#allocation33_spill] sm:$0xff] }
 0xa8d   : > { %v3998_v38 = vadd.f32 %v11778_v37, %v17381_v54  ;;  %v3992_v14 = vpop.f32.mrb[107].mxu0  ;;  %13294 = vpow2.f32 %v9928_v46  ;;  %v17384_v46 = vld [vmem:[#allocation34_spill] sm:$0xff] }
 0xa8e   : > { %v3993_v6 = vadd.f32 %v3992_v14, %v17382_v62  ;;  %13296 = vrcp.f32 %v4036_v5 }
 0xa8f   : > { %v13281_v40 = vpop.eup %13280  ;;  %v9930_v45 = vmul.f32 -1.442695, %v3998_v38  ;;  %13298 = vpow2.f32 %v9927_v28 }
 0xa90   : > { %v13283_v43 = vpop.eup %13282  ;;  %v4058_v17 = vadd.f32 1.0, %v13281_v40  ;;  %v9929_v29 = vmul.f32 -1.442695, %v3993_v6  ;;  %v11781_v36 = vpop.f32.mrb[108].mxu0  ;;  %v17385_v40 = vld [vmem:[#allocation37_spill] sm:$0xff] }
 0xa91   : > { %v4057_v8 = vadd.f32 1.0, %v13283_v43  ;;  %13300 = vpow2.f32 %v9930_v45  ;;  %v4008_v13 = vadd.f32 %v11781_v36, %v17383_v7  ;;  %v4002_v20 = vpop.f32.mrb[109].mxu0  ;;  %v13285_v24 = vpop.eup %13284  ;;  %v17386_v7 = vld [vmem:[#allocation38_spill] sm:$0xff] }
 0xa92   : > { %13302 = vrcp.f32 %v4058_v17  ;;  %v4003_v54 = vadd.f32 %v4002_v20, %v17384_v46  ;;  %v4035_v43 = vadd.f32 1.0, %v13285_v24 }
 0xa93   : > { %v13287_v37 = vpop.eup %13286  ;;  %13304 = vrcp.f32 %v4057_v8 }
 0xa94   : > { %v4060_v14 = vadd.f32 1.0, %v13287_v37  ;;  %13306 = vpow2.f32 %v9929_v29  ;;  %v11784_v5 = vpop.f32.mrb[110].mxu0  ;;  %v13289_v38 = vpop.eup %13288 }
 0xa95   : > { %13308 = vtanh.f32 %v4008_v13  ;;  %v4018_v28 = vadd.f32 %v11784_v5, %v17385_v40  ;;  %v4012_v6 = vpop.f32.mrb[111].mxu0  ;;  %v13291_v62 = vpop.eup %13290 }
 0xa96   : > { %13310 = vrcp.f32 %v4060_v14  ;;  %v13293_v45 = vpop.eup %13292  ;;  %v4059_v36 = vadd.f32 1.0, %v13291_v62  ;;  %v4013_v17 = vadd.f32 %v4012_v6, %v17386_v7 }
 0xa97   : > { %13312 = vtanh.f32 %v4003_v54  ;;  %v13295_v39 = vpop.eup %13294 }
 0xa98   : > { %13314 = vtanh.f32 %v4018_v28  ;;  %v11795_v8 = vpop.f32.mrb[112].mxu0  ;;  %v13297_v20 = vpop.eup %13296  ;;  %v4082_v6 = vadd.f32 1.0, %v13295_v39 }
 0xa99   : > { %13316 = vrcp.f32 %v4059_v36  ;;  %v4188_v29 = vpop.f32.mrb[113].mxu0  ;;  %v13299_v37 = vpop.eup %13298 }
 0xa9a   : > { %13318 = vrcp.f32 %v4035_v43  ;;  %11821 = vmatprep.mubr.msk.f32.mxu1 %vm324_vm1, %v4188_v29  ;;  %v4081_v43 = vadd.f32 1.0, %v13299_v37 }
 0xa9b   : > { %v13301_v13 = vpop.eup %13300  ;;  %13320 = vtanh.f32 %v4013_v17  ;;  %11822 = vmatmul.mubr.msk.f32.vlgmr.msra.gmra.mrb[112].mxu1 %vm324_vm1, %v11795_v8 }
 0xa9c   : > { %v13303_v24 = vpop.eup %13302  ;;  %v11798_v14 = vpop.f32.mrb[114].mxu0  ;;  %12668 = vmatpush3.bf16.msra.mxu1 %v14229_v9  ;;  %v4084_v27 = vadd.f32 1.0, %v13301_v13  ;;  %13322 = vrcp.f32 %v4082_v6 }
 0xa9d   : > { %v13305_v54 = vpop.eup %13304  ;;  %v4198_v62 = vpop.f32.mrb[115].mxu0  ;;  %v4098_v28 = vmul.f32 %v13303_v24, %v15267_v63  ;;  %13324 = vrcp.f32 %v4081_v43 }
 0xa9e   : > { %v13307_v5 = vpop.eup %13306  ;;  %11824 = vmatprep.mubr.msk.f32.mxu1 %vm324_vm1, %v4198_v62  ;;  %v4097_v17 = vmul.f32 %v13305_v54, %v15273_v3 }
 0xa9f   : > { %v13309_v36 = vpop.eup %13308  ;;  %11825 = vmatmul.mubr.msk.f32.gmra.mrb[114].mxu1 %vm324_vm1, %v11798_v14  ;;  %v4083_v54 = vadd.f32 1.0, %v13307_v5 }
 0xaa0   : > { %v13311_v29 = vpop.eup %13310  ;;  %v4102_v8 = vmul.f32 %v13309_v36, %v13289_v38  ;;  %v11801_v7 = vpop.f32.mrb[116].mxu0 }
 0xaa1   : > { %v13313_v40 = vpop.eup %13312  ;;  %v4100_v46 = vmul.f32 %v13311_v29, %v15275_v48  ;;  %v4208_v2 = vpop.f32.mrb[117].mxu0 }
 0xaa2   : > { %v13315_v4 = vpop.eup %13314  ;;  %v15626_v63 = vadd.f32 %v4102_v8, %v4098_v28  ;;  %v4101_v39 = vmul.f32 %v13313_v40, %v13293_v45  ;;  %11827 = vmatprep.mubr.msk.f32.mxu1 %vm324_vm1, %v4208_v2 }
 0xaa3   : > { %v13317_v37 = vpop.eup %13316  ;;  %v4104_v24 = vmul.f32 %v13315_v4, %v13297_v20  ;;  %11828 = vmatmul.mubr.msk.f32.gmra.mrb[116].mxu1 %vm324_vm1, %v11801_v7 }
 0xaa4   : > { %v13319_v3 = vpop.eup %13318  ;;  %v4099_v38 = vmul.f32 %v13317_v37, %v15281_v0  ;;  %13326 = vtanh.f32 %v15626_v63  ;;  %v15632_v48 = vadd.f32 %v4101_v39, %v4097_v17  ;;  %v11804_v13 = vpop.f32.mrb[118].mxu0 }
 0xaa5   : > { %v13321_v14 = vpop.eup %13320  ;;  %13328 = vrcp.f32 %v4084_v27  ;;  %v15634_v62 = vadd.f32 %v4104_v24, %v4100_v46  ;;  %v4218_v40 = vpop.f32.mrb[119].mxu0 }
 0xaa6   : > { %13330 = vtanh.f32 %v15632_v48  ;;  %v4103_v2 = vmul.f32 %v13321_v14, %v13319_v3  ;;  %11830 = vmatprep.mubr.msk.f32.mxu1 %vm324_vm1, %v4218_v40  ;;  %v13323_v27 = vpop.eup %13322 }
 0xaa7   : > { %13332 = vtanh.f32 %v15634_v62  ;;  %11831 = vmatmul.mubr.msk.f32.gmra.mrb[118].mxu1 %vm324_vm1, %v11804_v13  ;;  %v13325_v45 = vpop.eup %13324 }
 0xaa8   : > { %v15640_v0 = vadd.f32 %v4103_v2, %v4099_v38  ;;  %v11807_v4 = vpop.f32.mrb[120].mxu0  ;;  %13334 = vrcp.f32 %v4083_v54 }
 0xaa9   : > { %v4228_v7 = vpop.f32.mrb[121].mxu0 }
 0xaaa   : > { %13336 = vtanh.f32 %v15640_v0  ;;  %11833 = vmatprep.mubr.msk.f32.mxu1 %vm324_vm1, %v4228_v7 }
 0xaab   : > { %11834 = vmatmul.mubr.msk.f32.gmra.mrb[120].mxu1 %vm324_vm1, %v11807_v4 }
 0xaac   : > { %v11810_v46 = vpop.f32.mrb[122].mxu0 }
 0xaad   : > { %v4238_v20 = vpop.f32.mrb[123].mxu0 }
 0xaae   : > { %v13327_v5 = vpop.eup %13326  ;;  %11836 = vmatprep.mubr.msk.f32.mxu1 %vm324_vm1, %v4238_v20 }
 0xaaf   : > { %v13329_v28 = vpop.eup %13328  ;;  %11837 = vmatmul.mubr.msk.f32.gmra.mrb[122].mxu1 %vm324_vm1, %v11810_v46  ;;  %v4114_v6 = vmul.f32 %v13327_v5, %v13323_v27  ;;  %v17394_v27 = vld [vmem:[#allocation10_spill] sm:$0xff]  ;;  %v17395_v5 = vld [vmem:[#allocation11_spill] sm:$0xff] }
 0xab0   : > { %v13331_v36 = vpop.eup %13330  ;;  %v11813_v43 = vpop.f32.mrb[124].mxu0 }
 0xab1   : > { %v13333_v29 = vpop.eup %13332  ;;  %v4248_v17 = vpop.f32.mrb[125].mxu0  ;;  %v4113_v8 = vmul.f32 %v13331_v36, %v13325_v45  ;;  %9932 = vst.msk [vmem:[%s14216_s13 + $0x68] sm:$0xff] %vm324_vm1, %v4114_v6  ;;  %v17396_v36 = vld [vmem:[#allocation12_spill] sm:$0xff] }
 0xab2   : > { %11839 = vmatprep.mubr.msk.f32.mxu1 %vm324_vm1, %v4248_v17  ;;  %v4116_v39 = vmul.f32 %v13333_v29, %v13329_v28  ;;  %v13335_v37 = vpop.eup %13334 }
 0xab3   : > { %9931 = vst.msk [vmem:[%s14216_s13 + $0x60] sm:$0xff] %vm324_vm1, %v4113_v8  ;;  %v12649_v24 = vpack.c.bf16 %v4114_v6, %v4113_v8  ;;  %11840 = vmatmul.mubr.msk.f32.gmra.mrb[124].mxu1 %vm324_vm1, %v11813_v43 }
 0xab4   : > { %v13337_v3 = vpop.eup %13336  ;;  %v11816_v38 = vpop.f32.mrb[126].mxu0  ;;  %9934 = vst.msk [vmem:[%s14216_s13 + $0x78] sm:$0xff] %vm324_vm1, %v4116_v39 }
 0xab5   : > { %12650 = vmatprep.subr.bf16.mxu0 %v12649_v24  ;;  %v4258_v13 = vpop.f32.mrb[127].mxu0  ;;  %v4115_v14 = vmul.f32 %v13337_v3, %v13335_v37 }
 0xab6   : > { %12652 = vmatpush3.bf16.msra.mxu0 %v12649_v24  ;;  %11842 = vmatprep.mubr.msk.f32.mxu1 %vm324_vm1, %v4258_v13 }
 0xab7   : > { %9933 = vst.msk [vmem:[%s14216_s13 + $0x70] sm:$0xff] %vm324_vm1, %v4115_v14  ;;  %v12653_v54 = vpack.c.bf16 %v4116_v39, %v4115_v14  ;;  %11843 = vmatmul.mubr.msk.f32.gmra.mrb[126].mxu1 %vm324_vm1, %v11816_v38 }
 0xab9   : > { %12654 = vmatprep.subr.bf16.mxu0 %v12653_v54 }
 0xaba   : > { %12656 = vmatpush3.bf16.msra.mxu0 %v12653_v54 }
 0xabd   : > { %11854 = vmatmul.mubr.msk.f32.vlgmr.msra.gmra.mrb[128].mxu0 %vm329_vm0, %v15303_v51  ;;  %v17387_v51 = vld [vmem:[#allocation5_spill] sm:$0xff] }
 0xabe   : > { %11856 = vmatprep.mubr.msk.f32.mxu0 %vm329_vm0, %v15310_v61  ;;  %v17388_v61 = vld [vmem:[#allocation6_spill] sm:$0xff] }
 0xac1   : > { %11857 = vmatmul.mubr.msk.f32.gmra.mrb[130].mxu0 %vm329_vm0, %v15317_v57  ;;  %v17389_v57 = vld [vmem:[#allocation7_spill] sm:$0xff] }
 0xac2   : > { %11859 = vmatprep.mubr.msk.f32.mxu0 %vm329_vm0, %v15324_v22  ;;  %v17390_v22 = vld [vmem:[#allocation8_spill] sm:$0xff] }
 0xac5   : > { %11860 = vmatmul.mubr.msk.f32.gmra.mrb[132].mxu0 %vm329_vm0, %v15331_v59  ;;  %v17391_v59 = vld [vmem:[#allocation13_spill] sm:$0xff] }
 0xac6   : > { %11862 = vmatprep.mubr.msk.f32.mxu0 %vm329_vm0, %v15338_v52  ;;  %v17392_v52 = vld [vmem:[#allocation20_spill] sm:$0xff] }
 0xac9   : > { %11863 = vmatmul.mubr.msk.f32.gmra.mrb[134].mxu0 %vm329_vm0, %v15345_v16 }
 0xaca   : > { %11865 = vmatprep.mubr.msk.f32.mxu0 %vm329_vm0, %v15352_v34  ;;  %v17393_v34 = vld [vmem:[#allocation9_spill] sm:$0xff] }
 0xacd   : > { %11866 = vmatmul.mubr.msk.f32.gmra.mrb[136].mxu0 %vm329_vm0, %v15359_v33 }
 0xace   : > { %11868 = vmatprep.mubr.msk.f32.mxu0 %vm329_vm0, %v15366_v32 }
 0xad1   : > { %11869 = vmatmul.mubr.msk.f32.gmra.mrb[138].mxu0 %vm329_vm0, %v17387_v51 }
 0xad2   : > { %11871 = vmatprep.mubr.msk.f32.mxu0 %vm329_vm0, %v17388_v61 }
 0xad5   : > { %11872 = vmatmul.mubr.msk.f32.gmra.mrb[140].mxu0 %vm329_vm0, %v17389_v57 }
 0xad6   : > { %11874 = vmatprep.mubr.msk.f32.mxu0 %vm329_vm0, %v17390_v22 }
 0xad9   : > { %11875 = vmatmul.mubr.msk.f32.gmra.mrb[142].mxu0 %vm329_vm0, %v17391_v59 }
 0xada   : > { %11885 = vmatprep.mubr.msk.f32.mxu0 %vm329_vm0, %v17392_v52 }
 0xb6e   : > { %v11823_v16 = vpop.f32.mrb[112].mxu1 }
 0xb6f   : > { %v4461_v33 = vadd.f32 %v11823_v16, %v17393_v34  ;;  %v4381_v32 = vpop.f32.mrb[113].mxu1 }
 0xb70   : > { %v4460_v40 = vadd.f32 %v4381_v32, %v14696_v55 }
 0xb71   : > { %v9968_v2 = vmul.f32 -1.442695, %v4461_v33 }
 0xb72   : > { %v9967_v4 = vmul.f32 -1.442695, %v4460_v40  ;;  %v11826_v7 = vpop.f32.mrb[114].mxu1 }
 0xb73   : > { %13338 = vpow2.f32 %v9968_v2  ;;  %v4463_v46 = vadd.f32 %v11826_v7, %v17394_v27  ;;  %v4391_v45 = vpop.f32.mrb[115].mxu1 }
 0xb74   : > { %13340 = vpow2.f32 %v9967_v4  ;;  %v4462_v28 = vadd.f32 %v4391_v45, %v17395_v5 }
 0xb75   : > { %v9970_v20 = vmul.f32 -1.442695, %v4463_v46  ;;  %v17397_v46 = vld [vmem:[#allocation14_spill] sm:$0xff] }
 0xb76   : > { %v11829_v6 = vpop.f32.mrb[116].mxu1  ;;  %v9969_v39 = vmul.f32 -1.442695, %v4462_v28  ;;  %v17398_v28 = vld [vmem:[#allocation15_spill] sm:$0xff] }
 0xb77   : > { %13342 = vpow2.f32 %v9970_v20  ;;  %v4465_v43 = vadd.f32 %v11829_v6, %v17396_v36  ;;  %v4401_v29 = vpop.f32.mrb[117].mxu1 }
 0xb78   : > { %v4464_v17 = vadd.f32 %v4401_v29, %v14711_v30 }
 0xb79   : > { %v9972_v8 = vmul.f32 -1.442695, %v4465_v43 }
 0xb7a   : > { %v9971_v37 = vmul.f32 -1.442695, %v4464_v17  ;;  %v11832_v24 = vpop.f32.mrb[118].mxu1 }
 0xb7b   : > { %13344 = vpow2.f32 %v9972_v8  ;;  %v4467_v3 = vadd.f32 %v11832_v24, %v14717_v31  ;;  %v4411_v38 = vpop.f32.mrb[119].mxu1 }
 0xb7c   : > { %13346 = vpow2.f32 %v9971_v37  ;;  %v4466_v13 = vadd.f32 %v4411_v38, %v17337_v25 }
 0xb7d   : > { %v13339_v14 = vpop.eup %13338  ;;  %v9974_v54 = vmul.f32 -1.442695, %v4467_v3  ;;  %13348 = vpow2.f32 %v9969_v39  ;;  %v17399_v3 = vld [vmem:[#allocation16_spill] sm:$0xff] }
 0xb7e   : > { %v13341_v51 = vpop.eup %13340  ;;  %v4489_v61 = vadd.f32 1.0, %v13339_v14  ;;  %v9973_v57 = vmul.f32 -1.442695, %v4466_v13  ;;  %v11835_v22 = vpop.f32.mrb[120].mxu1 }
 0xb7f   : > { %v4488_v59 = vadd.f32 1.0, %v13341_v51  ;;  %13350 = vpow2.f32 %v9974_v54  ;;  %v4469_v52 = vadd.f32 %v11835_v22, %v14725_v58  ;;  %v4421_v16 = vpop.f32.mrb[121].mxu1  ;;  %v17400_v51 = vld [vmem:[#allocation17_spill] sm:$0xff] }
 0xb80   : > { %v4468_v33 = vadd.f32 %v4421_v16, %v14728_v44  ;;  %13352 = vrcp.f32 %v4489_v61 }
 0xb81   : > { %v13343_v32 = vpop.eup %13342  ;;  %v9976_v40 = vmul.f32 -1.442695, %v4469_v52  ;;  %13354 = vpow2.f32 %v9973_v57  ;;  %v17401_v52 = vld [vmem:[#allocation18_spill] sm:$0xff] }
 0xb82   : > { %v4491_v2 = vadd.f32 1.0, %v13343_v32  ;;  %v9975_v4 = vmul.f32 -1.442695, %v4468_v33  ;;  %v11838_v7 = vpop.f32.mrb[122].mxu1  ;;  %13356 = vrcp.f32 %v4488_v59 }
 0xb83   : > { %v4471_v45 = vadd.f32 %v11838_v7, %v17397_v46  ;;  %v4431_v20 = vpop.f32.mrb[123].mxu1  ;;  %13358 = vpow2.f32 %v9976_v40  ;;  %v17402_v7 = vld [vmem:[#allocation19_spill] sm:$0xff] }
 0xb84   : > { %v4470_v6 = vadd.f32 %v4431_v20, %v17398_v28  ;;  %13360 = vrcp.f32 %v4491_v2 }
 0xb85   : > { %v13345_v43 = vpop.eup %13344  ;;  %v9978_v29 = vmul.f32 -1.442695, %v4471_v45  ;;  %13362 = vpow2.f32 %v9975_v4 }
 0xb86   : > { %v13347_v17 = vpop.eup %13346  ;;  %v4513_v8 = vadd.f32 1.0, %v13345_v43  ;;  %v9977_v39 = vmul.f32 -1.442695, %v4470_v6  ;;  %v11841_v37 = vpop.f32.mrb[124].mxu1 }
 0xb87   : > { %v4512_v24 = vadd.f32 1.0, %v13347_v17  ;;  %13364 = vpow2.f32 %v9978_v29  ;;  %v4473_v38 = vadd.f32 %v11841_v37, %v17399_v3  ;;  %v4441_v13 = vpop.f32.mrb[125].mxu1  ;;  %v13349_v14 = vpop.eup %13348 }
 0xb88   : > { %13366 = vrcp.f32 %v4513_v8  ;;  %v4472_v61 = vadd.f32 %v4441_v13, %v17400_v51  ;;  %v4490_v40 = vadd.f32 1.0, %v13349_v14 }
 0xb89   : > { %v13351_v54 = vpop.eup %13350  ;;  %13368 = vrcp.f32 %v4512_v24 }
 0xb8a   : > { %v4515_v57 = vadd.f32 1.0, %v13351_v54  ;;  %13370 = vpow2.f32 %v9977_v39  ;;  %v11844_v22 = vpop.f32.mrb[126].mxu1  ;;  %v13353_v59 = vpop.eup %13352 }
 0xb8b   : > { %13372 = vtanh.f32 %v4473_v38  ;;  %v4475_v16 = vadd.f32 %v11844_v22, %v17401_v52  ;;  %v4451_v33 = vpop.f32.mrb[127].mxu1  ;;  %v13355_v32 = vpop.eup %13354 }
 0xb8c   : > { %13374 = vrcp.f32 %v4515_v57  ;;  %v13357_v2 = vpop.eup %13356  ;;  %v4514_v4 = vadd.f32 1.0, %v13355_v32  ;;  %v4474_v45 = vadd.f32 %v4451_v33, %v17402_v7 }
 0xb8d   : > { %13376 = vtanh.f32 %v4472_v61  ;;  %v13359_v20 = vpop.eup %13358 }
 0xb8e   : > { %13378 = vtanh.f32 %v4475_v16  ;;  %v13361_v6 = vpop.eup %13360  ;;  %v4537_v38 = vadd.f32 1.0, %v13359_v20 }
 0xb8f   : > { %13380 = vrcp.f32 %v4514_v4  ;;  %v13363_v43 = vpop.eup %13362 }
 0xb90   : > { %13382 = vrcp.f32 %v4490_v40  ;;  %v4536_v22 = vadd.f32 1.0, %v13363_v43 }
 0xb91   : > { %v13365_v29 = vpop.eup %13364  ;;  %13384 = vtanh.f32 %v4474_v45 }
 0xb92   : > { %v13367_v17 = vpop.eup %13366  ;;  %13386 = vrcp.f32 %v4537_v38 }
 0xb93   : > { %v13369_v8 = vpop.eup %13368  ;;  %v4553_v37 = vmul.f32 %v13367_v17, %v15431_v1  ;;  %v4539_v17 = vadd.f32 1.0, %v13365_v29 }
 0xb94   : > { %v13371_v39 = vpop.eup %13370  ;;  %v4552_v14 = vmul.f32 %v13369_v8, %v15435_v21 }
 0xb95   : > { %v13373_v24 = vpop.eup %13372 }
 0xb96   : > { %v13375_v13 = vpop.eup %13374  ;;  %v4557_v54 = vmul.f32 %v13373_v24, %v13353_v59  ;;  %v4538_v59 = vadd.f32 1.0, %v13371_v39 }
 0xb97   : > { %v13377_v61 = vpop.eup %13376  ;;  %v4555_v57 = vmul.f32 %v13375_v13, %v15437_v10 }
 0xb98   : > { %v13379_v16 = vpop.eup %13378  ;;  %v15710_v33 = vadd.f32 %v4557_v54, %v4553_v37  ;;  %v4556_v32 = vmul.f32 %v13377_v61, %v13357_v2 }
 0xb99   : > { %v13381_v40 = vpop.eup %13380  ;;  %v4559_v4 = vmul.f32 %v13379_v16, %v13361_v6 }
 0xb9a   : > { %v13383_v45 = vpop.eup %13382  ;;  %v4554_v1 = vmul.f32 %v13381_v40, %v15441_v49  ;;  %13388 = vtanh.f32 %v15710_v33  ;;  %v15714_v20 = vadd.f32 %v4556_v32, %v4552_v14 }
 0xb9b   : > { %v13385_v21 = vpop.eup %13384  ;;  %13390 = vrcp.f32 %v4536_v22  ;;  %v15716_v10 = vadd.f32 %v4559_v4, %v4555_v57  ;;  %v15775_v4 = vld [vmem:[%s17173_s2] sm:$0xff] }
 0xb9c   : > { %13392 = vtanh.f32 %v15714_v20  ;;  %v4558_v43 = vmul.f32 %v13385_v21, %v13383_v45  ;;  %v13387_v49 = vpop.eup %13386  ;;  %v15782_v45 = vld [vmem:[%s17173_s2 + $0x8] sm:$0xff]  ;;  %v15803_v21 = vld [vmem:[%s17173_s2 + $0x20] sm:$0xff] }
 0xb9d   : > { %13394 = vtanh.f32 %v15716_v10 }
 0xb9e   : > { %13396 = vrcp.f32 %v4539_v17  ;;  %v15720_v2 = vadd.f32 %v4558_v43, %v4554_v1  ;;  %v15789_v1 = vld [vmem:[%s17173_s2 + $0x10] sm:$0xff]  ;;  %v15796_v17 = vld [vmem:[%s17173_s2 + $0x18] sm:$0xff] }
 0xb9f   : > { %13398 = vrcp.f32 %v4538_v59  ;;  %v15810_v59 = vld [vmem:[%s17173_s2 + $0x28] sm:$0xff]  ;;  %v15817_v43 = vld [vmem:[%s17173_s2 + $0x30] sm:$0xff] }
 0xba0   : > { %13400 = vtanh.f32 %v15720_v2 }
 0xba4   : > { %v13389_v6 = vpop.eup %13388 }
 0xba5   : > { %v13391_v29 = vpop.eup %13390  ;;  %v4569_v8 = vmul.f32 %v13389_v6, %v13387_v49  ;;  %v15824_v49 = vld [vmem:[%s17173_s2 + $0x38] sm:$0xff]  ;;  %v15831_v6 = vld [vmem:[%s17173_s2 + $0x40] sm:$0xff] }
 0xba6   : > { %v13393_v37 = vpop.eup %13392 }
 0xba7   : > { %v13395_v24 = vpop.eup %13394  ;;  %v4568_v39 = vmul.f32 %v13393_v37, %v13391_v29  ;;  %v15838_v29 = vld [vmem:[%s17173_s2 + $0x48] sm:$0xff]  ;;  %v15852_v37 = vld [vmem:[%s17173_s2 + $0x58] sm:$0xff] }
 0xba8   : > { %v13397_v38 = vpop.eup %13396 }
 0xba9   : > { %v13399_v13 = vpop.eup %13398  ;;  %v12657_v14 = vpack.c.bf16 %v4569_v8, %v4568_v39  ;;  %v4571_v54 = vmul.f32 %v13397_v38, %v13395_v24  ;;  %v15845_v8 = vld [vmem:[%s17173_s2 + $0x50] sm:$0xff]  ;;  %v15859_v24 = vld [vmem:[%s17173_s2 + $0x60] sm:$0xff]  ;;  %v15866_v39 = vld [vmem:[%s17173_s2 + $0x68] sm:$0xff] }
 0xbaa   : > { %v13401_v61 = vpop.eup %13400  ;;  %v15873_v38 = vld [vmem:[%s17173_s2 + $0x70] sm:$0xff] }
 0xbab   : > { %12658 = vmatprep.subr.bf16.mxu0 %v12657_v14  ;;  %12670 = vmatprep.subr.bf16.mxu1 %v12657_v14  ;;  %v4570_v57 = vmul.f32 %v13401_v61, %v13399_v13  ;;  %v15880_v13 = vld [vmem:[%s17173_s2 + $0x78] sm:$0xff] }
 0xbac   : > { %12660 = vmatpush3.bf16.msra.mxu0 %v12657_v14  ;;  %17404 = vst [vmem:[#allocation22_spill] sm:$0xff] %v15880_v13 }
 0xbad   : > { %v12661_v22 = vpack.c.bf16 %v4571_v54, %v4570_v57 }
 0xbaf   : > { %12662 = vmatprep.subr.bf16.mxu0 %v12661_v22 }
 0xbb0   : > { %12664 = vmatpush3.bf16.msra.mxu0 %v12661_v22 }
 0xbb1   : > { %12678 = vmatprep.subr.bf16.mxu0 %v14229_v9 }
 0xbb3   : > { %11886 = vmatmul.mubr.msk.f32.vlgmr.msra.gmra.mrb[128].mxu0 %vm329_vm0, %v15448_v60  ;;  %v17403_v60 = vld [vmem:[#allocation21_spill] sm:$0xff] }
 0xbb4   : > { %11888 = vmatprep.mubr.msk.f32.mxu0 %vm329_vm0, %v15455_v12  ;;  %12680 = vmatpush3.bf16.msra.mxu0 %v14229_v9 }
 0xbb5   : > { %12698 = vmatprep.subr.bf16.mxu0 %v14229_v9 }
 0xbb7   : > { %11889 = vmatmul.mubr.msk.f32.gmra.mrb[130].mxu0 %vm329_vm0, %v15464_v35 }
 0xbb8   : > { %11891 = vmatprep.mubr.msk.f32.mxu0 %vm329_vm0, %v15471_v15 }
 0xbbb   : > { %11892 = vmatmul.mubr.msk.f32.gmra.mrb[132].mxu0 %vm329_vm0, %v15478_v42 }
 0xbbc   : > { %11894 = vmatprep.mubr.msk.f32.mxu0 %vm329_vm0, %v15485_v19 }
 0xbbf   : > { %11895 = vmatmul.mubr.msk.f32.gmra.mrb[134].mxu0 %vm329_vm0, %v15492_v26 }
 0xbc0   : > { %11897 = vmatprep.mubr.msk.f32.mxu0 %vm329_vm0, %v15499_v56 }
 0xbc3   : > { %11898 = vmatmul.mubr.msk.f32.gmra.mrb[136].mxu0 %vm329_vm0, %v15506_v41 }
 0xbc4   : > { %11900 = vmatprep.mubr.msk.f32.mxu0 %vm329_vm0, %v15513_v18 }
 0xbc7   : > { %11901 = vmatmul.mubr.msk.f32.gmra.mrb[138].mxu0 %vm329_vm0, %v15520_v23 }
 0xbc8   : > { %11903 = vmatprep.mubr.msk.f32.mxu0 %vm329_vm0, %v15527_v47 }
 0xbcb   : > { %11904 = vmatmul.mubr.msk.f32.gmra.mrb[140].mxu0 %vm329_vm0, %v15534_v50 }
 0xbcc   : > { %11906 = vmatprep.mubr.msk.f32.mxu0 %vm329_vm0, %v15541_v53 }
 0xbcf   : > { %11907 = vmatmul.mubr.msk.f32.gmra.mrb[142].mxu0 %vm329_vm0, %v17403_v60 }
 0xc86   : > { %v11887_v12 = vpop.f32.mrb[128].mxu0 }
 0xc87   : > { %v4783_v35 = vpop.f32.mrb[129].mxu0 }
 0xc88   : > { %11913 = vmatprep.mubr.msk.f32.mxu1 %vm324_vm1, %v4783_v35 }
 0xc89   : > { %11914 = vmatmul.mubr.msk.f32.vlgmr.msra.gmra.mrb[128].mxu1 %vm324_vm1, %v11887_v12 }
 0xc8a   : > { %12672 = vmatpush3.bf16.msra.mxu1 %v12657_v14  ;;  %v11890_v15 = vpop.f32.mrb[130].mxu0  ;;  %v15887_v14 = vld [vmem:[%s17173_s2 + $0x80] sm:$0xff] }
 0xc8b   : > { %12674 = vmatprep.subr.bf16.mxu1 %v12661_v22  ;;  %v4793_v42 = vpop.f32.mrb[131].mxu0  ;;  %17405 = vst [vmem:[#allocation3_spill] sm:$0xff] %v15887_v14 }
 0xc8c   : > { %11916 = vmatprep.mubr.msk.f32.mxu1 %vm324_vm1, %v4793_v42  ;;  %v17407_v42 = vld [vmem:[#allocation27_spill] sm:$0xff] }
 0xc8d   : > { %11917 = vmatmul.mubr.msk.f32.gmra.mrb[130].mxu1 %vm324_vm1, %v11890_v15 }
 0xc8e   : > { %12676 = vmatpush3.bf16.msra.mxu1 %v12661_v22  ;;  %v11893_v19 = vpop.f32.mrb[132].mxu0  ;;  %v17406_v22 = vld [vmem:[#allocation24_spill] sm:$0xff] }
 0xc8f   : > { %v4803_v26 = vpop.f32.mrb[133].mxu0 }
 0xc90   : > { %11919 = vmatprep.mubr.msk.f32.mxu1 %vm324_vm1, %v4803_v26 }
 0xc91   : > { %11920 = vmatmul.mubr.msk.f32.gmra.mrb[132].mxu1 %vm324_vm1, %v11893_v19 }
 0xc92   : > { %v11896_v56 = vpop.f32.mrb[134].mxu0 }
 0xc93   : > { %v4813_v41 = vpop.f32.mrb[135].mxu0 }
 0xc94   : > { %11922 = vmatprep.mubr.msk.f32.mxu1 %vm324_vm1, %v4813_v41  ;;  %v17408_v41 = vld [vmem:[#allocation28_spill] sm:$0xff] }
 0xc95   : > { %11923 = vmatmul.mubr.msk.f32.gmra.mrb[134].mxu1 %vm324_vm1, %v11896_v56 }
 0xc96   : > { %v11899_v18 = vpop.f32.mrb[136].mxu0 }
 0xc97   : > { %v4823_v23 = vpop.f32.mrb[137].mxu0 }
 0xc98   : > { %11925 = vmatprep.mubr.msk.f32.mxu1 %vm324_vm1, %v4823_v23 }
 0xc99   : > { %11926 = vmatmul.mubr.msk.f32.gmra.mrb[136].mxu1 %vm324_vm1, %v11899_v18 }
 0xc9a   : > { %v11902_v47 = vpop.f32.mrb[138].mxu0 }
 0xc9b   : > { %v4833_v50 = vpop.f32.mrb[139].mxu0 }
 0xc9c   : > { %11928 = vmatprep.mubr.msk.f32.mxu1 %vm324_vm1, %v4833_v50 }
 0xc9d   : > { %11929 = vmatmul.mubr.msk.f32.gmra.mrb[138].mxu1 %vm324_vm1, %v11902_v47  ;;  %v17409_v47 = vld [vmem:[#allocation25_spill] sm:$0xff] }
 0xc9e   : > { %v11905_v53 = vpop.f32.mrb[140].mxu0 }
 0xc9f   : > { %v4843_v16 = vpop.f32.mrb[141].mxu0 }
 0xca0   : > { %11931 = vmatprep.mubr.msk.f32.mxu1 %vm324_vm1, %v4843_v16  ;;  %v17410_v16 = vld [vmem:[#allocation26_spill] sm:$0xff] }
 0xca1   : > { %11932 = vmatmul.mubr.msk.f32.gmra.mrb[140].mxu1 %vm324_vm1, %v11905_v53 }
 0xca2   : > { %v11908_v32 = vpop.f32.mrb[142].mxu0 }
 0xca3   : > { %v4853_v40 = vpop.f32.mrb[143].mxu0 }
 0xca4   : > { %11934 = vmatprep.mubr.msk.f32.mxu1 %vm324_vm1, %v4853_v40 }
 0xca5   : > { %11935 = vmatmul.mubr.msk.f32.gmra.mrb[142].mxu1 %vm324_vm1, %v11908_v32 }
 0xca6   : > { %11945 = vmatprep.mubr.msk.f32.mxu1 %vm329_vm0, %v15775_v4 }
 0xca9   : > { %11946 = vmatmul.mubr.msk.f32.vlgmr.msra.gmra.mrb[144].mxu1 %vm329_vm0, %v15782_v45 }
 0xcaa   : > { %11948 = vmatprep.mubr.msk.f32.mxu1 %vm329_vm0, %v15789_v1 }
 0xcad   : > { %11949 = vmatmul.mubr.msk.f32.gmra.mrb[146].mxu1 %vm329_vm0, %v15796_v17 }
 0xcae   : > { %11951 = vmatprep.mubr.msk.f32.mxu1 %vm329_vm0, %v15803_v21 }
 0xcb1   : > { %11952 = vmatmul.mubr.msk.f32.gmra.mrb[148].mxu1 %vm329_vm0, %v15810_v59 }
 0xcb2   : > { %11954 = vmatprep.mubr.msk.f32.mxu1 %vm329_vm0, %v15817_v43 }
 0xcb5   : > { %11955 = vmatmul.mubr.msk.f32.gmra.mrb[150].mxu1 %vm329_vm0, %v15824_v49 }
 0xcb6   : > { %11957 = vmatprep.mubr.msk.f32.mxu1 %vm329_vm0, %v15831_v6 }
 0xcb9   : > { %11958 = vmatmul.mubr.msk.f32.gmra.mrb[152].mxu1 %vm329_vm0, %v15838_v29 }
 0xcba   : > { %11960 = vmatprep.mubr.msk.f32.mxu1 %vm329_vm0, %v15845_v8 }
 0xcbd   : > { %11961 = vmatmul.mubr.msk.f32.gmra.mrb[154].mxu1 %vm329_vm0, %v15852_v37 }
 0xcbe   : > { %11963 = vmatprep.mubr.msk.f32.mxu1 %vm329_vm0, %v15859_v24 }
 0xcc1   : > { %11964 = vmatmul.mubr.msk.f32.gmra.mrb[156].mxu1 %vm329_vm0, %v15866_v39 }
 0xcc2   : > { %11966 = vmatprep.mubr.msk.f32.mxu1 %vm329_vm0, %v15873_v38 }
 0xcc5   : > { %11967 = vmatmul.mubr.msk.f32.gmra.mrb[158].mxu1 %vm329_vm0, %v15880_v13 }
 0xcc6   : > { %12005 = vmatprep.mubr.msk.f32.mxu1 %vm329_vm0, %v15887_v14 }
 0xd5c   : > { %v11915_v54 = vpop.f32.mrb[128].mxu1 }
 0xd5d   : > { %v4982_v61 = vadd.f32 %v11915_v54, %v17371_v11  ;;  %v4976_v57 = vpop.f32.mrb[129].mxu1 }
 0xd5e   : > { %v4977_v60 = vadd.f32 %v4976_v57, %v17406_v22 }
 0xd5f   : > { %v10028_v12 = vmul.f32 -1.442695, %v4982_v61 }
 0xd60   : > { %v10027_v35 = vmul.f32 -1.442695, %v4977_v60  ;;  %v11918_v15 = vpop.f32.mrb[130].mxu1  ;;  %v17411_v60 = vld [vmem:[#allocation29_spill] sm:$0xff] }
 0xd61   : > { %13402 = vpow2.f32 %v10028_v12  ;;  %v4992_v19 = vadd.f32 %v11918_v15, %v17407_v42  ;;  %v4986_v26 = vpop.f32.mrb[131].mxu1 }
 0xd62   : > { %13404 = vpow2.f32 %v10027_v35  ;;  %v4987_v18 = vadd.f32 %v4986_v26, %v17408_v41  ;;  %v17412_v35 = vld [vmem:[#allocation30_spill] sm:$0xff] }
 0xd63   : > { %v10030_v56 = vmul.f32 -1.442695, %v4992_v19 }
 0xd64   : > { %v11921_v23 = vpop.f32.mrb[132].mxu1  ;;  %v10029_v54 = vmul.f32 -1.442695, %v4987_v18 }
 0xd65   : > { %13406 = vpow2.f32 %v10030_v56  ;;  %v5002_v50 = vadd.f32 %v11921_v23, %v17409_v47  ;;  %v4996_v53 = vpop.f32.mrb[133].mxu1 }
 0xd66   : > { %v4997_v32 = vadd.f32 %v4996_v53, %v17410_v16 }
 0xd67   : > { %v10032_v40 = vmul.f32 -1.442695, %v5002_v50  ;;  %v17413_v50 = vld [vmem:[#allocation31_spill] sm:$0xff] }
 0xd68   : > { %v10031_v61 = vmul.f32 -1.442695, %v4997_v32  ;;  %v11924_v57 = vpop.f32.mrb[134].mxu1  ;;  %v17414_v32 = vld [vmem:[#allocation32_spill] sm:$0xff] }
 0xd69   : > { %13408 = vpow2.f32 %v10032_v40  ;;  %v5012_v12 = vadd.f32 %v11924_v57, %v17411_v60  ;;  %v5006_v15 = vpop.f32.mrb[135].mxu1 }
 0xd6a   : > { %13410 = vpow2.f32 %v10031_v61  ;;  %v5007_v19 = vadd.f32 %v5006_v15, %v17412_v35 }
 0xd6b   : > { %v13403_v42 = vpop.eup %13402  ;;  %v10034_v26 = vmul.f32 -1.442695, %v5012_v12  ;;  %13412 = vpow2.f32 %v10029_v54  ;;  %v17415_v12 = vld [vmem:[#allocation35_spill] sm:$0xff] }
 0xd6c   : > { %v13405_v41 = vpop.eup %13404  ;;  %v5068_v56 = vadd.f32 1.0, %v13403_v42  ;;  %v10033_v23 = vmul.f32 -1.442695, %v5007_v19  ;;  %v11927_v47 = vpop.f32.mrb[136].mxu1  ;;  %v17416_v19 = vld [vmem:[#allocation36_spill] sm:$0xff] }
 0xd6d   : > { %v5067_v22 = vadd.f32 1.0, %v13405_v41  ;;  %13414 = vpow2.f32 %v10034_v26  ;;  %v5022_v18 = vadd.f32 %v11927_v47, %v17413_v50  ;;  %v5016_v53 = vpop.f32.mrb[137].mxu1 }
 0xd6e   : > { %v5017_v40 = vadd.f32 %v5016_v53, %v17414_v32  ;;  %13416 = vrcp.f32 %v5068_v56 }
 0xd6f   : > { %v13407_v16 = vpop.eup %13406  ;;  %v10036_v57 = vmul.f32 -1.442695, %v5022_v18  ;;  %13418 = vpow2.f32 %v10033_v23 }
 0xd70   : > { %v5070_v61 = vadd.f32 1.0, %v13407_v16  ;;  %v10035_v15 = vmul.f32 -1.442695, %v5017_v40  ;;  %v11930_v35 = vpop.f32.mrb[138].mxu1  ;;  %13420 = vrcp.f32 %v5067_v22  ;;  %v17417_v16 = vld [vmem:[#allocation33_spill] sm:$0xff] }
 0xd71   : > { %v5032_v42 = vadd.f32 %v11930_v35, %v17415_v12  ;;  %v5026_v54 = vpop.f32.mrb[139].mxu1  ;;  %13422 = vpow2.f32 %v10036_v57  ;;  %v17418_v57 = vld [vmem:[#allocation34_spill] sm:$0xff] }
 0xd72   : > { %v5027_v41 = vadd.f32 %v5026_v54, %v17416_v19  ;;  %13424 = vrcp.f32 %v5070_v61 }
 0xd73   : > { %v13409_v26 = vpop.eup %13408  ;;  %v10038_v47 = vmul.f32 -1.442695, %v5032_v42  ;;  %13426 = vpow2.f32 %v10035_v15 }
 0xd74   : > { %v13411_v50 = vpop.eup %13410  ;;  %v5092_v60 = vadd.f32 1.0, %v13409_v26  ;;  %v10037_v53 = vmul.f32 -1.442695, %v5027_v41  ;;  %v11933_v56 = vpop.f32.mrb[140].mxu1  ;;  %v17419_v26 = vld [vmem:[#allocation37_spill] sm:$0xff] }
 0xd75   : > { %v5091_v18 = vadd.f32 1.0, %v13411_v50  ;;  %13428 = vpow2.f32 %v10038_v47  ;;  %v5042_v23 = vadd.f32 %v11933_v56, %v17417_v16  ;;  %v5036_v40 = vpop.f32.mrb[141].mxu1  ;;  %v13413_v22 = vpop.eup %13412  ;;  %v17420_v16 = vld [vmem:[#allocation38_spill] sm:$0xff] }
 0xd76   : > { %13430 = vrcp.f32 %v5092_v60  ;;  %v5037_v12 = vadd.f32 %v5036_v40, %v17418_v57  ;;  %v5069_v50 = vadd.f32 1.0, %v13413_v22 }
 0xd77   : > { %v13415_v35 = vpop.eup %13414  ;;  %13432 = vrcp.f32 %v5091_v18 }
 0xd78   : > { %v5094_v54 = vadd.f32 1.0, %v13415_v35  ;;  %13434 = vpow2.f32 %v10037_v53  ;;  %v11936_v61 = vpop.f32.mrb[142].mxu1  ;;  %v13417_v42 = vpop.eup %13416 }
 0xd79   : > { %13436 = vtanh.f32 %v5042_v23  ;;  %v5052_v15 = vadd.f32 %v11936_v61, %v17419_v26  ;;  %v5046_v41 = vpop.f32.mrb[143].mxu1  ;;  %v13419_v19 = vpop.eup %13418 }
 0xd7a   : > { %13438 = vrcp.f32 %v5094_v54  ;;  %v13421_v47 = vpop.eup %13420  ;;  %v5093_v56 = vadd.f32 1.0, %v13419_v19  ;;  %v5047_v60 = vadd.f32 %v5046_v41, %v17420_v16 }
 0xd7b   : > { %13440 = vtanh.f32 %v5037_v12  ;;  %v13423_v32 = vpop.eup %13422 }
 0xd7c   : > { %13442 = vtanh.f32 %v5052_v15  ;;  %v11947_v18 = vpop.f32.mrb[144].mxu1  ;;  %v13425_v40 = vpop.eup %13424  ;;  %v5116_v41 = vadd.f32 1.0, %v13423_v32 }
 0xd7d   : > { %13444 = vrcp.f32 %v5093_v56  ;;  %v5222_v53 = vpop.f32.mrb[145].mxu1  ;;  %v13427_v35 = vpop.eup %13426 }
 0xd7e   : > { %13446 = vrcp.f32 %v5069_v50  ;;  %11973 = vmatprep.mubr.msk.f32.mxu0 %vm324_vm1, %v5222_v53  ;;  %v5115_v50 = vadd.f32 1.0, %v13427_v35 }
 0xd7f   : > { %v13429_v23 = vpop.eup %13428  ;;  %13448 = vtanh.f32 %v5047_v60  ;;  %11974 = vmatmul.mubr.msk.f32.vlgmr.msra.gmra.mrb[144].mxu0 %vm324_vm1, %v11947_v18 }
 0xd80   : > { %v13431_v22 = vpop.eup %13430  ;;  %v11950_v54 = vpop.f32.mrb[146].mxu1  ;;  %12700 = vmatpush3.bf16.msra.mxu0 %v14229_v9  ;;  %v5118_v11 = vadd.f32 1.0, %v13429_v23  ;;  %13450 = vrcp.f32 %v5116_v41 }
 0xd81   : > { %v13433_v12 = vpop.eup %13432  ;;  %v5232_v19 = vpop.f32.mrb[147].mxu1  ;;  %v5132_v15 = vmul.f32 %v13431_v22, %v15626_v63  ;;  %13452 = vrcp.f32 %v5115_v50 }
 0xd82   : > { %v13435_v61 = vpop.eup %13434  ;;  %11976 = vmatprep.mubr.msk.f32.mxu0 %vm324_vm1, %v5232_v19  ;;  %v5131_v60 = vmul.f32 %v13433_v12, %v15632_v48 }
 0xd83   : > { %v13437_v56 = vpop.eup %13436  ;;  %11977 = vmatmul.mubr.msk.f32.gmra.mrb[146].mxu0 %vm324_vm1, %v11950_v54  ;;  %v5117_v12 = vadd.f32 1.0, %v13435_v61 }
 0xd84   : > { %v13439_v53 = vpop.eup %13438  ;;  %v5136_v18 = vmul.f32 %v13437_v56, %v13417_v42  ;;  %v11953_v16 = vpop.f32.mrb[148].mxu1 }
 0xd85   : > { %v13441_v26 = vpop.eup %13440  ;;  %v5134_v57 = vmul.f32 %v13439_v53, %v15634_v62  ;;  %v5242_v14 = vpop.f32.mrb[149].mxu1 }
 0xd86   : > { %v13443_v13 = vpop.eup %13442  ;;  %v15915_v63 = vadd.f32 %v5136_v18, %v5132_v15  ;;  %v5135_v32 = vmul.f32 %v13441_v26, %v13421_v47  ;;  %11979 = vmatprep.mubr.msk.f32.mxu0 %vm324_vm1, %v5242_v14 }
 0xd87   : > { %v13445_v35 = vpop.eup %13444  ;;  %v5138_v22 = vmul.f32 %v13443_v13, %v13425_v40  ;;  %11980 = vmatmul.mubr.msk.f32.gmra.mrb[148].mxu0 %vm324_vm1, %v11953_v16 }
 0xd88   : > { %v13447_v48 = vpop.eup %13446  ;;  %v5133_v42 = vmul.f32 %v13445_v35, %v15640_v0  ;;  %13454 = vtanh.f32 %v15915_v63  ;;  %v15921_v62 = vadd.f32 %v5135_v32, %v5131_v60  ;;  %v11956_v23 = vpop.f32.mrb[150].mxu1 }
 0xd89   : > { %v13449_v54 = vpop.eup %13448  ;;  %13456 = vrcp.f32 %v5118_v11  ;;  %v15923_v19 = vadd.f32 %v5138_v22, %v5134_v57  ;;  %v5252_v26 = vpop.f32.mrb[151].mxu1 }
 0xd8a   : > { %13458 = vtanh.f32 %v15921_v62  ;;  %v5137_v14 = vmul.f32 %v13449_v54, %v13447_v48  ;;  %11982 = vmatprep.mubr.msk.f32.mxu0 %vm324_vm1, %v5252_v26  ;;  %v13451_v11 = vpop.eup %13450  ;;  %v15951_v26 = vld [vmem:[%s17173_s2 + $0x88] sm:$0xff] }
 0xd8b   : > { %13460 = vtanh.f32 %v15923_v19  ;;  %11983 = vmatmul.mubr.msk.f32.gmra.mrb[150].mxu0 %vm324_vm1, %v11956_v23  ;;  %v13453_v47 = vpop.eup %13452 }
 0xd8c   : > { %v15929_v0 = vadd.f32 %v5137_v14, %v5133_v42  ;;  %v11959_v13 = vpop.f32.mrb[152].mxu1  ;;  %13462 = vrcp.f32 %v5117_v12  ;;  %v15958_v14 = vld [vmem:[%s17173_s2 + $0x90] sm:$0xff] }
 0xd8d   : > { %v5262_v16 = vpop.f32.mrb[153].mxu1 }
 0xd8e   : > { %13464 = vtanh.f32 %v15929_v0  ;;  %11985 = vmatprep.mubr.msk.f32.mxu0 %vm324_vm1, %v5262_v16  ;;  %v15972_v16 = vld [vmem:[%s17173_s2 + $0xa0] sm:$0xff] }
 0xd8f   : > { %11986 = vmatmul.mubr.msk.f32.gmra.mrb[152].mxu0 %vm324_vm1, %v11959_v13  ;;  %v15965_v13 = vld [vmem:[%s17173_s2 + $0x98] sm:$0xff] }
 0xd90   : > { %v11962_v57 = vpop.f32.mrb[154].mxu1 }
 0xd91   : > { %v5272_v40 = vpop.f32.mrb[155].mxu1 }
 0xd92   : > { %v13455_v61 = vpop.eup %13454  ;;  %11988 = vmatprep.mubr.msk.f32.mxu0 %vm324_vm1, %v5272_v40  ;;  %v16000_v40 = vld [vmem:[%s17173_s2 + $0xc0] sm:$0xff] }
 0xd93   : > { %v13457_v15 = vpop.eup %13456  ;;  %11989 = vmatmul.mubr.msk.f32.gmra.mrb[154].mxu0 %vm324_vm1, %v11962_v57  ;;  %v5148_v41 = vmul.f32 %v13455_v61, %v13451_v11  ;;  %v15979_v11 = vld [vmem:[%s17173_s2 + $0xa8] sm:$0xff]  ;;  %v15986_v57 = vld [vmem:[%s17173_s2 + $0xb0] sm:$0xff] }
 0xd94   : > { %v13459_v56 = vpop.eup %13458  ;;  %v11965_v50 = vpop.f32.mrb[156].mxu1  ;;  %v16007_v61 = vld [vmem:[%s17173_s2 + $0xc8] sm:$0xff] }
 0xd95   : > { %v13461_v53 = vpop.eup %13460  ;;  %v5282_v60 = vpop.f32.mrb[157].mxu1  ;;  %v5147_v18 = vmul.f32 %v13459_v56, %v13453_v47  ;;  %10040 = vst.msk [vmem:[%s14216_s13 + $0x88] sm:$0xff] %vm324_vm1, %v5148_v41  ;;  %v15993_v47 = vld [vmem:[%s17173_s2 + $0xb8] sm:$0xff]  ;;  %v16028_v56 = vld [vmem:[%s17173_s2 + $0xe0] sm:$0xff] }
 0xd96   : > { %11991 = vmatprep.mubr.msk.f32.mxu0 %vm324_vm1, %v5282_v60  ;;  %v5150_v32 = vmul.f32 %v13461_v53, %v13457_v15  ;;  %v13463_v35 = vpop.eup %13462  ;;  %v16014_v15 = vld [vmem:[%s17173_s2 + $0xd0] sm:$0xff]  ;;  %17422 = vst [vmem:[#allocation5_spill] sm:$0xff] %v16028_v56  ;;  %v16049_v60 = vld [vmem:[%s17173_s2 + $0xf8] sm:$0xff] }
 0xd97   : > { %10039 = vst.msk [vmem:[%s14216_s13 + $0x80] sm:$0xff] %vm324_vm1, %v5147_v18  ;;  %v12681_v22 = vpack.c.bf16 %v5148_v41, %v5147_v18  ;;  %11992 = vmatmul.mubr.msk.f32.gmra.mrb[156].mxu0 %vm324_vm1, %v11965_v50  ;;  %v16021_v41 = vld [vmem:[%s17173_s2 + $0xd8] sm:$0xff]  ;;  %v16035_v50 = vld [vmem:[%s17173_s2 + $0xe8] sm:$0xff]  ;;  %v16042_v53 = vld [vmem:[%s17173_s2 + $0xf0] sm:$0xff] }
 0xd98   : > { %v13465_v48 = vpop.eup %13464  ;;  %v11968_v42 = vpop.f32.mrb[158].mxu1  ;;  %10042 = vst.msk [vmem:[%s14216_s13 + $0x98] sm:$0xff] %vm324_vm1, %v5150_v32  ;;  %17421 = vst [vmem:[#allocation4_spill] sm:$0xff] %v16021_v41  ;;  %v16056_v18 = vld [vmem:[%s17172_s1 + $0x80] sm:$0xff] }
 0xd99   : > { %12682 = vmatprep.subr.bf16.mxu1 %v12681_v22  ;;  %v5292_v23 = vpop.f32.mrb[159].mxu1  ;;  %v5149_v54 = vmul.f32 %v13465_v48, %v13463_v35  ;;  %17423 = vst [vmem:[#allocation6_spill] sm:$0xff] %v16035_v50  ;;  %17424 = vst [vmem:[#allocation7_spill] sm:$0xff] %v16042_v53 }
 0xd9a   : > { %12684 = vmatpush3.bf16.msra.mxu1 %v12681_v22  ;;  %11994 = vmatprep.mubr.msk.f32.mxu0 %vm324_vm1, %v5292_v23  ;;  %17425 = vst [vmem:[#allocation8_spill] sm:$0xff] %v16049_v60  ;;  %17426 = vst [vmem:[#allocation13_spill] sm:$0xff] %v16056_v18 }
 0xd9b   : > { %10041 = vst.msk [vmem:[%s14216_s13 + $0x90] sm:$0xff] %vm324_vm1, %v5149_v54  ;;  %v12685_v12 = vpack.c.bf16 %v5150_v32, %v5149_v54  ;;  %11995 = vmatmul.mubr.msk.f32.gmra.mrb[158].mxu0 %vm324_vm1, %v11968_v42 }
 0xd9d   : > { %12686 = vmatprep.subr.bf16.mxu1 %v12685_v12 }
 0xd9e   : > { %12688 = vmatpush3.bf16.msra.mxu1 %v12685_v12 }
 0xda1   : > { %12006 = vmatmul.mubr.msk.f32.vlgmr.msra.gmra.mrb[160].mxu1 %vm329_vm0, %v15951_v26 }
 0xda2   : > { %12008 = vmatprep.mubr.msk.f32.mxu1 %vm329_vm0, %v15958_v14 }
 0xda5   : > { %12009 = vmatmul.mubr.msk.f32.gmra.mrb[162].mxu1 %vm329_vm0, %v15965_v13 }
 0xda6   : > { %12011 = vmatprep.mubr.msk.f32.mxu1 %vm329_vm0, %v15972_v16 }
 0xda9   : > { %12012 = vmatmul.mubr.msk.f32.gmra.mrb[164].mxu1 %vm329_vm0, %v15979_v11 }
 0xdaa   : > { %12014 = vmatprep.mubr.msk.f32.mxu1 %vm329_vm0, %v15986_v57 }
 0xdad   : > { %12015 = vmatmul.mubr.msk.f32.gmra.mrb[166].mxu1 %vm329_vm0, %v15993_v47 }
 0xdae   : > { %12017 = vmatprep.mubr.msk.f32.mxu1 %vm329_vm0, %v16000_v40 }
 0xdb1   : > { %12018 = vmatmul.mubr.msk.f32.gmra.mrb[168].mxu1 %vm329_vm0, %v16007_v61 }
 0xdb2   : > { %12020 = vmatprep.mubr.msk.f32.mxu1 %vm329_vm0, %v16014_v15 }
 0xdb5   : > { %12021 = vmatmul.mubr.msk.f32.gmra.mrb[170].mxu1 %vm329_vm0, %v16021_v41 }
 0xdb6   : > { %12023 = vmatprep.mubr.msk.f32.mxu1 %vm329_vm0, %v16028_v56 }
 0xdb9   : > { %12024 = vmatmul.mubr.msk.f32.gmra.mrb[172].mxu1 %vm329_vm0, %v16035_v50 }
 0xdba   : > { %12026 = vmatprep.mubr.msk.f32.mxu1 %vm329_vm0, %v16042_v53 }
 0xdbd   : > { %12027 = vmatmul.mubr.msk.f32.gmra.mrb[174].mxu1 %vm329_vm0, %v16049_v60 }
 0xdbe   : > { %12037 = vmatprep.mubr.msk.f32.mxu1 %vm329_vm0, %v16056_v18 }
 0xe52   : > { %v11975_v32 = vpop.f32.mrb[144].mxu0 }
 0xe53   : > { %v5495_v35 = vadd.f32 %v11975_v32, %v17393_v34  ;;  %v5415_v22 = vpop.f32.mrb[145].mxu0 }
 0xe54   : > { %v5494_v48 = vadd.f32 %v5415_v22, %v14696_v55 }
 0xe55   : > { %v10076_v42 = vmul.f32 -1.442695, %v5495_v35 }
 0xe56   : > { %v10075_v23 = vmul.f32 -1.442695, %v5494_v48  ;;  %v11978_v54 = vpop.f32.mrb[146].mxu0 }
 0xe57   : > { %13466 = vpow2.f32 %v10076_v42  ;;  %v5497_v12 = vadd.f32 %v11978_v54, %v17394_v27  ;;  %v5425_v60 = vpop.f32.mrb[147].mxu0 }
 0xe58   : > { %13468 = vpow2.f32 %v10075_v23  ;;  %v5496_v50 = vadd.f32 %v5425_v60, %v17395_v5 }
 0xe59   : > { %v10078_v53 = vmul.f32 -1.442695, %v5497_v12 }
 0xe5a   : > { %v11981_v56 = vpop.f32.mrb[148].mxu0  ;;  %v10077_v22 = vmul.f32 -1.442695, %v5496_v50 }
 0xe5b   : > { %13470 = vpow2.f32 %v10078_v53  ;;  %v5499_v18 = vadd.f32 %v11981_v56, %v17396_v36  ;;  %v5435_v41 = vpop.f32.mrb[149].mxu0 }
 0xe5c   : > { %v5498_v32 = vadd.f32 %v5435_v41, %v14711_v30 }
 0xe5d   : > { %v10080_v34 = vmul.f32 -1.442695, %v5499_v18 }
 0xe5e   : > { %v10079_v35 = vmul.f32 -1.442695, %v5498_v32  ;;  %v11984_v48 = vpop.f32.mrb[150].mxu0 }
 0xe5f   : > { %13472 = vpow2.f32 %v10080_v34  ;;  %v5501_v42 = vadd.f32 %v11984_v48, %v14717_v31  ;;  %v5445_v54 = vpop.f32.mrb[151].mxu0 }
 0xe60   : > { %13474 = vpow2.f32 %v10079_v35  ;;  %v5500_v23 = vadd.f32 %v5445_v54, %v17337_v25 }
 0xe61   : > { %v13467_v12 = vpop.eup %13466  ;;  %v10082_v60 = vmul.f32 -1.442695, %v5501_v42  ;;  %13476 = vpow2.f32 %v10077_v22 }
 0xe62   : > { %v13469_v5 = vpop.eup %13468  ;;  %v5523_v53 = vadd.f32 1.0, %v13467_v12  ;;  %v10081_v56 = vmul.f32 -1.442695, %v5500_v23  ;;  %v11987_v36 = vpop.f32.mrb[152].mxu0 }
 0xe63   : > { %v5522_v27 = vadd.f32 1.0, %v13469_v5  ;;  %13478 = vpow2.f32 %v10082_v60  ;;  %v5503_v41 = vadd.f32 %v11987_v36, %v14725_v58  ;;  %v5455_v50 = vpop.f32.mrb[153].mxu0 }
 0xe64   : > { %v5502_v34 = vadd.f32 %v5455_v50, %v14728_v44  ;;  %13480 = vrcp.f32 %v5523_v53 }
 0xe65   : > { %v13471_v18 = vpop.eup %13470  ;;  %v10084_v32 = vmul.f32 -1.442695, %v5503_v41  ;;  %13482 = vpow2.f32 %v10081_v56 }
 0xe66   : > { %v5525_v35 = vadd.f32 1.0, %v13471_v18  ;;  %v10083_v48 = vmul.f32 -1.442695, %v5502_v34  ;;  %v11990_v54 = vpop.f32.mrb[154].mxu0  ;;  %13484 = vrcp.f32 %v5522_v27 }
 0xe67   : > { %v5505_v42 = vadd.f32 %v11990_v54, %v17397_v46  ;;  %v5465_v22 = vpop.f32.mrb[155].mxu0  ;;  %13486 = vpow2.f32 %v10084_v32 }
 0xe68   : > { %v5504_v5 = vadd.f32 %v5465_v22, %v17398_v28  ;;  %13488 = vrcp.f32 %v5525_v35 }
 0xe69   : > { %v13473_v23 = vpop.eup %13472  ;;  %v10086_v36 = vmul.f32 -1.442695, %v5505_v42  ;;  %13490 = vpow2.f32 %v10083_v48 }
 0xe6a   : > { %v13475_v12 = vpop.eup %13474  ;;  %v5547_v60 = vadd.f32 1.0, %v13473_v23  ;;  %v10085_v50 = vmul.f32 -1.442695, %v5504_v5  ;;  %v11993_v53 = vpop.f32.mrb[156].mxu0 }
 0xe6b   : > { %v5546_v41 = vadd.f32 1.0, %v13475_v12  ;;  %13492 = vpow2.f32 %v10086_v36  ;;  %v5507_v56 = vadd.f32 %v11993_v53, %v17399_v3  ;;  %v5475_v34 = vpop.f32.mrb[157].mxu0  ;;  %v13477_v27 = vpop.eup %13476 }
 0xe6c   : > { %13494 = vrcp.f32 %v5547_v60  ;;  %v5506_v32 = vadd.f32 %v5475_v34, %v17400_v51  ;;  %v5524_v23 = vadd.f32 1.0, %v13477_v27 }
 0xe6d   : > { %v13479_v18 = vpop.eup %13478  ;;  %13496 = vrcp.f32 %v5546_v41 }
 0xe6e   : > { %v5549_v54 = vadd.f32 1.0, %v13479_v18  ;;  %13498 = vpow2.f32 %v10085_v50  ;;  %v11996_v35 = vpop.f32.mrb[158].mxu0  ;;  %v13481_v42 = vpop.eup %13480 }
 0xe6f   : > { %13500 = vtanh.f32 %v5507_v56  ;;  %v5509_v48 = vadd.f32 %v11996_v35, %v17401_v52  ;;  %v5485_v22 = vpop.f32.mrb[159].mxu0  ;;  %v13483_v5 = vpop.eup %13482 }
 0xe70   : > { %13502 = vrcp.f32 %v5549_v54  ;;  %v13485_v36 = vpop.eup %13484  ;;  %v5548_v12 = vadd.f32 1.0, %v13483_v5  ;;  %v5508_v60 = vadd.f32 %v5485_v22, %v17402_v7 }
 0xe71   : > { %13504 = vtanh.f32 %v5506_v32  ;;  %v13487_v53 = vpop.eup %13486 }
 0xe72   : > { %13506 = vtanh.f32 %v5509_v48  ;;  %v13489_v41 = vpop.eup %13488  ;;  %v5571_v54 = vadd.f32 1.0, %v13487_v53 }
 0xe73   : > { %13508 = vrcp.f32 %v5548_v12  ;;  %v13491_v34 = vpop.eup %13490 }
 0xe74   : > { %13510 = vrcp.f32 %v5524_v23  ;;  %v5570_v7 = vadd.f32 1.0, %v13491_v34 }
 0xe75   : > { %v13493_v50 = vpop.eup %13492  ;;  %13512 = vtanh.f32 %v5508_v60 }
 0xe76   : > { %v13495_v56 = vpop.eup %13494  ;;  %13514 = vrcp.f32 %v5571_v54 }
 0xe77   : > { %v13497_v18 = vpop.eup %13496  ;;  %v5587_v52 = vmul.f32 %v13495_v56, %v15710_v33  ;;  %v5573_v56 = vadd.f32 1.0, %v13493_v50 }
 0xe78   : > { %v13499_v35 = vpop.eup %13498  ;;  %v5586_v32 = vmul.f32 %v13497_v18, %v15714_v20 }
 0xe79   : > { %v13501_v27 = vpop.eup %13500 }
 0xe7a   : > { %v13503_v51 = vpop.eup %13502  ;;  %v5591_v5 = vmul.f32 %v13501_v27, %v13481_v42  ;;  %v5572_v42 = vadd.f32 1.0, %v13499_v35 }
 0xe7b   : > { %v13505_v22 = vpop.eup %13504  ;;  %v5589_v48 = vmul.f32 %v13503_v51, %v15716_v10 }
 0xe7c   : > { %v13507_v12 = vpop.eup %13506  ;;  %v16079_v3 = vadd.f32 %v5591_v5, %v5587_v52  ;;  %v5590_v23 = vmul.f32 %v13505_v22, %v13485_v36  ;;  %v16096_v22 = vld [vmem:[%s17172_s1 + $0x88] sm:$0xff] }
 0xe7d   : > { %v13509_v60 = vpop.eup %13508  ;;  %v5593_v28 = vmul.f32 %v13507_v12, %v13489_v41  ;;  %v16112_v12 = vld [vmem:[%s17172_s1 + $0x98] sm:$0xff] }
 0xe7e   : > { %v13511_v46 = vpop.eup %13510  ;;  %v5588_v33 = vmul.f32 %v13509_v60, %v15720_v2  ;;  %13516 = vtanh.f32 %v16079_v3  ;;  %v16083_v53 = vadd.f32 %v5590_v23, %v5586_v32  ;;  %v16119_v23 = vld [vmem:[%s17172_s1 + $0xa0] sm:$0xff]  ;;  %v16126_v60 = vld [vmem:[%s17172_s1 + $0xa8] sm:$0xff] }
 0xe7f   : > { %v13513_v20 = vpop.eup %13512  ;;  %13518 = vrcp.f32 %v5570_v7  ;;  %v16085_v51 = vadd.f32 %v5593_v28, %v5589_v48  ;;  %v16103_v48 = vld [vmem:[%s17172_s1 + $0x90] sm:$0xff] }
 0xe80   : > { %13520 = vtanh.f32 %v16083_v53  ;;  %v5592_v52 = vmul.f32 %v13513_v20, %v13511_v46  ;;  %v13515_v2 = vpop.eup %13514  ;;  %v16147_v20 = vld [vmem:[%s17172_s1 + $0xc0] sm:$0xff] }
 0xe81   : > { %13522 = vtanh.f32 %v16085_v51 }
 0xe82   : > { %13524 = vrcp.f32 %v5573_v56  ;;  %v16089_v10 = vadd.f32 %v5592_v52, %v5588_v33  ;;  %v16133_v33 = vld [vmem:[%s17172_s1 + $0xb0] sm:$0xff]  ;;  %v16140_v56 = vld [vmem:[%s17172_s1 + $0xb8] sm:$0xff] }
 0xe83   : > { %13526 = vrcp.f32 %v5572_v42  ;;  %v16154_v42 = vld [vmem:[%s17172_s1 + $0xc8] sm:$0xff]  ;;  %v16161_v52 = vld [vmem:[%s17172_s1 + $0xd0] sm:$0xff] }
 0xe84   : > { %13528 = vtanh.f32 %v16089_v10 }
 0xe88   : > { %v13517_v36 = vpop.eup %13516 }
 0xe89   : > { %v13519_v41 = vpop.eup %13518  ;;  %v5603_v34 = vmul.f32 %v13517_v36, %v13515_v2  ;;  %v16168_v2 = vld [vmem:[%s17172_s1 + $0xd8] sm:$0xff]  ;;  %v16175_v36 = vld [vmem:[%s17172_s1 + $0xe0] sm:$0xff] }
 0xe8a   : > { %v13521_v50 = vpop.eup %13520 }
 0xe8b   : > { %v13523_v7 = vpop.eup %13522  ;;  %v5602_v18 = vmul.f32 %v13521_v50, %v13519_v41  ;;  %v16182_v41 = vld [vmem:[%s17172_s1 + $0xe8] sm:$0xff]  ;;  %v16196_v50 = vld [vmem:[%s17172_s1 + $0xf8] sm:$0xff] }
 0xe8c   : > { %v13525_v28 = vpop.eup %13524  ;;  %17427 = vst [vmem:[#allocation20_spill] sm:$0xff] %v16196_v50 }
 0xe8d   : > { %v13527_v35 = vpop.eup %13526  ;;  %v12689_v27 = vpack.c.bf16 %v5603_v34, %v5602_v18  ;;  %v5605_v54 = vmul.f32 %v13525_v28, %v13523_v7  ;;  %v16189_v34 = vld [vmem:[%s17172_s1 + $0xf0] sm:$0xff] }
 0xe8e   : > { %v13529_v46 = vpop.eup %13528 }
 0xe8f   : > { %12690 = vmatprep.subr.bf16.mxu1 %v12689_v27  ;;  %12702 = vmatprep.subr.bf16.mxu0 %v12689_v27  ;;  %v5604_v32 = vmul.f32 %v13529_v46, %v13527_v35 }
 0xe90   : > { %12692 = vmatpush3.bf16.msra.mxu1 %v12689_v27 }
 0xe91   : > { %v12693_v5 = vpack.c.bf16 %v5605_v54, %v5604_v32 }
 0xe93   : > { %12694 = vmatprep.subr.bf16.mxu1 %v12693_v5 }
 0xe94   : > { %12696 = vmatpush3.bf16.msra.mxu1 %v12693_v5 }
 0xe95   : > { %12710 = vmatprep.subr.bf16.mxu1 %v14229_v9 }
 0xe97   : > { %12038 = vmatmul.mubr.msk.f32.vlgmr.msra.gmra.mrb[160].mxu1 %vm329_vm0, %v16096_v22 }
 0xe98   : > { %12040 = vmatprep.mubr.msk.f32.mxu1 %vm329_vm0, %v16103_v48  ;;  %12712 = vmatpush3.bf16.msra.mxu1 %v14229_v9 }
 0xe99   : > { %12730 = vmatprep.subr.bf16.mxu1 %v14229_v9 }
 0xe9b   : > { %12041 = vmatmul.mubr.msk.f32.gmra.mrb[162].mxu1 %vm329_vm0, %v16112_v12 }
 0xe9c   : > { %12043 = vmatprep.mubr.msk.f32.mxu1 %vm329_vm0, %v16119_v23 }
 0xe9f   : > { %12044 = vmatmul.mubr.msk.f32.gmra.mrb[164].mxu1 %vm329_vm0, %v16126_v60 }
 0xea0   : > { %12046 = vmatprep.mubr.msk.f32.mxu1 %vm329_vm0, %v16133_v33 }
 0xea3   : > { %12047 = vmatmul.mubr.msk.f32.gmra.mrb[166].mxu1 %vm329_vm0, %v16140_v56 }
 0xea4   : > { %12049 = vmatprep.mubr.msk.f32.mxu1 %vm329_vm0, %v16147_v20 }
 0xea7   : > { %12050 = vmatmul.mubr.msk.f32.gmra.mrb[168].mxu1 %vm329_vm0, %v16154_v42 }
 0xea8   : > { %12052 = vmatprep.mubr.msk.f32.mxu1 %vm329_vm0, %v16161_v52 }
 0xeab   : > { %12053 = vmatmul.mubr.msk.f32.gmra.mrb[170].mxu1 %vm329_vm0, %v16168_v2 }
 0xeac   : > { %12055 = vmatprep.mubr.msk.f32.mxu1 %vm329_vm0, %v16175_v36 }
 0xeaf   : > { %12056 = vmatmul.mubr.msk.f32.gmra.mrb[172].mxu1 %vm329_vm0, %v16182_v41 }
 0xeb0   : > { %12058 = vmatprep.mubr.msk.f32.mxu1 %vm329_vm0, %v16189_v34 }
 0xeb3   : > { %12059 = vmatmul.mubr.msk.f32.gmra.mrb[174].mxu1 %vm329_vm0, %v16196_v50 }
 0xf6a   : > { %v12039_v7 = vpop.f32.mrb[160].mxu1 }
 0xf6b   : > { %v5817_v18 = vpop.f32.mrb[161].mxu1 }
 0xf6c   : > { %12065 = vmatprep.mubr.msk.f32.mxu0 %vm324_vm1, %v5817_v18 }
 0xf6d   : > { %12066 = vmatmul.mubr.msk.f32.vlgmr.msra.gmra.mrb[160].mxu0 %vm324_vm1, %v12039_v7 }
 0xf6e   : > { %12704 = vmatpush3.bf16.msra.mxu0 %v12689_v27  ;;  %v12042_v28 = vpop.f32.mrb[162].mxu1 }
 0xf6f   : > { %12706 = vmatprep.subr.bf16.mxu0 %v12693_v5  ;;  %v5827_v35 = vpop.f32.mrb[163].mxu1 }
 0xf70   : > { %12068 = vmatprep.mubr.msk.f32.mxu0 %vm324_vm1, %v5827_v35 }
 0xf71   : > { %12069 = vmatmul.mubr.msk.f32.gmra.mrb[162].mxu0 %vm324_vm1, %v12042_v28 }
 0xf72   : > { %12708 = vmatpush3.bf16.msra.mxu0 %v12693_v5  ;;  %v12045_v54 = vpop.f32.mrb[164].mxu1 }
 0xf73   : > { %v5837_v46 = vpop.f32.mrb[165].mxu1 }
 0xf74   : > { %12071 = vmatprep.mubr.msk.f32.mxu0 %vm324_vm1, %v5837_v46  ;;  %v17433_v46 = vld [vmem:[#allocation28_spill] sm:$0xff] }
 0xf75   : > { %12072 = vmatmul.mubr.msk.f32.gmra.mrb[164].mxu0 %vm324_vm1, %v12045_v54 }
 0xf76   : > { %v12048_v32 = vpop.f32.mrb[166].mxu1 }
 0xf77   : > { %v5847_v50 = vpop.f32.mrb[167].mxu1 }
 0xf78   : > { %12074 = vmatprep.mubr.msk.f32.mxu0 %vm324_vm1, %v5847_v50 }
 0xf79   : > { %12075 = vmatmul.mubr.msk.f32.gmra.mrb[166].mxu0 %vm324_vm1, %v12048_v32 }
 0xf7a   : > { %v12051_v27 = vpop.f32.mrb[168].mxu1 }
 0xf7b   : > { %v5857_v7 = vpop.f32.mrb[169].mxu1 }
 0xf7c   : > { %12077 = vmatprep.mubr.msk.f32.mxu0 %vm324_vm1, %v5857_v7  ;;  %v17434_v7 = vld [vmem:[#allocation25_spill] sm:$0xff] }
 0xf7d   : > { %12078 = vmatmul.mubr.msk.f32.gmra.mrb[168].mxu0 %vm324_vm1, %v12051_v27 }
 0xf7e   : > { %v12054_v18 = vpop.f32.mrb[170].mxu1 }
 0xf7f   : > { %v5867_v5 = vpop.f32.mrb[171].mxu1 }
 0xf80   : > { %12080 = vmatprep.mubr.msk.f32.mxu0 %vm324_vm1, %v5867_v5 }
 0xf81   : > { %12081 = vmatmul.mubr.msk.f32.gmra.mrb[170].mxu0 %vm324_vm1, %v12054_v18 }
 0xf82   : > { %v12057_v28 = vpop.f32.mrb[172].mxu1 }
 0xf83   : > { %v5877_v35 = vpop.f32.mrb[173].mxu1 }
 0xf84   : > { %12083 = vmatprep.mubr.msk.f32.mxu0 %vm324_vm1, %v5877_v35 }
 0xf85   : > { %12084 = vmatmul.mubr.msk.f32.gmra.mrb[172].mxu0 %vm324_vm1, %v12057_v28  ;;  %v17435_v28 = vld [vmem:[#allocation26_spill] sm:$0xff] }
 0xf86   : > { %v12060_v50 = vpop.f32.mrb[174].mxu1 }
 0xf87   : > { %v5887_v54 = vpop.f32.mrb[175].mxu1 }
 0xf88   : > { %12086 = vmatprep.mubr.msk.f32.mxu0 %vm324_vm1, %v5887_v54 }
 0xf89   : > { %12087 = vmatmul.mubr.msk.f32.gmra.mrb[174].mxu0 %vm324_vm1, %v12060_v50 }
 0xf8a   : > { %12097 = vmatprep.mubr.msk.f32.mxu0 %vm329_vm0, %v15775_v4  ;;  %v17428_v4 = vld [vmem:[#allocation22_spill] sm:$0xff] }
 0xf8d   : > { %12098 = vmatmul.mubr.msk.f32.vlgmr.msra.gmra.mrb[176].mxu0 %vm329_vm0, %v15782_v45  ;;  %v17429_v45 = vld [vmem:[#allocation3_spill] sm:$0xff] }
 0xf8e   : > { %12100 = vmatprep.mubr.msk.f32.mxu0 %vm329_vm0, %v15789_v1 }
 0xf91   : > { %12101 = vmatmul.mubr.msk.f32.gmra.mrb[178].mxu0 %vm329_vm0, %v15796_v17  ;;  %v17430_v17 = vld [vmem:[#allocation23_spill] sm:$0xff] }
 0xf92   : > { %12103 = vmatprep.mubr.msk.f32.mxu0 %vm329_vm0, %v15803_v21 }
 0xf95   : > { %12104 = vmatmul.mubr.msk.f32.gmra.mrb[180].mxu0 %vm329_vm0, %v15810_v59 }
 0xf96   : > { %12106 = vmatprep.mubr.msk.f32.mxu0 %vm329_vm0, %v15817_v43  ;;  %v17431_v43 = vld [vmem:[#allocation24_spill] sm:$0xff] }
 0xf99   : > { %12107 = vmatmul.mubr.msk.f32.gmra.mrb[182].mxu0 %vm329_vm0, %v15824_v49 }
 0xf9a   : > { %12109 = vmatprep.mubr.msk.f32.mxu0 %vm329_vm0, %v15831_v6 }
 0xf9d   : > { %12110 = vmatmul.mubr.msk.f32.gmra.mrb[184].mxu0 %vm329_vm0, %v15838_v29 }
 0xf9e   : > { %12112 = vmatprep.mubr.msk.f32.mxu0 %vm329_vm0, %v15845_v8 }
 0xfa1   : > { %12113 = vmatmul.mubr.msk.f32.gmra.mrb[186].mxu0 %vm329_vm0, %v15852_v37  ;;  %v17432_v37 = vld [vmem:[#allocation27_spill] sm:$0xff] }
 0xfa2   : > { %12115 = vmatprep.mubr.msk.f32.mxu0 %vm329_vm0, %v15859_v24 }
 0xfa5   : > { %12116 = vmatmul.mubr.msk.f32.gmra.mrb[188].mxu0 %vm329_vm0, %v15866_v39 }
 0xfa6   : > { %12118 = vmatprep.mubr.msk.f32.mxu0 %vm329_vm0, %v15873_v38 }
 0xfa9   : > { %12119 = vmatmul.mubr.msk.f32.gmra.mrb[190].mxu0 %vm329_vm0, %v17428_v4 }
 0xfaa   : > { %12157 = vmatprep.mubr.msk.f32.mxu0 %vm329_vm0, %v17429_v45 }
0x1040   : > { %v12067_v1 = vpop.f32.mrb[160].mxu0 }
0x1041   : > { %v6016_v21 = vadd.f32 %v12067_v1, %v17430_v17  ;;  %v6010_v59 = vpop.f32.mrb[161].mxu0  ;;  %v17436_v1 = vld [vmem:[#allocation29_spill] sm:$0xff] }
0x1042   : > { %v6011_v49 = vadd.f32 %v6010_v59, %v17431_v43 }
0x1043   : > { %v10136_v6 = vmul.f32 -1.442695, %v6016_v21 }
0x1044   : > { %v10135_v29 = vmul.f32 -1.442695, %v6011_v49  ;;  %v12070_v8 = vpop.f32.mrb[162].mxu0  ;;  %v17437_v49 = vld [vmem:[#allocation30_spill] sm:$0xff] }
0x1045   : > { %13530 = vpow2.f32 %v10136_v6  ;;  %v6026_v24 = vadd.f32 %v12070_v8, %v17432_v37  ;;  %v6020_v39 = vpop.f32.mrb[163].mxu0 }
0x1046   : > { %13532 = vpow2.f32 %v10135_v29  ;;  %v6021_v32 = vadd.f32 %v6020_v39, %v17433_v46 }
0x1047   : > { %v10138_v38 = vmul.f32 -1.442695, %v6026_v24 }
0x1048   : > { %v12073_v27 = vpop.f32.mrb[164].mxu0  ;;  %v10137_v54 = vmul.f32 -1.442695, %v6021_v32 }
0x1049   : > { %13534 = vpow2.f32 %v10138_v38  ;;  %v6036_v18 = vadd.f32 %v12073_v27, %v17434_v7  ;;  %v6030_v5 = vpop.f32.mrb[165].mxu0 }
0x104a   : > { %v6031_v35 = vadd.f32 %v6030_v5, %v17435_v28 }
0x104b   : > { %v10140_v50 = vmul.f32 -1.442695, %v6036_v18  ;;  %v17438_v18 = vld [vmem:[#allocation31_spill] sm:$0xff] }
0x104c   : > { %v10139_v4 = vmul.f32 -1.442695, %v6031_v35  ;;  %v12076_v45 = vpop.f32.mrb[166].mxu0  ;;  %v17439_v35 = vld [vmem:[#allocation32_spill] sm:$0xff] }
0x104d   : > { %13536 = vpow2.f32 %v10140_v50  ;;  %v6046_v21 = vadd.f32 %v12076_v45, %v17436_v1  ;;  %v6040_v59 = vpop.f32.mrb[167].mxu0 }
0x104e   : > { %13538 = vpow2.f32 %v10139_v4  ;;  %v6041_v6 = vadd.f32 %v6040_v59, %v17437_v49 }
0x104f   : > { %v13531_v29 = vpop.eup %13530  ;;  %v10142_v8 = vmul.f32 -1.442695, %v6046_v21  ;;  %13540 = vpow2.f32 %v10137_v54  ;;  %v17440_v21 = vld [vmem:[#allocation35_spill] sm:$0xff] }
0x1050   : > { %v13533_v24 = vpop.eup %13532  ;;  %v6102_v39 = vadd.f32 1.0, %v13531_v29  ;;  %v10141_v38 = vmul.f32 -1.442695, %v6041_v6  ;;  %v12079_v27 = vpop.f32.mrb[168].mxu0  ;;  %v17441_v6 = vld [vmem:[#allocation36_spill] sm:$0xff] }
0x1051   : > { %v6101_v7 = vadd.f32 1.0, %v13533_v24  ;;  %13542 = vpow2.f32 %v10142_v8  ;;  %v6056_v32 = vadd.f32 %v12079_v27, %v17438_v18  ;;  %v6050_v5 = vpop.f32.mrb[169].mxu0 }
0x1052   : > { %v6051_v50 = vadd.f32 %v6050_v5, %v17439_v35  ;;  %13544 = vrcp.f32 %v6102_v39 }
0x1053   : > { %v13535_v28 = vpop.eup %13534  ;;  %v10144_v45 = vmul.f32 -1.442695, %v6056_v32  ;;  %13546 = vpow2.f32 %v10141_v38 }
0x1054   : > { %v6104_v4 = vadd.f32 1.0, %v13535_v28  ;;  %v10143_v59 = vmul.f32 -1.442695, %v6051_v50  ;;  %v12082_v49 = vpop.f32.mrb[170].mxu0  ;;  %13548 = vrcp.f32 %v6101_v7  ;;  %v17442_v28 = vld [vmem:[#allocation33_spill] sm:$0xff] }
0x1055   : > { %v6066_v29 = vadd.f32 %v12082_v49, %v17440_v21  ;;  %v6060_v54 = vpop.f32.mrb[171].mxu0  ;;  %13550 = vpow2.f32 %v10144_v45  ;;  %v17443_v45 = vld [vmem:[#allocation34_spill] sm:$0xff] }
0x1056   : > { %v6061_v24 = vadd.f32 %v6060_v54, %v17441_v6  ;;  %13552 = vrcp.f32 %v6104_v4 }
0x1057   : > { %v13537_v8 = vpop.eup %13536  ;;  %v10146_v27 = vmul.f32 -1.442695, %v6066_v29  ;;  %13554 = vpow2.f32 %v10143_v59 }
0x1058   : > { %v13539_v18 = vpop.eup %13538  ;;  %v6126_v1 = vadd.f32 1.0, %v13537_v8  ;;  %v10145_v5 = vmul.f32 -1.442695, %v6061_v24  ;;  %v12085_v39 = vpop.f32.mrb[172].mxu0  ;;  %v17444_v8 = vld [vmem:[#allocation37_spill] sm:$0xff] }
0x1059   : > { %v6125_v32 = vadd.f32 1.0, %v13539_v18  ;;  %13556 = vpow2.f32 %v10146_v27  ;;  %v6076_v38 = vadd.f32 %v12085_v39, %v17442_v28  ;;  %v6070_v50 = vpop.f32.mrb[173].mxu0  ;;  %v13541_v7 = vpop.eup %13540  ;;  %v17445_v28 = vld [vmem:[#allocation38_spill] sm:$0xff] }
0x105a   : > { %13558 = vrcp.f32 %v6126_v1  ;;  %v6071_v21 = vadd.f32 %v6070_v50, %v17443_v45  ;;  %v6103_v18 = vadd.f32 1.0, %v13541_v7 }
0x105b   : > { %v13543_v49 = vpop.eup %13542  ;;  %13560 = vrcp.f32 %v6125_v32 }
0x105c   : > { %v6128_v54 = vadd.f32 1.0, %v13543_v49  ;;  %13562 = vpow2.f32 %v10145_v5  ;;  %v12088_v4 = vpop.f32.mrb[174].mxu0  ;;  %v13545_v29 = vpop.eup %13544 }
0x105d   : > { %13564 = vtanh.f32 %v6076_v38  ;;  %v6086_v59 = vadd.f32 %v12088_v4, %v17444_v8  ;;  %v6080_v24 = vpop.f32.mrb[175].mxu0  ;;  %v13547_v6 = vpop.eup %13546 }
0x105e   : > { %13566 = vrcp.f32 %v6128_v54  ;;  %v13549_v27 = vpop.eup %13548  ;;  %v6127_v39 = vadd.f32 1.0, %v13547_v6  ;;  %v6081_v1 = vadd.f32 %v6080_v24, %v17445_v28 }
0x105f   : > { %13568 = vtanh.f32 %v6071_v21  ;;  %v13551_v35 = vpop.eup %13550 }
0x1060   : > { %13570 = vtanh.f32 %v6086_v59  ;;  %v12099_v32 = vpop.f32.mrb[176].mxu0  ;;  %v13553_v50 = vpop.eup %13552  ;;  %v6150_v24 = vadd.f32 1.0, %v13551_v35 }
0x1061   : > { %13572 = vrcp.f32 %v6127_v39  ;;  %v6256_v5 = vpop.f32.mrb[177].mxu0  ;;  %v13555_v49 = vpop.eup %13554 }
0x1062   : > { %13574 = vrcp.f32 %v6103_v18  ;;  %12125 = vmatprep.mubr.msk.f32.mxu1 %vm324_vm1, %v6256_v5  ;;  %v6149_v18 = vadd.f32 1.0, %v13555_v49 }
0x1063   : > { %v13557_v38 = vpop.eup %13556  ;;  %13576 = vtanh.f32 %v6081_v1  ;;  %12126 = vmatmul.mubr.msk.f32.vlgmr.msra.gmra.mrb[176].mxu1 %vm324_vm1, %v12099_v32 }
0x1064   : > { %v13559_v7 = vpop.eup %13558  ;;  %v12102_v54 = vpop.f32.mrb[178].mxu0  ;;  %12732 = vmatpush3.bf16.msra.mxu1 %v14229_v9  ;;  %v6152_v46 = vadd.f32 1.0, %v13557_v38  ;;  %13578 = vrcp.f32 %v6150_v24 }
0x1065   : > { %v13561_v21 = vpop.eup %13560  ;;  %v6266_v6 = vpop.f32.mrb[179].mxu0  ;;  %v6166_v59 = vmul.f32 %v13559_v7, %v15915_v63  ;;  %13580 = vrcp.f32 %v6149_v18 }
0x1066   : > { %v13563_v4 = vpop.eup %13562  ;;  %12128 = vmatprep.mubr.msk.f32.mxu1 %vm324_vm1, %v6266_v6  ;;  %v6165_v1 = vmul.f32 %v13561_v21, %v15921_v62 }
0x1067   : > { %v13565_v39 = vpop.eup %13564  ;;  %12129 = vmatmul.mubr.msk.f32.gmra.mrb[178].mxu1 %vm324_vm1, %v12102_v54  ;;  %v6151_v21 = vadd.f32 1.0, %v13563_v4 }
0x1068   : > { %v13567_v5 = vpop.eup %13566  ;;  %v6170_v32 = vmul.f32 %v13565_v39, %v13545_v29  ;;  %v12105_v28 = vpop.f32.mrb[180].mxu0 }
0x1069   : > { %v13569_v8 = vpop.eup %13568  ;;  %v6168_v45 = vmul.f32 %v13567_v5, %v15923_v19  ;;  %v6276_v37 = vpop.f32.mrb[181].mxu0 }
0x106a   : > { %v13571_v43 = vpop.eup %13570  ;;  %v16274_v63 = vadd.f32 %v6170_v32, %v6166_v59  ;;  %v6169_v35 = vmul.f32 %v13569_v8, %v13549_v27  ;;  %12131 = vmatprep.mubr.msk.f32.mxu1 %vm324_vm1, %v6276_v37 }
0x106b   : > { %v13573_v49 = vpop.eup %13572  ;;  %v6172_v7 = vmul.f32 %v13571_v43, %v13553_v50  ;;  %12132 = vmatmul.mubr.msk.f32.gmra.mrb[180].mxu1 %vm324_vm1, %v12105_v28 }
0x106c   : > { %v13575_v62 = vpop.eup %13574  ;;  %v6167_v29 = vmul.f32 %v13573_v49, %v15929_v0  ;;  %13582 = vtanh.f32 %v16274_v63  ;;  %v16280_v19 = vadd.f32 %v6169_v35, %v6165_v1  ;;  %v12108_v38 = vpop.f32.mrb[182].mxu0 }
0x106d   : > { %v13577_v54 = vpop.eup %13576  ;;  %13584 = vrcp.f32 %v6152_v46  ;;  %v16282_v6 = vadd.f32 %v6172_v7, %v6168_v45  ;;  %v6286_v8 = vpop.f32.mrb[183].mxu0 }
0x106e   : > { %13586 = vtanh.f32 %v16280_v19  ;;  %v6171_v37 = vmul.f32 %v13577_v54, %v13575_v62  ;;  %12134 = vmatprep.mubr.msk.f32.mxu1 %vm324_vm1, %v6286_v8  ;;  %v13579_v46 = vpop.eup %13578 }
0x106f   : > { %13588 = vtanh.f32 %v16282_v6  ;;  %12135 = vmatmul.mubr.msk.f32.gmra.mrb[182].mxu1 %vm324_vm1, %v12108_v38  ;;  %v13581_v27 = vpop.eup %13580 }
0x1070   : > { %v16288_v0 = vadd.f32 %v6171_v37, %v6167_v29  ;;  %v12111_v43 = vpop.f32.mrb[184].mxu0  ;;  %13590 = vrcp.f32 %v6151_v21 }
0x1071   : > { %v6296_v28 = vpop.f32.mrb[185].mxu0 }
0x1072   : > { %13592 = vtanh.f32 %v16288_v0  ;;  %12137 = vmatprep.mubr.msk.f32.mxu1 %vm324_vm1, %v6296_v28 }
0x1073   : > { %12138 = vmatmul.mubr.msk.f32.gmra.mrb[184].mxu1 %vm324_vm1, %v12111_v43 }
0x1074   : > { %v12114_v45 = vpop.f32.mrb[186].mxu0 }
0x1075   : > { %v6306_v50 = vpop.f32.mrb[187].mxu0 }
0x1076   : > { %v13583_v4 = vpop.eup %13582  ;;  %12140 = vmatprep.mubr.msk.f32.mxu1 %vm324_vm1, %v6306_v50 }
0x1077   : > { %v13585_v59 = vpop.eup %13584  ;;  %12141 = vmatmul.mubr.msk.f32.gmra.mrb[186].mxu1 %vm324_vm1, %v12114_v45  ;;  %v6182_v24 = vmul.f32 %v13583_v4, %v13579_v46  ;;  %v17453_v46 = vld [vmem:[#allocation10_spill] sm:$0xff]  ;;  %v17454_v4 = vld [vmem:[#allocation11_spill] sm:$0xff] }
0x1078   : > { %v13587_v39 = vpop.eup %13586  ;;  %v12117_v18 = vpop.f32.mrb[188].mxu0 }
0x1079   : > { %v13589_v5 = vpop.eup %13588  ;;  %v6316_v1 = vpop.f32.mrb[189].mxu0  ;;  %v6181_v32 = vmul.f32 %v13587_v39, %v13581_v27  ;;  %10148 = vst.msk [vmem:[%s14216_s13 + $0xa8] sm:$0xff] %vm324_vm1, %v6182_v24  ;;  %v17455_v39 = vld [vmem:[#allocation12_spill] sm:$0xff] }
0x107a   : > { %12143 = vmatprep.mubr.msk.f32.mxu1 %vm324_vm1, %v6316_v1  ;;  %v6184_v35 = vmul.f32 %v13589_v5, %v13585_v59  ;;  %v13591_v49 = vpop.eup %13590 }
0x107b   : > { %10147 = vst.msk [vmem:[%s14216_s13 + $0xa0] sm:$0xff] %vm324_vm1, %v6181_v32  ;;  %v12713_v7 = vpack.c.bf16 %v6182_v24, %v6181_v32  ;;  %12144 = vmatmul.mubr.msk.f32.gmra.mrb[188].mxu1 %vm324_vm1, %v12117_v18 }
0x107c   : > { %v13593_v62 = vpop.eup %13592  ;;  %v12120_v29 = vpop.f32.mrb[190].mxu0  ;;  %10150 = vst.msk [vmem:[%s14216_s13 + $0xb8] sm:$0xff] %vm324_vm1, %v6184_v35 }
0x107d   : > { %12714 = vmatprep.subr.bf16.mxu0 %v12713_v7  ;;  %v6326_v38 = vpop.f32.mrb[191].mxu0  ;;  %v6183_v54 = vmul.f32 %v13593_v62, %v13591_v49 }
0x107e   : > { %12716 = vmatpush3.bf16.msra.mxu0 %v12713_v7  ;;  %12146 = vmatprep.mubr.msk.f32.mxu1 %vm324_vm1, %v6326_v38 }
0x107f   : > { %10149 = vst.msk [vmem:[%s14216_s13 + $0xb0] sm:$0xff] %vm324_vm1, %v6183_v54  ;;  %v12717_v21 = vpack.c.bf16 %v6184_v35, %v6183_v54  ;;  %12147 = vmatmul.mubr.msk.f32.gmra.mrb[190].mxu1 %vm324_vm1, %v12120_v29 }
0x1081   : > { %12718 = vmatprep.subr.bf16.mxu0 %v12717_v21 }
0x1082   : > { %12720 = vmatpush3.bf16.msra.mxu0 %v12717_v21 }
0x1085   : > { %12158 = vmatmul.mubr.msk.f32.vlgmr.msra.gmra.mrb[192].mxu0 %vm329_vm0, %v15951_v26  ;;  %v17446_v26 = vld [vmem:[#allocation4_spill] sm:$0xff] }
0x1086   : > { %12160 = vmatprep.mubr.msk.f32.mxu0 %vm329_vm0, %v15958_v14  ;;  %v17447_v14 = vld [vmem:[#allocation5_spill] sm:$0xff] }
0x1089   : > { %12161 = vmatmul.mubr.msk.f32.gmra.mrb[194].mxu0 %vm329_vm0, %v15965_v13  ;;  %v17448_v13 = vld [vmem:[#allocation6_spill] sm:$0xff] }
0x108a   : > { %12163 = vmatprep.mubr.msk.f32.mxu0 %vm329_vm0, %v15972_v16  ;;  %v17449_v16 = vld [vmem:[#allocation7_spill] sm:$0xff] }
0x108d   : > { %12164 = vmatmul.mubr.msk.f32.gmra.mrb[196].mxu0 %vm329_vm0, %v15979_v11  ;;  %v17450_v11 = vld [vmem:[#allocation8_spill] sm:$0xff] }
0x108e   : > { %12166 = vmatprep.mubr.msk.f32.mxu0 %vm329_vm0, %v15986_v57  ;;  %v17451_v57 = vld [vmem:[#allocation13_spill] sm:$0xff] }
0x1091   : > { %12167 = vmatmul.mubr.msk.f32.gmra.mrb[198].mxu0 %vm329_vm0, %v15993_v47 }
0x1092   : > { %12169 = vmatprep.mubr.msk.f32.mxu0 %vm329_vm0, %v16000_v40  ;;  %v17452_v40 = vld [vmem:[#allocation9_spill] sm:$0xff] }
0x1095   : > { %12170 = vmatmul.mubr.msk.f32.gmra.mrb[200].mxu0 %vm329_vm0, %v16007_v61 }
0x1096   : > { %12172 = vmatprep.mubr.msk.f32.mxu0 %vm329_vm0, %v16014_v15 }
0x1099   : > { %12173 = vmatmul.mubr.msk.f32.gmra.mrb[202].mxu0 %vm329_vm0, %v17446_v26 }
0x109a   : > { %12175 = vmatprep.mubr.msk.f32.mxu0 %vm329_vm0, %v17447_v14 }
0x109d   : > { %12176 = vmatmul.mubr.msk.f32.gmra.mrb[204].mxu0 %vm329_vm0, %v17448_v13 }
0x109e   : > { %12178 = vmatprep.mubr.msk.f32.mxu0 %vm329_vm0, %v17449_v16 }
0x10a1   : > { %12179 = vmatmul.mubr.msk.f32.gmra.mrb[206].mxu0 %vm329_vm0, %v17450_v11 }
0x10a2   : > { %12189 = vmatprep.mubr.msk.f32.mxu0 %vm329_vm0, %v17451_v57 }
0x1136   : > { %v12127_v47 = vpop.f32.mrb[176].mxu1 }
0x1137   : > { %v6529_v61 = vadd.f32 %v12127_v47, %v17452_v40  ;;  %v6449_v15 = vpop.f32.mrb[177].mxu1 }
0x1138   : > { %v6528_v8 = vadd.f32 %v6449_v15, %v14696_v55 }
0x1139   : > { %v10184_v37 = vmul.f32 -1.442695, %v6529_v61 }
0x113a   : > { %v10183_v43 = vmul.f32 -1.442695, %v6528_v8  ;;  %v12130_v28 = vpop.f32.mrb[178].mxu1 }
0x113b   : > { %13594 = vpow2.f32 %v10184_v37  ;;  %v6531_v45 = vadd.f32 %v12130_v28, %v17453_v46  ;;  %v6459_v27 = vpop.f32.mrb[179].mxu1 }
0x113c   : > { %13596 = vpow2.f32 %v10183_v43  ;;  %v6530_v59 = vadd.f32 %v6459_v27, %v17454_v4 }
0x113d   : > { %v10186_v50 = vmul.f32 -1.442695, %v6531_v45  ;;  %v17456_v45 = vld [vmem:[#allocation14_spill] sm:$0xff] }
0x113e   : > { %v12133_v24 = vpop.f32.mrb[180].mxu1  ;;  %v10185_v35 = vmul.f32 -1.442695, %v6530_v59  ;;  %v17457_v59 = vld [vmem:[#allocation15_spill] sm:$0xff] }
0x113f   : > { %13598 = vpow2.f32 %v10186_v50  ;;  %v6533_v18 = vadd.f32 %v12133_v24, %v17455_v39  ;;  %v6469_v5 = vpop.f32.mrb[181].mxu1 }
0x1140   : > { %v6532_v1 = vadd.f32 %v6469_v5, %v14711_v30 }
0x1141   : > { %v10188_v32 = vmul.f32 -1.442695, %v6533_v18 }
0x1142   : > { %v10187_v49 = vmul.f32 -1.442695, %v6532_v1  ;;  %v12136_v7 = vpop.f32.mrb[182].mxu1 }
0x1143   : > { %13600 = vpow2.f32 %v10188_v32  ;;  %v6535_v62 = vadd.f32 %v12136_v7, %v14717_v31  ;;  %v6479_v29 = vpop.f32.mrb[183].mxu1 }
0x1144   : > { %13602 = vpow2.f32 %v10187_v49  ;;  %v6534_v38 = vadd.f32 %v6479_v29, %v17337_v25 }
0x1145   : > { %v13595_v54 = vpop.eup %13594  ;;  %v10190_v21 = vmul.f32 -1.442695, %v6535_v62  ;;  %13604 = vpow2.f32 %v10185_v35  ;;  %v17458_v62 = vld [vmem:[#allocation16_spill] sm:$0xff] }
0x1146   : > { %v13597_v26 = vpop.eup %13596  ;;  %v6557_v14 = vadd.f32 1.0, %v13595_v54  ;;  %v10189_v13 = vmul.f32 -1.442695, %v6534_v38  ;;  %v12139_v16 = vpop.f32.mrb[184].mxu1 }
0x1147   : > { %v6556_v11 = vadd.f32 1.0, %v13597_v26  ;;  %13606 = vpow2.f32 %v10190_v21  ;;  %v6537_v57 = vadd.f32 %v12139_v16, %v14725_v58  ;;  %v6489_v47 = vpop.f32.mrb[185].mxu1  ;;  %v17459_v26 = vld [vmem:[#allocation17_spill] sm:$0xff] }
0x1148   : > { %v6536_v61 = vadd.f32 %v6489_v47, %v14728_v44  ;;  %13608 = vrcp.f32 %v6557_v14 }
0x1149   : > { %v13599_v15 = vpop.eup %13598  ;;  %v10192_v8 = vmul.f32 -1.442695, %v6537_v57  ;;  %13610 = vpow2.f32 %v10189_v13  ;;  %v17460_v57 = vld [vmem:[#allocation18_spill] sm:$0xff] }
0x114a   : > { %v6559_v37 = vadd.f32 1.0, %v13599_v15  ;;  %v10191_v43 = vmul.f32 -1.442695, %v6536_v61  ;;  %v12142_v28 = vpop.f32.mrb[186].mxu1  ;;  %13612 = vrcp.f32 %v6556_v11 }
0x114b   : > { %v6539_v27 = vadd.f32 %v12142_v28, %v17456_v45  ;;  %v6499_v50 = vpop.f32.mrb[187].mxu1  ;;  %13614 = vpow2.f32 %v10192_v8  ;;  %v17461_v28 = vld [vmem:[#allocation19_spill] sm:$0xff] }
0x114c   : > { %v6538_v24 = vadd.f32 %v6499_v50, %v17457_v59  ;;  %13616 = vrcp.f32 %v6559_v37 }
0x114d   : > { %v13601_v18 = vpop.eup %13600  ;;  %v10194_v5 = vmul.f32 -1.442695, %v6539_v27  ;;  %13618 = vpow2.f32 %v10191_v43 }
0x114e   : > { %v13603_v1 = vpop.eup %13602  ;;  %v6581_v32 = vadd.f32 1.0, %v13601_v18  ;;  %v10193_v35 = vmul.f32 -1.442695, %v6538_v24  ;;  %v12145_v49 = vpop.f32.mrb[188].mxu1 }
0x114f   : > { %v6580_v7 = vadd.f32 1.0, %v13603_v1  ;;  %13620 = vpow2.f32 %v10194_v5  ;;  %v6541_v29 = vadd.f32 %v12145_v49, %v17458_v62  ;;  %v6509_v38 = vpop.f32.mrb[189].mxu1  ;;  %v13605_v54 = vpop.eup %13604 }
0x1150   : > { %13622 = vrcp.f32 %v6581_v32  ;;  %v6540_v14 = vadd.f32 %v6509_v38, %v17459_v26  ;;  %v6558_v8 = vadd.f32 1.0, %v13605_v54 }
0x1151   : > { %v13607_v21 = vpop.eup %13606  ;;  %13624 = vrcp.f32 %v6580_v7 }
0x1152   : > { %v6583_v13 = vadd.f32 1.0, %v13607_v21  ;;  %13626 = vpow2.f32 %v10193_v35  ;;  %v12148_v16 = vpop.f32.mrb[190].mxu1  ;;  %v13609_v11 = vpop.eup %13608 }
0x1153   : > { %13628 = vtanh.f32 %v6541_v29  ;;  %v6543_v47 = vadd.f32 %v12148_v16, %v17460_v57  ;;  %v6519_v61 = vpop.f32.mrb[191].mxu1  ;;  %v13611_v15 = vpop.eup %13610 }
0x1154   : > { %13630 = vrcp.f32 %v6583_v13  ;;  %v13613_v37 = vpop.eup %13612  ;;  %v6582_v43 = vadd.f32 1.0, %v13611_v15  ;;  %v6542_v27 = vadd.f32 %v6519_v61, %v17461_v28 }
0x1155   : > { %13632 = vtanh.f32 %v6540_v14  ;;  %v13615_v50 = vpop.eup %13614 }
0x1156   : > { %13634 = vtanh.f32 %v6543_v47  ;;  %v13617_v24 = vpop.eup %13616  ;;  %v6605_v29 = vadd.f32 1.0, %v13615_v50 }
0x1157   : > { %13636 = vrcp.f32 %v6582_v43  ;;  %v13619_v18 = vpop.eup %13618 }
0x1158   : > { %13638 = vrcp.f32 %v6558_v8  ;;  %v6604_v16 = vadd.f32 1.0, %v13619_v18 }
0x1159   : > { %v13621_v5 = vpop.eup %13620  ;;  %13640 = vtanh.f32 %v6542_v27 }
0x115a   : > { %v13623_v1 = vpop.eup %13622  ;;  %13642 = vrcp.f32 %v6605_v29 }
0x115b   : > { %v13625_v32 = vpop.eup %13624  ;;  %v6621_v49 = vmul.f32 %v13623_v1, %v16079_v3  ;;  %v6607_v1 = vadd.f32 1.0, %v13621_v5 }
0x115c   : > { %v13627_v35 = vpop.eup %13626  ;;  %v6620_v54 = vmul.f32 %v13625_v32, %v16083_v53 }
0x115d   : > { %v13629_v7 = vpop.eup %13628 }
0x115e   : > { %v13631_v38 = vpop.eup %13630  ;;  %v6625_v21 = vmul.f32 %v13629_v7, %v13609_v11  ;;  %v6606_v11 = vadd.f32 1.0, %v13627_v35 }
0x115f   : > { %v13633_v14 = vpop.eup %13632  ;;  %v6623_v13 = vmul.f32 %v13631_v38, %v16085_v51 }
0x1160   : > { %v13635_v47 = vpop.eup %13634  ;;  %v16358_v61 = vadd.f32 %v6625_v21, %v6621_v49  ;;  %v6624_v15 = vmul.f32 %v13633_v14, %v13613_v37 }
0x1161   : > { %v13637_v8 = vpop.eup %13636  ;;  %v6627_v43 = vmul.f32 %v13635_v47, %v13617_v24 }
0x1162   : > { %v13639_v27 = vpop.eup %13638  ;;  %v6622_v3 = vmul.f32 %v13637_v8, %v16089_v10  ;;  %13644 = vtanh.f32 %v16358_v61  ;;  %v16362_v50 = vadd.f32 %v6624_v15, %v6620_v54 }
0x1163   : > { %v13641_v53 = vpop.eup %13640  ;;  %13646 = vrcp.f32 %v6604_v16  ;;  %v16364_v51 = vadd.f32 %v6627_v43, %v6623_v13  ;;  %v16423_v43 = vld [vmem:[%s17173_s2] sm:$0xff] }
0x1164   : > { %13648 = vtanh.f32 %v16362_v50  ;;  %v6626_v18 = vmul.f32 %v13641_v53, %v13639_v27  ;;  %v13643_v10 = vpop.eup %13642  ;;  %v16430_v27 = vld [vmem:[%s17173_s2 + $0x8] sm:$0xff]  ;;  %v16451_v53 = vld [vmem:[%s17173_s2 + $0x20] sm:$0xff] }
0x1165   : > { %13650 = vtanh.f32 %v16364_v51 }
0x1166   : > { %13652 = vrcp.f32 %v6607_v1  ;;  %v16368_v37 = vadd.f32 %v6626_v18, %v6622_v3  ;;  %v16437_v3 = vld [vmem:[%s17173_s2 + $0x10] sm:$0xff]  ;;  %v16444_v1 = vld [vmem:[%s17173_s2 + $0x18] sm:$0xff] }
0x1167   : > { %13654 = vrcp.f32 %v6606_v11  ;;  %v16458_v11 = vld [vmem:[%s17173_s2 + $0x28] sm:$0xff]  ;;  %v16465_v18 = vld [vmem:[%s17173_s2 + $0x30] sm:$0xff] }
0x1168   : > { %13656 = vtanh.f32 %v16368_v37 }
0x116c   : > { %v13645_v24 = vpop.eup %13644 }
0x116d   : > { %v13647_v5 = vpop.eup %13646  ;;  %v6637_v32 = vmul.f32 %v13645_v24, %v13643_v10  ;;  %v16472_v10 = vld [vmem:[%s17173_s2 + $0x38] sm:$0xff]  ;;  %v16479_v24 = vld [vmem:[%s17173_s2 + $0x40] sm:$0xff] }
0x116e   : > { %v13649_v49 = vpop.eup %13648 }
0x116f   : > { %v13651_v7 = vpop.eup %13650  ;;  %v6636_v35 = vmul.f32 %v13649_v49, %v13647_v5  ;;  %v16486_v5 = vld [vmem:[%s17173_s2 + $0x48] sm:$0xff]  ;;  %v16500_v49 = vld [vmem:[%s17173_s2 + $0x58] sm:$0xff] }
0x1170   : > { %v13653_v29 = vpop.eup %13652 }
0x1171   : > { %v13655_v38 = vpop.eup %13654  ;;  %v12721_v54 = vpack.c.bf16 %v6637_v32, %v6636_v35  ;;  %v6639_v21 = vmul.f32 %v13653_v29, %v13651_v7  ;;  %v16493_v32 = vld [vmem:[%s17173_s2 + $0x50] sm:$0xff]  ;;  %v16507_v7 = vld [vmem:[%s17173_s2 + $0x60] sm:$0xff]  ;;  %v16514_v35 = vld [vmem:[%s17173_s2 + $0x68] sm:$0xff] }
0x1172   : > { %v13657_v14 = vpop.eup %13656  ;;  %v16521_v29 = vld [vmem:[%s17173_s2 + $0x70] sm:$0xff] }
0x1173   : > { %12722 = vmatprep.subr.bf16.mxu0 %v12721_v54  ;;  %12734 = vmatprep.subr.bf16.mxu1 %v12721_v54  ;;  %v6638_v13 = vmul.f32 %v13657_v14, %v13655_v38  ;;  %v16528_v38 = vld [vmem:[%s17173_s2 + $0x78] sm:$0xff] }
0x1174   : > { %12724 = vmatpush3.bf16.msra.mxu0 %v12721_v54  ;;  %17463 = vst [vmem:[#allocation21_spill] sm:$0xff] %v16528_v38 }
0x1175   : > { %v12725_v16 = vpack.c.bf16 %v6639_v21, %v6638_v13 }
0x1177   : > { %12726 = vmatprep.subr.bf16.mxu0 %v12725_v16 }
0x1178   : > { %12728 = vmatpush3.bf16.msra.mxu0 %v12725_v16 }
0x1179   : > { %12742 = vmatprep.subr.bf16.mxu0 %v14229_v9 }
0x117b   : > { %12190 = vmatmul.mubr.msk.f32.vlgmr.msra.gmra.mrb[192].mxu0 %vm329_vm0, %v16096_v22  ;;  %v17462_v22 = vld [vmem:[#allocation20_spill] sm:$0xff] }
0x117c   : > { %12192 = vmatprep.mubr.msk.f32.mxu0 %vm329_vm0, %v16103_v48  ;;  %12744 = vmatpush3.bf16.msra.mxu0 %v14229_v9 }
0x117d   : > { %12762 = vmatprep.subr.bf16.mxu0 %v14229_v9 }
0x117f   : > { %12193 = vmatmul.mubr.msk.f32.gmra.mrb[194].mxu0 %vm329_vm0, %v16112_v12 }
0x1180   : > { %12195 = vmatprep.mubr.msk.f32.mxu0 %vm329_vm0, %v16119_v23 }
0x1183   : > { %12196 = vmatmul.mubr.msk.f32.gmra.mrb[196].mxu0 %vm329_vm0, %v16126_v60 }
0x1184   : > { %12198 = vmatprep.mubr.msk.f32.mxu0 %vm329_vm0, %v16133_v33 }
0x1187   : > { %12199 = vmatmul.mubr.msk.f32.gmra.mrb[198].mxu0 %vm329_vm0, %v16140_v56 }
0x1188   : > { %12201 = vmatprep.mubr.msk.f32.mxu0 %vm329_vm0, %v16147_v20 }
0x118b   : > { %12202 = vmatmul.mubr.msk.f32.gmra.mrb[200].mxu0 %vm329_vm0, %v16154_v42 }
0x118c   : > { %12204 = vmatprep.mubr.msk.f32.mxu0 %vm329_vm0, %v16161_v52 }
0x118f   : > { %12205 = vmatmul.mubr.msk.f32.gmra.mrb[202].mxu0 %vm329_vm0, %v16168_v2 }
0x1190   : > { %12207 = vmatprep.mubr.msk.f32.mxu0 %vm329_vm0, %v16175_v36 }
0x1193   : > { %12208 = vmatmul.mubr.msk.f32.gmra.mrb[204].mxu0 %vm329_vm0, %v16182_v41 }
0x1194   : > { %12210 = vmatprep.mubr.msk.f32.mxu0 %vm329_vm0, %v16189_v34 }
0x1197   : > { %12211 = vmatmul.mubr.msk.f32.gmra.mrb[206].mxu0 %vm329_vm0, %v17462_v22 }
0x124e   : > { %v12191_v48 = vpop.f32.mrb[192].mxu0 }
0x124f   : > { %v6851_v12 = vpop.f32.mrb[193].mxu0 }
0x1250   : > { %12217 = vmatprep.mubr.msk.f32.mxu1 %vm324_vm1, %v6851_v12 }
0x1251   : > { %12218 = vmatmul.mubr.msk.f32.vlgmr.msra.gmra.mrb[192].mxu1 %vm324_vm1, %v12191_v48 }
0x1252   : > { %12736 = vmatpush3.bf16.msra.mxu1 %v12721_v54  ;;  %v12194_v23 = vpop.f32.mrb[194].mxu0  ;;  %v16535_v54 = vld [vmem:[%s17173_s2 + $0x80] sm:$0xff] }
0x1253   : > { %12738 = vmatprep.subr.bf16.mxu1 %v12725_v16  ;;  %v6861_v60 = vpop.f32.mrb[195].mxu0  ;;  %17464 = vst [vmem:[#allocation22_spill] sm:$0xff] %v16535_v54 }
0x1254   : > { %12220 = vmatprep.mubr.msk.f32.mxu1 %vm324_vm1, %v6861_v60  ;;  %v17466_v60 = vld [vmem:[#allocation27_spill] sm:$0xff] }
0x1255   : > { %12221 = vmatmul.mubr.msk.f32.gmra.mrb[194].mxu1 %vm324_vm1, %v12194_v23 }
0x1256   : > { %12740 = vmatpush3.bf16.msra.mxu1 %v12725_v16  ;;  %v12197_v33 = vpop.f32.mrb[196].mxu0  ;;  %v17465_v16 = vld [vmem:[#allocation24_spill] sm:$0xff] }
0x1257   : > { %v6871_v56 = vpop.f32.mrb[197].mxu0 }
0x1258   : > { %12223 = vmatprep.mubr.msk.f32.mxu1 %vm324_vm1, %v6871_v56 }
0x1259   : > { %12224 = vmatmul.mubr.msk.f32.gmra.mrb[196].mxu1 %vm324_vm1, %v12197_v33 }
0x125a   : > { %v12200_v20 = vpop.f32.mrb[198].mxu0 }
0x125b   : > { %v6881_v42 = vpop.f32.mrb[199].mxu0 }
0x125c   : > { %12226 = vmatprep.mubr.msk.f32.mxu1 %vm324_vm1, %v6881_v42  ;;  %v17467_v42 = vld [vmem:[#allocation28_spill] sm:$0xff] }
0x125d   : > { %12227 = vmatmul.mubr.msk.f32.gmra.mrb[198].mxu1 %vm324_vm1, %v12200_v20 }
0x125e   : > { %v12203_v52 = vpop.f32.mrb[200].mxu0 }
0x125f   : > { %v6891_v2 = vpop.f32.mrb[201].mxu0 }
0x1260   : > { %12229 = vmatprep.mubr.msk.f32.mxu1 %vm324_vm1, %v6891_v2 }
0x1261   : > { %12230 = vmatmul.mubr.msk.f32.gmra.mrb[200].mxu1 %vm324_vm1, %v12203_v52 }
0x1262   : > { %v12206_v36 = vpop.f32.mrb[202].mxu0 }
0x1263   : > { %v6901_v41 = vpop.f32.mrb[203].mxu0 }
0x1264   : > { %12232 = vmatprep.mubr.msk.f32.mxu1 %vm324_vm1, %v6901_v41 }
0x1265   : > { %12233 = vmatmul.mubr.msk.f32.gmra.mrb[202].mxu1 %vm324_vm1, %v12206_v36  ;;  %v17468_v36 = vld [vmem:[#allocation25_spill] sm:$0xff] }
0x1266   : > { %v12209_v34 = vpop.f32.mrb[204].mxu0 }
0x1267   : > { %v6911_v47 = vpop.f32.mrb[205].mxu0 }
0x1268   : > { %12235 = vmatprep.mubr.msk.f32.mxu1 %vm324_vm1, %v6911_v47  ;;  %v17469_v47 = vld [vmem:[#allocation26_spill] sm:$0xff] }
0x1269   : > { %12236 = vmatmul.mubr.msk.f32.gmra.mrb[204].mxu1 %vm324_vm1, %v12209_v34 }
0x126a   : > { %v12212_v15 = vpop.f32.mrb[206].mxu0 }
0x126b   : > { %v6921_v8 = vpop.f32.mrb[207].mxu0 }
0x126c   : > { %12238 = vmatprep.mubr.msk.f32.mxu1 %vm324_vm1, %v6921_v8 }
0x126d   : > { %12239 = vmatmul.mubr.msk.f32.gmra.mrb[206].mxu1 %vm324_vm1, %v12212_v15 }
0x126e   : > { %12249 = vmatprep.mubr.msk.f32.mxu1 %vm329_vm0, %v16423_v43 }
0x1271   : > { %12250 = vmatmul.mubr.msk.f32.vlgmr.msra.gmra.mrb[208].mxu1 %vm329_vm0, %v16430_v27 }
0x1272   : > { %12252 = vmatprep.mubr.msk.f32.mxu1 %vm329_vm0, %v16437_v3 }
0x1275   : > { %12253 = vmatmul.mubr.msk.f32.gmra.mrb[210].mxu1 %vm329_vm0, %v16444_v1 }
0x1276   : > { %12255 = vmatprep.mubr.msk.f32.mxu1 %vm329_vm0, %v16451_v53 }
0x1279   : > { %12256 = vmatmul.mubr.msk.f32.gmra.mrb[212].mxu1 %vm329_vm0, %v16458_v11 }
0x127a   : > { %12258 = vmatprep.mubr.msk.f32.mxu1 %vm329_vm0, %v16465_v18 }
0x127d   : > { %12259 = vmatmul.mubr.msk.f32.gmra.mrb[214].mxu1 %vm329_vm0, %v16472_v10 }
0x127e   : > { %12261 = vmatprep.mubr.msk.f32.mxu1 %vm329_vm0, %v16479_v24 }
0x1281   : > { %12262 = vmatmul.mubr.msk.f32.gmra.mrb[216].mxu1 %vm329_vm0, %v16486_v5 }
0x1282   : > { %12264 = vmatprep.mubr.msk.f32.mxu1 %vm329_vm0, %v16493_v32 }
0x1285   : > { %12265 = vmatmul.mubr.msk.f32.gmra.mrb[218].mxu1 %vm329_vm0, %v16500_v49 }
0x1286   : > { %12267 = vmatprep.mubr.msk.f32.mxu1 %vm329_vm0, %v16507_v7 }
0x1289   : > { %12268 = vmatmul.mubr.msk.f32.gmra.mrb[220].mxu1 %vm329_vm0, %v16514_v35 }
0x128a   : > { %12270 = vmatprep.mubr.msk.f32.mxu1 %vm329_vm0, %v16521_v29 }
0x128d   : > { %12271 = vmatmul.mubr.msk.f32.gmra.mrb[222].mxu1 %vm329_vm0, %v16528_v38 }
0x128e   : > { %12309 = vmatprep.mubr.msk.f32.mxu1 %vm329_vm0, %v16535_v54 }
0x1324   : > { %v12219_v21 = vpop.f32.mrb[192].mxu1 }
0x1325   : > { %v7050_v14 = vadd.f32 %v12219_v21, %v17430_v17  ;;  %v7044_v13 = vpop.f32.mrb[193].mxu1 }
0x1326   : > { %v7045_v22 = vadd.f32 %v7044_v13, %v17465_v16 }
0x1327   : > { %v10244_v48 = vmul.f32 -1.442695, %v7050_v14 }
0x1328   : > { %v10243_v12 = vmul.f32 -1.442695, %v7045_v22  ;;  %v12222_v23 = vpop.f32.mrb[194].mxu1  ;;  %v17470_v22 = vld [vmem:[#allocation29_spill] sm:$0xff] }
0x1329   : > { %13658 = vpow2.f32 %v10244_v48  ;;  %v7060_v33 = vadd.f32 %v12222_v23, %v17466_v60  ;;  %v7054_v56 = vpop.f32.mrb[195].mxu1 }
0x132a   : > { %13660 = vpow2.f32 %v10243_v12  ;;  %v7055_v52 = vadd.f32 %v7054_v56, %v17467_v42  ;;  %v17471_v12 = vld [vmem:[#allocation30_spill] sm:$0xff] }
0x132b   : > { %v10246_v20 = vmul.f32 -1.442695, %v7060_v33 }
0x132c   : > { %v12225_v2 = vpop.f32.mrb[196].mxu1  ;;  %v10245_v21 = vmul.f32 -1.442695, %v7055_v52 }
0x132d   : > { %13662 = vpow2.f32 %v10246_v20  ;;  %v7070_v41 = vadd.f32 %v12225_v2, %v17468_v36  ;;  %v7064_v34 = vpop.f32.mrb[197].mxu1 }
0x132e   : > { %v7065_v15 = vadd.f32 %v7064_v34, %v17469_v47 }
0x132f   : > { %v10248_v8 = vmul.f32 -1.442695, %v7070_v41  ;;  %v17472_v41 = vld [vmem:[#allocation31_spill] sm:$0xff] }
0x1330   : > { %v10247_v14 = vmul.f32 -1.442695, %v7065_v15  ;;  %v12228_v13 = vpop.f32.mrb[198].mxu1  ;;  %v17473_v15 = vld [vmem:[#allocation32_spill] sm:$0xff] }
0x1331   : > { %13664 = vpow2.f32 %v10248_v8  ;;  %v7080_v48 = vadd.f32 %v12228_v13, %v17470_v22  ;;  %v7074_v23 = vpop.f32.mrb[199].mxu1 }
0x1332   : > { %13666 = vpow2.f32 %v10247_v14  ;;  %v7075_v33 = vadd.f32 %v7074_v23, %v17471_v12 }
0x1333   : > { %v13659_v60 = vpop.eup %13658  ;;  %v10250_v56 = vmul.f32 -1.442695, %v7080_v48  ;;  %13668 = vpow2.f32 %v10245_v21  ;;  %v17474_v48 = vld [vmem:[#allocation35_spill] sm:$0xff] }
0x1334   : > { %v13661_v42 = vpop.eup %13660  ;;  %v7136_v20 = vadd.f32 1.0, %v13659_v60  ;;  %v10249_v2 = vmul.f32 -1.442695, %v7075_v33  ;;  %v12231_v36 = vpop.f32.mrb[200].mxu1  ;;  %v17475_v33 = vld [vmem:[#allocation36_spill] sm:$0xff] }
0x1335   : > { %v7135_v16 = vadd.f32 1.0, %v13661_v42  ;;  %13670 = vpow2.f32 %v10250_v56  ;;  %v7090_v52 = vadd.f32 %v12231_v36, %v17472_v41  ;;  %v7084_v34 = vpop.f32.mrb[201].mxu1 }
0x1336   : > { %v7085_v8 = vadd.f32 %v7084_v34, %v17473_v15  ;;  %13672 = vrcp.f32 %v7136_v20 }
0x1337   : > { %v13663_v47 = vpop.eup %13662  ;;  %v10252_v13 = vmul.f32 -1.442695, %v7090_v52  ;;  %13674 = vpow2.f32 %v10249_v2 }
0x1338   : > { %v7138_v14 = vadd.f32 1.0, %v13663_v47  ;;  %v10251_v23 = vmul.f32 -1.442695, %v7085_v8  ;;  %v12234_v12 = vpop.f32.mrb[202].mxu1  ;;  %13676 = vrcp.f32 %v7135_v16  ;;  %v17476_v47 = vld [vmem:[#allocation33_spill] sm:$0xff] }
0x1339   : > { %v7100_v60 = vadd.f32 %v12234_v12, %v17474_v48  ;;  %v7094_v21 = vpop.f32.mrb[203].mxu1  ;;  %13678 = vpow2.f32 %v10252_v13  ;;  %v17477_v13 = vld [vmem:[#allocation34_spill] sm:$0xff] }
0x133a   : > { %v7095_v42 = vadd.f32 %v7094_v21, %v17475_v33  ;;  %13680 = vrcp.f32 %v7138_v14 }
0x133b   : > { %v13665_v56 = vpop.eup %13664  ;;  %v10254_v36 = vmul.f32 -1.442695, %v7100_v60  ;;  %13682 = vpow2.f32 %v10251_v23 }
0x133c   : > { %v13667_v41 = vpop.eup %13666  ;;  %v7160_v22 = vadd.f32 1.0, %v13665_v56  ;;  %v10253_v34 = vmul.f32 -1.442695, %v7095_v42  ;;  %v12237_v20 = vpop.f32.mrb[204].mxu1  ;;  %v17478_v56 = vld [vmem:[#allocation37_spill] sm:$0xff] }
0x133d   : > { %v7159_v52 = vadd.f32 1.0, %v13667_v41  ;;  %13684 = vpow2.f32 %v10254_v36  ;;  %v7110_v2 = vadd.f32 %v12237_v20, %v17476_v47  ;;  %v7104_v8 = vpop.f32.mrb[205].mxu1  ;;  %v13669_v16 = vpop.eup %13668  ;;  %v17479_v47 = vld [vmem:[#allocation38_spill] sm:$0xff] }
0x133e   : > { %13686 = vrcp.f32 %v7160_v22  ;;  %v7105_v48 = vadd.f32 %v7104_v8, %v17477_v13  ;;  %v7137_v41 = vadd.f32 1.0, %v13669_v16 }
0x133f   : > { %v13671_v12 = vpop.eup %13670  ;;  %13688 = vrcp.f32 %v7159_v52 }
0x1340   : > { %v7162_v21 = vadd.f32 1.0, %v13671_v12  ;;  %13690 = vpow2.f32 %v10253_v34  ;;  %v12240_v14 = vpop.f32.mrb[206].mxu1  ;;  %v13673_v60 = vpop.eup %13672 }
0x1341   : > { %13692 = vtanh.f32 %v7110_v2  ;;  %v7120_v23 = vadd.f32 %v12240_v14, %v17478_v56  ;;  %v7114_v42 = vpop.f32.mrb[207].mxu1  ;;  %v13675_v33 = vpop.eup %13674 }
0x1342   : > { %13694 = vrcp.f32 %v7162_v21  ;;  %v13677_v36 = vpop.eup %13676  ;;  %v7161_v20 = vadd.f32 1.0, %v13675_v33  ;;  %v7115_v22 = vadd.f32 %v7114_v42, %v17479_v47 }
0x1343   : > { %13696 = vtanh.f32 %v7105_v48  ;;  %v13679_v15 = vpop.eup %13678 }
0x1344   : > { %13698 = vtanh.f32 %v7120_v23  ;;  %v12251_v52 = vpop.f32.mrb[208].mxu1  ;;  %v13681_v8 = vpop.eup %13680  ;;  %v7184_v42 = vadd.f32 1.0, %v13679_v15 }
0x1345   : > { %13700 = vrcp.f32 %v7161_v20  ;;  %v7290_v34 = vpop.f32.mrb[209].mxu1  ;;  %v13683_v12 = vpop.eup %13682 }
0x1346   : > { %13702 = vrcp.f32 %v7137_v41  ;;  %12277 = vmatprep.mubr.msk.f32.mxu0 %vm324_vm1, %v7290_v34  ;;  %v7183_v41 = vadd.f32 1.0, %v13683_v12 }
0x1347   : > { %v13685_v2 = vpop.eup %13684  ;;  %13704 = vtanh.f32 %v7115_v22  ;;  %12278 = vmatmul.mubr.msk.f32.vlgmr.msra.gmra.mrb[208].mxu0 %vm324_vm1, %v12251_v52 }
0x1348   : > { %v13687_v16 = vpop.eup %13686  ;;  %v12254_v21 = vpop.f32.mrb[210].mxu1  ;;  %12764 = vmatpush3.bf16.msra.mxu0 %v14229_v9  ;;  %v7186_v17 = vadd.f32 1.0, %v13685_v2  ;;  %13706 = vrcp.f32 %v7184_v42 }
0x1349   : > { %v13689_v48 = vpop.eup %13688  ;;  %v7300_v33 = vpop.f32.mrb[211].mxu1  ;;  %v7200_v23 = vmul.f32 %v13687_v16, %v16274_v63  ;;  %13708 = vrcp.f32 %v7183_v41 }
0x134a   : > { %v13691_v14 = vpop.eup %13690  ;;  %12280 = vmatprep.mubr.msk.f32.mxu0 %vm324_vm1, %v7300_v33  ;;  %v7199_v22 = vmul.f32 %v13689_v48, %v16280_v19 }
0x134b   : > { %v13693_v20 = vpop.eup %13692  ;;  %12281 = vmatmul.mubr.msk.f32.gmra.mrb[210].mxu0 %vm324_vm1, %v12254_v21  ;;  %v7185_v48 = vadd.f32 1.0, %v13691_v14 }
0x134c   : > { %v13695_v34 = vpop.eup %13694  ;;  %v7204_v52 = vmul.f32 %v13693_v20, %v13673_v60  ;;  %v12257_v47 = vpop.f32.mrb[212].mxu1 }
0x134d   : > { %v13697_v56 = vpop.eup %13696  ;;  %v7202_v13 = vmul.f32 %v13695_v34, %v16282_v6  ;;  %v7310_v54 = vpop.f32.mrb[213].mxu1 }
0x134e   : > { %v13699_v38 = vpop.eup %13698  ;;  %v16563_v63 = vadd.f32 %v7204_v52, %v7200_v23  ;;  %v7203_v15 = vmul.f32 %v13697_v56, %v13677_v36  ;;  %12283 = vmatprep.mubr.msk.f32.mxu0 %vm324_vm1, %v7310_v54 }
0x134f   : > { %v13701_v12 = vpop.eup %13700  ;;  %v7206_v16 = vmul.f32 %v13699_v38, %v13681_v8  ;;  %12284 = vmatmul.mubr.msk.f32.gmra.mrb[212].mxu0 %vm324_vm1, %v12257_v47 }
0x1350   : > { %v13703_v19 = vpop.eup %13702  ;;  %v7201_v60 = vmul.f32 %v13701_v12, %v16288_v0  ;;  %13710 = vtanh.f32 %v16563_v63  ;;  %v16569_v6 = vadd.f32 %v7203_v15, %v7199_v22  ;;  %v12260_v2 = vpop.f32.mrb[214].mxu1 }
0x1351   : > { %v13705_v21 = vpop.eup %13704  ;;  %13712 = vrcp.f32 %v7186_v17  ;;  %v16571_v33 = vadd.f32 %v7206_v16, %v7202_v13  ;;  %v7320_v56 = vpop.f32.mrb[215].mxu1 }
0x1352   : > { %13714 = vtanh.f32 %v16569_v6  ;;  %v7205_v54 = vmul.f32 %v13705_v21, %v13703_v19  ;;  %12286 = vmatprep.mubr.msk.f32.mxu0 %vm324_vm1, %v7320_v56  ;;  %v13707_v17 = vpop.eup %13706  ;;  %v16599_v56 = vld [vmem:[%s17173_s2 + $0x88] sm:$0xff] }
0x1353   : > { %13716 = vtanh.f32 %v16571_v33  ;;  %12287 = vmatmul.mubr.msk.f32.gmra.mrb[214].mxu0 %vm324_vm1, %v12260_v2  ;;  %v13709_v36 = vpop.eup %13708 }
0x1354   : > { %v16577_v0 = vadd.f32 %v7205_v54, %v7201_v60  ;;  %v12263_v38 = vpop.f32.mrb[216].mxu1  ;;  %13718 = vrcp.f32 %v7185_v48  ;;  %v16606_v54 = vld [vmem:[%s17173_s2 + $0x90] sm:$0xff] }
0x1355   : > { %v7330_v47 = vpop.f32.mrb[217].mxu1 }
0x1356   : > { %13720 = vtanh.f32 %v16577_v0  ;;  %12289 = vmatprep.mubr.msk.f32.mxu0 %vm324_vm1, %v7330_v47  ;;  %v16620_v47 = vld [vmem:[%s17173_s2 + $0xa0] sm:$0xff] }
0x1357   : > { %12290 = vmatmul.mubr.msk.f32.gmra.mrb[216].mxu0 %vm324_vm1, %v12263_v38  ;;  %v16613_v38 = vld [vmem:[%s17173_s2 + $0x98] sm:$0xff] }
0x1358   : > { %v12266_v13 = vpop.f32.mrb[218].mxu1 }
0x1359   : > { %v7340_v8 = vpop.f32.mrb[219].mxu1 }
0x135a   : > { %v13711_v14 = vpop.eup %13710  ;;  %12292 = vmatprep.mubr.msk.f32.mxu0 %vm324_vm1, %v7340_v8  ;;  %v16648_v8 = vld [vmem:[%s17173_s2 + $0xc0] sm:$0xff] }
0x135b   : > { %v13713_v23 = vpop.eup %13712  ;;  %12293 = vmatmul.mubr.msk.f32.gmra.mrb[218].mxu0 %vm324_vm1, %v12266_v13  ;;  %v7216_v42 = vmul.f32 %v13711_v14, %v13707_v17  ;;  %v16627_v17 = vld [vmem:[%s17173_s2 + $0xa8] sm:$0xff]  ;;  %v16634_v13 = vld [vmem:[%s17173_s2 + $0xb0] sm:$0xff] }
0x135c   : > { %v13715_v20 = vpop.eup %13714  ;;  %v12269_v41 = vpop.f32.mrb[220].mxu1  ;;  %v16655_v14 = vld [vmem:[%s17173_s2 + $0xc8] sm:$0xff] }
0x135d   : > { %v13717_v34 = vpop.eup %13716  ;;  %v7350_v22 = vpop.f32.mrb[221].mxu1  ;;  %v7215_v52 = vmul.f32 %v13715_v20, %v13709_v36  ;;  %10256 = vst.msk [vmem:[%s14216_s13 + $0xc8] sm:$0xff] %vm324_vm1, %v7216_v42  ;;  %v16641_v36 = vld [vmem:[%s17173_s2 + $0xb8] sm:$0xff]  ;;  %v16676_v20 = vld [vmem:[%s17173_s2 + $0xe0] sm:$0xff] }
0x135e   : > { %12295 = vmatprep.mubr.msk.f32.mxu0 %vm324_vm1, %v7350_v22  ;;  %v7218_v15 = vmul.f32 %v13717_v34, %v13713_v23  ;;  %v13719_v12 = vpop.eup %13718  ;;  %v16662_v23 = vld [vmem:[%s17173_s2 + $0xd0] sm:$0xff]  ;;  %17481 = vst [vmem:[#allocation4_spill] sm:$0xff] %v16676_v20  ;;  %v16697_v22 = vld [vmem:[%s17173_s2 + $0xf8] sm:$0xff] }
0x135f   : > { %10255 = vst.msk [vmem:[%s14216_s13 + $0xc0] sm:$0xff] %vm324_vm1, %v7215_v52  ;;  %v12745_v16 = vpack.c.bf16 %v7216_v42, %v7215_v52  ;;  %12296 = vmatmul.mubr.msk.f32.gmra.mrb[220].mxu0 %vm324_vm1, %v12269_v41  ;;  %v16669_v42 = vld [vmem:[%s17173_s2 + $0xd8] sm:$0xff]  ;;  %v16683_v41 = vld [vmem:[%s17173_s2 + $0xe8] sm:$0xff]  ;;  %v16690_v34 = vld [vmem:[%s17173_s2 + $0xf0] sm:$0xff] }
0x1360   : > { %v13721_v19 = vpop.eup %13720  ;;  %v12272_v60 = vpop.f32.mrb[222].mxu1  ;;  %10258 = vst.msk [vmem:[%s14216_s13 + $0xd8] sm:$0xff] %vm324_vm1, %v7218_v15  ;;  %17480 = vst [vmem:[#allocation3_spill] sm:$0xff] %v16669_v42  ;;  %v16704_v52 = vld [vmem:[%s17172_s1 + $0x80] sm:$0xff] }
0x1361   : > { %12746 = vmatprep.subr.bf16.mxu1 %v12745_v16  ;;  %v7360_v2 = vpop.f32.mrb[223].mxu1  ;;  %v7217_v21 = vmul.f32 %v13721_v19, %v13719_v12  ;;  %17482 = vst [vmem:[#allocation5_spill] sm:$0xff] %v16683_v41  ;;  %17483 = vst [vmem:[#allocation6_spill] sm:$0xff] %v16690_v34 }
0x1362   : > { %12748 = vmatpush3.bf16.msra.mxu1 %v12745_v16  ;;  %12298 = vmatprep.mubr.msk.f32.mxu0 %vm324_vm1, %v7360_v2  ;;  %17484 = vst [vmem:[#allocation7_spill] sm:$0xff] %v16697_v22  ;;  %17485 = vst [vmem:[#allocation8_spill] sm:$0xff] %v16704_v52 }
0x1363   : > { %10257 = vst.msk [vmem:[%s14216_s13 + $0xd0] sm:$0xff] %vm324_vm1, %v7217_v21  ;;  %v12749_v48 = vpack.c.bf16 %v7218_v15, %v7217_v21  ;;  %12299 = vmatmul.mubr.msk.f32.gmra.mrb[222].mxu0 %vm324_vm1, %v12272_v60 }
0x1365   : > { %12750 = vmatprep.subr.bf16.mxu1 %v12749_v48 }
0x1366   : > { %12752 = vmatpush3.bf16.msra.mxu1 %v12749_v48 }
0x1369   : > { %12310 = vmatmul.mubr.msk.f32.vlgmr.msra.gmra.mrb[224].mxu1 %vm329_vm0, %v16599_v56 }
0x136a   : > { %12312 = vmatprep.mubr.msk.f32.mxu1 %vm329_vm0, %v16606_v54 }
0x136d   : > { %12313 = vmatmul.mubr.msk.f32.gmra.mrb[226].mxu1 %vm329_vm0, %v16613_v38 }
0x136e   : > { %12315 = vmatprep.mubr.msk.f32.mxu1 %vm329_vm0, %v16620_v47 }
0x1371   : > { %12316 = vmatmul.mubr.msk.f32.gmra.mrb[228].mxu1 %vm329_vm0, %v16627_v17 }
0x1372   : > { %12318 = vmatprep.mubr.msk.f32.mxu1 %vm329_vm0, %v16634_v13 }
0x1375   : > { %12319 = vmatmul.mubr.msk.f32.gmra.mrb[230].mxu1 %vm329_vm0, %v16641_v36 }
0x1376   : > { %12321 = vmatprep.mubr.msk.f32.mxu1 %vm329_vm0, %v16648_v8 }
0x1379   : > { %12322 = vmatmul.mubr.msk.f32.gmra.mrb[232].mxu1 %vm329_vm0, %v16655_v14 }
0x137a   : > { %12324 = vmatprep.mubr.msk.f32.mxu1 %vm329_vm0, %v16662_v23 }
0x137d   : > { %12325 = vmatmul.mubr.msk.f32.gmra.mrb[234].mxu1 %vm329_vm0, %v16669_v42 }
0x137e   : > { %12327 = vmatprep.mubr.msk.f32.mxu1 %vm329_vm0, %v16676_v20 }
0x1381   : > { %12328 = vmatmul.mubr.msk.f32.gmra.mrb[236].mxu1 %vm329_vm0, %v16683_v41 }
0x1382   : > { %12330 = vmatprep.mubr.msk.f32.mxu1 %vm329_vm0, %v16690_v34 }
0x1385   : > { %12331 = vmatmul.mubr.msk.f32.gmra.mrb[238].mxu1 %vm329_vm0, %v16697_v22 }
0x1386   : > { %12341 = vmatprep.mubr.msk.f32.mxu1 %vm329_vm0, %v16704_v52 }
0x141a   : > { %v12279_v15 = vpop.f32.mrb[208].mxu0 }
0x141b   : > { %v7563_v12 = vadd.f32 %v12279_v15, %v17452_v40  ;;  %v7483_v16 = vpop.f32.mrb[209].mxu0 }
0x141c   : > { %v7562_v19 = vadd.f32 %v7483_v16, %v14696_v55 }
0x141d   : > { %v10292_v60 = vmul.f32 -1.442695, %v7563_v12 }
0x141e   : > { %v10291_v2 = vmul.f32 -1.442695, %v7562_v19  ;;  %v12282_v21 = vpop.f32.mrb[210].mxu0 }
0x141f   : > { %13722 = vpow2.f32 %v10292_v60  ;;  %v7565_v48 = vadd.f32 %v12282_v21, %v17453_v46  ;;  %v7493_v22 = vpop.f32.mrb[211].mxu0 }
0x1420   : > { %13724 = vpow2.f32 %v10291_v2  ;;  %v7564_v41 = vadd.f32 %v7493_v22, %v17454_v4 }
0x1421   : > { %v10294_v34 = vmul.f32 -1.442695, %v7565_v48 }
0x1422   : > { %v12285_v20 = vpop.f32.mrb[212].mxu0  ;;  %v10293_v16 = vmul.f32 -1.442695, %v7564_v41 }
0x1423   : > { %13726 = vpow2.f32 %v10294_v34  ;;  %v7567_v52 = vadd.f32 %v12285_v20, %v17455_v39  ;;  %v7503_v42 = vpop.f32.mrb[213].mxu0 }
0x1424   : > { %v7566_v15 = vadd.f32 %v7503_v42, %v14711_v30 }
0x1425   : > { %v10296_v40 = vmul.f32 -1.442695, %v7567_v52 }
0x1426   : > { %v10295_v12 = vmul.f32 -1.442695, %v7566_v15  ;;  %v12288_v19 = vpop.f32.mrb[214].mxu0 }
0x1427   : > { %13728 = vpow2.f32 %v10296_v40  ;;  %v7569_v60 = vadd.f32 %v12288_v19, %v14717_v31  ;;  %v7513_v21 = vpop.f32.mrb[215].mxu0 }
0x1428   : > { %13730 = vpow2.f32 %v10295_v12  ;;  %v7568_v2 = vadd.f32 %v7513_v21, %v17337_v25 }
0x1429   : > { %v13723_v48 = vpop.eup %13722  ;;  %v10298_v22 = vmul.f32 -1.442695, %v7569_v60  ;;  %13732 = vpow2.f32 %v10293_v16 }
0x142a   : > { %v13725_v4 = vpop.eup %13724  ;;  %v7591_v34 = vadd.f32 1.0, %v13723_v48  ;;  %v10297_v20 = vmul.f32 -1.442695, %v7568_v2  ;;  %v12291_v39 = vpop.f32.mrb[216].mxu0 }
0x142b   : > { %v7590_v46 = vadd.f32 1.0, %v13725_v4  ;;  %13734 = vpow2.f32 %v10298_v22  ;;  %v7571_v42 = vadd.f32 %v12291_v39, %v14725_v58  ;;  %v7523_v41 = vpop.f32.mrb[217].mxu0 }
0x142c   : > { %v7570_v40 = vadd.f32 %v7523_v41, %v14728_v44  ;;  %13736 = vrcp.f32 %v7591_v34 }
0x142d   : > { %v13727_v52 = vpop.eup %13726  ;;  %v10300_v15 = vmul.f32 -1.442695, %v7571_v42  ;;  %13738 = vpow2.f32 %v10297_v20 }
0x142e   : > { %v7593_v12 = vadd.f32 1.0, %v13727_v52  ;;  %v10299_v19 = vmul.f32 -1.442695, %v7570_v40  ;;  %v12294_v21 = vpop.f32.mrb[218].mxu0  ;;  %13740 = vrcp.f32 %v7590_v46 }
0x142f   : > { %v7573_v60 = vadd.f32 %v12294_v21, %v17456_v45  ;;  %v7533_v16 = vpop.f32.mrb[219].mxu0  ;;  %13742 = vpow2.f32 %v10300_v15 }
0x1430   : > { %v7572_v4 = vadd.f32 %v7533_v16, %v17457_v59  ;;  %13744 = vrcp.f32 %v7593_v12 }
0x1431   : > { %v13729_v2 = vpop.eup %13728  ;;  %v10302_v39 = vmul.f32 -1.442695, %v7573_v60  ;;  %13746 = vpow2.f32 %v10299_v19 }
0x1432   : > { %v13731_v48 = vpop.eup %13730  ;;  %v7615_v22 = vadd.f32 1.0, %v13729_v2  ;;  %v10301_v41 = vmul.f32 -1.442695, %v7572_v4  ;;  %v12297_v34 = vpop.f32.mrb[220].mxu0 }
0x1433   : > { %v7614_v42 = vadd.f32 1.0, %v13731_v48  ;;  %13748 = vpow2.f32 %v10302_v39  ;;  %v7575_v20 = vadd.f32 %v12297_v34, %v17458_v62  ;;  %v7543_v40 = vpop.f32.mrb[221].mxu0  ;;  %v13733_v46 = vpop.eup %13732 }
0x1434   : > { %13750 = vrcp.f32 %v7615_v22  ;;  %v7574_v15 = vadd.f32 %v7543_v40, %v17459_v26  ;;  %v7592_v2 = vadd.f32 1.0, %v13733_v46 }
0x1435   : > { %v13735_v52 = vpop.eup %13734  ;;  %13752 = vrcp.f32 %v7614_v42 }
0x1436   : > { %v7617_v21 = vadd.f32 1.0, %v13735_v52  ;;  %13754 = vpow2.f32 %v10301_v41  ;;  %v12300_v12 = vpop.f32.mrb[222].mxu0  ;;  %v13737_v60 = vpop.eup %13736 }
0x1437   : > { %13756 = vtanh.f32 %v7575_v20  ;;  %v7577_v19 = vadd.f32 %v12300_v12, %v17460_v57  ;;  %v7553_v16 = vpop.f32.mrb[223].mxu0  ;;  %v13739_v4 = vpop.eup %13738 }
0x1438   : > { %13758 = vrcp.f32 %v7617_v21  ;;  %v13741_v39 = vpop.eup %13740  ;;  %v7616_v48 = vadd.f32 1.0, %v13739_v4  ;;  %v7576_v22 = vadd.f32 %v7553_v16, %v17461_v28 }
0x1439   : > { %13760 = vtanh.f32 %v7574_v15  ;;  %v13743_v34 = vpop.eup %13742 }
0x143a   : > { %13762 = vtanh.f32 %v7577_v19  ;;  %v13745_v42 = vpop.eup %13744  ;;  %v7639_v21 = vadd.f32 1.0, %v13743_v34 }
0x143b   : > { %13764 = vrcp.f32 %v7616_v48  ;;  %v13747_v40 = vpop.eup %13746 }
0x143c   : > { %13766 = vrcp.f32 %v7592_v2  ;;  %v7638_v28 = vadd.f32 1.0, %v13747_v40 }
0x143d   : > { %v13749_v41 = vpop.eup %13748  ;;  %13768 = vtanh.f32 %v7576_v22 }
0x143e   : > { %v13751_v20 = vpop.eup %13750  ;;  %13770 = vrcp.f32 %v7639_v21 }
0x143f   : > { %v13753_v52 = vpop.eup %13752  ;;  %v7655_v57 = vmul.f32 %v13751_v20, %v16358_v61  ;;  %v7641_v20 = vadd.f32 1.0, %v13749_v41 }
0x1440   : > { %v13755_v12 = vpop.eup %13754  ;;  %v7654_v15 = vmul.f32 %v13753_v52, %v16362_v50 }
0x1441   : > { %v13757_v46 = vpop.eup %13756 }
0x1442   : > { %v13759_v26 = vpop.eup %13758  ;;  %v7659_v4 = vmul.f32 %v13757_v46, %v13737_v60  ;;  %v7640_v60 = vadd.f32 1.0, %v13755_v12 }
0x1443   : > { %v13761_v16 = vpop.eup %13760  ;;  %v7657_v19 = vmul.f32 %v13759_v26, %v16364_v51 }
0x1444   : > { %v13763_v48 = vpop.eup %13762  ;;  %v16727_v62 = vadd.f32 %v7659_v4, %v7655_v57  ;;  %v7658_v2 = vmul.f32 %v13761_v16, %v13741_v39  ;;  %v16744_v16 = vld [vmem:[%s17172_s1 + $0x88] sm:$0xff] }
0x1445   : > { %v13765_v22 = vpop.eup %13764  ;;  %v7661_v59 = vmul.f32 %v13763_v48, %v13745_v42  ;;  %v16760_v48 = vld [vmem:[%s17172_s1 + $0x98] sm:$0xff] }
0x1446   : > { %v13767_v45 = vpop.eup %13766  ;;  %v7656_v61 = vmul.f32 %v13765_v22, %v16368_v37  ;;  %13772 = vtanh.f32 %v16727_v62  ;;  %v16731_v34 = vadd.f32 %v7658_v2, %v7654_v15  ;;  %v16767_v2 = vld [vmem:[%s17172_s1 + $0xa0] sm:$0xff]  ;;  %v16774_v22 = vld [vmem:[%s17172_s1 + $0xa8] sm:$0xff] }
0x1447   : > { %v13769_v50 = vpop.eup %13768  ;;  %13774 = vrcp.f32 %v7638_v28  ;;  %v16733_v26 = vadd.f32 %v7661_v59, %v7657_v19  ;;  %v16751_v19 = vld [vmem:[%s17172_s1 + $0x90] sm:$0xff] }
0x1448   : > { %13776 = vtanh.f32 %v16731_v34  ;;  %v7660_v57 = vmul.f32 %v13769_v50, %v13767_v45  ;;  %v13771_v37 = vpop.eup %13770  ;;  %v16795_v50 = vld [vmem:[%s17172_s1 + $0xc0] sm:$0xff] }
0x1449   : > { %13778 = vtanh.f32 %v16733_v26 }
0x144a   : > { %13780 = vrcp.f32 %v7641_v20  ;;  %v16737_v51 = vadd.f32 %v7660_v57, %v7656_v61  ;;  %v16781_v61 = vld [vmem:[%s17172_s1 + $0xb0] sm:$0xff]  ;;  %v16788_v20 = vld [vmem:[%s17172_s1 + $0xb8] sm:$0xff] }
0x144b   : > { %13782 = vrcp.f32 %v7640_v60  ;;  %v16802_v60 = vld [vmem:[%s17172_s1 + $0xc8] sm:$0xff]  ;;  %v16809_v57 = vld [vmem:[%s17172_s1 + $0xd0] sm:$0xff] }
0x144c   : > { %13784 = vtanh.f32 %v16737_v51 }
0x1450   : > { %v13773_v39 = vpop.eup %13772 }
0x1451   : > { %v13775_v42 = vpop.eup %13774  ;;  %v7671_v40 = vmul.f32 %v13773_v39, %v13771_v37  ;;  %v16816_v37 = vld [vmem:[%s17172_s1 + $0xd8] sm:$0xff]  ;;  %v16823_v39 = vld [vmem:[%s17172_s1 + $0xe0] sm:$0xff] }
0x1452   : > { %v13777_v41 = vpop.eup %13776 }
0x1453   : > { %v13779_v28 = vpop.eup %13778  ;;  %v7670_v52 = vmul.f32 %v13777_v41, %v13775_v42  ;;  %v16830_v42 = vld [vmem:[%s17172_s1 + $0xe8] sm:$0xff]  ;;  %v16844_v41 = vld [vmem:[%s17172_s1 + $0xf8] sm:$0xff] }
0x1454   : > { %v13781_v59 = vpop.eup %13780  ;;  %17486 = vst [vmem:[#allocation13_spill] sm:$0xff] %v16844_v41 }
0x1455   : > { %v13783_v12 = vpop.eup %13782  ;;  %v12753_v46 = vpack.c.bf16 %v7671_v40, %v7670_v52  ;;  %v7673_v21 = vmul.f32 %v13781_v59, %v13779_v28  ;;  %v16837_v40 = vld [vmem:[%s17172_s1 + $0xf0] sm:$0xff] }
0x1456   : > { %v13785_v45 = vpop.eup %13784 }
0x1457   : > { %12754 = vmatprep.subr.bf16.mxu1 %v12753_v46  ;;  %12766 = vmatprep.subr.bf16.mxu0 %v12753_v46  ;;  %v7672_v15 = vmul.f32 %v13785_v45, %v13783_v12 }
0x1458   : > { %12756 = vmatpush3.bf16.msra.mxu1 %v12753_v46 }
0x1459   : > { %v12757_v4 = vpack.c.bf16 %v7673_v21, %v7672_v15 }
0x145b   : > { %12758 = vmatprep.subr.bf16.mxu1 %v12757_v4 }
0x145c   : > { %12760 = vmatpush3.bf16.msra.mxu1 %v12757_v4 }
0x145d   : > { %12774 = vmatprep.subr.bf16.mxu1 %v14229_v9 }
0x145f   : > { %12342 = vmatmul.mubr.msk.f32.vlgmr.msra.gmra.mrb[224].mxu1 %vm329_vm0, %v16744_v16 }
0x1460   : > { %12344 = vmatprep.mubr.msk.f32.mxu1 %vm329_vm0, %v16751_v19  ;;  %12776 = vmatpush3.bf16.msra.mxu1 %v14229_v9 }
0x1461   : > { %12794 = vmatprep.subr.bf16.mxu1 %v14229_v9 }
0x1463   : > { %12345 = vmatmul.mubr.msk.f32.gmra.mrb[226].mxu1 %vm329_vm0, %v16760_v48 }
0x1464   : > { %12347 = vmatprep.mubr.msk.f32.mxu1 %vm329_vm0, %v16767_v2 }
0x1467   : > { %12348 = vmatmul.mubr.msk.f32.gmra.mrb[228].mxu1 %vm329_vm0, %v16774_v22 }
0x1468   : > { %12350 = vmatprep.mubr.msk.f32.mxu1 %vm329_vm0, %v16781_v61 }
0x146b   : > { %12351 = vmatmul.mubr.msk.f32.gmra.mrb[230].mxu1 %vm329_vm0, %v16788_v20 }
0x146c   : > { %12353 = vmatprep.mubr.msk.f32.mxu1 %vm329_vm0, %v16795_v50 }
0x146f   : > { %12354 = vmatmul.mubr.msk.f32.gmra.mrb[232].mxu1 %vm329_vm0, %v16802_v60 }
0x1470   : > { %12356 = vmatprep.mubr.msk.f32.mxu1 %vm329_vm0, %v16809_v57 }
0x1473   : > { %12357 = vmatmul.mubr.msk.f32.gmra.mrb[234].mxu1 %vm329_vm0, %v16816_v37 }
0x1474   : > { %12359 = vmatprep.mubr.msk.f32.mxu1 %vm329_vm0, %v16823_v39 }
0x1477   : > { %12360 = vmatmul.mubr.msk.f32.gmra.mrb[236].mxu1 %vm329_vm0, %v16830_v42 }
0x1478   : > { %12362 = vmatprep.mubr.msk.f32.mxu1 %vm329_vm0, %v16837_v40 }
0x147b   : > { %12363 = vmatmul.mubr.msk.f32.gmra.mrb[238].mxu1 %vm329_vm0, %v16844_v41 }
0x1532   : > { %v12343_v28 = vpop.f32.mrb[224].mxu1 }
0x1533   : > { %v7885_v52 = vpop.f32.mrb[225].mxu1 }
0x1534   : > { %12369 = vmatprep.mubr.msk.f32.mxu0 %vm324_vm1, %v7885_v52 }
0x1535   : > { %12370 = vmatmul.mubr.msk.f32.vlgmr.msra.gmra.mrb[224].mxu0 %vm324_vm1, %v12343_v28 }
0x1536   : > { %12768 = vmatpush3.bf16.msra.mxu0 %v12753_v46  ;;  %v12346_v59 = vpop.f32.mrb[226].mxu1 }
0x1537   : > { %12770 = vmatprep.subr.bf16.mxu0 %v12757_v4  ;;  %v7895_v12 = vpop.f32.mrb[227].mxu1 }
0x1538   : > { %12372 = vmatprep.mubr.msk.f32.mxu0 %vm324_vm1, %v7895_v12 }
0x1539   : > { %12373 = vmatmul.mubr.msk.f32.gmra.mrb[226].mxu0 %vm324_vm1, %v12346_v59 }
0x153a   : > { %12772 = vmatpush3.bf16.msra.mxu0 %v12757_v4  ;;  %v12349_v21 = vpop.f32.mrb[228].mxu1 }
0x153b   : > { %v7905_v45 = vpop.f32.mrb[229].mxu1 }
0x153c   : > { %12375 = vmatprep.mubr.msk.f32.mxu0 %vm324_vm1, %v7905_v45  ;;  %v17492_v45 = vld [vmem:[#allocation28_spill] sm:$0xff] }
0x153d   : > { %12376 = vmatmul.mubr.msk.f32.gmra.mrb[228].mxu0 %vm324_vm1, %v12349_v21 }
0x153e   : > { %v12352_v15 = vpop.f32.mrb[230].mxu1 }
0x153f   : > { %v7915_v41 = vpop.f32.mrb[231].mxu1 }
0x1540   : > { %12378 = vmatprep.mubr.msk.f32.mxu0 %vm324_vm1, %v7915_v41 }
0x1541   : > { %12379 = vmatmul.mubr.msk.f32.gmra.mrb[230].mxu0 %vm324_vm1, %v12352_v15 }
0x1542   : > { %v12355_v46 = vpop.f32.mrb[232].mxu1 }
0x1543   : > { %v7925_v28 = vpop.f32.mrb[233].mxu1 }
0x1544   : > { %12381 = vmatprep.mubr.msk.f32.mxu0 %vm324_vm1, %v7925_v28  ;;  %v17493_v28 = vld [vmem:[#allocation25_spill] sm:$0xff] }
0x1545   : > { %12382 = vmatmul.mubr.msk.f32.gmra.mrb[232].mxu0 %vm324_vm1, %v12355_v46 }
0x1546   : > { %v12358_v52 = vpop.f32.mrb[234].mxu1 }
0x1547   : > { %v7935_v4 = vpop.f32.mrb[235].mxu1 }
0x1548   : > { %12384 = vmatprep.mubr.msk.f32.mxu0 %vm324_vm1, %v7935_v4 }
0x1549   : > { %12385 = vmatmul.mubr.msk.f32.gmra.mrb[234].mxu0 %vm324_vm1, %v12358_v52 }
0x154a   : > { %v12361_v59 = vpop.f32.mrb[236].mxu1 }
0x154b   : > { %v7945_v12 = vpop.f32.mrb[237].mxu1 }
0x154c   : > { %12387 = vmatprep.mubr.msk.f32.mxu0 %vm324_vm1, %v7945_v12 }
0x154d   : > { %12388 = vmatmul.mubr.msk.f32.gmra.mrb[236].mxu0 %vm324_vm1, %v12361_v59  ;;  %v17494_v59 = vld [vmem:[#allocation26_spill] sm:$0xff] }
0x154e   : > { %v12364_v41 = vpop.f32.mrb[238].mxu1 }
0x154f   : > { %v7955_v21 = vpop.f32.mrb[239].mxu1 }
0x1550   : > { %12390 = vmatprep.mubr.msk.f32.mxu0 %vm324_vm1, %v7955_v21 }
0x1551   : > { %12391 = vmatmul.mubr.msk.f32.gmra.mrb[238].mxu0 %vm324_vm1, %v12364_v41 }
0x1552   : > { %12401 = vmatprep.mubr.msk.f32.mxu0 %vm329_vm0, %v16423_v43  ;;  %v17487_v43 = vld [vmem:[#allocation21_spill] sm:$0xff] }
0x1555   : > { %12402 = vmatmul.mubr.msk.f32.vlgmr.msra.gmra.mrb[240].mxu0 %vm329_vm0, %v16430_v27  ;;  %v17488_v27 = vld [vmem:[#allocation22_spill] sm:$0xff] }
0x1556   : > { %12404 = vmatprep.mubr.msk.f32.mxu0 %vm329_vm0, %v16437_v3 }
0x1559   : > { %12405 = vmatmul.mubr.msk.f32.gmra.mrb[242].mxu0 %vm329_vm0, %v16444_v1  ;;  %v17489_v1 = vld [vmem:[#allocation23_spill] sm:$0xff] }
0x155a   : > { %12407 = vmatprep.mubr.msk.f32.mxu0 %vm329_vm0, %v16451_v53 }
0x155d   : > { %12408 = vmatmul.mubr.msk.f32.gmra.mrb[244].mxu0 %vm329_vm0, %v16458_v11 }
0x155e   : > { %12410 = vmatprep.mubr.msk.f32.mxu0 %vm329_vm0, %v16465_v18  ;;  %v17490_v18 = vld [vmem:[#allocation24_spill] sm:$0xff] }
0x1561   : > { %12411 = vmatmul.mubr.msk.f32.gmra.mrb[246].mxu0 %vm329_vm0, %v16472_v10 }
0x1562   : > { %12413 = vmatprep.mubr.msk.f32.mxu0 %vm329_vm0, %v16479_v24 }
0x1565   : > { %12414 = vmatmul.mubr.msk.f32.gmra.mrb[248].mxu0 %vm329_vm0, %v16486_v5 }
0x1566   : > { %12416 = vmatprep.mubr.msk.f32.mxu0 %vm329_vm0, %v16493_v32 }
0x1569   : > { %12417 = vmatmul.mubr.msk.f32.gmra.mrb[250].mxu0 %vm329_vm0, %v16500_v49  ;;  %v17491_v49 = vld [vmem:[#allocation27_spill] sm:$0xff] }
0x156a   : > { %12419 = vmatprep.mubr.msk.f32.mxu0 %vm329_vm0, %v16507_v7 }
0x156d   : > { %12420 = vmatmul.mubr.msk.f32.gmra.mrb[252].mxu0 %vm329_vm0, %v16514_v35 }
0x156e   : > { %12422 = vmatprep.mubr.msk.f32.mxu0 %vm329_vm0, %v16521_v29 }
0x1571   : > { %12423 = vmatmul.mubr.msk.f32.gmra.mrb[254].mxu0 %vm329_vm0, %v17487_v43 }
0x1572   : > { %12461 = vmatprep.mubr.msk.f32.mxu0 %vm329_vm0, %v17488_v27 }
0x1608   : > { %v12371_v3 = vpop.f32.mrb[224].mxu0 }
0x1609   : > { %v8084_v53 = vadd.f32 %v12371_v3, %v17489_v1  ;;  %v8078_v11 = vpop.f32.mrb[225].mxu0  ;;  %v17495_v3 = vld [vmem:[#allocation29_spill] sm:$0xff] }
0x160a   : > { %v8079_v10 = vadd.f32 %v8078_v11, %v17490_v18 }
0x160b   : > { %v10352_v24 = vmul.f32 -1.442695, %v8084_v53 }
0x160c   : > { %v10351_v5 = vmul.f32 -1.442695, %v8079_v10  ;;  %v12374_v32 = vpop.f32.mrb[226].mxu0  ;;  %v17496_v10 = vld [vmem:[#allocation30_spill] sm:$0xff] }
0x160d   : > { %13786 = vpow2.f32 %v10352_v24  ;;  %v8094_v7 = vadd.f32 %v12374_v32, %v17491_v49  ;;  %v8088_v35 = vpop.f32.mrb[227].mxu0 }
0x160e   : > { %13788 = vpow2.f32 %v10351_v5  ;;  %v8089_v15 = vadd.f32 %v8088_v35, %v17492_v45 }
0x160f   : > { %v10354_v29 = vmul.f32 -1.442695, %v8094_v7 }
0x1610   : > { %v12377_v46 = vpop.f32.mrb[228].mxu0  ;;  %v10353_v21 = vmul.f32 -1.442695, %v8089_v15 }
0x1611   : > { %13790 = vpow2.f32 %v10354_v29  ;;  %v8104_v52 = vadd.f32 %v12377_v46, %v17493_v28  ;;  %v8098_v4 = vpop.f32.mrb[229].mxu0 }
0x1612   : > { %v8099_v12 = vadd.f32 %v8098_v4, %v17494_v59 }
0x1613   : > { %v10356_v41 = vmul.f32 -1.442695, %v8104_v52  ;;  %v17497_v52 = vld [vmem:[#allocation31_spill] sm:$0xff] }
0x1614   : > { %v10355_v43 = vmul.f32 -1.442695, %v8099_v12  ;;  %v12380_v27 = vpop.f32.mrb[230].mxu0  ;;  %v17498_v12 = vld [vmem:[#allocation32_spill] sm:$0xff] }
0x1615   : > { %13792 = vpow2.f32 %v10356_v41  ;;  %v8114_v53 = vadd.f32 %v12380_v27, %v17495_v3  ;;  %v8108_v11 = vpop.f32.mrb[231].mxu0 }
0x1616   : > { %13794 = vpow2.f32 %v10355_v43  ;;  %v8109_v24 = vadd.f32 %v8108_v11, %v17496_v10 }
0x1617   : > { %v13787_v5 = vpop.eup %13786  ;;  %v10358_v32 = vmul.f32 -1.442695, %v8114_v53  ;;  %13796 = vpow2.f32 %v10353_v21  ;;  %v17499_v53 = vld [vmem:[#allocation35_spill] sm:$0xff] }
0x1618   : > { %v13789_v7 = vpop.eup %13788  ;;  %v8170_v35 = vadd.f32 1.0, %v13787_v5  ;;  %v10357_v29 = vmul.f32 -1.442695, %v8109_v24  ;;  %v12383_v46 = vpop.f32.mrb[232].mxu0  ;;  %v17500_v24 = vld [vmem:[#allocation36_spill] sm:$0xff] }
0x1619   : > { %v8169_v28 = vadd.f32 1.0, %v13789_v7  ;;  %13798 = vpow2.f32 %v10358_v32  ;;  %v8124_v15 = vadd.f32 %v12383_v46, %v17497_v52  ;;  %v8118_v4 = vpop.f32.mrb[233].mxu0 }
0x161a   : > { %v8119_v41 = vadd.f32 %v8118_v4, %v17498_v12  ;;  %13800 = vrcp.f32 %v8170_v35 }
0x161b   : > { %v13791_v59 = vpop.eup %13790  ;;  %v10360_v27 = vmul.f32 -1.442695, %v8124_v15  ;;  %13802 = vpow2.f32 %v10357_v29 }
0x161c   : > { %v8172_v43 = vadd.f32 1.0, %v13791_v59  ;;  %v10359_v11 = vmul.f32 -1.442695, %v8119_v41  ;;  %v12386_v10 = vpop.f32.mrb[234].mxu0  ;;  %13804 = vrcp.f32 %v8169_v28  ;;  %v17501_v59 = vld [vmem:[#allocation33_spill] sm:$0xff] }
0x161d   : > { %v8134_v5 = vadd.f32 %v12386_v10, %v17499_v53  ;;  %v8128_v21 = vpop.f32.mrb[235].mxu0  ;;  %13806 = vpow2.f32 %v10360_v27  ;;  %v17502_v27 = vld [vmem:[#allocation34_spill] sm:$0xff] }
0x161e   : > { %v8129_v7 = vadd.f32 %v8128_v21, %v17500_v24  ;;  %13808 = vrcp.f32 %v8172_v43 }
0x161f   : > { %v13793_v32 = vpop.eup %13792  ;;  %v10362_v46 = vmul.f32 -1.442695, %v8134_v5  ;;  %13810 = vpow2.f32 %v10359_v11 }
0x1620   : > { %v13795_v52 = vpop.eup %13794  ;;  %v8194_v3 = vadd.f32 1.0, %v13793_v32  ;;  %v10361_v4 = vmul.f32 -1.442695, %v8129_v7  ;;  %v12389_v35 = vpop.f32.mrb[236].mxu0  ;;  %v17503_v32 = vld [vmem:[#allocation37_spill] sm:$0xff] }
0x1621   : > { %v8193_v15 = vadd.f32 1.0, %v13795_v52  ;;  %13812 = vpow2.f32 %v10362_v46  ;;  %v8144_v29 = vadd.f32 %v12389_v35, %v17501_v59  ;;  %v8138_v41 = vpop.f32.mrb[237].mxu0  ;;  %v13797_v28 = vpop.eup %13796  ;;  %v17504_v59 = vld [vmem:[#allocation38_spill] sm:$0xff] }
0x1622   : > { %13814 = vrcp.f32 %v8194_v3  ;;  %v8139_v53 = vadd.f32 %v8138_v41, %v17502_v27  ;;  %v8171_v52 = vadd.f32 1.0, %v13797_v28 }
0x1623   : > { %v13799_v10 = vpop.eup %13798  ;;  %13816 = vrcp.f32 %v8193_v15 }
0x1624   : > { %v8196_v21 = vadd.f32 1.0, %v13799_v10  ;;  %13818 = vpow2.f32 %v10361_v4  ;;  %v12392_v43 = vpop.f32.mrb[238].mxu0  ;;  %v13801_v5 = vpop.eup %13800 }
0x1625   : > { %13820 = vtanh.f32 %v8144_v29  ;;  %v8154_v11 = vadd.f32 %v12392_v43, %v17503_v32  ;;  %v8148_v7 = vpop.f32.mrb[239].mxu0  ;;  %v13803_v24 = vpop.eup %13802 }
0x1626   : > { %13822 = vrcp.f32 %v8196_v21  ;;  %v13805_v46 = vpop.eup %13804  ;;  %v8195_v35 = vadd.f32 1.0, %v13803_v24  ;;  %v8149_v3 = vadd.f32 %v8148_v7, %v17504_v59 }
0x1627   : > { %13824 = vtanh.f32 %v8139_v53  ;;  %v13807_v12 = vpop.eup %13806 }
0x1628   : > { %13826 = vtanh.f32 %v8154_v11  ;;  %v12403_v15 = vpop.f32.mrb[240].mxu0  ;;  %v13809_v41 = vpop.eup %13808  ;;  %v8218_v7 = vadd.f32 1.0, %v13807_v12 }
0x1629   : > { %13828 = vrcp.f32 %v8195_v35  ;;  %v8324_v4 = vpop.f32.mrb[241].mxu0  ;;  %v13811_v10 = vpop.eup %13810 }
0x162a   : > { %13830 = vrcp.f32 %v8171_v52  ;;  %12429 = vmatprep.mubr.msk.f32.mxu1 %vm324_vm1, %v8324_v4  ;;  %v8217_v52 = vadd.f32 1.0, %v13811_v10 }
0x162b   : > { %v13813_v29 = vpop.eup %13812  ;;  %13832 = vtanh.f32 %v8149_v3  ;;  %12430 = vmatmul.mubr.msk.f32.vlgmr.msra.gmra.mrb[240].mxu1 %vm324_vm1, %v12403_v15 }
0x162c   : > { %v13815_v28 = vpop.eup %13814  ;;  %v12406_v21 = vpop.f32.mrb[242].mxu0  ;;  %12796 = vmatpush3.bf16.msra.mxu1 %v14229_v9  ;;  %v8220_v27 = vadd.f32 1.0, %v13813_v29  ;;  %13834 = vrcp.f32 %v8218_v7 }
0x162d   : > { %v13817_v53 = vpop.eup %13816  ;;  %v8334_v24 = vpop.f32.mrb[243].mxu0  ;;  %v8234_v11 = vmul.f32 %v13815_v28, %v16563_v63  ;;  %13836 = vrcp.f32 %v8217_v52 }
0x162e   : > { %v13819_v43 = vpop.eup %13818  ;;  %12432 = vmatprep.mubr.msk.f32.mxu1 %vm324_vm1, %v8334_v24  ;;  %v8233_v3 = vmul.f32 %v13817_v53, %v16569_v6 }
0x162f   : > { %v13821_v35 = vpop.eup %13820  ;;  %12433 = vmatmul.mubr.msk.f32.gmra.mrb[242].mxu1 %vm324_vm1, %v12406_v21  ;;  %v8219_v53 = vadd.f32 1.0, %v13819_v43 }
0x1630   : > { %v13823_v4 = vpop.eup %13822  ;;  %v8238_v15 = vmul.f32 %v13821_v35, %v13801_v5  ;;  %v12409_v59 = vpop.f32.mrb[244].mxu0 }
0x1631   : > { %v13825_v32 = vpop.eup %13824  ;;  %v8236_v9 = vmul.f32 %v13823_v4, %v16571_v33  ;;  %v8344_v45 = vpop.f32.mrb[245].mxu0 }
0x1632   : > { %v13827_v49 = vpop.eup %13826  ;;  %v16922_v63 = vadd.f32 %v8238_v15, %v8234_v11  ;;  %v8237_v12 = vmul.f32 %v13825_v32, %v13805_v46  ;;  %12435 = vmatprep.mubr.msk.f32.mxu1 %vm324_vm1, %v8344_v45 }
0x1633   : > { %v13829_v10 = vpop.eup %13828  ;;  %v8240_v28 = vmul.f32 %v13827_v49, %v13809_v41  ;;  %12436 = vmatmul.mubr.msk.f32.gmra.mrb[244].mxu1 %vm324_vm1, %v12409_v59 }
0x1634   : > { %v13831_v6 = vpop.eup %13830  ;;  %v8235_v5 = vmul.f32 %v13829_v10, %v16577_v0  ;;  %13838 = vtanh.f32 %v16922_v63  ;;  %v16928_v33 = vadd.f32 %v8237_v12, %v8233_v3  ;;  %v12412_v29 = vpop.f32.mrb[246].mxu0 }
0x1635   : > { %v13833_v21 = vpop.eup %13832  ;;  %13840 = vrcp.f32 %v8220_v27  ;;  %v16930_v24 = vadd.f32 %v8240_v28, %v8236_v9  ;;  %v8354_v32 = vpop.f32.mrb[247].mxu0 }
0x1636   : > { %13842 = vtanh.f32 %v16928_v33  ;;  %v8239_v45 = vmul.f32 %v13833_v21, %v13831_v6  ;;  %12438 = vmatprep.mubr.msk.f32.mxu1 %vm324_vm1, %v8354_v32  ;;  %v13835_v27 = vpop.eup %13834 }
0x1637   : > { %13844 = vtanh.f32 %v16930_v24  ;;  %12439 = vmatmul.mubr.msk.f32.gmra.mrb[246].mxu1 %vm324_vm1, %v12412_v29  ;;  %v13837_v41 = vpop.eup %13836 }
0x1638   : > { %v16936_v0 = vadd.f32 %v8239_v45, %v8235_v5  ;;  %v12415_v49 = vpop.f32.mrb[248].mxu0  ;;  %13846 = vrcp.f32 %v8219_v53 }
0x1639   : > { %v8364_v59 = vpop.f32.mrb[249].mxu0 }
0x163a   : > { %13848 = vtanh.f32 %v16936_v0  ;;  %12441 = vmatprep.mubr.msk.f32.mxu1 %vm324_vm1, %v8364_v59 }
0x163b   : > { %12442 = vmatmul.mubr.msk.f32.gmra.mrb[248].mxu1 %vm324_vm1, %v12415_v49 }
0x163c   : > { %v12418_v46 = vpop.f32.mrb[250].mxu0 }
0x163d   : > { %v8374_v43 = vpop.f32.mrb[251].mxu0 }
0x163e   : > { %v13839_v11 = vpop.eup %13838  ;;  %12444 = vmatprep.mubr.msk.f32.mxu1 %vm324_vm1, %v8374_v43 }
0x163f   : > { %v13841_v7 = vpop.eup %13840  ;;  %12445 = vmatmul.mubr.msk.f32.gmra.mrb[250].mxu1 %vm324_vm1, %v12418_v46  ;;  %v8250_v35 = vmul.f32 %v13839_v11, %v13835_v27  ;;  %v17512_v27 = vld [vmem:[#allocation10_spill] sm:$0xff]  ;;  %v17513_v11 = vld [vmem:[#allocation11_spill] sm:$0xff] }
0x1640   : > { %v13843_v52 = vpop.eup %13842  ;;  %v12421_v4 = vpop.f32.mrb[252].mxu0 }
0x1641   : > { %v13845_v3 = vpop.eup %13844  ;;  %v8384_v15 = vpop.f32.mrb[253].mxu0  ;;  %v8249_v9 = vmul.f32 %v13843_v52, %v13837_v41  ;;  %10364 = vst.msk [vmem:[%s14216_s13 + $0xe8] sm:$0xff] %vm324_vm1, %v8250_v35  ;;  %v17514_v52 = vld [vmem:[#allocation12_spill] sm:$0xff] }
0x1642   : > { %12447 = vmatprep.mubr.msk.f32.mxu1 %vm324_vm1, %v8384_v15  ;;  %v8252_v12 = vmul.f32 %v13845_v3, %v13841_v7  ;;  %v13847_v10 = vpop.eup %13846 }
0x1643   : > { %10363 = vst.msk [vmem:[%s14216_s13 + $0xe0] sm:$0xff] %vm324_vm1, %v8249_v9  ;;  %v12777_v28 = vpack.c.bf16 %v8250_v35, %v8249_v9  ;;  %12448 = vmatmul.mubr.msk.f32.gmra.mrb[252].mxu1 %vm324_vm1, %v12421_v4 }
0x1644   : > { %v13849_v6 = vpop.eup %13848  ;;  %v12424_v5 = vpop.f32.mrb[254].mxu0  ;;  %10366 = vst.msk [vmem:[%s14216_s13 + $0xf8] sm:$0xff] %vm324_vm1, %v8252_v12 }
0x1645   : > { %12778 = vmatprep.subr.bf16.mxu0 %v12777_v28  ;;  %v8394_v29 = vpop.f32.mrb[255].mxu0  ;;  %v8251_v21 = vmul.f32 %v13849_v6, %v13847_v10 }
0x1646   : > { %12780 = vmatpush3.bf16.msra.mxu0 %v12777_v28  ;;  %12450 = vmatprep.mubr.msk.f32.mxu1 %vm324_vm1, %v8394_v29 }
0x1647   : > { %10365 = vst.msk [vmem:[%s14216_s13 + $0xf0] sm:$0xff] %vm324_vm1, %v8251_v21  ;;  %v12781_v53 = vpack.c.bf16 %v8252_v12, %v8251_v21  ;;  %12451 = vmatmul.mubr.msk.f32.gmra.mrb[254].mxu1 %vm324_vm1, %v12424_v5 }
0x1649   : > { %12782 = vmatprep.subr.bf16.mxu0 %v12781_v53 }
0x164a   : > { %12784 = vmatpush3.bf16.msra.mxu0 %v12781_v53 }
0x164d   : > { %12462 = vmatmul.mubr.msk.f32.vlgmr.msra.gmra.mrb[0].mxu0 %vm329_vm0, %v16599_v56  ;;  %v17505_v56 = vld [vmem:[#allocation3_spill] sm:$0xff] }
0x164e   : > { %12464 = vmatprep.mubr.msk.f32.mxu0 %vm329_vm0, %v16606_v54  ;;  %v17506_v54 = vld [vmem:[#allocation4_spill] sm:$0xff] }
0x1651   : > { %12465 = vmatmul.mubr.msk.f32.gmra.mrb[2].mxu0 %vm329_vm0, %v16613_v38  ;;  %v17507_v38 = vld [vmem:[#allocation5_spill] sm:$0xff] }
0x1652   : > { %12467 = vmatprep.mubr.msk.f32.mxu0 %vm329_vm0, %v16620_v47  ;;  %v17508_v47 = vld [vmem:[#allocation6_spill] sm:$0xff] }
0x1655   : > { %12468 = vmatmul.mubr.msk.f32.gmra.mrb[4].mxu0 %vm329_vm0, %v16627_v17  ;;  %v17509_v17 = vld [vmem:[#allocation7_spill] sm:$0xff] }
0x1656   : > { %12470 = vmatprep.mubr.msk.f32.mxu0 %vm329_vm0, %v16634_v13  ;;  %v17510_v13 = vld [vmem:[#allocation8_spill] sm:$0xff] }
0x1659   : > { %12471 = vmatmul.mubr.msk.f32.gmra.mrb[6].mxu0 %vm329_vm0, %v16641_v36 }
0x165a   : > { %12473 = vmatprep.mubr.msk.f32.mxu0 %vm329_vm0, %v16648_v8  ;;  %v17511_v8 = vld [vmem:[#allocation9_spill] sm:$0xff] }
0x165d   : > { %12474 = vmatmul.mubr.msk.f32.gmra.mrb[8].mxu0 %vm329_vm0, %v16655_v14 }
0x165e   : > { %12476 = vmatprep.mubr.msk.f32.mxu0 %vm329_vm0, %v16662_v23 }
0x1661   : > { %12477 = vmatmul.mubr.msk.f32.gmra.mrb[10].mxu0 %vm329_vm0, %v17505_v56 }
0x1662   : > { %12479 = vmatprep.mubr.msk.f32.mxu0 %vm329_vm0, %v17506_v54 }
0x1665   : > { %12480 = vmatmul.mubr.msk.f32.gmra.mrb[12].mxu0 %vm329_vm0, %v17507_v38 }
0x1666   : > { %12482 = vmatprep.mubr.msk.f32.mxu0 %vm329_vm0, %v17508_v47 }
0x1669   : > { %12483 = vmatmul.mubr.msk.f32.gmra.mrb[14].mxu0 %vm329_vm0, %v17509_v17 }
0x166a   : > { %12493 = vmatprep.mubr.msk.f32.mxu0 %vm329_vm0, %v17510_v13 }
0x16fe   : > { %v12431_v36 = vpop.f32.mrb[240].mxu1 }
0x16ff   : > { %v8597_v14 = vadd.f32 %v12431_v36, %v17511_v8  ;;  %v8517_v23 = vpop.f32.mrb[241].mxu1 }
0x1700   : > { %v8596_v32 = vadd.f32 %v8517_v23, %v14696_v55  ;;  %v17515_v23 = vld [vmem:[#allocation14_spill] sm:$0xff] }
0x1701   : > { %v10400_v45 = vmul.f32 -1.442695, %v8597_v14 }
0x1702   : > { %v10399_v49 = vmul.f32 -1.442695, %v8596_v32  ;;  %v12434_v59 = vpop.f32.mrb[242].mxu1 }
0x1703   : > { %13850 = vpow2.f32 %v10400_v45  ;;  %v8599_v46 = vadd.f32 %v12434_v59, %v17512_v27  ;;  %v8527_v41 = vpop.f32.mrb[243].mxu1 }
0x1704   : > { %13852 = vpow2.f32 %v10399_v49  ;;  %v8598_v7 = vadd.f32 %v8527_v41, %v17513_v11  ;;  %v17516_v49 = vld [vmem:[#allocation15_spill] sm:$0xff] }
0x1705   : > { %v10402_v43 = vmul.f32 -1.442695, %v8599_v46 }
0x1706   : > { %v12437_v35 = vpop.f32.mrb[244].mxu1  ;;  %v10401_v55 = vmul.f32 -1.442695, %v8598_v7  ;;  %v17517_v7 = vld [vmem:[#allocation16_spill] sm:$0xff] }
0x1707   : > { %13854 = vpow2.f32 %v10402_v43  ;;  %v8601_v4 = vadd.f32 %v12437_v35, %v17514_v52  ;;  %v8537_v3 = vpop.f32.mrb[245].mxu1 }
0x1708   : > { %v8600_v15 = vadd.f32 %v8537_v3, %v14711_v30 }
0x1709   : > { %v10404_v9 = vmul.f32 -1.442695, %v8601_v4 }
0x170a   : > { %v10403_v12 = vmul.f32 -1.442695, %v8600_v15  ;;  %v12440_v10 = vpop.f32.mrb[246].mxu1  ;;  %v17518_v15 = vld [vmem:[#allocation17_spill] sm:$0xff] }
0x170b   : > { %13856 = vpow2.f32 %v10404_v9  ;;  %v8603_v28 = vadd.f32 %v12440_v10, %v14717_v31  ;;  %v8547_v6 = vpop.f32.mrb[247].mxu1 }
0x170c   : > { %13858 = vpow2.f32 %v10403_v12  ;;  %v8602_v5 = vadd.f32 %v8547_v6, %v17337_v25 }
0x170d   : > { %v13851_v29 = vpop.eup %13850  ;;  %v10406_v21 = vmul.f32 -1.442695, %v8603_v28  ;;  %13860 = vpow2.f32 %v10401_v55  ;;  %v17519_v28 = vld [vmem:[#allocation18_spill] sm:$0xff] }
0x170e   : > { %v13853_v53 = vpop.eup %13852  ;;  %v8625_v56 = vadd.f32 1.0, %v13851_v29  ;;  %v10405_v54 = vmul.f32 -1.442695, %v8602_v5  ;;  %v12443_v38 = vpop.f32.mrb[248].mxu1 }
0x170f   : > { %v8624_v47 = vadd.f32 1.0, %v13853_v53  ;;  %13862 = vpow2.f32 %v10406_v21  ;;  %v8605_v30 = vadd.f32 %v12443_v38, %v14725_v58  ;;  %v8557_v17 = vpop.f32.mrb[249].mxu1 }
0x1710   : > { %v8604_v13 = vadd.f32 %v8557_v17, %v14728_v44  ;;  %13864 = vrcp.f32 %v8625_v56 }
0x1711   : > { %v13855_v36 = vpop.eup %13854  ;;  %v10408_v31 = vmul.f32 -1.442695, %v8605_v30  ;;  %13866 = vpow2.f32 %v10405_v54  ;;  %v17520_v54 = vld [vmem:[#allocation19_spill] sm:$0xff] }
0x1712   : > { %v8627_v8 = vadd.f32 1.0, %v13855_v36  ;;  %v10407_v25 = vmul.f32 -1.442695, %v8604_v13  ;;  %v12446_v14 = vpop.f32.mrb[250].mxu1  ;;  %13868 = vrcp.f32 %v8624_v47 }
0x1713   : > { %v8607_v32 = vadd.f32 %v12446_v14, %v17515_v23  ;;  %v8567_v45 = vpop.f32.mrb[251].mxu1  ;;  %13870 = vpow2.f32 %v10408_v31 }
0x1714   : > { %v8606_v59 = vadd.f32 %v8567_v45, %v17516_v49  ;;  %13872 = vrcp.f32 %v8627_v8 }
0x1715   : > { %v13857_v27 = vpop.eup %13856  ;;  %v10410_v58 = vmul.f32 -1.442695, %v8607_v32  ;;  %13874 = vpow2.f32 %v10407_v25 }
0x1716   : > { %v13859_v46 = vpop.eup %13858  ;;  %v8649_v41 = vadd.f32 1.0, %v13857_v27  ;;  %v10409_v44 = vmul.f32 -1.442695, %v8606_v59  ;;  %v12449_v43 = vpop.f32.mrb[252].mxu1 }
0x1717   : > { %v8648_v11 = vadd.f32 1.0, %v13859_v46  ;;  %13876 = vpow2.f32 %v10410_v58  ;;  %v8609_v35 = vadd.f32 %v12449_v43, %v17517_v7  ;;  %v8577_v52 = vpop.f32.mrb[253].mxu1  ;;  %v13861_v4 = vpop.eup %13860 }
0x1718   : > { %13878 = vrcp.f32 %v8649_v41  ;;  %v8608_v9 = vadd.f32 %v8577_v52, %v17518_v15  ;;  %v8626_v21 = vadd.f32 1.0, %v13861_v4 }
0x1719   : > { %v13863_v3 = vpop.eup %13862  ;;  %13880 = vrcp.f32 %v8648_v11 }
0x171a   : > { %v8651_v55 = vadd.f32 1.0, %v13863_v3  ;;  %13882 = vpow2.f32 %v10409_v44  ;;  %v12452_v12 = vpop.f32.mrb[254].mxu1  ;;  %v13865_v10 = vpop.eup %13864 }
0x171b   : > { %13884 = vtanh.f32 %v8609_v35  ;;  %v8611_v6 = vadd.f32 %v12452_v12, %v17519_v28  ;;  %v8587_v5 = vpop.f32.mrb[255].mxu1  ;;  %v13867_v29 = vpop.eup %13866 }
0x171c   : > { %13886 = vrcp.f32 %v8651_v55  ;;  %v13869_v53 = vpop.eup %13868  ;;  %v8650_v56 = vadd.f32 1.0, %v13867_v29  ;;  %v8610_v38 = vadd.f32 %v8587_v5, %v17520_v54 }
0x171d   : > { %13888 = vtanh.f32 %v8608_v9  ;;  %v13871_v47 = vpop.eup %13870 }
0x171e   : > { %13890 = vtanh.f32 %v8611_v6  ;;  %v13873_v30 = vpop.eup %13872  ;;  %v8673_v14 = vadd.f32 1.0, %v13871_v47 }
0x171f   : > { %13892 = vrcp.f32 %v8650_v56  ;;  %v13875_v17 = vpop.eup %13874 }
0x1720   : > { %13894 = vrcp.f32 %v8626_v21  ;;  %v8672_v32 = vadd.f32 1.0, %v13875_v17 }
0x1721   : > { %v13877_v13 = vpop.eup %13876  ;;  %13896 = vtanh.f32 %v8610_v38 }
0x1722   : > { %v13879_v36 = vpop.eup %13878  ;;  %v8675_v46 = vadd.f32 1.0, %v13877_v13  ;;  %13898 = vrcp.f32 %v8673_v14 }
0x1723   : > { %v13881_v31 = vpop.eup %13880  ;;  %v8689_v25 = vmul.f32 %v13879_v36, %v16727_v62  ;;  %13900 = vrcp.f32 %v8672_v32  ;;  %v17522_v32 = vld [vmem:[#allocation27_spill] sm:$0xff] }
0x1724   : > { %v13883_v8 = vpop.eup %13882  ;;  %v8688_v49 = vmul.f32 %v13881_v31, %v16731_v34 }
0x1725   : > { %v13885_v23 = vpop.eup %13884  ;;  %v8674_v34 = vadd.f32 1.0, %v13883_v8 }
0x1726   : > { %v13887_v45 = vpop.eup %13886  ;;  %v8693_v59 = vmul.f32 %v13885_v23, %v13865_v10 }
0x1727   : > { %v13889_v27 = vpop.eup %13888  ;;  %v8691_v58 = vmul.f32 %v13887_v45, %v16733_v26 }
0x1728   : > { %v13891_v41 = vpop.eup %13890  ;;  %v8697_v44 = vadd.f32 %v8693_v59, %v8689_v25  ;;  %v8692_v43 = vmul.f32 %v13889_v27, %v13869_v53  ;;  %v17523_v27 = vld [vmem:[#allocation28_spill] sm:$0xff] }
0x1729   : > { %v13893_v11 = vpop.eup %13892  ;;  %v8695_v7 = vmul.f32 %v13891_v41, %v13873_v30  ;;  %v17524_v41 = vld [vmem:[#allocation25_spill] sm:$0xff] }
0x172a   : > { %v13895_v35 = vpop.eup %13894  ;;  %v8690_v62 = vmul.f32 %v13893_v11, %v16737_v51  ;;  %13902 = vtanh.f32 %v8697_v44  ;;  %v8696_v52 = vadd.f32 %v8692_v43, %v8688_v49 }
0x172b   : > { %v13897_v4 = vpop.eup %13896  ;;  %13904 = vrcp.f32 %v8675_v46  ;;  %v8699_v3 = vadd.f32 %v8695_v7, %v8691_v58 }
0x172c   : > { %13906 = vtanh.f32 %v8696_v52  ;;  %v8694_v15 = vmul.f32 %v13897_v4, %v13895_v35  ;;  %v13899_v9 = vpop.eup %13898  ;;  %v17526_v52 = vld [vmem:[#allocation29_spill] sm:$0xff] }
0x172d   : > { %13908 = vtanh.f32 %v8699_v3  ;;  %v13901_v55 = vpop.eup %13900  ;;  %v17527_v3 = vld [vmem:[#allocation30_spill] sm:$0xff] }
0x172e   : > { %v8698_v26 = vadd.f32 %v8694_v15, %v8690_v62  ;;  %13910 = vrcp.f32 %v8674_v34 }
0x1730   : > { %13912 = vtanh.f32 %v8698_v26 }
0x1734   : > { %v13903_v12 = vpop.eup %13902 }
0x1735   : > { %v13905_v10 = vpop.eup %13904  ;;  %v8705_v28 = vmul.f32 %v13903_v12, %v13899_v9 }
0x1736   : > { %v13907_v6 = vpop.eup %13906 }
0x1737   : > { %v13909_v5 = vpop.eup %13908  ;;  %v8704_v51 = vmul.f32 %v13907_v6, %v13901_v55 }
0x1738   : > { %v8707_v29 = vmul.f32 %v13909_v5, %v13905_v10  ;;  %v13911_v21 = vpop.eup %13910  ;;  %v17528_v5 = vld [vmem:[#allocation31_spill] sm:$0xff] }
0x1739   : > { %v12785_v53 = vpack.c.bf16 %v8705_v28, %v8704_v51 }
0x173a   : > { %v13913_v56 = vpop.eup %13912 }
0x173b   : > { %12786 = vmatprep.subr.bf16.mxu0 %v12785_v53  ;;  %v8706_v54 = vmul.f32 %v13913_v56, %v13911_v21  ;;  %v17529_v21 = vld [vmem:[#allocation32_spill] sm:$0xff] }
0x173c   : > { %12788 = vmatpush3.bf16.msra.mxu0 %v12785_v53 }
0x173d   : > { %v12789_v38 = vpack.c.bf16 %v8707_v29, %v8706_v54 }
0x173f   : > { %12790 = vmatprep.subr.bf16.mxu0 %v12789_v38 }
0x1740   : > { %12792 = vmatpush3.bf16.msra.mxu0 %v12789_v38 }
0x1743   : > { %12494 = vmatmul.mubr.msk.f32.vlgmr.msra.gmra.mrb[0].mxu0 %vm329_vm0, %v16744_v16  ;;  %v17521_v16 = vld [vmem:[#allocation13_spill] sm:$0xff] }
0x1744   : > { %12496 = vmatprep.mubr.msk.f32.mxu0 %vm329_vm0, %v16751_v19 }
0x1747   : > { %12497 = vmatmul.mubr.msk.f32.gmra.mrb[2].mxu0 %vm329_vm0, %v16760_v48 }
0x1748   : > { %12499 = vmatprep.mubr.msk.f32.mxu0 %vm329_vm0, %v16767_v2 }
0x174b   : > { %12500 = vmatmul.mubr.msk.f32.gmra.mrb[4].mxu0 %vm329_vm0, %v16774_v22 }
0x174c   : > { %12502 = vmatprep.mubr.msk.f32.mxu0 %vm329_vm0, %v16781_v61 }
0x174f   : > { %12503 = vmatmul.mubr.msk.f32.gmra.mrb[6].mxu0 %vm329_vm0, %v16788_v20 }
0x1750   : > { %12505 = vmatprep.mubr.msk.f32.mxu0 %vm329_vm0, %v16795_v50 }
0x1753   : > { %12506 = vmatmul.mubr.msk.f32.gmra.mrb[8].mxu0 %vm329_vm0, %v16802_v60 }
0x1754   : > { %12508 = vmatprep.mubr.msk.f32.mxu0 %vm329_vm0, %v16809_v57 }
0x1757   : > { %12509 = vmatmul.mubr.msk.f32.gmra.mrb[10].mxu0 %vm329_vm0, %v16816_v37 }
0x1758   : > { %12511 = vmatprep.mubr.msk.f32.mxu0 %vm329_vm0, %v16823_v39 }
0x175b   : > { %12512 = vmatmul.mubr.msk.f32.gmra.mrb[12].mxu0 %vm329_vm0, %v16830_v42 }
0x175c   : > { %12514 = vmatprep.mubr.msk.f32.mxu0 %vm329_vm0, %v16837_v40 }
0x175f   : > { %12515 = vmatmul.mubr.msk.f32.gmra.mrb[14].mxu0 %vm329_vm0, %v17521_v16 }
0x1816   : > { %v12495_v19 = vpop.f32.mrb[0].mxu0 }
0x1817   : > { %v8919_v48 = vpop.f32.mrb[1].mxu0 }
0x1818   : > { %12521 = vmatprep.mubr.msk.f32.mxu1 %vm324_vm1, %v8919_v48  ;;  %v17530_v48 = vld [vmem:[#allocation35_spill] sm:$0xff] }
0x1819   : > { %12522 = vmatmul.mubr.msk.f32.vlgmr.msra.gmra.mrb[0].mxu1 %vm324_vm1, %v12495_v19 }
0x181a   : > { %v12498_v2 = vpop.f32.mrb[2].mxu0 }
0x181b   : > { %v8929_v22 = vpop.f32.mrb[3].mxu0 }
0x181c   : > { %12524 = vmatprep.mubr.msk.f32.mxu1 %vm324_vm1, %v8929_v22 }
0x181d   : > { %12525 = vmatmul.mubr.msk.f32.gmra.mrb[2].mxu1 %vm324_vm1, %v12498_v2 }
0x181e   : > { %v12501_v61 = vpop.f32.mrb[4].mxu0 }
0x181f   : > { %v8939_v20 = vpop.f32.mrb[5].mxu0 }
0x1820   : > { %12527 = vmatprep.mubr.msk.f32.mxu1 %vm324_vm1, %v8939_v20 }
0x1821   : > { %12528 = vmatmul.mubr.msk.f32.gmra.mrb[4].mxu1 %vm324_vm1, %v12501_v61  ;;  %v17531_v61 = vld [vmem:[#allocation36_spill] sm:$0xff] }
0x1822   : > { %v12504_v50 = vpop.f32.mrb[6].mxu0 }
0x1823   : > { %v8949_v60 = vpop.f32.mrb[7].mxu0 }
0x1824   : > { %12530 = vmatprep.mubr.msk.f32.mxu1 %vm324_vm1, %v8949_v60 }
0x1825   : > { %12531 = vmatmul.mubr.msk.f32.gmra.mrb[6].mxu1 %vm324_vm1, %v12504_v50 }
0x1826   : > { %v12507_v57 = vpop.f32.mrb[8].mxu0 }
0x1827   : > { %v8959_v37 = vpop.f32.mrb[9].mxu0 }
0x1828   : > { %12533 = vmatprep.mubr.msk.f32.mxu1 %vm324_vm1, %v8959_v37 }
0x1829   : > { %12534 = vmatmul.mubr.msk.f32.gmra.mrb[8].mxu1 %vm324_vm1, %v12507_v57 }
0x182a   : > { %v12510_v39 = vpop.f32.mrb[10].mxu0 }
0x182b   : > { %v8969_v42 = vpop.f32.mrb[11].mxu0 }
0x182c   : > { %12536 = vmatprep.mubr.msk.f32.mxu1 %vm324_vm1, %v8969_v42 }
0x182d   : > { %12537 = vmatmul.mubr.msk.f32.gmra.mrb[10].mxu1 %vm324_vm1, %v12510_v39 }
0x182e   : > { %v12513_v40 = vpop.f32.mrb[12].mxu0 }
0x182f   : > { %v8979_v47 = vpop.f32.mrb[13].mxu0 }
0x1830   : > { %12539 = vmatprep.mubr.msk.f32.mxu1 %vm324_vm1, %v8979_v47  ;;  %v17532_v47 = vld [vmem:[#allocation33_spill] sm:$0xff] }
0x1831   : > { %12540 = vmatmul.mubr.msk.f32.gmra.mrb[12].mxu1 %vm324_vm1, %v12513_v40 }
0x1832   : > { %v12516_v30 = vpop.f32.mrb[14].mxu0 }
0x1833   : > { %v8989_v17 = vpop.f32.mrb[15].mxu0 }
0x1834   : > { %12542 = vmatprep.mubr.msk.f32.mxu1 %vm324_vm1, %v8989_v17 }
0x1835   : > { %12543 = vmatmul.mubr.msk.f32.gmra.mrb[14].mxu1 %vm324_vm1, %v12516_v30 }
0x18ec   : > { %v12523_v13 = vpop.f32.mrb[0].mxu1 }
0x18ed   : > { %v9118_v36 = vadd.f32 %v12523_v13, %v17489_v1  ;;  %v9112_v31 = vpop.f32.mrb[1].mxu1  ;;  %v17525_v1 = vld [vmem:[#allocation26_spill] sm:$0xff] }
0x18ee   : > { %v9113_v8 = vadd.f32 %v9112_v31, %v17490_v18  ;;  %v17533_v31 = vld [vmem:[#allocation34_spill] sm:$0xff] }
0x18ef   : > { %v10460_v25 = vmul.f32 -1.442695, %v9118_v36 }
0x18f0   : > { %v10459_v14 = vmul.f32 -1.442695, %v9113_v8  ;;  %v12526_v23 = vpop.f32.mrb[2].mxu1 }
0x18f1   : > { %13914 = vpow2.f32 %v10460_v25  ;;  %v9128_v45 = vadd.f32 %v12526_v23, %v17522_v32  ;;  %v9122_v49 = vpop.f32.mrb[3].mxu1  ;;  %v17534_v32 = vld [vmem:[#allocation37_spill] sm:$0xff] }
0x18f2   : > { %13916 = vpow2.f32 %v10459_v14  ;;  %v9123_v58 = vadd.f32 %v9122_v49, %v17523_v27 }
0x18f3   : > { %v10462_v59 = vmul.f32 -1.442695, %v9128_v45 }
0x18f4   : > { %v12529_v46 = vpop.f32.mrb[4].mxu1  ;;  %v10461_v18 = vmul.f32 -1.442695, %v9123_v58 }
0x18f5   : > { %13918 = vpow2.f32 %v10462_v59  ;;  %v9138_v44 = vadd.f32 %v12529_v46, %v17524_v41  ;;  %v9132_v43 = vpop.f32.mrb[5].mxu1  ;;  %v17535_v41 = vld [vmem:[#allocation38_spill] sm:$0xff] }
0x18f6   : > { %v9133_v11 = vadd.f32 %v9132_v43, %v17525_v1 }
0x18f7   : > { %v10464_v7 = vmul.f32 -1.442695, %v9138_v44 }
0x18f8   : > { %v10463_v35 = vmul.f32 -1.442695, %v9133_v11  ;;  %v12532_v62 = vpop.f32.mrb[6].mxu1 }
0x18f9   : > { %13920 = vpow2.f32 %v10464_v7  ;;  %v9148_v4 = vadd.f32 %v12532_v62, %v17526_v52  ;;  %v9142_v34 = vpop.f32.mrb[7].mxu1 }
0x18fa   : > { %13922 = vpow2.f32 %v10463_v35  ;;  %v9143_v15 = vadd.f32 %v9142_v34, %v17527_v3 }
0x18fb   : > { %v13915_v26 = vpop.eup %13914  ;;  %v10466_v9 = vmul.f32 -1.442695, %v9148_v4  ;;  %13924 = vpow2.f32 %v10461_v18 }
0x18fc   : > { %v13917_v55 = vpop.eup %13916  ;;  %v9204_v12 = vadd.f32 1.0, %v13915_v26  ;;  %v10465_v10 = vmul.f32 -1.442695, %v9143_v15  ;;  %v12535_v28 = vpop.f32.mrb[8].mxu1 }
0x18fd   : > { %v9203_v6 = vadd.f32 1.0, %v13917_v55  ;;  %13926 = vpow2.f32 %v10466_v9  ;;  %v9158_v51 = vadd.f32 %v12535_v28, %v17528_v5  ;;  %v9152_v29 = vpop.f32.mrb[9].mxu1 }
0x18fe   : > { %v9153_v53 = vadd.f32 %v9152_v29, %v17529_v21  ;;  %13928 = vrcp.f32 %v9204_v12 }
0x18ff   : > { %v13919_v56 = vpop.eup %13918  ;;  %v10468_v54 = vmul.f32 -1.442695, %v9158_v51  ;;  %13930 = vpow2.f32 %v10465_v10 }
0x1900   : > { %v9206_v38 = vadd.f32 1.0, %v13919_v56  ;;  %v10467_v16 = vmul.f32 -1.442695, %v9153_v53  ;;  %v12538_v19 = vpop.f32.mrb[10].mxu1  ;;  %13932 = vrcp.f32 %v9203_v6 }
0x1901   : > { %v9168_v2 = vadd.f32 %v12538_v19, %v17530_v48  ;;  %v9162_v22 = vpop.f32.mrb[11].mxu1  ;;  %13934 = vpow2.f32 %v10468_v54 }
0x1902   : > { %v9163_v20 = vadd.f32 %v9162_v22, %v17531_v61  ;;  %13936 = vrcp.f32 %v9206_v38 }
0x1903   : > { %v13921_v50 = vpop.eup %13920  ;;  %v10470_v60 = vmul.f32 -1.442695, %v9168_v2  ;;  %13938 = vpow2.f32 %v10467_v16 }
0x1904   : > { %v13923_v57 = vpop.eup %13922  ;;  %v9228_v37 = vadd.f32 1.0, %v13921_v50  ;;  %v10469_v39 = vmul.f32 -1.442695, %v9163_v20  ;;  %v12541_v42 = vpop.f32.mrb[12].mxu1 }
0x1905   : > { %v9227_v40 = vadd.f32 1.0, %v13923_v57  ;;  %13940 = vpow2.f32 %v10470_v60  ;;  %v9178_v30 = vadd.f32 %v12541_v42, %v17532_v47  ;;  %v9172_v17 = vpop.f32.mrb[13].mxu1  ;;  %v13925_v13 = vpop.eup %13924  ;;  %v9401_v42 = vld [vmem:[%s14216_s13 + $0x8] sm:$0xff] (%p14200_p4)  ;;  %v9405_v47 = vld [vmem:[%s14216_s13 + $0x18] sm:$0xff] (%p14200_p4) }
0x1906   : > { %13942 = vrcp.f32 %v9228_v37  ;;  %v9173_v8 = vadd.f32 %v9172_v17, %v17533_v31  ;;  %v9205_v27 = vadd.f32 1.0, %v13925_v13  ;;  %v9409_v17 = vld [vmem:[%s14216_s13 + $0x28] sm:$0xff] (%p14200_p4)  ;;  %9402 = vst [vmem:[%s17090_s27 + $0x8] sm:$0xff] (%p14200_p4), %v9401_v42  ;;  %9406 = vst [vmem:[%s17090_s27 + $0x18] sm:$0xff] (%p14200_p4), %v9405_v47  ;;  %v9411_v13 = vld [vmem:[%s14216_s13 + $0x30] sm:$0xff] (%p14200_p4) }
0x1907   : > { %v13927_v36 = vpop.eup %13926  ;;  %13944 = vrcp.f32 %v9227_v40  ;;  %v9403_v40 = vld [vmem:[%s14216_s13 + $0x10] sm:$0xff] (%p14200_p4)  ;;  %9410 = vst [vmem:[%s17090_s27 + $0x48] sm:$0xff] (%p14200_p4), %v9409_v17  ;;  %v9415_v31 = vld [vmem:[%s14216_s13 + $0x40] sm:$0xff] (%p14200_p4)  ;;  %9412 = vst [vmem:[%s17090_s27 + $0x50] sm:$0xff] (%p14200_p4), %v9411_v13 }
0x1908   : > { %v9230_v25 = vadd.f32 1.0, %v13927_v36  ;;  %13946 = vpow2.f32 %v10469_v39  ;;  %v12544_v14 = vpop.f32.mrb[14].mxu1  ;;  %v13929_v23 = vpop.eup %13928  ;;  %v9399_v39 = vld [vmem:[%s14216_s13] sm:$0xff] (%p14200_p4)  ;;  %9404 = vst [vmem:[%s17090_s27 + $0x10] sm:$0xff] (%p14200_p4), %v9403_v40  ;;  %v9413_v36 = vld [vmem:[%s14216_s13 + $0x38] sm:$0xff] (%p14200_p4)  ;;  %9416 = vst [vmem:[%s17090_s27 + $0x80] sm:$0xff] (%p14200_p4), %v9415_v31 }
0x1909   : > { %13948 = vtanh.f32 %v9178_v30  ;;  %v9188_v45 = vadd.f32 %v12544_v14, %v17534_v32  ;;  %v9182_v49 = vpop.f32.mrb[15].mxu1  ;;  %v13931_v59 = vpop.eup %13930  ;;  %v9407_v30 = vld [vmem:[%s14216_s13 + $0x20] sm:$0xff] (%p14200_p4)  ;;  %9400 = vst [vmem:[%s17090_s27] sm:$0xff] (%p14200_p4), %v9399_v39  ;;  %9414 = vst [vmem:[%s17090_s27 + $0x58] sm:$0xff] (%p14200_p4), %v9413_v36  ;;  %v9421_v14 = vld [vmem:[%s14216_s13 + $0x58] sm:$0xff] (%p14200_p4) }
0x190a   : > { %13950 = vrcp.f32 %v9230_v25  ;;  %v13933_v58 = vpop.eup %13932  ;;  %v9229_v46 = vadd.f32 1.0, %v13931_v59  ;;  %v9183_v44 = vadd.f32 %v9182_v49, %v17535_v41  ;;  %9408 = vst [vmem:[%s17090_s27 + $0x40] sm:$0xff] (%p14200_p4), %v9407_v30  ;;  %v9419_v25 = vld [vmem:[%s14216_s13 + $0x50] sm:$0xff] (%p14200_p4)  ;;  %9422 = vst [vmem:[%s17090_s27 + $0x98] sm:$0xff] (%p14200_p4), %v9421_v14  ;;  %v9425_v32 = vld [vmem:[%s14216_s13 + $0x68] sm:$0xff] (%p14200_p4) }
0x190b   : > { %13952 = vtanh.f32 %v9173_v8  ;;  %v13935_v43 = vpop.eup %13934  ;;  %v9417_v8 = vld [vmem:[%s14216_s13 + $0x48] sm:$0xff] (%p14200_p4)  ;;  %9420 = vst [vmem:[%s17090_s27 + $0x90] sm:$0xff] (%p14200_p4), %v9419_v25  ;;  %9426 = vst [vmem:[%s17090_s27 + $0xc8] sm:$0xff] (%p14200_p4), %v9425_v32  ;;  %v9429_v49 = vld [vmem:[%s14216_s13 + $0x78] sm:$0xff] (%p14200_p4) }
0x190c   : > { %13954 = vtanh.f32 %v9188_v45  ;;  %v13937_v1 = vpop.eup %13936  ;;  %v9252_v4 = vadd.f32 1.0, %v13935_v43  ;;  %9418 = vst [vmem:[%s17090_s27 + $0x88] sm:$0xff] (%p14200_p4), %v9417_v8  ;;  %v9427_v45 = vld [vmem:[%s14216_s13 + $0x70] sm:$0xff] (%p14200_p4)  ;;  %v9431_v59 = vld [vmem:[%s14216_s13 + $0x80] sm:$0xff] (%p14200_p4)  ;;  %9430 = vst [vmem:[%s17090_s27 + $0xd8] sm:$0xff] (%p14200_p4), %v9429_v49 }
0x190d   : > { %13956 = vrcp.f32 %v9229_v46  ;;  %v13939_v11 = vpop.eup %13938  ;;  %9428 = vst [vmem:[%s17090_s27 + $0xd0] sm:$0xff] (%p14200_p4), %v9427_v45  ;;  %9432 = vst [vmem:[%s17090_s27 + $0x100] sm:$0xff] (%p14200_p4), %v9431_v59  ;;  %v9437_v46 = vld [vmem:[%s14216_s13 + $0x98] sm:$0xff] (%p14200_p4)  ;;  %v9439_v41 = vld [vmem:[%s14216_s13 + $0xa0] sm:$0xff] (%p14200_p4) }
0x190e   : > { %13958 = vrcp.f32 %v9205_v27  ;;  %v9251_v3 = vadd.f32 1.0, %v13939_v11  ;;  %v9433_v27 = vld [vmem:[%s14216_s13 + $0x88] sm:$0xff] (%p14200_p4)  ;;  %9438 = vst [vmem:[%s17090_s27 + $0x118] sm:$0xff] (%p14200_p4), %v9437_v46  ;;  %9440 = vst [vmem:[%s17090_s27 + $0x140] sm:$0xff] (%p14200_p4), %v9439_v41  ;;  %v9443_v43 = vld [vmem:[%s14216_s13 + $0xb0] sm:$0xff] (%p14200_p4) }
0x190f   : > { %v13941_v7 = vpop.eup %13940  ;;  %13960 = vtanh.f32 %v9183_v44  ;;  %9434 = vst [vmem:[%s17090_s27 + $0x108] sm:$0xff] (%p14200_p4), %v9433_v27  ;;  %v9441_v44 = vld [vmem:[%s14216_s13 + $0xa8] sm:$0xff] (%p14200_p4)  ;;  %9444 = vst [vmem:[%s17090_s27 + $0x150] sm:$0xff] (%p14200_p4), %v9443_v43  ;;  %v9447_v11 = vld [vmem:[%s14216_s13 + $0xc0] sm:$0xff] (%p14200_p4) }
0x1910   : > { %v13943_v18 = vpop.eup %13942  ;;  %v9254_v10 = vadd.f32 1.0, %v13941_v7  ;;  %13962 = vrcp.f32 %v9252_v4  ;;  %9442 = vst [vmem:[%s17090_s27 + $0x148] sm:$0xff] (%p14200_p4), %v9441_v44  ;;  %v9449_v7 = vld [vmem:[%s14216_s13 + $0xc8] sm:$0xff] (%p14200_p4)  ;;  %9448 = vst [vmem:[%s17090_s27 + $0x180] sm:$0xff] (%p14200_p4), %v9447_v11  ;;  %v9459_v4 = vld [vmem:[%s14216_s13 + $0xf0] sm:$0xff] (%p14200_p4) }
0x1911   : > { %v13945_v35 = vpop.eup %13944  ;;  %v9268_v52 = vmul.f32 %v13943_v18, %v16922_v63  ;;  %13964 = vrcp.f32 %v9251_v3  ;;  %v9451_v18 = vld [vmem:[%s14216_s13 + $0xd0] sm:$0xff] (%p14200_p4)  ;;  %9450 = vst [vmem:[%s17090_s27 + $0x188] sm:$0xff] (%p14200_p4), %v9449_v7  ;;  %9460 = vst [vmem:[%s17090_s27 + $0x1d0] sm:$0xff] (%p14200_p4), %v9459_v4 }
0x1912   : > { %v13947_v62 = vpop.eup %13946  ;;  %v9267_v26 = vmul.f32 %v13945_v35, %v16928_v33  ;;  %9452 = vst [vmem:[%s17090_s27 + $0x190] sm:$0xff] (%p14200_p4), %v9451_v18  ;;  %v9453_v35 = vld [vmem:[%s14216_s13 + $0xd8] sm:$0xff] (%p14200_p4) }
0x1913   : > { %v13949_v34 = vpop.eup %13948  ;;  %v9253_v33 = vadd.f32 1.0, %v13947_v62  ;;  %v9455_v62 = vld [vmem:[%s14216_s13 + $0xe0] sm:$0xff] (%p14200_p4)  ;;  %9454 = vst [vmem:[%s17090_s27 + $0x198] sm:$0xff] (%p14200_p4), %v9453_v35 }
0x1914   : > { %v13951_v15 = vpop.eup %13950  ;;  %v9272_v9 = vmul.f32 %v13949_v34, %v13929_v23  ;;  %v9423_v23 = vld [vmem:[%s14216_s13 + $0x60] sm:$0xff] (%p14200_p4)  ;;  %9456 = vst [vmem:[%s17090_s27 + $0x1c0] sm:$0xff] (%p14200_p4), %v9455_v62  ;;  %v9461_v34 = vld [vmem:[%s14216_s13 + $0xf8] sm:$0xff] (%p14200_p4) }
0x1915   : > { %v13953_v55 = vpop.eup %13952  ;;  %v9270_v12 = vmul.f32 %v13951_v15, %v16930_v24  ;;  %9424 = vst [vmem:[%s17090_s27 + $0xc0] sm:$0xff] (%p14200_p4), %v9423_v23  ;;  %9462 = vst [vmem:[%s17090_s27 + $0x1d8] sm:$0xff] (%p14200_p4), %v9461_v34 }
0x1916   : > { %v13955_v28 = vpop.eup %13954  ;;  %v9276_v6 = vadd.f32 %v9272_v9, %v9268_v52  ;;  %v9271_v5 = vmul.f32 %v13953_v55, %v13933_v58  ;;  %v9435_v58 = vld [vmem:[%s14216_s13 + $0x90] sm:$0xff] (%p14200_p4)  ;;  %v9457_v52 = vld [vmem:[%s14216_s13 + $0xe8] sm:$0xff] (%p14200_p4) }
0x1917   : > { %v13957_v51 = vpop.eup %13956  ;;  %v9274_v29 = vmul.f32 %v13955_v28, %v13937_v1  ;;  %9436 = vst [vmem:[%s17090_s27 + $0x110] sm:$0xff] (%p14200_p4), %v9435_v58  ;;  %v9445_v1 = vld [vmem:[%s14216_s13 + $0xb8] sm:$0xff] (%p14200_p4)  ;;  %9458 = vst [vmem:[%s17090_s27 + $0x1c8] sm:$0xff] (%p14200_p4), %v9457_v52 }
0x1918   : > { %v13959_v21 = vpop.eup %13958  ;;  %v9269_v63 = vmul.f32 %v13957_v51, %v16936_v0  ;;  %13966 = vtanh.f32 %v9276_v6  ;;  %v9275_v53 = vadd.f32 %v9271_v5, %v9267_v26  ;;  %9446 = vst [vmem:[%s17090_s27 + $0x158] sm:$0xff] (%p14200_p4), %v9445_v1 }
0x1919   : > { %v13961_v56 = vpop.eup %13960  ;;  %13968 = vrcp.f32 %v9254_v10  ;;  %v9278_v54 = vadd.f32 %v9274_v29, %v9270_v12 }
0x191a   : > { %13970 = vtanh.f32 %v9275_v53  ;;  %v9273_v24 = vmul.f32 %v13961_v56, %v13959_v21  ;;  %v13963_v16 = vpop.eup %13962 }
0x191b   : > { %13972 = vtanh.f32 %v9278_v54  ;;  %v13965_v19 = vpop.eup %13964 }
0x191c   : > { %v9277_v38 = vadd.f32 %v9273_v24, %v9269_v63  ;;  %13974 = vrcp.f32 %v9253_v33 }
0x191e   : > { %13976 = vtanh.f32 %v9277_v38 }
0x1922   : > { %v13967_v48 = vpop.eup %13966 }
0x1923   : > { %v13969_v0 = vpop.eup %13968  ;;  %v9284_v2 = vmul.f32 %v13967_v48, %v13963_v16 }
0x1924   : > { %v13971_v22 = vpop.eup %13970 }
0x1925   : > { %v13973_v61 = vpop.eup %13972  ;;  %10472 = vst.msk [vmem:[%s14216_s13 + $0x108] sm:$0xff] %vm324_vm1, %v9284_v2  ;;  %v9283_v20 = vmul.f32 %v13971_v22, %v13965_v19  ;;  %9298 = sbr.rel (!%p14200_p4) target bundleno = 6452 (0x1934), region = 44 }
0x1926   : > { %v9286_v50 = vmul.f32 %v13973_v61, %v13969_v0  ;;  %v13975_v60 = vpop.eup %13974 }
0x1927   : > { %10471 = vst.msk [vmem:[%s14216_s13 + $0x100] sm:$0xff] %vm324_vm1, %v9283_v20 }
0x1928   : > { %v13977_v57 = vpop.eup %13976  ;;  %10474 = vst.msk [vmem:[%s14216_s13 + $0x118] sm:$0xff] %vm324_vm1, %v9286_v50 }
0x1929   : > { %v9285_v37 = vmul.f32 %v13977_v57, %v13975_v60 }
0x192b   : > { %10473 = vst.msk [vmem:[%s14216_s13 + $0x110] sm:$0xff] %vm324_vm1, %v9285_v37 }
0x192c   : > { %v9465_v15 = vld [vmem:[%s14216_s13 + $0x108] sm:$0xff] }
0x192d   : > { %9466 = vst [vmem:[%s17090_s27 + $0x208] sm:$0xff] %v9465_v15 }
0x192e   : > { %v9463_v3 = vld [vmem:[%s14216_s13 + $0x100] sm:$0xff] }
0x192f   : > { %9464 = vst [vmem:[%s17090_s27 + $0x200] sm:$0xff] %v9463_v3  ;;  %v9469_v9 = vld [vmem:[%s14216_s13 + $0x118] sm:$0xff] }
0x1930   : > { %9470 = vst [vmem:[%s17090_s27 + $0x218] sm:$0xff] %v9469_v9 }
0x1932   : > { %v9467_v26 = vld [vmem:[%s14216_s13 + $0x110] sm:$0xff] }
0x1933   : > { %9468 = vst [vmem:[%s17090_s27 + $0x210] sm:$0xff] %v9467_v26 }
0x1934 PF: > { %p12_p8 = scmp.ge.s32.totalorder %s14191_s22, 4   ;;  %s17536_s18 = smov %s14140_s19 }
0x1935   : > { %s17537_s19 = smov %s14198_s25  ;;  %s17538_s20 = smov %s14191_s22 }
0x1936   :  { %14 = sbr.rel (!%p12_p8) target bundleno = 2 (0x2), region = 119 }

</bundles_post_ra>
